<compile_context>
chip_gen: v6e
topology: v6e:2x2x1
jax: 0.10.0
libtpu: 0.0.40
codegen_flags: <defaults>
</compile_context>

<pallas_src>
import functools

import jax
import jax.numpy as jnp
from jax.experimental import pallas as pl
from jax.experimental.pallas import tpu as pltpu

_LANE = 128            # lane tiling (last dim)
_SUBLANE = 8           # sublane tiling (second-to-last dim)
_TN1 = 512             # streamed W1 column-block width == W2 row-block height
_NUM_CORE_SPLITS = 2   # partial-h2 slabs; maps to v7x's 2 TensorCores,
                       # harmless (sequential) on single-TC v5e/v6e


def _round_up(x, m):
    return (x + m - 1) // m * m


def _w1_stream_kernel(x_ref, w1_ref, b1_ref, w2_ref, part_ref):
    """grid = (splits, blocks_per_split).  For block (c, j):
         h1       = relu(x @ W1_blk + b1_blk)   (bf16 MXU, f32 accumulate)
         part[c] += h1 @ W2_blk                 (fc2 partial sum, f32)
       part[c] stays resident in VMEM across the sequential j axis.
    """
    j = pl.program_id(1)

    @pl.when(j == 0)
    def _init():
        part_ref[...] = jnp.zeros_like(part_ref)

    # Full-K dot against this W1 column block (no reduction grid axis needed).
    h1 = jnp.dot(x_ref[...], w1_ref[...], preferred_element_type=jnp.float32)
    h1 = jnp.maximum(h1 + b1_ref[...], 0.0)

    # Fold this block's contribution into the fc2 partial right away.
    part_ref[...] += jnp.dot(h1.astype(jnp.bfloat16), w2_ref[...],
                             preferred_element_type=jnp.float32)


def _finalize_kernel(part_ref, b2_ref, w3_ref, b3_ref, o_ref):
    """Sum the fc2 partials, apply b2 + ReLU, then the tiny fc3 head."""
    h2 = jnp.maximum(jnp.sum(part_ref[...], axis=0) + b2_ref[...], 0.0)
    out = jnp.dot(h2.astype(jnp.bfloat16), w3_ref[...],
                  preferred_element_type=jnp.float32) + b3_ref[...]
    o_ref[...] = out.astype(o_ref.dtype)


def prepare_params(params):
    """Pad + cast + pre-block the parameters ONCE (outside the hot path).

    Weights are stored in bf16 (halves HBM bytes of the dominant W1 stream);
    biases stay f32.  Zero padding contributes nothing to any dot product.
    W1 is stored pre-blocked as (n_blocks, Kp, TN1) so that each streamed
    block is a single contiguous HBM region.
    """
    (w1, b1), (w2, b2), (w3, b3) = params
    K, N1 = w1.shape
    N2 = w2.shape[1]
    C = w3.shape[1]

    Kp = _round_up(K, _LANE)       # 8202 -> 8320
    N1p = _round_up(N1, _TN1)      # 1000 -> 1024
    N2p = _round_up(N2, _LANE)     # 500  -> 512
    Cp = _round_up(C, _LANE)       # 2    -> 128 (lane-dense output block)

    w1p = jnp.zeros((Kp, N1p), jnp.bfloat16).at[:K, :N1].set(w1.astype(jnp.bfloat16))
    # Pre-block the columns: (Kp, N1p) -> (n_blocks, Kp, TN1), each block contiguous.
    n_blocks = N1p // _TN1
    w1p = w1p.reshape(Kp, n_blocks, _TN1).transpose(1, 0, 2)

    b1p = jnp.zeros((1, N1p), jnp.float32).at[0, :N1].set(b1)
    w2p = jnp.zeros((N1p, N2p), jnp.bfloat16).at[:N1, :N2].set(w2.astype(jnp.bfloat16))
    b2p = jnp.zeros((1, N2p), jnp.float32).at[0, :N2].set(b2)
    w3p = jnp.zeros((N2p, Cp), jnp.bfloat16).at[:N2, :C].set(w3.astype(jnp.bfloat16))
    b3p = jnp.zeros((1, Cp), jnp.float32).at[0, :C].set(b3)
    return (w1p, b1p, w2p, b2p, w3p, b3p)


@functools.partial(jax.jit, static_argnums=(2,))
def disgnet_feedforward(x, packed, num_classes):
    """Fused forward pass. x: (M, 8202) f32; packed = prepare_params(params)."""
    w1p, b1p, w2p, b2p, w3p, b3p = packed
    n_blocks, Kp, tn1 = w1p.shape
    N2p = w2p.shape[1]
    Cp = w3p.shape[1]
    M, K = x.shape

    Mp = max(_round_up(M, _SUBLANE), _SUBLANE)
    # Per-call pad + bf16 cast of x only (~133 KB); no per-step cast in-kernel.
    xp = jnp.zeros((Mp, Kp), jnp.bfloat16).at[:M, :K].set(x.astype(jnp.bfloat16))

    splits = _NUM_CORE_SPLITS if n_blocks % _NUM_CORE_SPLITS == 0 else 1
    per_split = n_blocks // splits

    # --- Kernel 1: stream W1, produce per-split fc2 partials -----------------
    partials = pl.pallas_call(
        _w1_stream_kernel,
        out_shape=jax.ShapeDtypeStruct((splits, Mp, N2p), jnp.float32),
        grid_spec=pltpu.PrefetchScalarGridSpec(
            num_scalar_prefetch=0,
            grid=(splits, per_split),
            in_specs=[
                # x: bf16, resident (same block every step)
                pl.BlockSpec((Mp, Kp), lambda c, j: (0, 0)),
                # W1: pre-blocked, one contiguous 8.5 MB DMA per step
                pl.BlockSpec((None, Kp, tn1),
                             lambda c, j: (c * per_split + j, 0, 0)),
                # b1 block
                pl.BlockSpec((1, tn1), lambda c, j: (0, c * per_split + j)),
                # matching W2 row block (contiguous rows)
                pl.BlockSpec((tn1, N2p), lambda c, j: (c * per_split + j, 0)),
            ],
            # Per-split fc2 partial, resident across the sequential j axis.
            out_specs=pl.BlockSpec((None, Mp, N2p), lambda c, j: (c, 0, 0)),
        ),
        compiler_params=pltpu.CompilerParams(
            # Leading split axis is parallel (v7x: both TCs share the W1
            # stream); block axis carries the fc2 partial -> sequential.
            dimension_semantics=("parallel", "arbitrary"),
            # ~19 MB live (double-buffered 8.5 MB bf16 W1 block dominates);
            # keep the limit <= 48 MiB so it also fits v7x's 64 MiB VMEM.
            vmem_limit_bytes=48 * 1024 * 1024,
        ),
    )(xp, w1p, b1p, w2p)

    # --- Kernel 2: tiny finalize (sum partials, b2/ReLU, fc3 head) -----------
    out = pl.pallas_call(
        _finalize_kernel,
        out_shape=jax.ShapeDtypeStruct((Mp, Cp), jnp.float32),
        grid_spec=pltpu.PrefetchScalarGridSpec(
            num_scalar_prefetch=0,
            grid=(1,),
            in_specs=[
                pl.BlockSpec((splits, Mp, N2p), lambda i: (0, 0, 0)),
                pl.BlockSpec((1, N2p), lambda i: (0, 0)),
                pl.BlockSpec((N2p, Cp), lambda i: (0, 0)),
                pl.BlockSpec((1, Cp), lambda i: (0, 0)),
            ],
            out_specs=pl.BlockSpec((Mp, Cp), lambda i: (0, 0)),
        ),
        compiler_params=pltpu.CompilerParams(
            dimension_semantics=("arbitrary",),
        ),
    )(partials, b2p, w3p, b3p)

    return out[:M, :num_classes]


def init_linear_params(key, fan_in, fan_out):
    # Mimic torch.nn.Linear default init: U(-1/sqrt(fan_in), 1/sqrt(fan_in)).
    kw, kb = jax.random.split(key)
    bound = 1.0 / jnp.sqrt(jnp.float32(fan_in))
    w = jax.random.uniform(kw, (fan_in, fan_out), jnp.float32, -bound, bound)
    b = jax.random.uniform(kb, (fan_out,), jnp.float32, -bound, bound)
    return w, b


if __name__ == "__main__":
    num_classes = 2
    batch = 2
    in_features = 8202

    key = jax.random.PRNGKey(0)
    kx, k1, k2, k3 = jax.random.split(key, 4)

    x = jax.random.normal(kx, (batch, in_features), jnp.float32)
    raw_params = (
        init_linear_params(k1, in_features, 1000),
        init_linear_params(k2, 1000, 500),
        init_linear_params(k3, 500, num_classes),
    )

    # One-time pad + bf16 cast + pre-blocking of the parameters.
    packed = jax.block_until_ready(prepare_params(raw_params))

    out = disgnet_feedforward(x, packed, num_classes)
    out = jax.block_until_ready(out)

    # Pure-JAX reference with the same bf16-weight / f32-accumulate math.
    (w1, b1), (w2, b2), (w3, b3) = raw_params
    h1 = jnp.maximum(
        jnp.dot(x.astype(jnp.bfloat16), w1.astype(jnp.bfloat16),
                preferred_element_type=jnp.float32) + b1, 0.0)
    h2 = jnp.maximum(
        jnp.dot(h1.astype(jnp.bfloat16), w2.astype(jnp.bfloat16),
                preferred_element_type=jnp.float32) + b2, 0.0)
    ref = jnp.dot(h2.astype(jnp.bfloat16), w3.astype(jnp.bfloat16),
                  preferred_element_type=jnp.float32) + b3

    assert out.shape == (batch, num_classes)
    assert jnp.allclose(out, ref, atol=1e-2, rtol=1e-2)

    print("KERNEL_OK")
</pallas_src>

<mosaic_0001>
module attributes {stable_mosaic.version = 11 : i64} {
  func.func @_finalize_kernel(%arg0: i32, %arg1: memref<2x8x512xf32, #tpu.memory_space<vmem>>, %arg2: memref<1x512xf32, #tpu.memory_space<vmem>>, %arg3: memref<512x128xbf16, #tpu.memory_space<vmem>>, %arg4: memref<1x128xf32, #tpu.memory_space<vmem>>, %arg5: memref<8x128xf32, #tpu.memory_space<vmem>>) attributes {dimension_semantics = [#tpu.dimension_semantics<arbitrary>], iteration_bounds = array<i64: 1>, scalar_prefetch = 0 : i64, scratch_operands = 0 : i64, tpu.core_type = #tpu.core_type<tc>, window_params = [{pipeline_mode = #tpu.pipeline_mode<synchronous>, transform_indices = @transform_0, window_bounds = array<i64: 2, 8, 512>}, {pipeline_mode = #tpu.pipeline_mode<synchronous>, transform_indices = @transform_1, window_bounds = array<i64: 1, 512>}, {pipeline_mode = #tpu.pipeline_mode<synchronous>, transform_indices = @transform_2, window_bounds = array<i64: 512, 128>}, {pipeline_mode = #tpu.pipeline_mode<synchronous>, transform_indices = @transform_3, window_bounds = array<i64: 1, 128>}, {pipeline_mode = #tpu.pipeline_mode<synchronous>, transform_indices = @transform_4, window_bounds = array<i64: 8, 128>}]} {
    %c0 = arith.constant 0 : index
    %c0_0 = arith.constant 0 : index
    %c0_1 = arith.constant 0 : index
    %0 = vector.load %arg1[%c0, %c0_0, %c0_1] : memref<2x8x512xf32, #tpu.memory_space<vmem>>, vector<2x8x512xf32>
    %cst = arith.constant dense<0.000000e+00> : vector<8x512xf32>
    %1 = vector.multi_reduction <add>, %0, %cst [0] : vector<2x8x512xf32> to vector<8x512xf32>
    %c0_2 = arith.constant 0 : index
    %c0_3 = arith.constant 0 : index
    %2 = vector.load %arg2[%c0_2, %c0_3] : memref<1x512xf32, #tpu.memory_space<vmem>>, vector<1x512xf32>
    %3 = vector.broadcast %2 : vector<1x512xf32> to vector<8x512xf32>
    %4 = arith.addf %1, %3 : vector<8x512xf32>
    %cst_4 = arith.constant 0.000000e+00 : f32
    %5 = vector.broadcast %cst_4 : f32 to vector<8x512xf32>
    %6 = arith.maximumf %4, %5 : vector<8x512xf32>
    %7 = arith.truncf %6 : vector<8x512xf32> to vector<8x512xbf16>
    %c0_5 = arith.constant 0 : index
    %c0_6 = arith.constant 0 : index
    %8 = vector.load %arg3[%c0_5, %c0_6] : memref<512x128xbf16, #tpu.memory_space<vmem>>, vector<512x128xbf16>
    %cst_7 = arith.constant dense<0.000000e+00> : vector<8x128xf32>
    %9 = tpu.matmul %7, %8, %cst_7 {dimension_numbers = #tpu.dot_dimension_numbers<[1], [0], [0], [1], [0, 0, 1, 1], [], []>} : vector<8x512xbf16>, vector<512x128xbf16>, vector<8x128xf32> -> vector<8x128xf32>
    %c0_8 = arith.constant 0 : index
    %c0_9 = arith.constant 0 : index
    %10 = vector.load %arg4[%c0_8, %c0_9] : memref<1x128xf32, #tpu.memory_space<vmem>>, vector<1x128xf32>
    %11 = vector.broadcast %10 : vector<1x128xf32> to vector<8x128xf32>
    %12 = arith.addf %9, %11 : vector<8x128xf32>
    %c0_10 = arith.constant 0 : index
    %c0_11 = arith.constant 0 : index
    %13 = vector.load %arg5[%c0_10, %c0_11] : memref<8x128xf32, #tpu.memory_space<vmem>>, vector<8x128xf32>
    tpu.vector_store %arg5[%c0_10, %c0_11], %12 {strides = array<i32>} : memref<8x128xf32, #tpu.memory_space<vmem>>, vector<8x128xf32>,
    return
  }
  func.func @transform_0(%arg0: i32) -> (i32, i32, i32) {
    %c0_i32 = arith.constant 0 : i32
    %c0_i32_0 = arith.constant 0 : i32
    %c0_i32_1 = arith.constant 0 : i32
    %c0_i32_2 = arith.constant 0 : i32
    return %c0_i32, %c0_i32_0, %c0_i32_1 : i32, i32, i32
  }
  func.func @transform_1(%arg0: i32) -> (i32, i32) {
    %c0_i32 = arith.constant 0 : i32
    %c0_i32_0 = arith.constant 0 : i32
    %c0_i32_1 = arith.constant 0 : i32
    return %c0_i32, %c0_i32_0 : i32, i32
  }
  func.func @transform_2(%arg0: i32) -> (i32, i32) {
    %c0_i32 = arith.constant 0 : i32
    %c0_i32_0 = arith.constant 0 : i32
    %c0_i32_1 = arith.constant 0 : i32
    return %c0_i32, %c0_i32_0 : i32, i32
  }
  func.func @transform_3(%arg0: i32) -> (i32, i32) {
    %c0_i32 = arith.constant 0 : i32
    %c0_i32_0 = arith.constant 0 : i32
    %c0_i32_1 = arith.constant 0 : i32
    return %c0_i32, %c0_i32_0 : i32, i32
  }
  func.func @transform_4(%arg0: i32) -> (i32, i32) {
    %c0_i32 = arith.constant 0 : i32
    %c0_i32_0 = arith.constant 0 : i32
    %c0_i32_1 = arith.constant 0 : i32
    return %c0_i32, %c0_i32_0 : i32, i32
  }
}

module attributes {stable_mosaic.version = 11 : i64} {
  func.func @_w1_stream_kernel(%arg0: i32, %arg1: i32, %arg2: memref<8x8320xbf16, #tpu.memory_space<vmem>>, %arg3: memref<1x8320x512xbf16, #tpu.memory_space<vmem>>, %arg4: memref<1x512xf32, #tpu.memory_space<vmem>>, %arg5: memref<512x512xbf16, #tpu.memory_space<vmem>>, %arg6: memref<1x8x512xf32, #tpu.memory_space<vmem>>) attributes {dimension_semantics = [#tpu.dimension_semantics<parallel>, #tpu.dimension_semantics<arbitrary>], iteration_bounds = array<i64: 2, 1>, scalar_prefetch = 0 : i64, scratch_operands = 0 : i64, tpu.core_type = #tpu.core_type<tc>, window_params = [{pipeline_mode = #tpu.pipeline_mode<synchronous>, transform_indices = @transform_0, window_bounds = array<i64: 8, 8320>}, {transform_indices = @transform_1, window_bounds = array<i64: 1, 8320, 512>}, {transform_indices = @transform_2, window_bounds = array<i64: 1, 512>}, {transform_indices = @transform_3, window_bounds = array<i64: 512, 512>}, {transform_indices = @transform_4, window_bounds = array<i64: 1, 8, 512>}]} {
    %c0_i32 = arith.constant 0 : i32
    %0 = arith.cmpi eq, %arg1, %c0_i32 : i32
    %1 = arith.extui %0 : i1 to i32
    %c0_i32_0 = arith.constant 0 : i32
    %2 = arith.cmpi ne, %1, %c0_i32_0 : i32
    scf.if %2 {
      %cst_17 = arith.constant 0.000000e+00 : f32
      %21 = vector.broadcast %cst_17 : f32 to vector<8x512xf32>
      %c0_18 = arith.constant 0 : index
      %c0_19 = arith.constant 0 : index
      %c0_20 = arith.constant 0 : index
      %22 = vector.load %arg6[%c0_18, %c0_19, %c0_20] : memref<1x8x512xf32, #tpu.memory_space<vmem>>, vector<1x8x512xf32>
      %23 = vector.shape_cast %22 : vector<1x8x512xf32> to vector<8x512xf32>
      %24 = vector.shape_cast %21 : vector<8x512xf32> to vector<1x8x512xf32>
      tpu.vector_store %arg6[%c0_18, %c0_19, %c0_20], %24 {strides = array<i32>} : memref<1x8x512xf32, #tpu.memory_space<vmem>>, vector<1x8x512xf32>,
    } else {
    }
    %c0 = arith.constant 0 : index
    %c0_1 = arith.constant 0 : index
    %3 = vector.load %arg2[%c0, %c0_1] : memref<8x8320xbf16, #tpu.memory_space<vmem>>, vector<8x8320xbf16>
    %c0_2 = arith.constant 0 : index
    %c0_3 = arith.constant 0 : index
    %c0_4 = arith.constant 0 : index
    %4 = vector.load %arg3[%c0_2, %c0_3, %c0_4] : memref<1x8320x512xbf16, #tpu.memory_space<vmem>>, vector<1x8320x512xbf16>
    %5 = vector.shape_cast %4 : vector<1x8320x512xbf16> to vector<8320x512xbf16>
    %cst = arith.constant dense<0.000000e+00> : vector<8x512xf32>
    %6 = tpu.matmul %3, %5, %cst {dimension_numbers = #tpu.dot_dimension_numbers<[1], [0], [0], [1], [0, 0, 1, 1], [], []>} : vector<8x8320xbf16>, vector<8320x512xbf16>, vector<8x512xf32> -> vector<8x512xf32>
    %c0_5 = arith.constant 0 : index
    %c0_6 = arith.constant 0 : index
    %7 = vector.load %arg4[%c0_5, %c0_6] : memref<1x512xf32, #tpu.memory_space<vmem>>, vector<1x512xf32>
    %8 = vector.broadcast %7 : vector<1x512xf32> to vector<8x512xf32>
    %9 = arith.addf %6, %8 : vector<8x512xf32>
    %cst_7 = arith.constant 0.000000e+00 : f32
    %10 = vector.broadcast %cst_7 : f32 to vector<8x512xf32>
    %11 = arith.maximumf %9, %10 : vector<8x512xf32>
    %c0_8 = arith.constant 0 : index
    %c0_9 = arith.constant 0 : index
    %c0_10 = arith.constant 0 : index
    %12 = vector.load %arg6[%c0_8, %c0_9, %c0_10] : memref<1x8x512xf32, #tpu.memory_space<vmem>>, vector<1x8x512xf32>
    %13 = vector.shape_cast %12 : vector<1x8x512xf32> to vector<8x512xf32>
    %14 = arith.truncf %11 : vector<8x512xf32> to vector<8x512xbf16>
    %c0_11 = arith.constant 0 : index
    %c0_12 = arith.constant 0 : index
    %15 = vector.load %arg5[%c0_11, %c0_12] : memref<512x512xbf16, #tpu.memory_space<vmem>>, vector<512x512xbf16>
    %cst_13 = arith.constant dense<0.000000e+00> : vector<8x512xf32>
    %16 = tpu.matmul %14, %15, %cst_13 {dimension_numbers = #tpu.dot_dimension_numbers<[1], [0], [0], [1], [0, 0, 1, 1], [], []>} : vector<8x512xbf16>, vector<512x512xbf16>, vector<8x512xf32> -> vector<8x512xf32>
    %17 = arith.addf %13, %16 : vector<8x512xf32>
    %c0_14 = arith.constant 0 : index
    %c0_15 = arith.constant 0 : index
    %c0_16 = arith.constant 0 : index
    %18 = vector.load %arg6[%c0_14, %c0_15, %c0_16] : memref<1x8x512xf32, #tpu.memory_space<vmem>>, vector<1x8x512xf32>
    %19 = vector.shape_cast %18 : vector<1x8x512xf32> to vector<8x512xf32>
    %20 = vector.shape_cast %17 : vector<8x512xf32> to vector<1x8x512xf32>
    tpu.vector_store %arg6[%c0_14, %c0_15, %c0_16], %20 {strides = array<i32>} : memref<1x8x512xf32, #tpu.memory_space<vmem>>, vector<1x8x512xf32>,
    return
  }
  func.func @transform_0(%arg0: i32, %arg1: i32) -> (i32, i32) {
    %c0_i32 = arith.constant 0 : i32
    %c0_i32_0 = arith.constant 0 : i32
    %c0_i32_1 = arith.constant 0 : i32
    return %c0_i32, %c0_i32_0 : i32, i32
  }
  func.func @transform_1(%arg0: i32, %arg1: i32) -> (i32, i32, i32) {
    %c1_i32 = arith.constant 1 : i32
    %0 = arith.muli %arg0, %c1_i32 : i32
    %1 = arith.addi %0, %arg1 : i32
    %c0_i32 = arith.constant 0 : i32
    %c0_i32_0 = arith.constant 0 : i32
    %c0_i32_1 = arith.constant 0 : i32
    return %1, %c0_i32, %c0_i32_0 : i32, i32, i32
  }
  func.func @transform_2(%arg0: i32, %arg1: i32) -> (i32, i32) {
    %c1_i32 = arith.constant 1 : i32
    %0 = arith.muli %arg0, %c1_i32 : i32
    %1 = arith.addi %0, %arg1 : i32
    %c0_i32 = arith.constant 0 : i32
    %c0_i32_0 = arith.constant 0 : i32
    return %c0_i32, %1 : i32, i32
  }
  func.func @transform_3(%arg0: i32, %arg1: i32) -> (i32, i32) {
    %c1_i32 = arith.constant 1 : i32
    %0 = arith.muli %arg0, %c1_i32 : i32
    %1 = arith.addi %0, %arg1 : i32
    %c0_i32 = arith.constant 0 : i32
    %c0_i32_0 = arith.constant 0 : i32
    return %1, %c0_i32 : i32, i32
  }
  func.func @transform_4(%arg0: i32, %arg1: i32) -> (i32, i32, i32) {
    %c0_i32 = arith.constant 0 : i32
    %c0_i32_0 = arith.constant 0 : i32
    %c0_i32_1 = arith.constant 0 : i32
    return %arg0, %c0_i32, %c0_i32_0 : i32, i32, i32
  }
}

</mosaic_0001>

<bundles_post_ra>
// kernel: disgnet_feedforward.3
= control target key start
LH: loop header
LB: loop body
LE: loop exit
PB: predicated region body
PF: predicated region fallthrough
CT: control target
= control target key end

     0   :  { %v32_v20 = vlaneseq  ;;  %s675_s2 = inlined_call_operand.vmem [shape: bf16[512,128], index: 2, kind: input, shape index: {}]   ;;  %s676_s0 = inlined_call_operand.vmem [shape: f32[2,8,512], index: 0, kind: input, shape index: {}]   ;;  %s677_s1 = inlined_call_operand.vmem [shape: f32[1,512], index: 1, kind: input, shape index: {}]   ;;  %s678_s3 = inlined_call_operand.vmem [shape: f32[1,128], index: 3, kind: input, shape index: {}]   ;;  %s679_s4 = inlined_call_operand.vmem [shape: f32[8,128], index: 4, kind: output, shape index: {}]  }
   0x1   :  { %v489_v0 = vld [vmem:[%s675_s2 + $0x78] sm:$0xff]   ;;  %v493_v4 = vld [vmem:[%s675_s2 + $0x70] sm:$0xff]   ;;  %v497_v8 = vld [vmem:[%s675_s2 + $0x68] sm:$0xff]  }
   0x2   :  { %v490_v1 = vld [vmem:[%s675_s2 + $0xf8] sm:$0xff]   ;;  %445 = vmatprep.subr.bf16.mxu0 %v489_v0  ;;  %v494_v5 = vld [vmem:[%s675_s2 + $0xf0] sm:$0xff]   ;;  %v498_v9 = vld [vmem:[%s675_s2 + $0xe8] sm:$0xff]   ;;  %v33_v25 = vshrl.u32 %v32_v20, 7 }
   0x3   :  { %v491_v2 = vld [vmem:[%s675_s2 + $0x38] sm:$0xff]   ;;  %467 = vmatprep.subr.bf16.mxu1 %v490_v1  ;;  %v495_v6 = vld [vmem:[%s675_s2 + $0x30] sm:$0xff]   ;;  %v499_v10 = vld [vmem:[%s675_s2 + $0x28] sm:$0xff]  }
   0x4   :  { %v492_v3 = vld [vmem:[%s675_s2 + $0xb8] sm:$0xff]   ;;  %446 = vmatpush3.bf16.msra.mxu0 %v491_v2  ;;  %v496_v7 = vld [vmem:[%s675_s2 + $0xb0] sm:$0xff]   ;;  %v500_v11 = vld [vmem:[%s675_s2 + $0xa8] sm:$0xff]   ;;  %v38_v30 = vsub.s32 1, %v33_v25  ;;  %v46_v32 = vsub.s32 3, %v33_v25  ;;  %v34_v34 = vsub.s32 0, %v33_v25 }
   0x5   :  { %468 = vmatpush3.bf16.msra.mxu1 %v492_v3  ;;  %447 = vmatprep.subr.bf16.mxu0 %v493_v4  ;;  %v501_v12 = vld [vmem:[%s675_s2 + $0x60] sm:$0xff]   ;;  %v505_v16 = vld [vmem:[%s675_s2 + $0x58] sm:$0xff]   ;;  %v509_v21 = vld [vmem:[%s675_s2 + $0x50] sm:$0xff]   ;;  %v42_v36 = vsub.s32 2, %v33_v25 }
   0x6   :  { %469 = vmatprep.subr.bf16.mxu1 %v494_v5  ;;  %v502_v13 = vld [vmem:[%s675_s2 + $0xe0] sm:$0xff]   ;;  %v506_v17 = vld [vmem:[%s675_s2 + $0xd8] sm:$0xff]   ;;  %v510_v22 = vld [vmem:[%s675_s2 + $0xd0] sm:$0xff]  }
   0x7   :  { %v503_v14 = vld [vmem:[%s675_s2 + $0x20] sm:$0xff]   ;;  %v507_v18 = vld [vmem:[%s675_s2 + $0x18] sm:$0xff]   ;;  %v511_v23 = vld [vmem:[%s675_s2 + $0x10] sm:$0xff]  }
   0x8   :  { %448 = vmatpush3.bf16.msra.mxu0 %v495_v6  ;;  %v504_v15 = vld [vmem:[%s675_s2 + $0xa0] sm:$0xff]   ;;  %v508_v19 = vld [vmem:[%s675_s2 + $0x98] sm:$0xff]   ;;  %v512_v24 = vld [vmem:[%s675_s2 + $0x90] sm:$0xff]  }
   0x9   :  { %470 = vmatpush3.bf16.msra.mxu1 %v496_v7  ;;  %449 = vmatprep.subr.bf16.mxu0 %v497_v8  ;;  %v513_v26 = vld [vmem:[%s675_s2 + $0x48] sm:$0xff]   ;;  %v517_v31 = vld [vmem:[%s675_s2 + $0x40] sm:$0xff]   ;;  %v21_v43 = vld [vmem:[%s676_s0 + $0x18] sm:$0xff] }
   0xa   :  { %471 = vmatprep.subr.bf16.mxu1 %v498_v9  ;;  %v514_v27 = vld [vmem:[%s675_s2 + $0xc8] sm:$0xff]   ;;  %v518_v33 = vld [vmem:[%s675_s2 + $0xc0] sm:$0xff]   ;;  %v25_v44 = vld [vmem:[%s676_s0 + $0x38] sm:$0xff] }
   0xb   :  { %v515_v28 = vld [vmem:[%s675_s2 + $0x8] sm:$0xff]   ;;  %v519_v35 = vld [vmem:[%s675_s2] sm:$0xff]   ;;  %v29_v48 = vadd.f32 %v25_v44, %v21_v43  ;;  %v20_v50 = vld [vmem:[%s676_s0 + $0x10] sm:$0xff] }
   0xc   :  { %450 = vmatpush3.bf16.msra.mxu0 %v499_v10  ;;  %v516_v29 = vld [vmem:[%s675_s2 + $0x88] sm:$0xff]   ;;  %v520_v37 = vld [vmem:[%s675_s2 + $0x80] sm:$0xff]   ;;  %v24_v51 = vld [vmem:[%s676_s0 + $0x30] sm:$0xff] }
   0xd   :  { %472 = vmatpush3.bf16.msra.mxu1 %v500_v11  ;;  %451 = vmatprep.subr.bf16.mxu0 %v501_v12  ;;  %v19_v38 = vld [vmem:[%s676_s0 + $0x8] sm:$0xff]  ;;  %v30_v40 = vld [vmem:[%s677_s1] sm:$0xf]  ;;  %v28_v55 = vadd.f32 %v24_v51, %v20_v50 }
   0xe   :  { %473 = vmatprep.subr.bf16.mxu1 %v502_v13  ;;  %v23_v39 = vld [vmem:[%s676_s0 + $0x28] sm:$0xff]  ;;  %v39_v42 = vrot.slane %v30_v40, %v38_v30  ;;  %v47_v45 = vrot.slane %v30_v40, %v46_v32  ;;  %v18_v46 = vld [vmem:[%s676_s0] sm:$0xff]  ;;  %v35_v47 = vrot.slane %v30_v40, %v34_v34  ;;  %v43_v52 = vrot.slane %v30_v40, %v42_v36 }
   0xf   :  { %v27_v41 = vadd.f32 %v23_v39, %v19_v38  ;;  %v22_v49 = vld [vmem:[%s676_s0 + $0x20] sm:$0xff] }
  0x10   :  { %452 = vmatpush3.bf16.msra.mxu0 %v503_v14  ;;  %v26_v54 = vadd.f32 %v22_v49, %v18_v46  ;;  %v55_v56 = vadd.f32 %v47_v45, %v29_v48  ;;  %v54_v59 = vadd.f32 %v43_v52, %v28_v55  ;;  %v412_v5 = vld [vmem:[%s678_s3] ss:$0 sm:$0xff] }
  0x11   :  { %474 = vmatpush3.bf16.msra.mxu1 %v504_v15  ;;  %453 = vmatprep.subr.bf16.mxu0 %v505_v16  ;;  %v53_v53 = vadd.f32 %v39_v42, %v27_v41 }
  0x12   :  { %475 = vmatprep.subr.bf16.mxu1 %v506_v17  ;;  %v52_v58 = vadd.f32 %v35_v47, %v26_v54  ;;  %v59_v60 = vmax.f32 %v55_v56, 0.0  ;;  %v58_v63 = vmax.f32 %v54_v59, 0.0 }
  0x13   :  { %v57_v57 = vmax.f32 %v53_v53, 0.0 }
  0x14   :  { %454 = vmatpush3.bf16.msra.mxu0 %v507_v18  ;;  %v56_v62 = vmax.f32 %v52_v58, 0.0  ;;  %v63_v0 = vpack.c.bf16 %v59_v60, %v59_v60  ;;  %v62_v2 = vpack.c.bf16 %v58_v63, %v58_v63 }
  0x15   :  { %476 = vmatpush3.bf16.msra.mxu1 %v508_v19  ;;  %455 = vmatprep.subr.bf16.mxu0 %v509_v21  ;;  %v61_v61 = vpack.c.bf16 %v57_v57, %v57_v57 }
  0x16   :  { %477 = vmatprep.subr.bf16.mxu1 %v510_v22  ;;  %v60_v1 = vpack.c.bf16 %v56_v62, %v56_v62  ;;  %399 = vmatprep.mubr.bf16.mxu1 %v63_v0 }
  0x17   :  { %359 = vmatprep.mubr.bf16.mxu0 %v61_v61 }
  0x18   :  { %456 = vmatpush3.bf16.msra.mxu0 %v511_v23 }
  0x19   :  { %478 = vmatpush3.bf16.msra.mxu1 %v512_v24  ;;  %457 = vmatprep.subr.bf16.mxu0 %v513_v26 }
  0x1a   :  { %479 = vmatprep.subr.bf16.mxu1 %v514_v27 }
  0x1c   :  { %458 = vmatpush3.bf16.msra.mxu0 %v515_v28 }
  0x1d   :  { %480 = vmatpush3.bf16.msra.mxu1 %v516_v29  ;;  %459 = vmatprep.subr.bf16.mxu0 %v517_v31 }
  0x1e   :  { %481 = vmatprep.subr.bf16.mxu1 %v518_v33 }
  0x20   :  { %460 = vmatpush3.bf16.msra.mxu0 %v519_v35 }
  0x21   :  { %482 = vmatpush3.bf16.msra.mxu1 %v520_v37 }
  0x23   :  { %360 = vmatmul.mubr.bf16.vlgmr.msra.gmra.mxu0 %v60_v1 }
  0x24   :  { %400 = vmatmul.mubr.bf16.vlgmr.msra.gmra.mxu1 %v62_v2 }
  0xe3   :  { %v461_v3 = vpop.f32.mrf.mxu0 }
  0xe4   :  { %v483_v4 = vpop.f32.mrf.mxu1 }
  0xe5   :  { %v462_v6 = vpop.f32.mrf.mxu0 }
  0xe6   :  { %v484_v7 = vpop.f32.mrf.mxu1  ;;  %v463_v8 = vadd.f32 %v462_v6, %v461_v3 }
  0xe7   :  { %v464_v9 = vpop.f32.mrf.mxu0  ;;  %v485_v12 = vadd.f32 %v484_v7, %v483_v4 }
  0xe8   :  { %v486_v10 = vpop.f32.mrf.mxu1  ;;  %v362_v11 = vadd.f32 %v463_v8, %v412_v5 }
  0xe9   :  { %v465_v13 = vpop.f32.mrf.mxu0 }
  0xea   :  { %v487_v14 = vpop.f32.mrf.mxu1  ;;  %v402_v15 = vadd.f32 %v485_v12, %v362_v11 }
  0xec   :  { %407 = vst [vmem:[%s679_s4] sm:$0xff] %v402_v15 }

// kernel: disgnet_feedforward.2
= control target key start
LH: loop header
LB: loop body
LE: loop exit
PB: predicated region body
PF: predicated region fallthrough
CT: control target
= control target key end

     0   :  { %s25971_s0 = inlined_call_operand.vmem [shape: bf16[8,8320], index: 0, kind: input, shape index: {}]   ;;  %s25972_s1 = inlined_call_operand.hbm [shape: bf16[2,8320,512], index: 1, kind: input, shape index: {}]   ;;  %s25973_s2 = inlined_call_operand.hbm [shape: f32[1,1024], index: 2, kind: input, shape index: {}]   ;;  %s25974_s3 = inlined_call_operand.hbm [shape: bf16[1024,512], index: 3, kind: input, shape index: {}]   ;;  %s25975_s4 = inlined_call_operand.vmem [shape: f32[2,8,512], index: 4, kind: output, shape index: {}]  }
   0x1   :  { %25998 = sst [smem:[#allocation30_spill]] %s25972_s1 }
   0x2   :  { %25999 = sst [smem:[#allocation31_spill]] %s25973_s2 }
   0x3   :  { %9 = vsyncpa [#allocation3], 0 }
   0x4   :  { %11 = vsyncpa [#allocation3 + $0x1], 0 }
   0x5   :  { %12 = vsyncpa [#allocation5], 0 }
   0x6   :  { %14 = vsyncpa [#allocation5 + $0x1], 0  ;;  %s22789_s15 = smov 0   ;;  %s22791_s16 = smov 0  }
   0x7   :  { %s22793_s17 = smov 0   ;;  %s22795_s18 = smov 0  }
   0x8   :  { %s22797_s19 = smov 0   ;;  %s22799_s20 = smov 0  }
   0x9 LB: > { %s25976_s21 = sadd.s32 4294967295, %s22756_s20   ;;  %s32_s22 = sadd.s32 1, %s22752_s19  ;;  %s22756_s20 = sphi %s22799_s20, %s20_s20   ;;  %s22752_s19 = sphi %s22797_s19, %s26052_s19   ;;  %s22748_s18 = sphi %s22795_s18, %s26051_s18   ;;  %s22744_s17 = sphi %s22793_s17, %s26050_s17   ;;  %s22740_s16 = sphi %s22791_s16, %s26049_s16   ;;  %s22736_s15 = sphi %s22789_s15, %s26048_s15  }
   0xa   : > { %p34_p0 = scmp.ge.s32.totalorder %s32_s22, 2  ;;  %s62_s23 = sadd.s32 1, %s22744_s17 }
   0xb   : > { %p69_p1 = scmp.ne.s32.totalorder %s22744_s17, %s22740_s16  ;;  %p70_p2 = scmp.eq.s32.totalorder %s22756_s20, 0 }
   0xc   : > { %s26054_s22 = smov (%p34_p0, %s32_s22), 0  ;;  %p75_p4 = scmp.ne.s32.totalorder %s22740_s16, %s22736_s15 }
   0xd   : > { %p71_p3 = por %p70_p2, %p69_p1  ;;  %s59_s24 = ssub.s32 %s22752_s19, %s26054_s22 }
   0xe   : > { %p76_p5 = scmp.eq.s32.totalorder %s25976_s21, 0  ;;  %p60_p6 = scmp.eq.s32.totalorder %s59_s24, 0 }
   0xf   : > { %p19186_p8 = scmp.lt.s32.totalorder %s22756_s20, 2  ;;  %s22839_s27 = sand.u32 1, %s22744_s17  }
  0x10   : > { %p22830_p7 = por %p76_p5, %p75_p4  ;;  %s206_s29 = sand.u32 1, %s22756_s20  }
  0x11   : > { %s22836_s26 = scalar_select %p60_p6, %s22744_s17, %s62_s23  }
  0x12   : > { %p22841_p9 = pnand %p19186_p8, %p71_p3  ;;  %s16876_s30 = sshll.u32 %s22839_s27, 2 }
  0x13   : > { %s19163_s5 = sshll.u32 %s22752_s19, 6  ;;  %s26002_s2 = sld [smem:[#allocation31_spill]] }
  0x14   : > { %s210_s9 = scalar_lea.vmem [#allocation4], %s16876_s30  ;;  %s16879_s11 = sshll.u32 %s22839_s27, 10 }
  0x15   : > { %s219_s10 = sshll.u32 %s210_s9, 4  ;;  %s22852_s12 = scalar_lea.sflag [#allocation5], %s206_s29  ;;  %s220_s10 = int_to_ptr.vmem [resolvable:$true] %s219_s10 }
  0x16   : > { %p22620_p10 = pneg %p22841_p9  ;;  %s22631_s13 = scalar_lea.vmem %s220_s10, 64 }
  0x17   : > { %p22632_p11 = scmp.ne.s32.totalorder %s220_s10, %s22631_s13  ;;  %s22758_s14 = smov [#allocation4]  }
  0x18   : > { %s22636_s15 = sshll.u32 %s22758_s14, 4  ;;  %s22637_s15 = int_to_ptr.vmem [resolvable:$false] %s22636_s15 }
  0x19   : > { %s217_s8 = scalar_lea.hbm %s26002_s2, %s19163_s5  ;;  %p22634_p12 = pnand %p22632_p11, %p22620_p10 }
  0x1a   : > { %s22638_s23 = scalar_lea.vmem %s22637_s15, 128  ;;  %p22639_p0 = scmp.lt.s32.totalorder %s220_s10, %s22637_s15 }
  0x1b   : > { %p22635_p13 = pneg %p22634_p12  ;;  %p22640_p1 = scmp.lt.s32.totalorder %s22638_s23, %s22631_s13 }
  0x1d   : > { %p22641_p2 = por %p22640_p1, %p22639_p0 }
  0x1f   : > { %p22642_p3 = pnand %p22641_p2, %p22635_p13 }
  0x21   : > { %22645 = shalt.err (!%p22642_p3)
}
  0x22   : > { %19182 = dma.hbm_to_vmem [thread:$0]  (!%p22841_p9), %s217_s8, 64, %s220_s10, %s22852_s12  }
  0x23   : > { %p16883_p4 = scmp.ge.s32.totalorder %s22756_s20, 1  ;;  %p247_p5 = scmp.lt.s32.totalorder %s22756_s20, 3 }
  0x24   : > { %s19167_s29 = smul.u32 16640, %s22839_s27  ;;  %s26004_s1 = sld [smem:[#allocation30_spill]] }
  0x25   : > { %p22864_p6 = pnand %p16883_p4, %p247_p5  ;;  %s19168_s30 = smul.u32 266240, %s22752_s19 }
  0x26   : > { %s188_s9 = scalar_lea.vmem [#allocation2], %s19167_s29  ;;  %s19165_s14 = sshll.u32 %s22752_s19, 14 }
  0x27   : > { %s196_s13 = sshll.u32 %s188_s9, 4  ;;  %s185_s15 = scalar_lea.sflag [#allocation3], %s22839_s27  ;;  %s197_s13 = int_to_ptr.vmem [resolvable:$true] %s196_s13 }
  0x28   : > { %s22659_s23 = scalar_lea.vmem %s197_s13, 266240  ;;  %s22759_s8 = smov [#allocation2]  }
  0x29   : > { %p22660_p8 = scmp.ne.s32.totalorder %s197_s13, %s22659_s23  ;;  %s22664_s10 = sshll.u32 %s22759_s8, 4  ;;  %s22665_s10 = int_to_ptr.vmem [resolvable:$false] %s22664_s10 }
  0x2a   : > { %s195_s7 = scalar_lea.hbm %s26004_s1, %s19168_s30  ;;  %s22666_s21 = scalar_lea.vmem %s22665_s10, 532480 }
  0x2b   : > { %p22662_p11 = pnand %p22660_p8, %p22620_p10  ;;  %p22667_p13 = scmp.lt.s32.totalorder %s197_s13, %s22665_s10 }
  0x2c   : > { %p22668_p0 = scmp.lt.s32.totalorder %s22666_s21, %s22659_s23 }
  0x2d   : > { %p22663_p12 = pneg %p22662_p11 }
  0x2e   : > { %p22669_p1 = por %p22668_p0, %p22667_p13 }
  0x30   : > { %p22670_p2 = pnand %p22669_p1, %p22663_p12 }
  0x32   : > { %22673 = shalt.err (!%p22670_p2)
}
  0x33   : > { %s22760_s29 = smov 256   ;;  %s22761_s30 = smov 16  }
  0x34   : > { %19179 = dma.hbm_to_vmem [thread:$0]  (!%p22841_p9), %s195_s7, 266240, %s197_s13, %s185_s15, %s22760_s29, %s22760_s29, %s22761_s30  }
  0x35   : > { %s238_s9 = scalar_lea.hbm %s25974_s3, %s19165_s14  ;;  %s230_s8 = scalar_lea.vmem [#allocation6], %s16879_s11 }
  0x36   : > { %s239_s1 = sshll.u32 %s230_s8, 4  ;;  %s22762_s21 = smov [#allocation6]   ;;  %s240_s1 = int_to_ptr.vmem [resolvable:$true] %s239_s1 }
  0x37   : > { %s22687_s10 = scalar_lea.vmem %s240_s1, 16384  ;;  %s22692_s23 = sshll.u32 %s22762_s21, 4  ;;  %s22693_s23 = int_to_ptr.vmem [resolvable:$false] %s22692_s23 }
  0x38   : > { %p22688_p3 = scmp.ne.s32.totalorder %s240_s1, %s22687_s10  ;;  %s22694_s2 = scalar_lea.vmem %s22693_s23, 32768 }
  0x39   : > { %p22695_p8 = scmp.lt.s32.totalorder %s240_s1, %s22693_s23  ;;  %p22696_p11 = scmp.lt.s32.totalorder %s22694_s2, %s22687_s10 }
  0x3a   : > { %p22690_p4 = pnand %p22688_p3, %p22620_p10 }
  0x3b   : > { %p22697_p12 = por %p22696_p11, %p22695_p8 }
  0x3c   : > { %p22691_p5 = pneg %p22690_p4 }
  0x3e   : > { %p22698_p13 = pnand %p22697_p12, %p22691_p5 }
  0x40   : > { %22701 = shalt.err (!%p22698_p13)
}
  0x41   : > { %19185 = dma.hbm_to_vmem [thread:$0]  (!%p22841_p9), %s238_s9, 16384, %s240_s1, %s22852_s12, %s22760_s29, %s22760_s29, %s22761_s30  }
  0x42   : > { %251 = sbr.rel (%p22864_p6) target bundleno = 2628 (0xa44), region = 36 }
  0x47   : > { %s22894_s27 = sand.u32 1, %s22740_s16  }
  0x48   : > { %s19169_s11 = smul.u32 16640, %s22894_s27  ;;  %s254_s7 = scalar_lea.sflag [#allocation3], %s22894_s27 }
  0x4a   : > { %s22898_s13 = scalar_lea.vmem [#allocation2], %s19169_s11 }
  0x4b   : > { %22727 = dma.done.wait (%p22830_p7), %s254_s7, 266240  }
  0x4c   : > { %22729 = vsyncadd (%p22830_p7), %s254_s7, 4294701056  ;;  %s26005_s1 = sadd.s32 4294967295, %s22756_s20   ;;  %s16884_s28 = sshll.u32 %s22894_s27, 2 }
  0x4d   : > { %s262_s2 = sand.u32 1, %s26005_s1   ;;  %s22907_s24 = scalar_lea.vmem [#allocation4], %s16884_s28 }
  0x4e   : > { %s263_s12 = scalar_lea.sflag [#allocation5], %s262_s2 }
  0x4f   : > { %22731 = dma.done.wait (%p22830_p7), %s263_s12, 16448  }
  0x50   : > { %22733 = vsyncadd (%p22830_p7), %s263_s12, 4294950848  ;;  %v19239_v0 = vld [vmem:[%s22898_s13 + $0xe4] ss:$16 sps:$4 sm:$0xff]   ;;  %v19243_v2 = vld [vmem:[%s22898_s13 + $0xe0] ss:$16 sps:$4 sm:$0xff]   ;;  %p315_p7 = scmp.lt.s32.totalorder %s22748_s18, 1 }
  0x51   : > { %v19241_v1 = vld [vmem:[%s22898_s13 + $0x2e4] ss:$16 sps:$4 sm:$0xff]   ;;  %13092 = vmatprep.subr.bf16.mxu0 %v19239_v0  ;;  %v19244_v3 = vld [vmem:[%s22898_s13 + $0x2e0] ss:$16 sps:$4 sm:$0xff]   ;;  %v330_v48 = vld [vmem:[%s25971_s0 + $0x8] sm:$0xff] }
  0x52   : > { %13133 = vmatprep.subr.bf16.mxu1 %v19241_v1  ;;  %v19245_v4 = vld [vmem:[%s22898_s13 + $0xc4] ss:$16 sps:$4 sm:$0xff]   ;;  %13093 = vmatpush1.bf16.msra.mxu0 %v19243_v2  ;;  %v19249_v6 = vld [vmem:[%s22898_s13 + $0xc0] ss:$16 sps:$4 sm:$0xff]   ;;  %v22969_v51 = vcombine.high %v330_v48, %v330_v48  ;;  %s26056_s18 = smov (!%p315_p7, %s22748_s18), 1 }
  0x53   : > { %13134 = vmatpush1.bf16.msra.mxu1 %v19244_v3  ;;  %v19247_v5 = vld [vmem:[%s22898_s13 + $0x2c4] ss:$16 sps:$4 sm:$0xff]   ;;  %13094 = vmatprep.subr.bf16.mxu0 %v19245_v4  ;;  %v19250_v7 = vld [vmem:[%s22898_s13 + $0x2c0] ss:$16 sps:$4 sm:$0xff]   ;;  %s19166_s7 = sshll.u32 %s26056_s18, 5 }
  0x54   : > { %13135 = vmatprep.subr.bf16.mxu1 %v19247_v5  ;;  %v19251_v8 = vld [vmem:[%s22898_s13 + $0xa4] ss:$16 sps:$4 sm:$0xff]   ;;  %v19255_v10 = vld [vmem:[%s22898_s13 + $0xa0] ss:$16 sps:$4 sm:$0xff]   ;;  %13165 = vmatprep.mubr.bf16.mxu1 %v22969_v51  ;;  %s319_s28 = scalar_lea.vmem %s25975_s4, %s19166_s7 }
  0x55   : > { %v19253_v9 = vld [vmem:[%s22898_s13 + $0x2a4] ss:$16 sps:$4 sm:$0xff]   ;;  %v19256_v11 = vld [vmem:[%s22898_s13 + $0x2a0] ss:$16 sps:$4 sm:$0xff]  }
  0x56   : > { %13095 = vmatpush1.bf16.msra.mxu0 %v19249_v6  ;;  %v19257_v12 = vld [vmem:[%s22898_s13 + $0x84] ss:$16 sps:$4 sm:$0xff]   ;;  %v19261_v14 = vld [vmem:[%s22898_s13 + $0x80] ss:$16 sps:$4 sm:$0xff]  }
  0x57   : > { %13136 = vmatpush1.bf16.msra.mxu1 %v19250_v7  ;;  %13096 = vmatprep.subr.bf16.mxu0 %v19251_v8  ;;  %v19259_v13 = vld [vmem:[%s22898_s13 + $0x284] ss:$16 sps:$4 sm:$0xff]   ;;  %v19262_v15 = vld [vmem:[%s22898_s13 + $0x280] ss:$16 sps:$4 sm:$0xff]   ;;  %v22993_v7 = vcombine.low %v330_v48, %v330_v48 }
  0x58   : > { %13137 = vmatprep.subr.bf16.mxu1 %v19253_v9  ;;  %v19263_v16 = vld [vmem:[%s22898_s13 + $0x64] ss:$16 sps:$4 sm:$0xff]   ;;  %v19267_v18 = vld [vmem:[%s22898_s13 + $0x60] ss:$16 sps:$4 sm:$0xff]  }
  0x59   : > { %v19265_v17 = vld [vmem:[%s22898_s13 + $0x264] ss:$16 sps:$4 sm:$0xff]   ;;  %v19268_v19 = vld [vmem:[%s22898_s13 + $0x260] ss:$16 sps:$4 sm:$0xff]  }
  0x5a   : > { %13097 = vmatpush1.bf16.msra.mxu0 %v19255_v10  ;;  %v19269_v20 = vld [vmem:[%s22898_s13 + $0x44] ss:$16 sps:$4 sm:$0xff]   ;;  %v19273_v22 = vld [vmem:[%s22898_s13 + $0x40] ss:$16 sps:$4 sm:$0xff]  }
  0x5b   : > { %13138 = vmatpush1.bf16.msra.mxu1 %v19256_v11  ;;  %13098 = vmatprep.subr.bf16.mxu0 %v19257_v12  ;;  %v19271_v21 = vld [vmem:[%s22898_s13 + $0x244] ss:$16 sps:$4 sm:$0xff]   ;;  %v19274_v23 = vld [vmem:[%s22898_s13 + $0x240] ss:$16 sps:$4 sm:$0xff]  }
  0x5c   : > { %13139 = vmatprep.subr.bf16.mxu1 %v19259_v13  ;;  %v19275_v24 = vld [vmem:[%s22898_s13 + $0x24] ss:$16 sps:$4 sm:$0xff]   ;;  %v19279_v26 = vld [vmem:[%s22898_s13 + $0x20] ss:$16 sps:$4 sm:$0xff]  }
  0x5d   : > { %v19277_v25 = vld [vmem:[%s22898_s13 + $0x224] ss:$16 sps:$4 sm:$0xff]   ;;  %v19280_v27 = vld [vmem:[%s22898_s13 + $0x220] ss:$16 sps:$4 sm:$0xff]  }
  0x5e   : > { %13099 = vmatpush1.bf16.msra.mxu0 %v19261_v14  ;;  %v19281_v28 = vld [vmem:[%s22898_s13 + $0x4] ss:$16 sps:$4 sm:$0xff]   ;;  %v19285_v30 = vld [vmem:[%s22898_s13] ss:$16 sps:$4 sm:$0xff]  }
  0x5f   : > { %13140 = vmatpush1.bf16.msra.mxu1 %v19262_v15  ;;  %13100 = vmatprep.subr.bf16.mxu0 %v19263_v16  ;;  %v19283_v29 = vld [vmem:[%s22898_s13 + $0x204] ss:$16 sps:$4 sm:$0xff]   ;;  %v19286_v31 = vld [vmem:[%s22898_s13 + $0x200] ss:$16 sps:$4 sm:$0xff]  }
  0x60   : > { %13141 = vmatprep.subr.bf16.mxu1 %v19265_v17  ;;  %v19287_v32 = vld [vmem:[%s22898_s13 + $0x1e4] ss:$16 sps:$4 sm:$0xff]   ;;  %v19291_v34 = vld [vmem:[%s22898_s13 + $0x1e0] ss:$16 sps:$4 sm:$0xff]  }
  0x61   : > { %v19289_v33 = vld [vmem:[%s22898_s13 + $0x3e4] ss:$16 sps:$4 sm:$0xff]   ;;  %v19292_v35 = vld [vmem:[%s22898_s13 + $0x3e0] ss:$16 sps:$4 sm:$0xff]  }
  0x62   : > { %13101 = vmatpush1.bf16.msra.mxu0 %v19267_v18  ;;  %v19293_v36 = vld [vmem:[%s22898_s13 + $0x1c4] ss:$16 sps:$4 sm:$0xff]   ;;  %v19297_v38 = vld [vmem:[%s22898_s13 + $0x1c0] ss:$16 sps:$4 sm:$0xff]  }
  0x63   : > { %13142 = vmatpush1.bf16.msra.mxu1 %v19268_v19  ;;  %13102 = vmatprep.subr.bf16.mxu0 %v19269_v20  ;;  %v19295_v37 = vld [vmem:[%s22898_s13 + $0x3c4] ss:$16 sps:$4 sm:$0xff]   ;;  %v19298_v39 = vld [vmem:[%s22898_s13 + $0x3c0] ss:$16 sps:$4 sm:$0xff]  }
  0x64   : > { %13143 = vmatprep.subr.bf16.mxu1 %v19271_v21  ;;  %v19299_v40 = vld [vmem:[%s22898_s13 + $0x1a4] ss:$16 sps:$4 sm:$0xff]   ;;  %v19303_v42 = vld [vmem:[%s22898_s13 + $0x1a0] ss:$16 sps:$4 sm:$0xff]  }
  0x65   : > { %v19301_v41 = vld [vmem:[%s22898_s13 + $0x3a4] ss:$16 sps:$4 sm:$0xff]   ;;  %v19304_v43 = vld [vmem:[%s22898_s13 + $0x3a0] ss:$16 sps:$4 sm:$0xff]  }
  0x66   : > { %13103 = vmatpush1.bf16.msra.mxu0 %v19273_v22  ;;  %v19305_v44 = vld [vmem:[%s22898_s13 + $0x184] ss:$16 sps:$4 sm:$0xff]   ;;  %v19309_v49 = vld [vmem:[%s22898_s13 + $0x180] ss:$16 sps:$4 sm:$0xff]  }
  0x67   : > { %13144 = vmatpush1.bf16.msra.mxu1 %v19274_v23  ;;  %13104 = vmatprep.subr.bf16.mxu0 %v19275_v24  ;;  %v19307_v45 = vld [vmem:[%s22898_s13 + $0x384] ss:$16 sps:$4 sm:$0xff]   ;;  %v19310_v50 = vld [vmem:[%s22898_s13 + $0x380] ss:$16 sps:$4 sm:$0xff]  }
  0x68   : > { %13145 = vmatprep.subr.bf16.mxu1 %v19277_v25  ;;  %v329_v46 = vld [vmem:[%s25971_s0] sm:$0xff] }
  0x69   : > { %v22962_v47 = vcombine.high %v329_v46, %v329_v46  ;;  %v19311_v52 = vld [vmem:[%s22898_s13 + $0x164] ss:$16 sps:$4 sm:$0xff]   ;;  %v19315_v54 = vld [vmem:[%s22898_s13 + $0x160] ss:$16 sps:$4 sm:$0xff]   ;;  %v22991_v6 = vcombine.low %v329_v46, %v329_v46 }
  0x6a   : > { %13105 = vmatpush1.bf16.msra.mxu0 %v19279_v26  ;;  %v19313_v53 = vld [vmem:[%s22898_s13 + $0x364] ss:$16 sps:$4 sm:$0xff]   ;;  %v19316_v55 = vld [vmem:[%s22898_s13 + $0x360] ss:$16 sps:$4 sm:$0xff]  }
  0x6b   : > { %13146 = vmatpush1.bf16.msra.mxu1 %v19280_v27  ;;  %13106 = vmatprep.subr.bf16.mxu0 %v19281_v28  ;;  %v19317_v56 = vld [vmem:[%s22898_s13 + $0x144] ss:$16 sps:$4 sm:$0xff]   ;;  %v19321_v58 = vld [vmem:[%s22898_s13 + $0x140] ss:$16 sps:$4 sm:$0xff]  }
  0x6c   : > { %13147 = vmatprep.subr.bf16.mxu1 %v19283_v29  ;;  %13124 = vmatprep.mubr.bf16.mxu0 %v22962_v47  ;;  %v19319_v57 = vld [vmem:[%s22898_s13 + $0x344] ss:$16 sps:$4 sm:$0xff]   ;;  %v19322_v59 = vld [vmem:[%s22898_s13 + $0x340] ss:$16 sps:$4 sm:$0xff]  }
  0x6d   : > { %v19323_v60 = vld [vmem:[%s22898_s13 + $0x124] ss:$16 sps:$4 sm:$0xff]   ;;  %v19327_v62 = vld [vmem:[%s22898_s13 + $0x120] ss:$16 sps:$4 sm:$0xff]  }
  0x6e   : > { %13107 = vmatpush1.bf16.msra.mxu0 %v19285_v30  ;;  %v19325_v61 = vld [vmem:[%s22898_s13 + $0x324] ss:$16 sps:$4 sm:$0xff]   ;;  %v19328_v63 = vld [vmem:[%s22898_s13 + $0x320] ss:$16 sps:$4 sm:$0xff]  }
  0x6f   : > { %13148 = vmatpush1.bf16.msra.mxu1 %v19286_v31  ;;  %13108 = vmatprep.subr.bf16.mxu0 %v19287_v32  ;;  %v19329_v0 = vld [vmem:[%s22898_s13 + $0x104] ss:$16 sps:$4 sm:$0xff]   ;;  %v19333_v2 = vld [vmem:[%s22898_s13 + $0x100] ss:$16 sps:$4 sm:$0xff]  }
  0x70   : > { %13149 = vmatprep.subr.bf16.mxu1 %v19289_v33  ;;  %v19331_v1 = vld [vmem:[%s22898_s13 + $0x304] ss:$16 sps:$4 sm:$0xff]   ;;  %v19334_v3 = vld [vmem:[%s22898_s13 + $0x300] ss:$16 sps:$4 sm:$0xff]   ;;  %v23029_v33 = vld [vmem:[%s25971_s0 + $0x18] sm:$0xff] }
  0x71   : > { %v19341_v4 = vld [vmem:[%s22898_s13 + $0x4e4] ss:$16 sps:$4 sm:$0xff]   ;;  %v19339_v8 = vld [vmem:[%s22898_s13 + $0x4e0] ss:$16 sps:$4 sm:$0xff]  }
  0x72   : > { %13109 = vmatpush2.bf16.msra.mxu0 %v19291_v34  ;;  %v19344_v5 = vld [vmem:[%s22898_s13 + $0x6e4] ss:$16 sps:$4 sm:$0xff]   ;;  %v19342_v9 = vld [vmem:[%s22898_s13 + $0x6e0] ss:$16 sps:$4 sm:$0xff]  }
  0x73   : > { %13150 = vmatpush2.bf16.msra.mxu1 %v19292_v35  ;;  %13110 = vmatprep.subr.bf16.mxu0 %v19293_v36  ;;  %v19347_v10 = vld [vmem:[%s22898_s13 + $0x4c4] ss:$16 sps:$4 sm:$0xff]   ;;  %v19345_v12 = vld [vmem:[%s22898_s13 + $0x4c0] ss:$16 sps:$4 sm:$0xff]  }
  0x74   : > { %13151 = vmatprep.subr.bf16.mxu1 %v19295_v37  ;;  %v19350_v11 = vld [vmem:[%s22898_s13 + $0x6c4] ss:$16 sps:$4 sm:$0xff]   ;;  %v19348_v13 = vld [vmem:[%s22898_s13 + $0x6c0] ss:$16 sps:$4 sm:$0xff]   ;;  %v23039_v37 = vcombine.high %v23029_v33, %v23029_v33 }
  0x75   : > { %v19353_v14 = vld [vmem:[%s22898_s13 + $0x4a4] ss:$16 sps:$4 sm:$0xff]   ;;  %v19351_v16 = vld [vmem:[%s22898_s13 + $0x4a0] ss:$16 sps:$4 sm:$0xff]  }
  0x76   : > { %13111 = vmatpush2.bf16.msra.mxu0 %v19297_v38  ;;  %v19356_v15 = vld [vmem:[%s22898_s13 + $0x6a4] ss:$16 sps:$4 sm:$0xff]   ;;  %v19354_v17 = vld [vmem:[%s22898_s13 + $0x6a0] ss:$16 sps:$4 sm:$0xff]  }
  0x77   : > { %13152 = vmatpush2.bf16.msra.mxu1 %v19298_v39  ;;  %13112 = vmatprep.subr.bf16.mxu0 %v19299_v40  ;;  %v19359_v18 = vld [vmem:[%s22898_s13 + $0x484] ss:$16 sps:$4 sm:$0xff]   ;;  %v19357_v20 = vld [vmem:[%s22898_s13 + $0x480] ss:$16 sps:$4 sm:$0xff]  }
  0x78   : > { %13153 = vmatprep.subr.bf16.mxu1 %v19301_v41  ;;  %v19362_v19 = vld [vmem:[%s22898_s13 + $0x684] ss:$16 sps:$4 sm:$0xff]   ;;  %v19360_v21 = vld [vmem:[%s22898_s13 + $0x680] ss:$16 sps:$4 sm:$0xff]  }
  0x79   : > { %v19365_v22 = vld [vmem:[%s22898_s13 + $0x464] ss:$16 sps:$4 sm:$0xff]   ;;  %v19363_v24 = vld [vmem:[%s22898_s13 + $0x460] ss:$16 sps:$4 sm:$0xff]  }
  0x7a   : > { %13113 = vmatpush2.bf16.msra.mxu0 %v19303_v42  ;;  %v19368_v23 = vld [vmem:[%s22898_s13 + $0x664] ss:$16 sps:$4 sm:$0xff]   ;;  %v19366_v25 = vld [vmem:[%s22898_s13 + $0x660] ss:$16 sps:$4 sm:$0xff]  }
  0x7b   : > { %13154 = vmatpush2.bf16.msra.mxu1 %v19304_v43  ;;  %13114 = vmatprep.subr.bf16.mxu0 %v19305_v44  ;;  %v19371_v26 = vld [vmem:[%s22898_s13 + $0x444] ss:$16 sps:$4 sm:$0xff]   ;;  %v19369_v28 = vld [vmem:[%s22898_s13 + $0x440] ss:$16 sps:$4 sm:$0xff]  }
  0x7c   : > { %13155 = vmatprep.subr.bf16.mxu1 %v19307_v45  ;;  %v19374_v27 = vld [vmem:[%s22898_s13 + $0x644] ss:$16 sps:$4 sm:$0xff]   ;;  %v19372_v29 = vld [vmem:[%s22898_s13 + $0x640] ss:$16 sps:$4 sm:$0xff]  }
  0x7d   : > { %v19377_v30 = vld [vmem:[%s22898_s13 + $0x424] ss:$16 sps:$4 sm:$0xff]   ;;  %v19375_v34 = vld [vmem:[%s22898_s13 + $0x420] ss:$16 sps:$4 sm:$0xff]  }
  0x7e   : > { %13115 = vmatpush2.bf16.msra.mxu0 %v19309_v49  ;;  %v19380_v31 = vld [vmem:[%s22898_s13 + $0x624] ss:$16 sps:$4 sm:$0xff]   ;;  %v19378_v35 = vld [vmem:[%s22898_s13 + $0x620] ss:$16 sps:$4 sm:$0xff]  }
  0x7f   : > { %13156 = vmatpush2.bf16.msra.mxu1 %v19310_v50  ;;  %13116 = vmatprep.subr.bf16.mxu0 %v19311_v52  ;;  %v23024_v32 = vld [vmem:[%s25971_s0 + $0x10] sm:$0xff] }
  0x80   : > { %13157 = vmatprep.subr.bf16.mxu1 %v19313_v53  ;;  %v23035_v36 = vcombine.high %v23024_v32, %v23024_v32  ;;  %v19383_v38 = vld [vmem:[%s22898_s13 + $0x404] ss:$16 sps:$4 sm:$0xff]   ;;  %v19381_v40 = vld [vmem:[%s22898_s13 + $0x400] ss:$16 sps:$4 sm:$0xff]  }
  0x81   : > { %v19386_v39 = vld [vmem:[%s22898_s13 + $0x604] ss:$16 sps:$4 sm:$0xff]   ;;  %v19384_v41 = vld [vmem:[%s22898_s13 + $0x600] ss:$16 sps:$4 sm:$0xff]  }
  0x82   : > { %13117 = vmatpush2.bf16.msra.mxu0 %v19315_v54  ;;  %v19389_v42 = vld [vmem:[%s22898_s13 + $0x5e4] ss:$16 sps:$4 sm:$0xff]   ;;  %v19387_v44 = vld [vmem:[%s22898_s13 + $0x5e0] ss:$16 sps:$4 sm:$0xff]  }
  0x83   : > { %13158 = vmatpush2.bf16.msra.mxu1 %v19316_v55  ;;  %13118 = vmatprep.subr.bf16.mxu0 %v19317_v56  ;;  %v19392_v43 = vld [vmem:[%s22898_s13 + $0x7e4] ss:$16 sps:$4 sm:$0xff]   ;;  %v19390_v45 = vld [vmem:[%s22898_s13 + $0x7e0] ss:$16 sps:$4 sm:$0xff]  }
  0x84   : > { %13159 = vmatprep.subr.bf16.mxu1 %v19319_v57  ;;  %v19395_v46 = vld [vmem:[%s22898_s13 + $0x5c4] ss:$16 sps:$4 sm:$0xff]   ;;  %v19393_v49 = vld [vmem:[%s22898_s13 + $0x5c0] ss:$16 sps:$4 sm:$0xff]  }
  0x85   : > { %v19398_v48 = vld [vmem:[%s22898_s13 + $0x7c4] ss:$16 sps:$4 sm:$0xff]   ;;  %v19396_v50 = vld [vmem:[%s22898_s13 + $0x7c0] ss:$16 sps:$4 sm:$0xff]  }
  0x86   : > { %13119 = vmatpush2.bf16.msra.mxu0 %v19321_v58  ;;  %v19401_v52 = vld [vmem:[%s22898_s13 + $0x5a4] ss:$16 sps:$4 sm:$0xff]   ;;  %v19399_v54 = vld [vmem:[%s22898_s13 + $0x5a0] ss:$16 sps:$4 sm:$0xff]  }
  0x87   : > { %13160 = vmatpush2.bf16.msra.mxu1 %v19322_v59  ;;  %13120 = vmatprep.subr.bf16.mxu0 %v19323_v60  ;;  %v19404_v53 = vld [vmem:[%s22898_s13 + $0x7a4] ss:$16 sps:$4 sm:$0xff]   ;;  %v19402_v55 = vld [vmem:[%s22898_s13 + $0x7a0] ss:$16 sps:$4 sm:$0xff]  }
  0x88   : > { %13161 = vmatprep.subr.bf16.mxu1 %v19325_v61  ;;  %v19407_v56 = vld [vmem:[%s22898_s13 + $0x584] ss:$16 sps:$4 sm:$0xff]   ;;  %v19405_v58 = vld [vmem:[%s22898_s13 + $0x580] ss:$16 sps:$4 sm:$0xff]  }
  0x89   : > { %v19410_v57 = vld [vmem:[%s22898_s13 + $0x784] ss:$16 sps:$4 sm:$0xff]   ;;  %v19408_v59 = vld [vmem:[%s22898_s13 + $0x780] ss:$16 sps:$4 sm:$0xff]  }
  0x8a   : > { %13121 = vmatpush2.bf16.msra.mxu0 %v19327_v62  ;;  %v19413_v60 = vld [vmem:[%s22898_s13 + $0x564] ss:$16 sps:$4 sm:$0xff]   ;;  %v19411_v62 = vld [vmem:[%s22898_s13 + $0x560] ss:$16 sps:$4 sm:$0xff]  }
  0x8b   : > { %13162 = vmatpush2.bf16.msra.mxu1 %v19328_v63  ;;  %13122 = vmatprep.subr.bf16.mxu0 %v19329_v0  ;;  %v19416_v61 = vld [vmem:[%s22898_s13 + $0x764] ss:$16 sps:$4 sm:$0xff]   ;;  %v19414_v63 = vld [vmem:[%s22898_s13 + $0x760] ss:$16 sps:$4 sm:$0xff]  }
  0x8c   : > { %13163 = vmatprep.subr.bf16.mxu1 %v19331_v1  ;;  %v19419_v0 = vld [vmem:[%s22898_s13 + $0x544] ss:$16 sps:$4 sm:$0xff]  }
  0x8d   : > { %v19422_v1 = vld [vmem:[%s22898_s13 + $0x744] ss:$16 sps:$4 sm:$0xff]  }
  0x8e   : > { %13123 = vmatpush2.bf16.msra.mxu0 %v19333_v2  ;;  %v19417_v2 = vld [vmem:[%s22898_s13 + $0x540] ss:$16 sps:$4 sm:$0xff]  }
  0x8f   : > { %13164 = vmatpush2.bf16.msra.mxu1 %v19334_v3  ;;  %13174 = vmatprep.subr.bf16.mxu0 %v19341_v4  ;;  %v19420_v3 = vld [vmem:[%s22898_s13 + $0x740] ss:$16 sps:$4 sm:$0xff]   ;;  %v19425_v4 = vld [vmem:[%s22898_s13 + $0x524] ss:$16 sps:$4 sm:$0xff]  }
  0x90   : > { %13215 = vmatprep.subr.bf16.mxu1 %v19344_v5  ;;  %v19428_v5 = vld [vmem:[%s22898_s13 + $0x724] ss:$16 sps:$4 sm:$0xff]  }
  0x91   : > { %13125 = vmatmul.mubr.bf16.vlgmr.msra.gmra.mxu0 %v22991_v6 }
  0x92   : > { %13166 = vmatmul.mubr.bf16.vlgmr.msra.gmra.mxu1 %v22993_v7  ;;  %13175 = vmatpush1.bf16.msra.mxu0 %v19339_v8  ;;  %v19423_v8 = vld [vmem:[%s22898_s13 + $0x520] ss:$16 sps:$4 sm:$0xff]  }
  0x93   : > { %13216 = vmatpush1.bf16.msra.mxu1 %v19342_v9  ;;  %13176 = vmatprep.subr.bf16.mxu0 %v19347_v10  ;;  %v19426_v9 = vld [vmem:[%s22898_s13 + $0x720] ss:$16 sps:$4 sm:$0xff]   ;;  %v19431_v10 = vld [vmem:[%s22898_s13 + $0x504] ss:$16 sps:$4 sm:$0xff]  }
  0x94   : > { %13217 = vmatprep.subr.bf16.mxu1 %v19350_v11  ;;  %13206 = vmatprep.mubr.bf16.mxu0 %v23035_v36  ;;  %v19434_v11 = vld [vmem:[%s22898_s13 + $0x704] ss:$16 sps:$4 sm:$0xff]  }
  0x95   : > { %13247 = vmatprep.mubr.bf16.mxu1 %v23039_v37 }
  0x96   : > { %13177 = vmatpush1.bf16.msra.mxu0 %v19345_v12  ;;  %v19429_v12 = vld [vmem:[%s22898_s13 + $0x500] ss:$16 sps:$4 sm:$0xff]  }
  0x97   : > { %13218 = vmatpush1.bf16.msra.mxu1 %v19348_v13  ;;  %13178 = vmatprep.subr.bf16.mxu0 %v19353_v14  ;;  %v19432_v13 = vld [vmem:[%s22898_s13 + $0x700] ss:$16 sps:$4 sm:$0xff]   ;;  %v19441_v14 = vld [vmem:[%s22898_s13 + $0x8e4] ss:$16 sps:$4 sm:$0xff]  }
  0x98   : > { %13219 = vmatprep.subr.bf16.mxu1 %v19356_v15  ;;  %v19444_v15 = vld [vmem:[%s22898_s13 + $0xae4] ss:$16 sps:$4 sm:$0xff]  }
  0x9a   : > { %13179 = vmatpush1.bf16.msra.mxu0 %v19351_v16  ;;  %v23083_v16 = vcombine.low %v23024_v32, %v23024_v32  ;;  %v19459_v32 = vld [vmem:[%s22898_s13 + $0x884] ss:$16 sps:$4 sm:$0xff]  }
  0x9b   : > { %13220 = vmatpush1.bf16.msra.mxu1 %v19354_v17  ;;  %13180 = vmatprep.subr.bf16.mxu0 %v19359_v18  ;;  %v23087_v17 = vcombine.low %v23029_v33, %v23029_v33  ;;  %v19439_v18 = vld [vmem:[%s22898_s13 + $0x8e0] ss:$16 sps:$4 sm:$0xff]   ;;  %v19462_v33 = vld [vmem:[%s22898_s13 + $0xa84] ss:$16 sps:$4 sm:$0xff]  }
  0x9c   : > { %13221 = vmatprep.subr.bf16.mxu1 %v19362_v19  ;;  %v19442_v19 = vld [vmem:[%s22898_s13 + $0xae0] ss:$16 sps:$4 sm:$0xff]  }
  0x9e   : > { %13181 = vmatpush1.bf16.msra.mxu0 %v19357_v20  ;;  %v19447_v20 = vld [vmem:[%s22898_s13 + $0x8c4] ss:$16 sps:$4 sm:$0xff]  }
  0x9f   : > { %13222 = vmatpush1.bf16.msra.mxu1 %v19360_v21  ;;  %13182 = vmatprep.subr.bf16.mxu0 %v19365_v22  ;;  %v19450_v21 = vld [vmem:[%s22898_s13 + $0xac4] ss:$16 sps:$4 sm:$0xff]  }
  0xa0   : > { %13223 = vmatprep.subr.bf16.mxu1 %v19368_v23  ;;  %v23096_v22 = vld [vmem:[%s25971_s0 + $0x20] sm:$0xff]  ;;  %v23101_v23 = vld [vmem:[%s25971_s0 + $0x28] sm:$0xff] }
  0xa2   : > { %13183 = vmatpush1.bf16.msra.mxu0 %v19363_v24  ;;  %v23105_v24 = vcombine.high %v23096_v22, %v23096_v22 }
  0xa3   : > { %13224 = vmatpush1.bf16.msra.mxu1 %v19366_v25  ;;  %13184 = vmatprep.subr.bf16.mxu0 %v19371_v26  ;;  %v23109_v25 = vcombine.high %v23101_v23, %v23101_v23  ;;  %v19445_v26 = vld [vmem:[%s22898_s13 + $0x8c0] ss:$16 sps:$4 sm:$0xff]  }
  0xa4   : > { %13225 = vmatprep.subr.bf16.mxu1 %v19374_v27  ;;  %v19448_v27 = vld [vmem:[%s22898_s13 + $0xac0] ss:$16 sps:$4 sm:$0xff]  }
  0xa6   : > { %13185 = vmatpush1.bf16.msra.mxu0 %v19369_v28  ;;  %v19453_v28 = vld [vmem:[%s22898_s13 + $0x8a4] ss:$16 sps:$4 sm:$0xff]  }
  0xa7   : > { %13226 = vmatpush1.bf16.msra.mxu1 %v19372_v29  ;;  %13186 = vmatprep.subr.bf16.mxu0 %v19377_v30  ;;  %v19456_v29 = vld [vmem:[%s22898_s13 + $0xaa4] ss:$16 sps:$4 sm:$0xff]   ;;  %v19451_v30 = vld [vmem:[%s22898_s13 + $0x8a0] ss:$16 sps:$4 sm:$0xff]  }
  0xa8   : > { %13227 = vmatprep.subr.bf16.mxu1 %v19380_v31  ;;  %v19454_v31 = vld [vmem:[%s22898_s13 + $0xaa0] ss:$16 sps:$4 sm:$0xff]  }
  0xaa   : > { %13187 = vmatpush1.bf16.msra.mxu0 %v19375_v34  ;;  %v19457_v34 = vld [vmem:[%s22898_s13 + $0x880] ss:$16 sps:$4 sm:$0xff]  }
  0xab   : > { %13228 = vmatpush1.bf16.msra.mxu1 %v19378_v35  ;;  %13188 = vmatprep.subr.bf16.mxu0 %v19383_v38  ;;  %v19460_v35 = vld [vmem:[%s22898_s13 + $0xa80] ss:$16 sps:$4 sm:$0xff]   ;;  %v19465_v38 = vld [vmem:[%s22898_s13 + $0x864] ss:$16 sps:$4 sm:$0xff]  }
  0xac   : > { %13229 = vmatprep.subr.bf16.mxu1 %v19386_v39  ;;  %v19468_v39 = vld [vmem:[%s22898_s13 + $0xa64] ss:$16 sps:$4 sm:$0xff]  }
  0xae   : > { %13189 = vmatpush1.bf16.msra.mxu0 %v19381_v40  ;;  %v19463_v40 = vld [vmem:[%s22898_s13 + $0x860] ss:$16 sps:$4 sm:$0xff]  }
  0xaf   : > { %13230 = vmatpush1.bf16.msra.mxu1 %v19384_v41  ;;  %13190 = vmatprep.subr.bf16.mxu0 %v19389_v42  ;;  %v19466_v41 = vld [vmem:[%s22898_s13 + $0xa60] ss:$16 sps:$4 sm:$0xff]   ;;  %v19471_v42 = vld [vmem:[%s22898_s13 + $0x844] ss:$16 sps:$4 sm:$0xff]  }
  0xb0   : > { %13231 = vmatprep.subr.bf16.mxu1 %v19392_v43  ;;  %v19474_v43 = vld [vmem:[%s22898_s13 + $0xa44] ss:$16 sps:$4 sm:$0xff]  }
  0xb2   : > { %13191 = vmatpush2.bf16.msra.mxu0 %v19387_v44  ;;  %v19469_v44 = vld [vmem:[%s22898_s13 + $0x840] ss:$16 sps:$4 sm:$0xff]  }
  0xb3   : > { %13232 = vmatpush2.bf16.msra.mxu1 %v19390_v45  ;;  %13192 = vmatprep.subr.bf16.mxu0 %v19395_v46  ;;  %v19472_v45 = vld [vmem:[%s22898_s13 + $0xa40] ss:$16 sps:$4 sm:$0xff]   ;;  %v19477_v46 = vld [vmem:[%s22898_s13 + $0x824] ss:$16 sps:$4 sm:$0xff]  }
  0xb4   : > { %13233 = vmatprep.subr.bf16.mxu1 %v19398_v48  ;;  %v19480_v48 = vld [vmem:[%s22898_s13 + $0xa24] ss:$16 sps:$4 sm:$0xff]  }
  0xb6   : > { %13193 = vmatpush2.bf16.msra.mxu0 %v19393_v49  ;;  %v19475_v49 = vld [vmem:[%s22898_s13 + $0x820] ss:$16 sps:$4 sm:$0xff]  }
  0xb7   : > { %13234 = vmatpush2.bf16.msra.mxu1 %v19396_v50  ;;  %13194 = vmatprep.subr.bf16.mxu0 %v19401_v52  ;;  %v19478_v50 = vld [vmem:[%s22898_s13 + $0xa20] ss:$16 sps:$4 sm:$0xff]   ;;  %v19483_v52 = vld [vmem:[%s22898_s13 + $0x804] ss:$16 sps:$4 sm:$0xff]  }
  0xb8   : > { %13235 = vmatprep.subr.bf16.mxu1 %v19404_v53  ;;  %v19486_v53 = vld [vmem:[%s22898_s13 + $0xa04] ss:$16 sps:$4 sm:$0xff]  }
  0xba   : > { %13195 = vmatpush2.bf16.msra.mxu0 %v19399_v54  ;;  %v19481_v54 = vld [vmem:[%s22898_s13 + $0x800] ss:$16 sps:$4 sm:$0xff]  }
  0xbb   : > { %13236 = vmatpush2.bf16.msra.mxu1 %v19402_v55  ;;  %13196 = vmatprep.subr.bf16.mxu0 %v19407_v56  ;;  %v19484_v55 = vld [vmem:[%s22898_s13 + $0xa00] ss:$16 sps:$4 sm:$0xff]   ;;  %v19489_v56 = vld [vmem:[%s22898_s13 + $0x9e4] ss:$16 sps:$4 sm:$0xff]  }
  0xbc   : > { %13237 = vmatprep.subr.bf16.mxu1 %v19410_v57  ;;  %v19492_v57 = vld [vmem:[%s22898_s13 + $0xbe4] ss:$16 sps:$4 sm:$0xff]  }
  0xbe   : > { %13197 = vmatpush2.bf16.msra.mxu0 %v19405_v58  ;;  %v19487_v58 = vld [vmem:[%s22898_s13 + $0x9e0] ss:$16 sps:$4 sm:$0xff]  }
  0xbf   : > { %13238 = vmatpush2.bf16.msra.mxu1 %v19408_v59  ;;  %13198 = vmatprep.subr.bf16.mxu0 %v19413_v60  ;;  %v19490_v59 = vld [vmem:[%s22898_s13 + $0xbe0] ss:$16 sps:$4 sm:$0xff]   ;;  %v19495_v60 = vld [vmem:[%s22898_s13 + $0x9c4] ss:$16 sps:$4 sm:$0xff]  }
  0xc0   : > { %13239 = vmatprep.subr.bf16.mxu1 %v19416_v61  ;;  %v19498_v61 = vld [vmem:[%s22898_s13 + $0xbc4] ss:$16 sps:$4 sm:$0xff]  }
  0xc2   : > { %13199 = vmatpush2.bf16.msra.mxu0 %v19411_v62  ;;  %v19493_v62 = vld [vmem:[%s22898_s13 + $0x9c0] ss:$16 sps:$4 sm:$0xff]  }
  0xc3   : > { %13240 = vmatpush2.bf16.msra.mxu1 %v19414_v63  ;;  %13200 = vmatprep.subr.bf16.mxu0 %v19419_v0  ;;  %v19496_v63 = vld [vmem:[%s22898_s13 + $0xbc0] ss:$16 sps:$4 sm:$0xff]   ;;  %v19501_v0 = vld [vmem:[%s22898_s13 + $0x9a4] ss:$16 sps:$4 sm:$0xff]  }
  0xc4   : > { %13241 = vmatprep.subr.bf16.mxu1 %v19422_v1  ;;  %v19504_v1 = vld [vmem:[%s22898_s13 + $0xba4] ss:$16 sps:$4 sm:$0xff]  }
  0xc6   : > { %13201 = vmatpush2.bf16.msra.mxu0 %v19417_v2  ;;  %v19499_v2 = vld [vmem:[%s22898_s13 + $0x9a0] ss:$16 sps:$4 sm:$0xff]  }
  0xc7   : > { %13242 = vmatpush2.bf16.msra.mxu1 %v19420_v3  ;;  %13202 = vmatprep.subr.bf16.mxu0 %v19425_v4  ;;  %v19502_v3 = vld [vmem:[%s22898_s13 + $0xba0] ss:$16 sps:$4 sm:$0xff]   ;;  %v19507_v4 = vld [vmem:[%s22898_s13 + $0x984] ss:$16 sps:$4 sm:$0xff]  }
  0xc8   : > { %13243 = vmatprep.subr.bf16.mxu1 %v19428_v5  ;;  %v19510_v5 = vld [vmem:[%s22898_s13 + $0xb84] ss:$16 sps:$4 sm:$0xff]  }
  0xca   : > { %13203 = vmatpush2.bf16.msra.mxu0 %v19423_v8  ;;  %v19505_v8 = vld [vmem:[%s22898_s13 + $0x980] ss:$16 sps:$4 sm:$0xff]  }
  0xcb   : > { %13244 = vmatpush2.bf16.msra.mxu1 %v19426_v9  ;;  %13204 = vmatprep.subr.bf16.mxu0 %v19431_v10  ;;  %v19508_v9 = vld [vmem:[%s22898_s13 + $0xb80] ss:$16 sps:$4 sm:$0xff]   ;;  %v19513_v10 = vld [vmem:[%s22898_s13 + $0x964] ss:$16 sps:$4 sm:$0xff]  }
  0xcc   : > { %13245 = vmatprep.subr.bf16.mxu1 %v19434_v11  ;;  %v19516_v11 = vld [vmem:[%s22898_s13 + $0xb64] ss:$16 sps:$4 sm:$0xff]  }
  0xce   : > { %13205 = vmatpush2.bf16.msra.mxu0 %v19429_v12  ;;  %v19511_v12 = vld [vmem:[%s22898_s13 + $0x960] ss:$16 sps:$4 sm:$0xff]  }
  0xcf   : > { %13246 = vmatpush2.bf16.msra.mxu1 %v19432_v13  ;;  %13256 = vmatprep.subr.bf16.mxu0 %v19441_v14  ;;  %v19514_v13 = vld [vmem:[%s22898_s13 + $0xb60] ss:$16 sps:$4 sm:$0xff]   ;;  %v19519_v14 = vld [vmem:[%s22898_s13 + $0x944] ss:$16 sps:$4 sm:$0xff]  }
  0xd0   : > { %13297 = vmatprep.subr.bf16.mxu1 %v19444_v15  ;;  %v19522_v15 = vld [vmem:[%s22898_s13 + $0xb44] ss:$16 sps:$4 sm:$0xff]  }
  0xd1   : > { %13207 = vmatmul.mubr.bf16.vlgmr.msra.gmra.mxu0 %v23083_v16 }
  0xd2   : > { %13248 = vmatmul.mubr.bf16.vlgmr.msra.gmra.mxu1 %v23087_v17  ;;  %13257 = vmatpush1.bf16.msra.mxu0 %v19439_v18  ;;  %v19517_v18 = vld [vmem:[%s22898_s13 + $0x940] ss:$16 sps:$4 sm:$0xff]  }
  0xd3   : > { %13298 = vmatpush1.bf16.msra.mxu1 %v19442_v19  ;;  %13258 = vmatprep.subr.bf16.mxu0 %v19447_v20  ;;  %v19520_v19 = vld [vmem:[%s22898_s13 + $0xb40] ss:$16 sps:$4 sm:$0xff]   ;;  %v19525_v20 = vld [vmem:[%s22898_s13 + $0x924] ss:$16 sps:$4 sm:$0xff]  }
  0xd4   : > { %13299 = vmatprep.subr.bf16.mxu1 %v19450_v21  ;;  %13288 = vmatprep.mubr.bf16.mxu0 %v23105_v24  ;;  %v19528_v21 = vld [vmem:[%s22898_s13 + $0xb24] ss:$16 sps:$4 sm:$0xff]  }
  0xd5   : > { %13329 = vmatprep.mubr.bf16.mxu1 %v23109_v25 }
  0xd6   : > { %13259 = vmatpush1.bf16.msra.mxu0 %v19445_v26  ;;  %v19523_v26 = vld [vmem:[%s22898_s13 + $0x920] ss:$16 sps:$4 sm:$0xff]  }
  0xd7   : > { %13300 = vmatpush1.bf16.msra.mxu1 %v19448_v27  ;;  %13260 = vmatprep.subr.bf16.mxu0 %v19453_v28  ;;  %v19526_v27 = vld [vmem:[%s22898_s13 + $0xb20] ss:$16 sps:$4 sm:$0xff]   ;;  %v19531_v28 = vld [vmem:[%s22898_s13 + $0x904] ss:$16 sps:$4 sm:$0xff]  }
  0xd8   : > { %13301 = vmatprep.subr.bf16.mxu1 %v19456_v29  ;;  %v19534_v29 = vld [vmem:[%s22898_s13 + $0xb04] ss:$16 sps:$4 sm:$0xff]  }
  0xda   : > { %13261 = vmatpush1.bf16.msra.mxu0 %v19451_v30  ;;  %v19529_v30 = vld [vmem:[%s22898_s13 + $0x900] ss:$16 sps:$4 sm:$0xff]  }
  0xdb   : > { %13302 = vmatpush1.bf16.msra.mxu1 %v19454_v31  ;;  %13262 = vmatprep.subr.bf16.mxu0 %v19459_v32  ;;  %v19532_v31 = vld [vmem:[%s22898_s13 + $0xb00] ss:$16 sps:$4 sm:$0xff]   ;;  %v19541_v32 = vld [vmem:[%s22898_s13 + $0xce4] ss:$16 sps:$4 sm:$0xff]  }
  0xdc   : > { %13303 = vmatprep.subr.bf16.mxu1 %v19462_v33  ;;  %v19544_v33 = vld [vmem:[%s22898_s13 + $0xee4] ss:$16 sps:$4 sm:$0xff]  }
  0xde   : > { %13263 = vmatpush1.bf16.msra.mxu0 %v19457_v34  ;;  %v19539_v34 = vld [vmem:[%s22898_s13 + $0xce0] ss:$16 sps:$4 sm:$0xff]  }
  0xdf   : > { %13304 = vmatpush1.bf16.msra.mxu1 %v19460_v35  ;;  %13264 = vmatprep.subr.bf16.mxu0 %v19465_v38  ;;  %v23179_v35 = vld [vmem:[%s25971_s0 + $0x30] sm:$0xff]  ;;  %v23183_v38 = vcombine.low %v23096_v22, %v23096_v22 }
  0xe0   : > { %13305 = vmatprep.subr.bf16.mxu1 %v19468_v39  ;;  %v23187_v39 = vcombine.low %v23101_v23, %v23101_v23  ;;  %v19550_v22 = vld [vmem:[%s22898_s13 + $0xec4] ss:$16 sps:$4 sm:$0xff]   ;;  %v23199_v23 = vcombine.high %v23179_v35, %v23179_v35 }
  0xe2   : > { %13265 = vmatpush1.bf16.msra.mxu0 %v19463_v40  ;;  %v23192_v40 = vld [vmem:[%s25971_s0 + $0x38] sm:$0xff] }
  0xe3   : > { %13306 = vmatpush1.bf16.msra.mxu1 %v19466_v41  ;;  %13266 = vmatprep.subr.bf16.mxu0 %v19471_v42  ;;  %v19542_v41 = vld [vmem:[%s22898_s13 + $0xee0] ss:$16 sps:$4 sm:$0xff]   ;;  %v19547_v42 = vld [vmem:[%s22898_s13 + $0xcc4] ss:$16 sps:$4 sm:$0xff]  }
  0xe4   : > { %13307 = vmatprep.subr.bf16.mxu1 %v19474_v43  ;;  %v23203_v43 = vcombine.high %v23192_v40, %v23192_v40 }
  0xe6   : > { %13267 = vmatpush1.bf16.msra.mxu0 %v19469_v44  ;;  %v19545_v44 = vld [vmem:[%s22898_s13 + $0xcc0] ss:$16 sps:$4 sm:$0xff]  }
  0xe7   : > { %13308 = vmatpush1.bf16.msra.mxu1 %v19472_v45  ;;  %13268 = vmatprep.subr.bf16.mxu0 %v19477_v46  ;;  %v19548_v45 = vld [vmem:[%s22898_s13 + $0xec0] ss:$16 sps:$4 sm:$0xff]   ;;  %v19553_v46 = vld [vmem:[%s22898_s13 + $0xca4] ss:$16 sps:$4 sm:$0xff]  }
  0xe8   : > { %13309 = vmatprep.subr.bf16.mxu1 %v19480_v48  ;;  %v19556_v48 = vld [vmem:[%s22898_s13 + $0xea4] ss:$16 sps:$4 sm:$0xff]  }
  0xea   : > { %13269 = vmatpush1.bf16.msra.mxu0 %v19475_v49  ;;  %v19551_v49 = vld [vmem:[%s22898_s13 + $0xca0] ss:$16 sps:$4 sm:$0xff]  }
  0xeb   : > { %13310 = vmatpush1.bf16.msra.mxu1 %v19478_v50  ;;  %13270 = vmatprep.subr.bf16.mxu0 %v19483_v52  ;;  %v19554_v50 = vld [vmem:[%s22898_s13 + $0xea0] ss:$16 sps:$4 sm:$0xff]   ;;  %v19559_v52 = vld [vmem:[%s22898_s13 + $0xc84] ss:$16 sps:$4 sm:$0xff]  }
  0xec   : > { %13311 = vmatprep.subr.bf16.mxu1 %v19486_v53  ;;  %v19562_v53 = vld [vmem:[%s22898_s13 + $0xe84] ss:$16 sps:$4 sm:$0xff]  }
  0xee   : > { %13271 = vmatpush1.bf16.msra.mxu0 %v19481_v54  ;;  %v19557_v54 = vld [vmem:[%s22898_s13 + $0xc80] ss:$16 sps:$4 sm:$0xff]  }
  0xef   : > { %13312 = vmatpush1.bf16.msra.mxu1 %v19484_v55  ;;  %13272 = vmatprep.subr.bf16.mxu0 %v19489_v56  ;;  %v19560_v55 = vld [vmem:[%s22898_s13 + $0xe80] ss:$16 sps:$4 sm:$0xff]   ;;  %v19565_v56 = vld [vmem:[%s22898_s13 + $0xc64] ss:$16 sps:$4 sm:$0xff]  }
  0xf0   : > { %13313 = vmatprep.subr.bf16.mxu1 %v19492_v57  ;;  %v19568_v57 = vld [vmem:[%s22898_s13 + $0xe64] ss:$16 sps:$4 sm:$0xff]  }
  0xf2   : > { %13273 = vmatpush2.bf16.msra.mxu0 %v19487_v58  ;;  %v19563_v58 = vld [vmem:[%s22898_s13 + $0xc60] ss:$16 sps:$4 sm:$0xff]  }
  0xf3   : > { %13314 = vmatpush2.bf16.msra.mxu1 %v19490_v59  ;;  %13274 = vmatprep.subr.bf16.mxu0 %v19495_v60  ;;  %v19566_v59 = vld [vmem:[%s22898_s13 + $0xe60] ss:$16 sps:$4 sm:$0xff]   ;;  %v19571_v60 = vld [vmem:[%s22898_s13 + $0xc44] ss:$16 sps:$4 sm:$0xff]  }
  0xf4   : > { %13315 = vmatprep.subr.bf16.mxu1 %v19498_v61  ;;  %v19574_v61 = vld [vmem:[%s22898_s13 + $0xe44] ss:$16 sps:$4 sm:$0xff]  }
  0xf6   : > { %13275 = vmatpush2.bf16.msra.mxu0 %v19493_v62  ;;  %v19569_v62 = vld [vmem:[%s22898_s13 + $0xc40] ss:$16 sps:$4 sm:$0xff]  }
  0xf7   : > { %13316 = vmatpush2.bf16.msra.mxu1 %v19496_v63  ;;  %13276 = vmatprep.subr.bf16.mxu0 %v19501_v0  ;;  %v19572_v63 = vld [vmem:[%s22898_s13 + $0xe40] ss:$16 sps:$4 sm:$0xff]   ;;  %v19577_v0 = vld [vmem:[%s22898_s13 + $0xc24] ss:$16 sps:$4 sm:$0xff]  }
  0xf8   : > { %13317 = vmatprep.subr.bf16.mxu1 %v19504_v1  ;;  %v19580_v1 = vld [vmem:[%s22898_s13 + $0xe24] ss:$16 sps:$4 sm:$0xff]  }
  0xfa   : > { %13277 = vmatpush2.bf16.msra.mxu0 %v19499_v2  ;;  %v19575_v2 = vld [vmem:[%s22898_s13 + $0xc20] ss:$16 sps:$4 sm:$0xff]  }
  0xfb   : > { %13318 = vmatpush2.bf16.msra.mxu1 %v19502_v3  ;;  %13278 = vmatprep.subr.bf16.mxu0 %v19507_v4  ;;  %v19578_v3 = vld [vmem:[%s22898_s13 + $0xe20] ss:$16 sps:$4 sm:$0xff]   ;;  %v19583_v4 = vld [vmem:[%s22898_s13 + $0xc04] ss:$16 sps:$4 sm:$0xff]  }
  0xfc   : > { %13319 = vmatprep.subr.bf16.mxu1 %v19510_v5  ;;  %v19586_v5 = vld [vmem:[%s22898_s13 + $0xe04] ss:$16 sps:$4 sm:$0xff]  }
  0xfe   : > { %13279 = vmatpush2.bf16.msra.mxu0 %v19505_v8  ;;  %v19581_v8 = vld [vmem:[%s22898_s13 + $0xc00] ss:$16 sps:$4 sm:$0xff]  }
  0xff   : > { %13320 = vmatpush2.bf16.msra.mxu1 %v19508_v9  ;;  %13280 = vmatprep.subr.bf16.mxu0 %v19513_v10  ;;  %v19584_v9 = vld [vmem:[%s22898_s13 + $0xe00] ss:$16 sps:$4 sm:$0xff]   ;;  %v19589_v10 = vld [vmem:[%s22898_s13 + $0xde4] ss:$16 sps:$4 sm:$0xff]  }
 0x100   : > { %13321 = vmatprep.subr.bf16.mxu1 %v19516_v11  ;;  %v19592_v11 = vld [vmem:[%s22898_s13 + $0xfe4] ss:$16 sps:$4 sm:$0xff]  }
 0x102   : > { %13281 = vmatpush2.bf16.msra.mxu0 %v19511_v12  ;;  %v19587_v12 = vld [vmem:[%s22898_s13 + $0xde0] ss:$16 sps:$4 sm:$0xff]  }
 0x103   : > { %13322 = vmatpush2.bf16.msra.mxu1 %v19514_v13  ;;  %13282 = vmatprep.subr.bf16.mxu0 %v19519_v14  ;;  %v19590_v13 = vld [vmem:[%s22898_s13 + $0xfe0] ss:$16 sps:$4 sm:$0xff]   ;;  %v19595_v14 = vld [vmem:[%s22898_s13 + $0xdc4] ss:$16 sps:$4 sm:$0xff]  }
 0x104   : > { %13323 = vmatprep.subr.bf16.mxu1 %v19522_v15  ;;  %v19598_v15 = vld [vmem:[%s22898_s13 + $0xfc4] ss:$16 sps:$4 sm:$0xff]  }
 0x106   : > { %13283 = vmatpush2.bf16.msra.mxu0 %v19517_v18  ;;  %v19593_v18 = vld [vmem:[%s22898_s13 + $0xdc0] ss:$16 sps:$4 sm:$0xff]  }
 0x107   : > { %13324 = vmatpush2.bf16.msra.mxu1 %v19520_v19  ;;  %13284 = vmatprep.subr.bf16.mxu0 %v19525_v20  ;;  %v19596_v19 = vld [vmem:[%s22898_s13 + $0xfc0] ss:$16 sps:$4 sm:$0xff]   ;;  %v19601_v20 = vld [vmem:[%s22898_s13 + $0xda4] ss:$16 sps:$4 sm:$0xff]  }
 0x108   : > { %13325 = vmatprep.subr.bf16.mxu1 %v19528_v21  ;;  %v19604_v21 = vld [vmem:[%s22898_s13 + $0xfa4] ss:$16 sps:$4 sm:$0xff]  }
 0x10a   : > { %13285 = vmatpush2.bf16.msra.mxu0 %v19523_v26  ;;  %v19599_v26 = vld [vmem:[%s22898_s13 + $0xda0] ss:$16 sps:$4 sm:$0xff]  }
 0x10b   : > { %13326 = vmatpush2.bf16.msra.mxu1 %v19526_v27  ;;  %13286 = vmatprep.subr.bf16.mxu0 %v19531_v28  ;;  %v19602_v27 = vld [vmem:[%s22898_s13 + $0xfa0] ss:$16 sps:$4 sm:$0xff]   ;;  %v19607_v28 = vld [vmem:[%s22898_s13 + $0xd84] ss:$16 sps:$4 sm:$0xff]  }
 0x10c   : > { %13327 = vmatprep.subr.bf16.mxu1 %v19534_v29  ;;  %v19610_v29 = vld [vmem:[%s22898_s13 + $0xf84] ss:$16 sps:$4 sm:$0xff]  }
 0x10e   : > { %13287 = vmatpush2.bf16.msra.mxu0 %v19529_v30  ;;  %v19605_v30 = vld [vmem:[%s22898_s13 + $0xd80] ss:$16 sps:$4 sm:$0xff]  }
 0x10f   : > { %13328 = vmatpush2.bf16.msra.mxu1 %v19532_v31  ;;  %13338 = vmatprep.subr.bf16.mxu0 %v19541_v32  ;;  %v19608_v31 = vld [vmem:[%s22898_s13 + $0xf80] ss:$16 sps:$4 sm:$0xff]   ;;  %v19613_v32 = vld [vmem:[%s22898_s13 + $0xd64] ss:$16 sps:$4 sm:$0xff]  }
 0x110   : > { %13379 = vmatprep.subr.bf16.mxu1 %v19544_v33  ;;  %v19616_v33 = vld [vmem:[%s22898_s13 + $0xf64] ss:$16 sps:$4 sm:$0xff]  }
 0x111   : > { %13289 = vmatmul.mubr.bf16.vlgmr.msra.gmra.mxu0 %v23183_v38 }
 0x112   : > { %13330 = vmatmul.mubr.bf16.vlgmr.msra.gmra.mxu1 %v23187_v39  ;;  %13339 = vmatpush1.bf16.msra.mxu0 %v19539_v34  ;;  %v19611_v34 = vld [vmem:[%s22898_s13 + $0xd60] ss:$16 sps:$4 sm:$0xff]  }
 0x113   : > { %13380 = vmatpush1.bf16.msra.mxu1 %v19542_v41  ;;  %13340 = vmatprep.subr.bf16.mxu0 %v19547_v42  ;;  %v19614_v41 = vld [vmem:[%s22898_s13 + $0xf60] ss:$16 sps:$4 sm:$0xff]   ;;  %v19619_v42 = vld [vmem:[%s22898_s13 + $0xd44] ss:$16 sps:$4 sm:$0xff]  }
 0x114   : > { %13381 = vmatprep.subr.bf16.mxu1 %v19550_v22  ;;  %13370 = vmatprep.mubr.bf16.mxu0 %v23199_v23  ;;  %v19622_v22 = vld [vmem:[%s22898_s13 + $0xf44] ss:$16 sps:$4 sm:$0xff]  }
 0x115   : > { %13411 = vmatprep.mubr.bf16.mxu1 %v23203_v43 }
 0x116   : > { %13341 = vmatpush1.bf16.msra.mxu0 %v19545_v44  ;;  %v19617_v44 = vld [vmem:[%s22898_s13 + $0xd40] ss:$16 sps:$4 sm:$0xff]  }
 0x117   : > { %13382 = vmatpush1.bf16.msra.mxu1 %v19548_v45  ;;  %13342 = vmatprep.subr.bf16.mxu0 %v19553_v46  ;;  %v19620_v45 = vld [vmem:[%s22898_s13 + $0xf40] ss:$16 sps:$4 sm:$0xff]   ;;  %v19625_v46 = vld [vmem:[%s22898_s13 + $0xd24] ss:$16 sps:$4 sm:$0xff]  }
 0x118   : > { %13383 = vmatprep.subr.bf16.mxu1 %v19556_v48  ;;  %v2444_v48 = vlaneseq }
 0x11a   : > { %13343 = vmatpush1.bf16.msra.mxu0 %v19551_v49  ;;  %v19628_v49 = vld [vmem:[%s22898_s13 + $0xf24] ss:$16 sps:$4 sm:$0xff]  }
 0x11b   : > { %13384 = vmatpush1.bf16.msra.mxu1 %v19554_v50  ;;  %13344 = vmatprep.subr.bf16.mxu0 %v19559_v52  ;;  %v19623_v50 = vld [vmem:[%s22898_s13 + $0xd20] ss:$16 sps:$4 sm:$0xff]  }
 0x11c   : > { %13385 = vmatprep.subr.bf16.mxu1 %v19562_v53  ;;  %v19626_v52 = vld [vmem:[%s22898_s13 + $0xf20] ss:$16 sps:$4 sm:$0xff]   ;;  %v19631_v53 = vld [vmem:[%s22898_s13 + $0xd04] ss:$16 sps:$4 sm:$0xff]  }
 0x11e   : > { %13345 = vmatpush1.bf16.msra.mxu0 %v19557_v54  ;;  %v23264_v54 = vshrl.u32 %v2444_v48, 7  ;;  %v19663_v48 = vld [vmem:[%s22898_s13 + $0x1060] ss:$16 sps:$4 sm:$0xff]  }
 0x11f   : > { %13386 = vmatpush1.bf16.msra.mxu1 %v19560_v55  ;;  %13346 = vmatprep.subr.bf16.mxu0 %v19565_v56  ;;  %v19634_v55 = vld [vmem:[%s22898_s13 + $0xf04] ss:$16 sps:$4 sm:$0xff]   ;;  %v19629_v56 = vld [vmem:[%s22898_s13 + $0xd00] ss:$16 sps:$4 sm:$0xff]  }
 0x120   : > { %13387 = vmatprep.subr.bf16.mxu1 %v19568_v57  ;;  %v19632_v57 = vld [vmem:[%s22898_s13 + $0xf00] ss:$16 sps:$4 sm:$0xff]  }
 0x122   : > { %13347 = vmatpush1.bf16.msra.mxu0 %v19563_v58  ;;  %v2442_v58 = vld [vmem:[%s22907_s24] sm:$0xf] }
 0x123   : > { %13388 = vmatpush1.bf16.msra.mxu1 %v19566_v59  ;;  %13348 = vmatprep.subr.bf16.mxu0 %v19571_v60  ;;  %v2446_v59 = vsub.s32 0, %v23264_v54  ;;  %v19641_v60 = vld [vmem:[%s22898_s13 + $0x10e4] ss:$16 sps:$4 sm:$0xff]  }
 0x124   : > { %13389 = vmatprep.subr.bf16.mxu1 %v19574_v61  ;;  %v19644_v61 = vld [vmem:[%s22898_s13 + $0x12e4] ss:$16 sps:$4 sm:$0xff]  }
 0x126   : > { %13349 = vmatpush1.bf16.msra.mxu0 %v19569_v62  ;;  %v19639_v62 = vld [vmem:[%s22898_s13 + $0x10e0] ss:$16 sps:$4 sm:$0xff]  }
 0x127   : > { %13390 = vmatpush1.bf16.msra.mxu1 %v19572_v63  ;;  %13350 = vmatprep.subr.bf16.mxu0 %v19577_v0  ;;  %v2450_v63 = vsub.s32 1, %v23264_v54  ;;  %v23277_v0 = vcombine.low %v23179_v35, %v23179_v35  ;;  %v19642_v35 = vld [vmem:[%s22898_s13 + $0x12e0] ss:$16 sps:$4 sm:$0xff]  }
 0x128   : > { %13391 = vmatprep.subr.bf16.mxu1 %v19580_v1  ;;  %v23281_v1 = vcombine.low %v23192_v40, %v23192_v40  ;;  %v19650_v40 = vld [vmem:[%s22898_s13 + $0x12c4] ss:$16 sps:$4 sm:$0xff]  }
 0x12a   : > { %13351 = vmatpush1.bf16.msra.mxu0 %v19575_v2  ;;  %v23286_v2 = vld [vmem:[%s25971_s0 + $0x40] sm:$0xff] }
 0x12b   : > { %13392 = vmatpush1.bf16.msra.mxu1 %v19578_v3  ;;  %13352 = vmatprep.subr.bf16.mxu0 %v19583_v4  ;;  %v23291_v3 = vld [vmem:[%s25971_s0 + $0x48] sm:$0xff]  ;;  %v2447_v4 = vrot.slane %v2442_v58, %v2446_v59  ;;  %v19678_v59 = vld [vmem:[%s22898_s13 + $0x1220] ss:$16 sps:$4 sm:$0xff]  }
 0x12c   : > { %13393 = vmatprep.subr.bf16.mxu1 %v19586_v5  ;;  %v19647_v5 = vld [vmem:[%s22898_s13 + $0x10c4] ss:$16 sps:$4 sm:$0xff]  }
 0x12e   : > { %13353 = vmatpush1.bf16.msra.mxu0 %v19581_v8  ;;  %v2451_v8 = vrot.slane %v2442_v58, %v2450_v63  ;;  %v19675_v58 = vld [vmem:[%s22898_s13 + $0x1020] ss:$16 sps:$4 sm:$0xff]  }
 0x12f   : > { %13394 = vmatpush1.bf16.msra.mxu1 %v19584_v9  ;;  %13354 = vmatprep.subr.bf16.mxu0 %v19589_v10  ;;  %v23298_v9 = vcombine.high %v23286_v2, %v23286_v2  ;;  %v23302_v10 = vcombine.high %v23291_v3, %v23291_v3  ;;  %v19684_v63 = vld [vmem:[%s22898_s13 + $0x1200] ss:$16 sps:$4 sm:$0xff]  }
 0x130   : > { %13395 = vmatprep.subr.bf16.mxu1 %v19592_v11 }
 0x132   : > { %13355 = vmatpush2.bf16.msra.mxu0 %v19587_v12 }
 0x133   : > { %13396 = vmatpush2.bf16.msra.mxu1 %v19590_v13  ;;  %13356 = vmatprep.subr.bf16.mxu0 %v19595_v14  ;;  %v19645_v13 = vld [vmem:[%s22898_s13 + $0x10c0] ss:$16 sps:$4 sm:$0xff]  }
 0x134   : > { %13397 = vmatprep.subr.bf16.mxu1 %v19598_v15  ;;  %v19648_v15 = vld [vmem:[%s22898_s13 + $0x12c0] ss:$16 sps:$4 sm:$0xff]  }
 0x136   : > { %13357 = vmatpush2.bf16.msra.mxu0 %v19593_v18 }
 0x137   : > { %13398 = vmatpush2.bf16.msra.mxu1 %v19596_v19  ;;  %13358 = vmatprep.subr.bf16.mxu0 %v19601_v20  ;;  %v19653_v20 = vld [vmem:[%s22898_s13 + $0x10a4] ss:$16 sps:$4 sm:$0xff]  }
 0x138   : > { %13399 = vmatprep.subr.bf16.mxu1 %v19604_v21  ;;  %v19656_v21 = vld [vmem:[%s22898_s13 + $0x12a4] ss:$16 sps:$4 sm:$0xff]  }
 0x13a   : > { %13359 = vmatpush2.bf16.msra.mxu0 %v19599_v26 }
 0x13b   : > { %13400 = vmatpush2.bf16.msra.mxu1 %v19602_v27  ;;  %13360 = vmatprep.subr.bf16.mxu0 %v19607_v28 }
 0x13c   : > { %13401 = vmatprep.subr.bf16.mxu1 %v19610_v29 }
 0x13e   : > { %13361 = vmatpush2.bf16.msra.mxu0 %v19605_v30  ;;  %v19651_v30 = vld [vmem:[%s22898_s13 + $0x10a0] ss:$16 sps:$4 sm:$0xff]  }
 0x13f   : > { %13402 = vmatpush2.bf16.msra.mxu1 %v19608_v31  ;;  %13362 = vmatprep.subr.bf16.mxu0 %v19613_v32  ;;  %v19654_v32 = vld [vmem:[%s22898_s13 + $0x12a0] ss:$16 sps:$4 sm:$0xff]  }
 0x140   : > { %13403 = vmatprep.subr.bf16.mxu1 %v19616_v33 }
 0x142   : > { %13363 = vmatpush2.bf16.msra.mxu0 %v19611_v34 }
 0x143   : > { %13404 = vmatpush2.bf16.msra.mxu1 %v19614_v41  ;;  %13364 = vmatprep.subr.bf16.mxu0 %v19619_v42  ;;  %v19659_v41 = vld [vmem:[%s22898_s13 + $0x1084] ss:$16 sps:$4 sm:$0xff]  }
 0x144   : > { %13405 = vmatprep.subr.bf16.mxu1 %v19622_v22  ;;  %v19662_v42 = vld [vmem:[%s22898_s13 + $0x1284] ss:$16 sps:$4 sm:$0xff]   ;;  %v19657_v22 = vld [vmem:[%s22898_s13 + $0x1080] ss:$16 sps:$4 sm:$0xff]  }
 0x146   : > { %13365 = vmatpush2.bf16.msra.mxu0 %v19617_v44  ;;  %v19660_v44 = vld [vmem:[%s22898_s13 + $0x1280] ss:$16 sps:$4 sm:$0xff]  }
 0x147   : > { %13406 = vmatpush2.bf16.msra.mxu1 %v19620_v45  ;;  %13366 = vmatprep.subr.bf16.mxu0 %v19625_v46  ;;  %v19665_v45 = vld [vmem:[%s22898_s13 + $0x1064] ss:$16 sps:$4 sm:$0xff]  }
 0x148   : > { %13407 = vmatprep.subr.bf16.mxu1 %v19628_v49  ;;  %v19668_v46 = vld [vmem:[%s22898_s13 + $0x1264] ss:$16 sps:$4 sm:$0xff]   ;;  %v19666_v49 = vld [vmem:[%s22898_s13 + $0x1260] ss:$16 sps:$4 sm:$0xff]  }
 0x14a   : > { %13367 = vmatpush2.bf16.msra.mxu0 %v19623_v50  ;;  %v19671_v50 = vld [vmem:[%s22898_s13 + $0x1044] ss:$16 sps:$4 sm:$0xff]  }
 0x14b   : > { %13408 = vmatpush2.bf16.msra.mxu1 %v19626_v52  ;;  %13368 = vmatprep.subr.bf16.mxu0 %v19631_v53  ;;  %v19674_v52 = vld [vmem:[%s22898_s13 + $0x1244] ss:$16 sps:$4 sm:$0xff]   ;;  %v19669_v53 = vld [vmem:[%s22898_s13 + $0x1040] ss:$16 sps:$4 sm:$0xff]  }
 0x14c   : > { %13409 = vmatprep.subr.bf16.mxu1 %v19634_v55  ;;  %v19672_v55 = vld [vmem:[%s22898_s13 + $0x1240] ss:$16 sps:$4 sm:$0xff]  }
 0x14e   : > { %13369 = vmatpush2.bf16.msra.mxu0 %v19629_v56  ;;  %v19677_v56 = vld [vmem:[%s22898_s13 + $0x1024] ss:$16 sps:$4 sm:$0xff]  }
 0x14f   : > { %13410 = vmatpush2.bf16.msra.mxu1 %v19632_v57  ;;  %13420 = vmatprep.subr.bf16.mxu0 %v19641_v60  ;;  %v19680_v57 = vld [vmem:[%s22898_s13 + $0x1224] ss:$16 sps:$4 sm:$0xff]  }
 0x150   : > { %13461 = vmatprep.subr.bf16.mxu1 %v19644_v61  ;;  %v19683_v60 = vld [vmem:[%s22898_s13 + $0x1004] ss:$16 sps:$4 sm:$0xff]  }
 0x151   : > { %v13126_v11 = vpop.f32.mrf.mxu0  ;;  %13371 = vmatmul.mubr.bf16.vlgmr.msra.gmra.mxu0 %v23277_v0  ;;  %v19686_v61 = vld [vmem:[%s22898_s13 + $0x1204] ss:$16 sps:$4 sm:$0xff]  }
 0x152   : > { %v13167_v12 = vpop.f32.mrf.mxu1  ;;  %13412 = vmatmul.mubr.bf16.vlgmr.msra.gmra.mxu1 %v23281_v1  ;;  %v13127_v14 = vadd.f32 %v13126_v11, %v2447_v4  ;;  %13421 = vmatpush1.bf16.msra.mxu0 %v19639_v62  ;;  %v19681_v62 = vld [vmem:[%s22898_s13 + $0x1000] ss:$16 sps:$4 sm:$0xff]   ;;  %v19689_v4 = vld [vmem:[%s22898_s13 + $0x11e4] ss:$16 sps:$4 sm:$0xff]  }
 0x153   : > { %13462 = vmatpush1.bf16.msra.mxu1 %v19642_v35  ;;  %v13128_v18 = vpop.f32.mrf.mxu0  ;;  %13422 = vmatprep.subr.bf16.mxu0 %v19647_v5  ;;  %v19692_v35 = vld [vmem:[%s22898_s13 + $0x13e4] ss:$16 sps:$4 sm:$0xff]   ;;  %v19687_v5 = vld [vmem:[%s22898_s13 + $0x11e0] ss:$16 sps:$4 sm:$0xff]  }
 0x154   : > { %v13169_v19 = vpop.f32.mrf.mxu1  ;;  %13463 = vmatprep.subr.bf16.mxu1 %v19650_v40  ;;  %v23310_v26 = vadd.f32 %v13167_v12, %v13127_v14  ;;  %v13129_v27 = vadd.f32 %v13128_v18, %v2451_v8  ;;  %13452 = vmatprep.mubr.bf16.mxu0 %v23298_v9  ;;  %v19690_v40 = vld [vmem:[%s22898_s13 + $0x13e0] ss:$16 sps:$4 sm:$0xff]   ;;  %v19695_v8 = vld [vmem:[%s22898_s13 + $0x11c4] ss:$16 sps:$4 sm:$0xff]  }
 0x155   : > { %13493 = vmatprep.mubr.bf16.mxu1 %v23302_v10  ;;  %v13130_v28 = vpop.f32.mrf.mxu0  ;;  %v19698_v11 = vld [vmem:[%s22898_s13 + $0x13c4] ss:$16 sps:$4 sm:$0xff]   ;;  %v19693_v12 = vld [vmem:[%s22898_s13 + $0x11c0] ss:$16 sps:$4 sm:$0xff]  }
 0x156   : > { %v13171_v29 = vpop.f32.mrf.mxu1  ;;  %v23315_v31 = vadd.f32 %v13169_v19, %v13129_v27  ;;  %13423 = vmatpush1.bf16.msra.mxu0 %v19645_v13  ;;  %v19696_v13 = vld [vmem:[%s22898_s13 + $0x13c0] ss:$16 sps:$4 sm:$0xff]   ;;  %v19701_v14 = vld [vmem:[%s22898_s13 + $0x11a4] ss:$16 sps:$4 sm:$0xff]  }
 0x157   : > { %13464 = vmatpush1.bf16.msra.mxu1 %v19648_v15  ;;  %v13131_v33 = vpop.f32.mrf.mxu0  ;;  %13424 = vmatprep.subr.bf16.mxu0 %v19653_v20  ;;  %v19704_v15 = vld [vmem:[%s22898_s13 + $0x13a4] ss:$16 sps:$4 sm:$0xff]   ;;  %v19699_v18 = vld [vmem:[%s22898_s13 + $0x11a0] ss:$16 sps:$4 sm:$0xff]  }
 0x158   : > { %v13172_v34 = vpop.f32.mrf.mxu1  ;;  %13465 = vmatprep.subr.bf16.mxu1 %v19656_v21  ;;  %v19702_v19 = vld [vmem:[%s22898_s13 + $0x13a0] ss:$16 sps:$4 sm:$0xff]   ;;  %v19707_v20 = vld [vmem:[%s22898_s13 + $0x1184] ss:$16 sps:$4 sm:$0xff]  }
 0x159   : > { %v19710_v21 = vld [vmem:[%s22898_s13 + $0x1384] ss:$16 sps:$4 sm:$0xff]   ;;  %v19705_v27 = vld [vmem:[%s22898_s13 + $0x1180] ss:$16 sps:$4 sm:$0xff]  }
 0x15a   : > { %13425 = vmatpush1.bf16.msra.mxu0 %v19651_v30  ;;  %v19708_v28 = vld [vmem:[%s22898_s13 + $0x1380] ss:$16 sps:$4 sm:$0xff]   ;;  %v19713_v29 = vld [vmem:[%s22898_s13 + $0x1164] ss:$16 sps:$4 sm:$0xff]  }
 0x15b   : > { %13466 = vmatpush1.bf16.msra.mxu1 %v19654_v32  ;;  %13426 = vmatprep.subr.bf16.mxu0 %v19659_v41  ;;  %v19716_v30 = vld [vmem:[%s22898_s13 + $0x1364] ss:$16 sps:$4 sm:$0xff]   ;;  %v19711_v32 = vld [vmem:[%s22898_s13 + $0x1160] ss:$16 sps:$4 sm:$0xff]  }
 0x15c   : > { %13467 = vmatprep.subr.bf16.mxu1 %v19662_v42  ;;  %v19714_v33 = vld [vmem:[%s22898_s13 + $0x1360] ss:$16 sps:$4 sm:$0xff]   ;;  %v19719_v34 = vld [vmem:[%s22898_s13 + $0x1144] ss:$16 sps:$4 sm:$0xff]  }
 0x15d   : > { %v19722_v41 = vld [vmem:[%s22898_s13 + $0x1344] ss:$16 sps:$4 sm:$0xff]   ;;  %v19717_v42 = vld [vmem:[%s22898_s13 + $0x1140] ss:$16 sps:$4 sm:$0xff]  }
 0x15e   : > { %13427 = vmatpush1.bf16.msra.mxu0 %v19657_v22  ;;  %v19720_v22 = vld [vmem:[%s22898_s13 + $0x1340] ss:$16 sps:$4 sm:$0xff]  }
 0x15f   : > { %13468 = vmatpush1.bf16.msra.mxu1 %v19660_v44  ;;  %13428 = vmatprep.subr.bf16.mxu0 %v19665_v45  ;;  %v19725_v44 = vld [vmem:[%s22898_s13 + $0x1124] ss:$16 sps:$4 sm:$0xff]  }
 0x160   : > { %13469 = vmatprep.subr.bf16.mxu1 %v19668_v46  ;;  %v19728_v45 = vld [vmem:[%s22898_s13 + $0x1324] ss:$16 sps:$4 sm:$0xff]   ;;  %v19723_v46 = vld [vmem:[%s22898_s13 + $0x1120] ss:$16 sps:$4 sm:$0xff]  }
 0x162   : > { %13429 = vmatpush1.bf16.msra.mxu0 %v19663_v48  ;;  %v19726_v48 = vld [vmem:[%s22898_s13 + $0x1320] ss:$16 sps:$4 sm:$0xff]  }
 0x163   : > { %13470 = vmatpush1.bf16.msra.mxu1 %v19666_v49  ;;  %13430 = vmatprep.subr.bf16.mxu0 %v19671_v50  ;;  %v19731_v49 = vld [vmem:[%s22898_s13 + $0x1104] ss:$16 sps:$4 sm:$0xff]  }
 0x164   : > { %13471 = vmatprep.subr.bf16.mxu1 %v19674_v52  ;;  %v19734_v50 = vld [vmem:[%s22898_s13 + $0x1304] ss:$16 sps:$4 sm:$0xff]   ;;  %v19729_v52 = vld [vmem:[%s22898_s13 + $0x1100] ss:$16 sps:$4 sm:$0xff]  }
 0x166   : > { %13431 = vmatpush1.bf16.msra.mxu0 %v19669_v53  ;;  %v19732_v53 = vld [vmem:[%s22898_s13 + $0x1300] ss:$16 sps:$4 sm:$0xff]  }
 0x167   : > { %13472 = vmatpush1.bf16.msra.mxu1 %v19672_v55  ;;  %13432 = vmatprep.subr.bf16.mxu0 %v19677_v56  ;;  %v19741_v55 = vld [vmem:[%s22898_s13 + $0x14e4] ss:$16 sps:$4 sm:$0xff]  }
 0x168   : > { %13473 = vmatprep.subr.bf16.mxu1 %v19680_v57  ;;  %v19744_v56 = vld [vmem:[%s22898_s13 + $0x16e4] ss:$16 sps:$4 sm:$0xff]   ;;  %v19739_v57 = vld [vmem:[%s22898_s13 + $0x14e0] ss:$16 sps:$4 sm:$0xff]  }
 0x16a   : > { %13433 = vmatpush1.bf16.msra.mxu0 %v19675_v58  ;;  %v19742_v58 = vld [vmem:[%s22898_s13 + $0x16e0] ss:$16 sps:$4 sm:$0xff]  }
 0x16b   : > { %13474 = vmatpush1.bf16.msra.mxu1 %v19678_v59  ;;  %13434 = vmatprep.subr.bf16.mxu0 %v19683_v60  ;;  %v23376_v59 = vcombine.low %v23286_v2, %v23286_v2  ;;  %v23380_v60 = vcombine.low %v23291_v3, %v23291_v3  ;;  %v19747_v2 = vld [vmem:[%s22898_s13 + $0x14c4] ss:$16 sps:$4 sm:$0xff]   ;;  %v19748_v3 = vld [vmem:[%s22898_s13 + $0x16c0] ss:$16 sps:$4 sm:$0xff]  }
 0x16c   : > { %13475 = vmatprep.subr.bf16.mxu1 %v19686_v61  ;;  %v23385_v61 = vld [vmem:[%s25971_s0 + $0x50] sm:$0xff] }
 0x16e   : > { %13435 = vmatpush1.bf16.msra.mxu0 %v19681_v62  ;;  %v23390_v62 = vld [vmem:[%s25971_s0 + $0x58] sm:$0xff] }
 0x16f   : > { %13476 = vmatpush1.bf16.msra.mxu1 %v19684_v63  ;;  %13436 = vmatprep.subr.bf16.mxu0 %v19689_v4  ;;  %v19750_v63 = vld [vmem:[%s22898_s13 + $0x16c4] ss:$16 sps:$4 sm:$0xff]   ;;  %v19745_v4 = vld [vmem:[%s22898_s13 + $0x14c0] ss:$16 sps:$4 sm:$0xff]  }
 0x170   : > { %13477 = vmatprep.subr.bf16.mxu1 %v19692_v35  ;;  %v23398_v35 = vcombine.high %v23385_v61, %v23385_v61 }
 0x172   : > { %13437 = vmatpush2.bf16.msra.mxu0 %v19687_v5  ;;  %v23402_v5 = vcombine.high %v23390_v62, %v23390_v62 }
 0x173   : > { %13478 = vmatpush2.bf16.msra.mxu1 %v19690_v40  ;;  %13438 = vmatprep.subr.bf16.mxu0 %v19695_v8 }
 0x174   : > { %13479 = vmatprep.subr.bf16.mxu1 %v19698_v11 }
 0x176   : > { %13439 = vmatpush2.bf16.msra.mxu0 %v19693_v12 }
 0x177   : > { %13480 = vmatpush2.bf16.msra.mxu1 %v19696_v13  ;;  %13440 = vmatprep.subr.bf16.mxu0 %v19701_v14  ;;  %v19753_v14 = vld [vmem:[%s22898_s13 + $0x14a4] ss:$16 sps:$4 sm:$0xff]  }
 0x178   : > { %13481 = vmatprep.subr.bf16.mxu1 %v19704_v15  ;;  %v19756_v15 = vld [vmem:[%s22898_s13 + $0x16a4] ss:$16 sps:$4 sm:$0xff]  }
 0x17a   : > { %13441 = vmatpush2.bf16.msra.mxu0 %v19699_v18 }
 0x17b   : > { %13482 = vmatpush2.bf16.msra.mxu1 %v19702_v19  ;;  %13442 = vmatprep.subr.bf16.mxu0 %v19707_v20  ;;  %v19751_v20 = vld [vmem:[%s22898_s13 + $0x14a0] ss:$16 sps:$4 sm:$0xff]  }
 0x17c   : > { %13483 = vmatprep.subr.bf16.mxu1 %v19710_v21  ;;  %v19754_v21 = vld [vmem:[%s22898_s13 + $0x16a0] ss:$16 sps:$4 sm:$0xff]  }
 0x17e   : > { %13443 = vmatpush2.bf16.msra.mxu0 %v19705_v27 }
 0x17f   : > { %13484 = vmatpush2.bf16.msra.mxu1 %v19708_v28  ;;  %13444 = vmatprep.subr.bf16.mxu0 %v19713_v29 }
 0x180   : > { %13485 = vmatprep.subr.bf16.mxu1 %v19716_v30 }
 0x182   : > { %13445 = vmatpush2.bf16.msra.mxu0 %v19711_v32  ;;  %v19762_v32 = vld [vmem:[%s22898_s13 + $0x1684] ss:$16 sps:$4 sm:$0xff]  }
 0x183   : > { %13486 = vmatpush2.bf16.msra.mxu1 %v19714_v33  ;;  %13446 = vmatprep.subr.bf16.mxu0 %v19719_v34  ;;  %v19757_v33 = vld [vmem:[%s22898_s13 + $0x1480] ss:$16 sps:$4 sm:$0xff]  }
 0x184   : > { %13487 = vmatprep.subr.bf16.mxu1 %v19722_v41  ;;  %v19760_v34 = vld [vmem:[%s22898_s13 + $0x1680] ss:$16 sps:$4 sm:$0xff]   ;;  %v19765_v41 = vld [vmem:[%s22898_s13 + $0x1464] ss:$16 sps:$4 sm:$0xff]  }
 0x186   : > { %13447 = vmatpush2.bf16.msra.mxu0 %v19717_v42  ;;  %v19768_v42 = vld [vmem:[%s22898_s13 + $0x1664] ss:$16 sps:$4 sm:$0xff]  }
 0x187   : > { %13488 = vmatpush2.bf16.msra.mxu1 %v19720_v22  ;;  %13448 = vmatprep.subr.bf16.mxu0 %v19725_v44  ;;  %v19763_v22 = vld [vmem:[%s22898_s13 + $0x1460] ss:$16 sps:$4 sm:$0xff]  }
 0x188   : > { %13489 = vmatprep.subr.bf16.mxu1 %v19728_v45  ;;  %v19766_v44 = vld [vmem:[%s22898_s13 + $0x1660] ss:$16 sps:$4 sm:$0xff]   ;;  %v19771_v45 = vld [vmem:[%s22898_s13 + $0x1444] ss:$16 sps:$4 sm:$0xff]  }
 0x18a   : > { %13449 = vmatpush2.bf16.msra.mxu0 %v19723_v46  ;;  %v19774_v46 = vld [vmem:[%s22898_s13 + $0x1644] ss:$16 sps:$4 sm:$0xff]  }
 0x18b   : > { %13490 = vmatpush2.bf16.msra.mxu1 %v19726_v48  ;;  %13450 = vmatprep.subr.bf16.mxu0 %v19731_v49  ;;  %v19769_v48 = vld [vmem:[%s22898_s13 + $0x1440] ss:$16 sps:$4 sm:$0xff]  }
 0x18c   : > { %13491 = vmatprep.subr.bf16.mxu1 %v19734_v50  ;;  %v19772_v49 = vld [vmem:[%s22898_s13 + $0x1640] ss:$16 sps:$4 sm:$0xff]   ;;  %v19777_v50 = vld [vmem:[%s22898_s13 + $0x1424] ss:$16 sps:$4 sm:$0xff]  }
 0x18e   : > { %13451 = vmatpush2.bf16.msra.mxu0 %v19729_v52  ;;  %v19780_v52 = vld [vmem:[%s22898_s13 + $0x1624] ss:$16 sps:$4 sm:$0xff]  }
 0x18f   : > { %13492 = vmatpush2.bf16.msra.mxu1 %v19732_v53  ;;  %13502 = vmatprep.subr.bf16.mxu0 %v19741_v55  ;;  %v19775_v53 = vld [vmem:[%s22898_s13 + $0x1420] ss:$16 sps:$4 sm:$0xff]  }
 0x190   : > { %13543 = vmatprep.subr.bf16.mxu1 %v19744_v56  ;;  %v19778_v55 = vld [vmem:[%s22898_s13 + $0x1620] ss:$16 sps:$4 sm:$0xff]   ;;  %v19783_v56 = vld [vmem:[%s22898_s13 + $0x1404] ss:$16 sps:$4 sm:$0xff]  }
 0x191   : > { %v13208_v40 = vpop.f32.mrf.mxu0  ;;  %13453 = vmatmul.mubr.bf16.vlgmr.msra.gmra.mxu0 %v23376_v59 }
 0x192   : > { %v13249_v8 = vpop.f32.mrf.mxu1  ;;  %13494 = vmatmul.mubr.bf16.vlgmr.msra.gmra.mxu1 %v23380_v60  ;;  %v13209_v11 = vadd.f32 %v13208_v40, %v23310_v26  ;;  %13503 = vmatpush1.bf16.msra.mxu0 %v19739_v57  ;;  %v19786_v57 = vld [vmem:[%s22898_s13 + $0x1604] ss:$16 sps:$4 sm:$0xff]   ;;  %v19790_v40 = vld [vmem:[%s22898_s13 + $0x17e0] ss:$16 sps:$4 sm:$0xff]  }
 0x193   : > { %13544 = vmatpush1.bf16.msra.mxu1 %v19742_v58  ;;  %v13210_v12 = vpop.f32.mrf.mxu0  ;;  %13504 = vmatprep.subr.bf16.mxu0 %v19747_v2  ;;  %v19781_v58 = vld [vmem:[%s22898_s13 + $0x1400] ss:$16 sps:$4 sm:$0xff]  }
 0x194   : > { %v13251_v13 = vpop.f32.mrf.mxu1  ;;  %13545 = vmatprep.subr.bf16.mxu1 %v19750_v63  ;;  %v23409_v18 = vadd.f32 %v13249_v8, %v13209_v11  ;;  %v13211_v19 = vadd.f32 %v13210_v12, %v23315_v31  ;;  %13534 = vmatprep.mubr.bf16.mxu0 %v23398_v35  ;;  %v19759_v31 = vld [vmem:[%s22898_s13 + $0x1484] ss:$16 sps:$4 sm:$0xff]   ;;  %v19784_v2 = vld [vmem:[%s22898_s13 + $0x1600] ss:$16 sps:$4 sm:$0xff]  }
 0x195   : > { %13575 = vmatprep.mubr.bf16.mxu1 %v23402_v5  ;;  %v13212_v26 = vpop.f32.mrf.mxu0  ;;  %v19789_v63 = vld [vmem:[%s22898_s13 + $0x15e4] ss:$16 sps:$4 sm:$0xff]   ;;  %v19793_v12 = vld [vmem:[%s22898_s13 + $0x15c0] ss:$16 sps:$4 sm:$0xff]  }
 0x196   : > { %v13253_v27 = vpop.f32.mrf.mxu1  ;;  %v23416_v28 = vadd.f32 %v13251_v13, %v13211_v19  ;;  %13505 = vmatpush1.bf16.msra.mxu0 %v19745_v4  ;;  %v19792_v4 = vld [vmem:[%s22898_s13 + $0x17e4] ss:$16 sps:$4 sm:$0xff]   ;;  %v19796_v13 = vld [vmem:[%s22898_s13 + $0x17c0] ss:$16 sps:$4 sm:$0xff]  }
 0x197   : > { %13546 = vmatpush1.bf16.msra.mxu1 %v19748_v3  ;;  %v13213_v29 = vpop.f32.mrf.mxu0  ;;  %13506 = vmatprep.subr.bf16.mxu0 %v19753_v14  ;;  %v19787_v3 = vld [vmem:[%s22898_s13 + $0x15e0] ss:$16 sps:$4 sm:$0xff]   ;;  %v19795_v8 = vld [vmem:[%s22898_s13 + $0x15c4] ss:$16 sps:$4 sm:$0xff]  }
 0x198   : > { %v13254_v30 = vpop.f32.mrf.mxu1  ;;  %13547 = vmatprep.subr.bf16.mxu1 %v19756_v15  ;;  %v19798_v11 = vld [vmem:[%s22898_s13 + $0x17c4] ss:$16 sps:$4 sm:$0xff]   ;;  %v19799_v19 = vld [vmem:[%s22898_s13 + $0x15a0] ss:$16 sps:$4 sm:$0xff]  }
 0x199   : > { %v19801_v14 = vld [vmem:[%s22898_s13 + $0x15a4] ss:$16 sps:$4 sm:$0xff]   ;;  %v19805_v27 = vld [vmem:[%s22898_s13 + $0x1580] ss:$16 sps:$4 sm:$0xff]  }
 0x19a   : > { %13507 = vmatpush1.bf16.msra.mxu0 %v19751_v20  ;;  %v19804_v15 = vld [vmem:[%s22898_s13 + $0x17a4] ss:$16 sps:$4 sm:$0xff]   ;;  %v19802_v20 = vld [vmem:[%s22898_s13 + $0x17a0] ss:$16 sps:$4 sm:$0xff]  }
 0x19b   : > { %13548 = vmatpush1.bf16.msra.mxu1 %v19754_v21  ;;  %13508 = vmatprep.subr.bf16.mxu0 %v19759_v31  ;;  %v19807_v21 = vld [vmem:[%s22898_s13 + $0x1584] ss:$16 sps:$4 sm:$0xff]   ;;  %v19808_v29 = vld [vmem:[%s22898_s13 + $0x1780] ss:$16 sps:$4 sm:$0xff]  }
 0x19c   : > { %13549 = vmatprep.subr.bf16.mxu1 %v19762_v32  ;;  %v19810_v26 = vld [vmem:[%s22898_s13 + $0x1784] ss:$16 sps:$4 sm:$0xff]   ;;  %v19811_v32 = vld [vmem:[%s22898_s13 + $0x1560] ss:$16 sps:$4 sm:$0xff]  }
 0x19d   : > { %v19813_v30 = vld [vmem:[%s22898_s13 + $0x1564] ss:$16 sps:$4 sm:$0xff]  }
 0x19e   : > { %13509 = vmatpush1.bf16.msra.mxu0 %v19757_v33  ;;  %v19816_v31 = vld [vmem:[%s22898_s13 + $0x1764] ss:$16 sps:$4 sm:$0xff]   ;;  %v19814_v33 = vld [vmem:[%s22898_s13 + $0x1760] ss:$16 sps:$4 sm:$0xff]  }
 0x19f   : > { %13550 = vmatpush1.bf16.msra.mxu1 %v19760_v34  ;;  %13510 = vmatprep.subr.bf16.mxu0 %v19765_v41  ;;  %v19819_v34 = vld [vmem:[%s22898_s13 + $0x1544] ss:$16 sps:$4 sm:$0xff]  }
 0x1a0   : > { %13551 = vmatprep.subr.bf16.mxu1 %v19768_v42  ;;  %v19822_v41 = vld [vmem:[%s22898_s13 + $0x1744] ss:$16 sps:$4 sm:$0xff]   ;;  %v19817_v42 = vld [vmem:[%s22898_s13 + $0x1540] ss:$16 sps:$4 sm:$0xff]  }
 0x1a2   : > { %13511 = vmatpush1.bf16.msra.mxu0 %v19763_v22  ;;  %v19820_v22 = vld [vmem:[%s22898_s13 + $0x1740] ss:$16 sps:$4 sm:$0xff]  }
 0x1a3   : > { %13552 = vmatpush1.bf16.msra.mxu1 %v19766_v44  ;;  %13512 = vmatprep.subr.bf16.mxu0 %v19771_v45  ;;  %v19825_v44 = vld [vmem:[%s22898_s13 + $0x1524] ss:$16 sps:$4 sm:$0xff]  }
 0x1a4   : > { %13553 = vmatprep.subr.bf16.mxu1 %v19774_v46  ;;  %v19828_v45 = vld [vmem:[%s22898_s13 + $0x1724] ss:$16 sps:$4 sm:$0xff]   ;;  %v19823_v46 = vld [vmem:[%s22898_s13 + $0x1520] ss:$16 sps:$4 sm:$0xff]  }
 0x1a6   : > { %13513 = vmatpush1.bf16.msra.mxu0 %v19769_v48  ;;  %v19826_v48 = vld [vmem:[%s22898_s13 + $0x1720] ss:$16 sps:$4 sm:$0xff]  }
 0x1a7   : > { %13554 = vmatpush1.bf16.msra.mxu1 %v19772_v49  ;;  %13514 = vmatprep.subr.bf16.mxu0 %v19777_v50  ;;  %v19831_v49 = vld [vmem:[%s22898_s13 + $0x1504] ss:$16 sps:$4 sm:$0xff]  }
 0x1a8   : > { %13555 = vmatprep.subr.bf16.mxu1 %v19780_v52  ;;  %v19834_v50 = vld [vmem:[%s22898_s13 + $0x1704] ss:$16 sps:$4 sm:$0xff]   ;;  %v19829_v52 = vld [vmem:[%s22898_s13 + $0x1500] ss:$16 sps:$4 sm:$0xff]  }
 0x1aa   : > { %13515 = vmatpush1.bf16.msra.mxu0 %v19775_v53  ;;  %v19832_v53 = vld [vmem:[%s22898_s13 + $0x1700] ss:$16 sps:$4 sm:$0xff]  }
 0x1ab   : > { %13556 = vmatpush1.bf16.msra.mxu1 %v19778_v55  ;;  %13516 = vmatprep.subr.bf16.mxu0 %v19783_v56  ;;  %v19841_v55 = vld [vmem:[%s22898_s13 + $0x18e4] ss:$16 sps:$4 sm:$0xff]  }
 0x1ac   : > { %13557 = vmatprep.subr.bf16.mxu1 %v19786_v57  ;;  %v19844_v56 = vld [vmem:[%s22898_s13 + $0x1ae4] ss:$16 sps:$4 sm:$0xff]   ;;  %v19839_v57 = vld [vmem:[%s22898_s13 + $0x18e0] ss:$16 sps:$4 sm:$0xff]  }
 0x1ae   : > { %13517 = vmatpush1.bf16.msra.mxu0 %v19781_v58  ;;  %v19842_v58 = vld [vmem:[%s22898_s13 + $0x1ae0] ss:$16 sps:$4 sm:$0xff]  }
 0x1af   : > { %13558 = vmatpush1.bf16.msra.mxu1 %v19784_v2  ;;  %13518 = vmatprep.subr.bf16.mxu0 %v19789_v63  ;;  %v23476_v2 = vcombine.low %v23385_v61, %v23385_v61  ;;  %v23480_v63 = vcombine.low %v23390_v62, %v23390_v62  ;;  %v19847_v61 = vld [vmem:[%s22898_s13 + $0x18c4] ss:$16 sps:$4 sm:$0xff]   ;;  %v19848_v62 = vld [vmem:[%s22898_s13 + $0x1ac0] ss:$16 sps:$4 sm:$0xff]  }
 0x1b0   : > { %13559 = vmatprep.subr.bf16.mxu1 %v19792_v4  ;;  %v23485_v4 = vld [vmem:[%s25971_s0 + $0x60] sm:$0xff] }
 0x1b2   : > { %13519 = vmatpush2.bf16.msra.mxu0 %v19787_v3  ;;  %v23490_v3 = vld [vmem:[%s25971_s0 + $0x68] sm:$0xff] }
 0x1b3   : > { %13560 = vmatpush2.bf16.msra.mxu1 %v19790_v40  ;;  %13520 = vmatprep.subr.bf16.mxu0 %v19795_v8  ;;  %v19850_v40 = vld [vmem:[%s22898_s13 + $0x1ac4] ss:$16 sps:$4 sm:$0xff]   ;;  %v19845_v8 = vld [vmem:[%s22898_s13 + $0x18c0] ss:$16 sps:$4 sm:$0xff]  }
 0x1b4   : > { %13561 = vmatprep.subr.bf16.mxu1 %v19798_v11  ;;  %v23498_v11 = vcombine.high %v23485_v4, %v23485_v4 }
 0x1b6   : > { %13521 = vmatpush2.bf16.msra.mxu0 %v19793_v12  ;;  %v23502_v12 = vcombine.high %v23490_v3, %v23490_v3 }
 0x1b7   : > { %13562 = vmatpush2.bf16.msra.mxu1 %v19796_v13  ;;  %13522 = vmatprep.subr.bf16.mxu0 %v19801_v14 }
 0x1b8   : > { %13563 = vmatprep.subr.bf16.mxu1 %v19804_v15 }
 0x1ba   : > { %13523 = vmatpush2.bf16.msra.mxu0 %v19799_v19 }
 0x1bb   : > { %13564 = vmatpush2.bf16.msra.mxu1 %v19802_v20  ;;  %13524 = vmatprep.subr.bf16.mxu0 %v19807_v21  ;;  %v19853_v21 = vld [vmem:[%s22898_s13 + $0x18a4] ss:$16 sps:$4 sm:$0xff]  }
 0x1bc   : > { %13565 = vmatprep.subr.bf16.mxu1 %v19810_v26  ;;  %v19856_v26 = vld [vmem:[%s22898_s13 + $0x1aa4] ss:$16 sps:$4 sm:$0xff]  }
 0x1be   : > { %13525 = vmatpush2.bf16.msra.mxu0 %v19805_v27 }
 0x1bf   : > { %13566 = vmatpush2.bf16.msra.mxu1 %v19808_v29  ;;  %13526 = vmatprep.subr.bf16.mxu0 %v19813_v30  ;;  %v19851_v30 = vld [vmem:[%s22898_s13 + $0x18a0] ss:$16 sps:$4 sm:$0xff]  }
 0x1c0   : > { %13567 = vmatprep.subr.bf16.mxu1 %v19816_v31  ;;  %v19854_v31 = vld [vmem:[%s22898_s13 + $0x1aa0] ss:$16 sps:$4 sm:$0xff]  }
 0x1c2   : > { %13527 = vmatpush2.bf16.msra.mxu0 %v19811_v32 }
 0x1c3   : > { %13568 = vmatpush2.bf16.msra.mxu1 %v19814_v33  ;;  %13528 = vmatprep.subr.bf16.mxu0 %v19819_v34 }
 0x1c4   : > { %13569 = vmatprep.subr.bf16.mxu1 %v19822_v41 }
 0x1c6   : > { %13529 = vmatpush2.bf16.msra.mxu0 %v19817_v42  ;;  %v19862_v42 = vld [vmem:[%s22898_s13 + $0x1a84] ss:$16 sps:$4 sm:$0xff]  }
 0x1c7   : > { %13570 = vmatpush2.bf16.msra.mxu1 %v19820_v22  ;;  %13530 = vmatprep.subr.bf16.mxu0 %v19825_v44  ;;  %v19857_v22 = vld [vmem:[%s22898_s13 + $0x1880] ss:$16 sps:$4 sm:$0xff]  }
 0x1c8   : > { %13571 = vmatprep.subr.bf16.mxu1 %v19828_v45  ;;  %v19860_v44 = vld [vmem:[%s22898_s13 + $0x1a80] ss:$16 sps:$4 sm:$0xff]   ;;  %v19865_v45 = vld [vmem:[%s22898_s13 + $0x1864] ss:$16 sps:$4 sm:$0xff]  }
 0x1ca   : > { %13531 = vmatpush2.bf16.msra.mxu0 %v19823_v46  ;;  %v19868_v46 = vld [vmem:[%s22898_s13 + $0x1a64] ss:$16 sps:$4 sm:$0xff]  }
 0x1cb   : > { %13572 = vmatpush2.bf16.msra.mxu1 %v19826_v48  ;;  %13532 = vmatprep.subr.bf16.mxu0 %v19831_v49  ;;  %v19863_v48 = vld [vmem:[%s22898_s13 + $0x1860] ss:$16 sps:$4 sm:$0xff]  }
 0x1cc   : > { %13573 = vmatprep.subr.bf16.mxu1 %v19834_v50  ;;  %v19866_v49 = vld [vmem:[%s22898_s13 + $0x1a60] ss:$16 sps:$4 sm:$0xff]   ;;  %v19871_v50 = vld [vmem:[%s22898_s13 + $0x1844] ss:$16 sps:$4 sm:$0xff]  }
 0x1ce   : > { %13533 = vmatpush2.bf16.msra.mxu0 %v19829_v52  ;;  %v19874_v52 = vld [vmem:[%s22898_s13 + $0x1a44] ss:$16 sps:$4 sm:$0xff]  }
 0x1cf   : > { %13574 = vmatpush2.bf16.msra.mxu1 %v19832_v53  ;;  %13584 = vmatprep.subr.bf16.mxu0 %v19841_v55  ;;  %v19869_v53 = vld [vmem:[%s22898_s13 + $0x1840] ss:$16 sps:$4 sm:$0xff]  }
 0x1d0   : > { %13625 = vmatprep.subr.bf16.mxu1 %v19844_v56  ;;  %v19872_v55 = vld [vmem:[%s22898_s13 + $0x1a40] ss:$16 sps:$4 sm:$0xff]   ;;  %v19877_v56 = vld [vmem:[%s22898_s13 + $0x1824] ss:$16 sps:$4 sm:$0xff]  }
 0x1d1   : > { %v13290_v13 = vpop.f32.mrf.mxu0  ;;  %13535 = vmatmul.mubr.bf16.vlgmr.msra.gmra.mxu0 %v23476_v2 }
 0x1d2   : > { %v13331_v14 = vpop.f32.mrf.mxu1  ;;  %13576 = vmatmul.mubr.bf16.vlgmr.msra.gmra.mxu1 %v23480_v63  ;;  %v13291_v15 = vadd.f32 %v13290_v13, %v23409_v18  ;;  %13585 = vmatpush1.bf16.msra.mxu0 %v19839_v57  ;;  %v19880_v57 = vld [vmem:[%s22898_s13 + $0x1a24] ss:$16 sps:$4 sm:$0xff]   ;;  %v19884_v13 = vld [vmem:[%s22898_s13 + $0x1a00] ss:$16 sps:$4 sm:$0xff]  }
 0x1d3   : > { %13626 = vmatpush1.bf16.msra.mxu1 %v19842_v58  ;;  %v13292_v19 = vpop.f32.mrf.mxu0  ;;  %13586 = vmatprep.subr.bf16.mxu0 %v19847_v61  ;;  %v19875_v58 = vld [vmem:[%s22898_s13 + $0x1820] ss:$16 sps:$4 sm:$0xff]  }
 0x1d4   : > { %v13333_v20 = vpop.f32.mrf.mxu1  ;;  %13627 = vmatprep.subr.bf16.mxu1 %v19850_v40  ;;  %v23509_v27 = vadd.f32 %v13331_v14, %v13291_v15  ;;  %v13293_v29 = vadd.f32 %v13292_v19, %v23416_v28  ;;  %13616 = vmatprep.mubr.bf16.mxu0 %v23498_v11  ;;  %v19859_v28 = vld [vmem:[%s22898_s13 + $0x1884] ss:$16 sps:$4 sm:$0xff]   ;;  %v19878_v61 = vld [vmem:[%s22898_s13 + $0x1a20] ss:$16 sps:$4 sm:$0xff]  }
 0x1d5   : > { %13657 = vmatprep.mubr.bf16.mxu1 %v23502_v12  ;;  %v13294_v18 = vpop.f32.mrf.mxu0  ;;  %v19883_v40 = vld [vmem:[%s22898_s13 + $0x1804] ss:$16 sps:$4 sm:$0xff]   ;;  %v19887_v19 = vld [vmem:[%s22898_s13 + $0x19e0] ss:$16 sps:$4 sm:$0xff]  }
 0x1d6   : > { %v13335_v32 = vpop.f32.mrf.mxu1  ;;  %v23516_v33 = vadd.f32 %v13333_v20, %v13293_v29  ;;  %13587 = vmatpush1.bf16.msra.mxu0 %v19845_v8  ;;  %v19886_v8 = vld [vmem:[%s22898_s13 + $0x1a04] ss:$16 sps:$4 sm:$0xff]   ;;  %v19890_v20 = vld [vmem:[%s22898_s13 + $0x1be0] ss:$16 sps:$4 sm:$0xff]  }
 0x1d7   : > { %13628 = vmatpush1.bf16.msra.mxu1 %v19848_v62  ;;  %v13295_v34 = vpop.f32.mrf.mxu0  ;;  %13588 = vmatprep.subr.bf16.mxu0 %v19853_v21  ;;  %v19881_v62 = vld [vmem:[%s22898_s13 + $0x1800] ss:$16 sps:$4 sm:$0xff]   ;;  %v19889_v14 = vld [vmem:[%s22898_s13 + $0x19e4] ss:$16 sps:$4 sm:$0xff]  }
 0x1d8   : > { %v13336_v41 = vpop.f32.mrf.mxu1  ;;  %13629 = vmatprep.subr.bf16.mxu1 %v19856_v26  ;;  %v19892_v15 = vld [vmem:[%s22898_s13 + $0x1be4] ss:$16 sps:$4 sm:$0xff]   ;;  %v19893_v29 = vld [vmem:[%s22898_s13 + $0x19c0] ss:$16 sps:$4 sm:$0xff]  }
 0x1d9   : > { %v19895_v21 = vld [vmem:[%s22898_s13 + $0x19c4] ss:$16 sps:$4 sm:$0xff]   ;;  %v19899_v32 = vld [vmem:[%s22898_s13 + $0x19a0] ss:$16 sps:$4 sm:$0xff]  }
 0x1da   : > { %13589 = vmatpush1.bf16.msra.mxu0 %v19851_v30  ;;  %v19898_v26 = vld [vmem:[%s22898_s13 + $0x1bc4] ss:$16 sps:$4 sm:$0xff]   ;;  %v19896_v30 = vld [vmem:[%s22898_s13 + $0x1bc0] ss:$16 sps:$4 sm:$0xff]  }
 0x1db   : > { %13630 = vmatpush1.bf16.msra.mxu1 %v19854_v31  ;;  %13590 = vmatprep.subr.bf16.mxu0 %v19859_v28  ;;  %v19901_v31 = vld [vmem:[%s22898_s13 + $0x19a4] ss:$16 sps:$4 sm:$0xff]   ;;  %v19902_v34 = vld [vmem:[%s22898_s13 + $0x1ba0] ss:$16 sps:$4 sm:$0xff]  }
 0x1dc   : > { %13631 = vmatprep.subr.bf16.mxu1 %v19862_v42  ;;  %v19904_v18 = vld [vmem:[%s22898_s13 + $0x1ba4] ss:$16 sps:$4 sm:$0xff]   ;;  %v19905_v42 = vld [vmem:[%s22898_s13 + $0x1980] ss:$16 sps:$4 sm:$0xff]  }
 0x1dd   : > { %v19907_v41 = vld [vmem:[%s22898_s13 + $0x1984] ss:$16 sps:$4 sm:$0xff]  }
 0x1de   : > { %13591 = vmatpush1.bf16.msra.mxu0 %v19857_v22  ;;  %v19910_v28 = vld [vmem:[%s22898_s13 + $0x1b84] ss:$16 sps:$4 sm:$0xff]   ;;  %v19908_v22 = vld [vmem:[%s22898_s13 + $0x1b80] ss:$16 sps:$4 sm:$0xff]  }
 0x1df   : > { %13632 = vmatpush1.bf16.msra.mxu1 %v19860_v44  ;;  %13592 = vmatprep.subr.bf16.mxu0 %v19865_v45  ;;  %v19913_v44 = vld [vmem:[%s22898_s13 + $0x1964] ss:$16 sps:$4 sm:$0xff]  }
 0x1e0   : > { %13633 = vmatprep.subr.bf16.mxu1 %v19868_v46  ;;  %v19916_v45 = vld [vmem:[%s22898_s13 + $0x1b64] ss:$16 sps:$4 sm:$0xff]   ;;  %v19911_v46 = vld [vmem:[%s22898_s13 + $0x1960] ss:$16 sps:$4 sm:$0xff]  }
 0x1e2   : > { %13593 = vmatpush1.bf16.msra.mxu0 %v19863_v48  ;;  %v19914_v48 = vld [vmem:[%s22898_s13 + $0x1b60] ss:$16 sps:$4 sm:$0xff]  }
 0x1e3   : > { %13634 = vmatpush1.bf16.msra.mxu1 %v19866_v49  ;;  %13594 = vmatprep.subr.bf16.mxu0 %v19871_v50  ;;  %v19919_v49 = vld [vmem:[%s22898_s13 + $0x1944] ss:$16 sps:$4 sm:$0xff]  }
 0x1e4   : > { %13635 = vmatprep.subr.bf16.mxu1 %v19874_v52  ;;  %v19922_v50 = vld [vmem:[%s22898_s13 + $0x1b44] ss:$16 sps:$4 sm:$0xff]   ;;  %v19917_v52 = vld [vmem:[%s22898_s13 + $0x1940] ss:$16 sps:$4 sm:$0xff]  }
 0x1e6   : > { %13595 = vmatpush1.bf16.msra.mxu0 %v19869_v53  ;;  %v19920_v53 = vld [vmem:[%s22898_s13 + $0x1b40] ss:$16 sps:$4 sm:$0xff]  }
 0x1e7   : > { %13636 = vmatpush1.bf16.msra.mxu1 %v19872_v55  ;;  %13596 = vmatprep.subr.bf16.mxu0 %v19877_v56  ;;  %v19925_v55 = vld [vmem:[%s22898_s13 + $0x1924] ss:$16 sps:$4 sm:$0xff]  }
 0x1e8   : > { %13637 = vmatprep.subr.bf16.mxu1 %v19880_v57  ;;  %v19928_v56 = vld [vmem:[%s22898_s13 + $0x1b24] ss:$16 sps:$4 sm:$0xff]   ;;  %v19923_v57 = vld [vmem:[%s22898_s13 + $0x1920] ss:$16 sps:$4 sm:$0xff]  }
 0x1ea   : > { %13597 = vmatpush1.bf16.msra.mxu0 %v19875_v58  ;;  %v19926_v58 = vld [vmem:[%s22898_s13 + $0x1b20] ss:$16 sps:$4 sm:$0xff]  }
 0x1eb   : > { %13638 = vmatpush1.bf16.msra.mxu1 %v19878_v61  ;;  %13598 = vmatprep.subr.bf16.mxu0 %v19883_v40  ;;  %v19931_v61 = vld [vmem:[%s22898_s13 + $0x1904] ss:$16 sps:$4 sm:$0xff]  }
 0x1ec   : > { %13639 = vmatprep.subr.bf16.mxu1 %v19886_v8  ;;  %v19934_v40 = vld [vmem:[%s22898_s13 + $0x1b04] ss:$16 sps:$4 sm:$0xff]   ;;  %v19929_v8 = vld [vmem:[%s22898_s13 + $0x1900] ss:$16 sps:$4 sm:$0xff]  }
 0x1ee   : > { %13599 = vmatpush1.bf16.msra.mxu0 %v19881_v62  ;;  %v19932_v62 = vld [vmem:[%s22898_s13 + $0x1b00] ss:$16 sps:$4 sm:$0xff]  }
 0x1ef   : > { %13640 = vmatpush1.bf16.msra.mxu1 %v19884_v13  ;;  %13600 = vmatprep.subr.bf16.mxu0 %v19889_v14  ;;  %v19941_v13 = vld [vmem:[%s22898_s13 + $0x1ce4] ss:$16 sps:$4 sm:$0xff]  }
 0x1f0   : > { %13641 = vmatprep.subr.bf16.mxu1 %v19892_v15  ;;  %v19944_v14 = vld [vmem:[%s22898_s13 + $0x1ee4] ss:$16 sps:$4 sm:$0xff]   ;;  %v19939_v15 = vld [vmem:[%s22898_s13 + $0x1ce0] ss:$16 sps:$4 sm:$0xff]  }
 0x1f2   : > { %13601 = vmatpush2.bf16.msra.mxu0 %v19887_v19  ;;  %v19942_v19 = vld [vmem:[%s22898_s13 + $0x1ee0] ss:$16 sps:$4 sm:$0xff]  }
 0x1f3   : > { %13642 = vmatpush2.bf16.msra.mxu1 %v19890_v20  ;;  %13602 = vmatprep.subr.bf16.mxu0 %v19895_v21  ;;  %v23576_v20 = vcombine.low %v23485_v4, %v23485_v4  ;;  %v23580_v21 = vcombine.low %v23490_v3, %v23490_v3  ;;  %v19947_v4 = vld [vmem:[%s22898_s13 + $0x1cc4] ss:$16 sps:$4 sm:$0xff]   ;;  %v19948_v3 = vld [vmem:[%s22898_s13 + $0x1ec0] ss:$16 sps:$4 sm:$0xff]  }
 0x1f4   : > { %13643 = vmatprep.subr.bf16.mxu1 %v19898_v26  ;;  %v23585_v26 = vld [vmem:[%s25971_s0 + $0x70] sm:$0xff] }
 0x1f6   : > { %13603 = vmatpush2.bf16.msra.mxu0 %v19893_v29  ;;  %v23590_v29 = vld [vmem:[%s25971_s0 + $0x78] sm:$0xff] }
 0x1f7   : > { %13644 = vmatpush2.bf16.msra.mxu1 %v19896_v30  ;;  %13604 = vmatprep.subr.bf16.mxu0 %v19901_v31  ;;  %v19950_v30 = vld [vmem:[%s22898_s13 + $0x1ec4] ss:$16 sps:$4 sm:$0xff]   ;;  %v19945_v31 = vld [vmem:[%s22898_s13 + $0x1cc0] ss:$16 sps:$4 sm:$0xff]  }
 0x1f8   : > { %13645 = vmatprep.subr.bf16.mxu1 %v19904_v18  ;;  %v23598_v18 = vcombine.high %v23585_v26, %v23585_v26 }
 0x1fa   : > { %13605 = vmatpush2.bf16.msra.mxu0 %v19899_v32  ;;  %v23602_v32 = vcombine.high %v23590_v29, %v23590_v29 }
 0x1fb   : > { %13646 = vmatpush2.bf16.msra.mxu1 %v19902_v34  ;;  %13606 = vmatprep.subr.bf16.mxu0 %v19907_v41 }
 0x1fc   : > { %13647 = vmatprep.subr.bf16.mxu1 %v19910_v28 }
 0x1fe   : > { %13607 = vmatpush2.bf16.msra.mxu0 %v19905_v42 }
 0x1ff   : > { %13648 = vmatpush2.bf16.msra.mxu1 %v19908_v22  ;;  %13608 = vmatprep.subr.bf16.mxu0 %v19913_v44  ;;  %v19953_v44 = vld [vmem:[%s22898_s13 + $0x1ca4] ss:$16 sps:$4 sm:$0xff]  }
 0x200   : > { %13649 = vmatprep.subr.bf16.mxu1 %v19916_v45  ;;  %v19956_v45 = vld [vmem:[%s22898_s13 + $0x1ea4] ss:$16 sps:$4 sm:$0xff]  }
 0x202   : > { %13609 = vmatpush2.bf16.msra.mxu0 %v19911_v46 }
 0x203   : > { %13650 = vmatpush2.bf16.msra.mxu1 %v19914_v48  ;;  %13610 = vmatprep.subr.bf16.mxu0 %v19919_v49  ;;  %v19951_v49 = vld [vmem:[%s22898_s13 + $0x1ca0] ss:$16 sps:$4 sm:$0xff]  }
 0x204   : > { %13651 = vmatprep.subr.bf16.mxu1 %v19922_v50  ;;  %v19954_v50 = vld [vmem:[%s22898_s13 + $0x1ea0] ss:$16 sps:$4 sm:$0xff]  }
 0x206   : > { %13611 = vmatpush2.bf16.msra.mxu0 %v19917_v52 }
 0x207   : > { %13652 = vmatpush2.bf16.msra.mxu1 %v19920_v53  ;;  %13612 = vmatprep.subr.bf16.mxu0 %v19925_v55 }
 0x208   : > { %13653 = vmatprep.subr.bf16.mxu1 %v19928_v56 }
 0x20a   : > { %13613 = vmatpush2.bf16.msra.mxu0 %v19923_v57  ;;  %v19962_v57 = vld [vmem:[%s22898_s13 + $0x1e84] ss:$16 sps:$4 sm:$0xff]  }
 0x20b   : > { %13654 = vmatpush2.bf16.msra.mxu1 %v19926_v58  ;;  %13614 = vmatprep.subr.bf16.mxu0 %v19931_v61  ;;  %v19957_v58 = vld [vmem:[%s22898_s13 + $0x1c80] ss:$16 sps:$4 sm:$0xff]  }
 0x20c   : > { %13655 = vmatprep.subr.bf16.mxu1 %v19934_v40  ;;  %v19960_v61 = vld [vmem:[%s22898_s13 + $0x1e80] ss:$16 sps:$4 sm:$0xff]   ;;  %v19965_v40 = vld [vmem:[%s22898_s13 + $0x1c64] ss:$16 sps:$4 sm:$0xff]  }
 0x20e   : > { %13615 = vmatpush2.bf16.msra.mxu0 %v19929_v8  ;;  %v19968_v8 = vld [vmem:[%s22898_s13 + $0x1e64] ss:$16 sps:$4 sm:$0xff]  }
 0x20f   : > { %13656 = vmatpush2.bf16.msra.mxu1 %v19932_v62  ;;  %13666 = vmatprep.subr.bf16.mxu0 %v19941_v13  ;;  %v19963_v62 = vld [vmem:[%s22898_s13 + $0x1c60] ss:$16 sps:$4 sm:$0xff]  }
 0x210   : > { %13707 = vmatprep.subr.bf16.mxu1 %v19944_v14  ;;  %v19966_v13 = vld [vmem:[%s22898_s13 + $0x1e60] ss:$16 sps:$4 sm:$0xff]   ;;  %v19971_v14 = vld [vmem:[%s22898_s13 + $0x1c44] ss:$16 sps:$4 sm:$0xff]  }
 0x211   : > { %v13372_v34 = vpop.f32.mrf.mxu0  ;;  %13617 = vmatmul.mubr.bf16.vlgmr.msra.gmra.mxu0 %v23576_v20 }
 0x212   : > { %v13413_v41 = vpop.f32.mrf.mxu1  ;;  %13658 = vmatmul.mubr.bf16.vlgmr.msra.gmra.mxu1 %v23580_v21  ;;  %v13373_v28 = vadd.f32 %v13372_v34, %v23509_v27  ;;  %13667 = vmatpush1.bf16.msra.mxu0 %v19939_v15  ;;  %v19974_v15 = vld [vmem:[%s22898_s13 + $0x1e44] ss:$16 sps:$4 sm:$0xff]   ;;  %v19978_v34 = vld [vmem:[%s22898_s13 + $0x1e20] ss:$16 sps:$4 sm:$0xff]  }
 0x213   : > { %13708 = vmatpush1.bf16.msra.mxu1 %v19942_v19  ;;  %v13374_v42 = vpop.f32.mrf.mxu0  ;;  %13668 = vmatprep.subr.bf16.mxu0 %v19947_v4  ;;  %v19969_v19 = vld [vmem:[%s22898_s13 + $0x1c40] ss:$16 sps:$4 sm:$0xff]  }
 0x214   : > { %v13415_v22 = vpop.f32.mrf.mxu1  ;;  %13709 = vmatprep.subr.bf16.mxu1 %v19950_v30  ;;  %v23609_v46 = vadd.f32 %v13413_v41, %v13373_v28  ;;  %v13375_v48 = vadd.f32 %v13374_v42, %v23516_v33  ;;  %13698 = vmatprep.mubr.bf16.mxu0 %v23598_v18  ;;  %v19959_v33 = vld [vmem:[%s22898_s13 + $0x1c84] ss:$16 sps:$4 sm:$0xff]   ;;  %v19972_v4 = vld [vmem:[%s22898_s13 + $0x1e40] ss:$16 sps:$4 sm:$0xff]  }
 0x215   : > { %13739 = vmatprep.mubr.bf16.mxu1 %v23602_v32  ;;  %v13376_v27 = vpop.f32.mrf.mxu0  ;;  %v19977_v30 = vld [vmem:[%s22898_s13 + $0x1c24] ss:$16 sps:$4 sm:$0xff]   ;;  %v19981_v42 = vld [vmem:[%s22898_s13 + $0x1c00] ss:$16 sps:$4 sm:$0xff]  }
 0x216   : > { %v13417_v52 = vpop.f32.mrf.mxu1  ;;  %v23616_v53 = vadd.f32 %v13415_v22, %v13375_v48  ;;  %13669 = vmatpush1.bf16.msra.mxu0 %v19945_v31  ;;  %v19980_v31 = vld [vmem:[%s22898_s13 + $0x1e24] ss:$16 sps:$4 sm:$0xff]   ;;  %v19984_v22 = vld [vmem:[%s22898_s13 + $0x1e00] ss:$16 sps:$4 sm:$0xff]  }
 0x217   : > { %13710 = vmatpush1.bf16.msra.mxu1 %v19948_v3  ;;  %v13377_v55 = vpop.f32.mrf.mxu0  ;;  %13670 = vmatprep.subr.bf16.mxu0 %v19953_v44  ;;  %v19975_v3 = vld [vmem:[%s22898_s13 + $0x1c20] ss:$16 sps:$4 sm:$0xff]   ;;  %v19983_v41 = vld [vmem:[%s22898_s13 + $0x1c04] ss:$16 sps:$4 sm:$0xff]  }
 0x218   : > { %v13418_v56 = vpop.f32.mrf.mxu1  ;;  %13711 = vmatprep.subr.bf16.mxu1 %v19956_v45  ;;  %v19986_v28 = vld [vmem:[%s22898_s13 + $0x1e04] ss:$16 sps:$4 sm:$0xff]   ;;  %v19987_v48 = vld [vmem:[%s22898_s13 + $0x1de0] ss:$16 sps:$4 sm:$0xff]  }
 0x219   : > { %v19989_v44 = vld [vmem:[%s22898_s13 + $0x1de4] ss:$16 sps:$4 sm:$0xff]   ;;  %v19993_v52 = vld [vmem:[%s22898_s13 + $0x1dc0] ss:$16 sps:$4 sm:$0xff]  }
 0x21a   : > { %13671 = vmatpush1.bf16.msra.mxu0 %v19951_v49  ;;  %v19992_v45 = vld [vmem:[%s22898_s13 + $0x1fe4] ss:$16 sps:$4 sm:$0xff]   ;;  %v19990_v49 = vld [vmem:[%s22898_s13 + $0x1fe0] ss:$16 sps:$4 sm:$0xff]  }
 0x21b   : > { %13712 = vmatpush1.bf16.msra.mxu1 %v19954_v50  ;;  %13672 = vmatprep.subr.bf16.mxu0 %v19959_v33  ;;  %v19995_v50 = vld [vmem:[%s22898_s13 + $0x1dc4] ss:$16 sps:$4 sm:$0xff]   ;;  %v19996_v55 = vld [vmem:[%s22898_s13 + $0x1fc0] ss:$16 sps:$4 sm:$0xff]  }
 0x21c   : > { %13713 = vmatprep.subr.bf16.mxu1 %v19962_v57  ;;  %v19998_v27 = vld [vmem:[%s22898_s13 + $0x1fc4] ss:$16 sps:$4 sm:$0xff]   ;;  %v19999_v57 = vld [vmem:[%s22898_s13 + $0x1da0] ss:$16 sps:$4 sm:$0xff]  }
 0x21d   : > { %v20001_v56 = vld [vmem:[%s22898_s13 + $0x1da4] ss:$16 sps:$4 sm:$0xff]  }
 0x21e   : > { %13673 = vmatpush1.bf16.msra.mxu0 %v19957_v58  ;;  %v20004_v33 = vld [vmem:[%s22898_s13 + $0x1fa4] ss:$16 sps:$4 sm:$0xff]   ;;  %v20002_v58 = vld [vmem:[%s22898_s13 + $0x1fa0] ss:$16 sps:$4 sm:$0xff]  }
 0x21f   : > { %13714 = vmatpush1.bf16.msra.mxu1 %v19960_v61  ;;  %13674 = vmatprep.subr.bf16.mxu0 %v19965_v40  ;;  %v20007_v61 = vld [vmem:[%s22898_s13 + $0x1d84] ss:$16 sps:$4 sm:$0xff]  }
 0x220   : > { %13715 = vmatprep.subr.bf16.mxu1 %v19968_v8  ;;  %v20010_v40 = vld [vmem:[%s22898_s13 + $0x1f84] ss:$16 sps:$4 sm:$0xff]   ;;  %v20005_v8 = vld [vmem:[%s22898_s13 + $0x1d80] ss:$16 sps:$4 sm:$0xff]  }
 0x222   : > { %13675 = vmatpush1.bf16.msra.mxu0 %v19963_v62  ;;  %v20008_v62 = vld [vmem:[%s22898_s13 + $0x1f80] ss:$16 sps:$4 sm:$0xff]  }
 0x223   : > { %13716 = vmatpush1.bf16.msra.mxu1 %v19966_v13  ;;  %13676 = vmatprep.subr.bf16.mxu0 %v19971_v14  ;;  %v20013_v13 = vld [vmem:[%s22898_s13 + $0x1d64] ss:$16 sps:$4 sm:$0xff]  }
 0x224   : > { %13717 = vmatprep.subr.bf16.mxu1 %v19974_v15  ;;  %v20016_v14 = vld [vmem:[%s22898_s13 + $0x1f64] ss:$16 sps:$4 sm:$0xff]   ;;  %v20011_v15 = vld [vmem:[%s22898_s13 + $0x1d60] ss:$16 sps:$4 sm:$0xff]  }
 0x226   : > { %13677 = vmatpush1.bf16.msra.mxu0 %v19969_v19  ;;  %v20014_v19 = vld [vmem:[%s22898_s13 + $0x1f60] ss:$16 sps:$4 sm:$0xff]  }
 0x227   : > { %13718 = vmatpush1.bf16.msra.mxu1 %v19972_v4  ;;  %13678 = vmatprep.subr.bf16.mxu0 %v19977_v30  ;;  %v20019_v4 = vld [vmem:[%s22898_s13 + $0x1d44] ss:$16 sps:$4 sm:$0xff]  }
 0x228   : > { %13719 = vmatprep.subr.bf16.mxu1 %v19980_v31  ;;  %v20022_v30 = vld [vmem:[%s22898_s13 + $0x1f44] ss:$16 sps:$4 sm:$0xff]   ;;  %v20017_v31 = vld [vmem:[%s22898_s13 + $0x1d40] ss:$16 sps:$4 sm:$0xff]  }
 0x22a   : > { %13679 = vmatpush1.bf16.msra.mxu0 %v19975_v3  ;;  %v20020_v3 = vld [vmem:[%s22898_s13 + $0x1f40] ss:$16 sps:$4 sm:$0xff]  }
 0x22b   : > { %13720 = vmatpush1.bf16.msra.mxu1 %v19978_v34  ;;  %13680 = vmatprep.subr.bf16.mxu0 %v19983_v41  ;;  %v20025_v34 = vld [vmem:[%s22898_s13 + $0x1d24] ss:$16 sps:$4 sm:$0xff]  }
 0x22c   : > { %13721 = vmatprep.subr.bf16.mxu1 %v19986_v28  ;;  %v20028_v41 = vld [vmem:[%s22898_s13 + $0x1f24] ss:$16 sps:$4 sm:$0xff]   ;;  %v20023_v28 = vld [vmem:[%s22898_s13 + $0x1d20] ss:$16 sps:$4 sm:$0xff]  }
 0x22e   : > { %13681 = vmatpush1.bf16.msra.mxu0 %v19981_v42  ;;  %v20026_v42 = vld [vmem:[%s22898_s13 + $0x1f20] ss:$16 sps:$4 sm:$0xff]  }
 0x22f   : > { %13722 = vmatpush1.bf16.msra.mxu1 %v19984_v22  ;;  %13682 = vmatprep.subr.bf16.mxu0 %v19989_v44  ;;  %v20031_v22 = vld [vmem:[%s22898_s13 + $0x1d04] ss:$16 sps:$4 sm:$0xff]  }
 0x230   : > { %13723 = vmatprep.subr.bf16.mxu1 %v19992_v45  ;;  %v20034_v44 = vld [vmem:[%s22898_s13 + $0x1f04] ss:$16 sps:$4 sm:$0xff]   ;;  %v20029_v45 = vld [vmem:[%s22898_s13 + $0x1d00] ss:$16 sps:$4 sm:$0xff]  }
 0x232   : > { %13683 = vmatpush2.bf16.msra.mxu0 %v19987_v48  ;;  %v20032_v48 = vld [vmem:[%s22898_s13 + $0x1f00] ss:$16 sps:$4 sm:$0xff]  }
 0x233   : > { %13724 = vmatpush2.bf16.msra.mxu1 %v19990_v49  ;;  %13684 = vmatprep.subr.bf16.mxu0 %v19995_v50  ;;  %v20041_v49 = vld [vmem:[%s22898_s13 + $0x20e4] ss:$16 sps:$4 sm:$0xff]  }
 0x234   : > { %13725 = vmatprep.subr.bf16.mxu1 %v19998_v27  ;;  %v20044_v50 = vld [vmem:[%s22898_s13 + $0x22e4] ss:$16 sps:$4 sm:$0xff]   ;;  %v20039_v27 = vld [vmem:[%s22898_s13 + $0x20e0] ss:$16 sps:$4 sm:$0xff]  }
 0x236   : > { %13685 = vmatpush2.bf16.msra.mxu0 %v19993_v52  ;;  %v20042_v52 = vld [vmem:[%s22898_s13 + $0x22e0] ss:$16 sps:$4 sm:$0xff]  }
 0x237   : > { %13726 = vmatpush2.bf16.msra.mxu1 %v19996_v55  ;;  %13686 = vmatprep.subr.bf16.mxu0 %v20001_v56  ;;  %v23676_v55 = vcombine.low %v23585_v26, %v23585_v26  ;;  %v23680_v56 = vcombine.low %v23590_v29, %v23590_v29  ;;  %v20047_v26 = vld [vmem:[%s22898_s13 + $0x20c4] ss:$16 sps:$4 sm:$0xff]   ;;  %v20048_v29 = vld [vmem:[%s22898_s13 + $0x22c0] ss:$16 sps:$4 sm:$0xff]  }
 0x238   : > { %13727 = vmatprep.subr.bf16.mxu1 %v20004_v33  ;;  %v23685_v33 = vld [vmem:[%s25971_s0 + $0x80] sm:$0xff] }
 0x23a   : > { %13687 = vmatpush2.bf16.msra.mxu0 %v19999_v57  ;;  %v23690_v57 = vld [vmem:[%s25971_s0 + $0x88] sm:$0xff] }
 0x23b   : > { %13728 = vmatpush2.bf16.msra.mxu1 %v20002_v58  ;;  %13688 = vmatprep.subr.bf16.mxu0 %v20007_v61  ;;  %v20050_v58 = vld [vmem:[%s22898_s13 + $0x22c4] ss:$16 sps:$4 sm:$0xff]   ;;  %v20045_v61 = vld [vmem:[%s22898_s13 + $0x20c0] ss:$16 sps:$4 sm:$0xff]  }
 0x23c   : > { %13729 = vmatprep.subr.bf16.mxu1 %v20010_v40  ;;  %v23698_v40 = vcombine.high %v23685_v33, %v23685_v33 }
 0x23e   : > { %13689 = vmatpush2.bf16.msra.mxu0 %v20005_v8  ;;  %v23702_v8 = vcombine.high %v23690_v57, %v23690_v57 }
 0x23f   : > { %13730 = vmatpush2.bf16.msra.mxu1 %v20008_v62  ;;  %13690 = vmatprep.subr.bf16.mxu0 %v20013_v13 }
 0x240   : > { %13731 = vmatprep.subr.bf16.mxu1 %v20016_v14 }
 0x242   : > { %13691 = vmatpush2.bf16.msra.mxu0 %v20011_v15 }
 0x243   : > { %13732 = vmatpush2.bf16.msra.mxu1 %v20014_v19  ;;  %13692 = vmatprep.subr.bf16.mxu0 %v20019_v4  ;;  %v20053_v4 = vld [vmem:[%s22898_s13 + $0x20a4] ss:$16 sps:$4 sm:$0xff]  }
 0x244   : > { %13733 = vmatprep.subr.bf16.mxu1 %v20022_v30  ;;  %v20056_v30 = vld [vmem:[%s22898_s13 + $0x22a4] ss:$16 sps:$4 sm:$0xff]  }
 0x246   : > { %13693 = vmatpush2.bf16.msra.mxu0 %v20017_v31 }
 0x247   : > { %13734 = vmatpush2.bf16.msra.mxu1 %v20020_v3  ;;  %13694 = vmatprep.subr.bf16.mxu0 %v20025_v34  ;;  %v20051_v34 = vld [vmem:[%s22898_s13 + $0x20a0] ss:$16 sps:$4 sm:$0xff]  }
 0x248   : > { %13735 = vmatprep.subr.bf16.mxu1 %v20028_v41  ;;  %v20054_v41 = vld [vmem:[%s22898_s13 + $0x22a0] ss:$16 sps:$4 sm:$0xff]  }
 0x24a   : > { %13695 = vmatpush2.bf16.msra.mxu0 %v20023_v28 }
 0x24b   : > { %13736 = vmatpush2.bf16.msra.mxu1 %v20026_v42  ;;  %13696 = vmatprep.subr.bf16.mxu0 %v20031_v22 }
 0x24c   : > { %13737 = vmatprep.subr.bf16.mxu1 %v20034_v44 }
 0x24e   : > { %13697 = vmatpush2.bf16.msra.mxu0 %v20029_v45  ;;  %v20062_v45 = vld [vmem:[%s22898_s13 + $0x2284] ss:$16 sps:$4 sm:$0xff]  }
 0x24f   : > { %13738 = vmatpush2.bf16.msra.mxu1 %v20032_v48  ;;  %13748 = vmatprep.subr.bf16.mxu0 %v20041_v49  ;;  %v20057_v48 = vld [vmem:[%s22898_s13 + $0x2080] ss:$16 sps:$4 sm:$0xff]  }
 0x250   : > { %13789 = vmatprep.subr.bf16.mxu1 %v20044_v50  ;;  %v20060_v49 = vld [vmem:[%s22898_s13 + $0x2280] ss:$16 sps:$4 sm:$0xff]   ;;  %v20065_v50 = vld [vmem:[%s22898_s13 + $0x2064] ss:$16 sps:$4 sm:$0xff]  }
 0x251   : > { %v13454_v62 = vpop.f32.mrf.mxu0  ;;  %13699 = vmatmul.mubr.bf16.vlgmr.msra.gmra.mxu0 %v23676_v55 }
 0x252   : > { %v13495_v13 = vpop.f32.mrf.mxu1  ;;  %13740 = vmatmul.mubr.bf16.vlgmr.msra.gmra.mxu1 %v23680_v56  ;;  %v13455_v14 = vadd.f32 %v13454_v62, %v23609_v46  ;;  %13749 = vmatpush1.bf16.msra.mxu0 %v20039_v27  ;;  %v20068_v27 = vld [vmem:[%s22898_s13 + $0x2264] ss:$16 sps:$4 sm:$0xff]   ;;  %v20072_v62 = vld [vmem:[%s22898_s13 + $0x2240] ss:$16 sps:$4 sm:$0xff]  }
 0x253   : > { %13790 = vmatpush1.bf16.msra.mxu1 %v20042_v52  ;;  %v13456_v15 = vpop.f32.mrf.mxu0  ;;  %13750 = vmatprep.subr.bf16.mxu0 %v20047_v26  ;;  %v20063_v52 = vld [vmem:[%s22898_s13 + $0x2060] ss:$16 sps:$4 sm:$0xff]  }
 0x254   : > { %v13497_v19 = vpop.f32.mrf.mxu1  ;;  %13791 = vmatprep.subr.bf16.mxu1 %v20050_v58  ;;  %v23709_v31 = vadd.f32 %v13495_v13, %v13455_v14  ;;  %v13457_v3 = vadd.f32 %v13456_v15, %v23616_v53  ;;  %13780 = vmatprep.mubr.bf16.mxu0 %v23698_v40  ;;  %v20059_v53 = vld [vmem:[%s22898_s13 + $0x2084] ss:$16 sps:$4 sm:$0xff]   ;;  %v20066_v26 = vld [vmem:[%s22898_s13 + $0x2260] ss:$16 sps:$4 sm:$0xff]  }
 0x255   : > { %13821 = vmatprep.mubr.bf16.mxu1 %v23702_v8  ;;  %v13458_v46 = vpop.f32.mrf.mxu0  ;;  %v20071_v58 = vld [vmem:[%s22898_s13 + $0x2044] ss:$16 sps:$4 sm:$0xff]   ;;  %v20075_v15 = vld [vmem:[%s22898_s13 + $0x2020] ss:$16 sps:$4 sm:$0xff]  }
 0x256   : > { %v13499_v28 = vpop.f32.mrf.mxu1  ;;  %v23716_v42 = vadd.f32 %v13497_v19, %v13457_v3  ;;  %13751 = vmatpush1.bf16.msra.mxu0 %v20045_v61  ;;  %v20074_v61 = vld [vmem:[%s22898_s13 + $0x2244] ss:$16 sps:$4 sm:$0xff]   ;;  %v20078_v19 = vld [vmem:[%s22898_s13 + $0x2220] ss:$16 sps:$4 sm:$0xff]  }
 0x257   : > { %13792 = vmatpush1.bf16.msra.mxu1 %v20048_v29  ;;  %v13459_v22 = vpop.f32.mrf.mxu0  ;;  %13752 = vmatprep.subr.bf16.mxu0 %v20053_v4  ;;  %v20069_v29 = vld [vmem:[%s22898_s13 + $0x2040] ss:$16 sps:$4 sm:$0xff]   ;;  %v20077_v13 = vld [vmem:[%s22898_s13 + $0x2024] ss:$16 sps:$4 sm:$0xff]  }
 0x258   : > { %v13500_v44 = vpop.f32.mrf.mxu1  ;;  %13793 = vmatprep.subr.bf16.mxu1 %v20056_v30  ;;  %v20080_v14 = vld [vmem:[%s22898_s13 + $0x2224] ss:$16 sps:$4 sm:$0xff]   ;;  %v20081_v3 = vld [vmem:[%s22898_s13 + $0x2000] ss:$16 sps:$4 sm:$0xff]  }
 0x259   : > { %v20083_v4 = vld [vmem:[%s22898_s13 + $0x2004] ss:$16 sps:$4 sm:$0xff]   ;;  %v20087_v28 = vld [vmem:[%s22898_s13 + $0x21e0] ss:$16 sps:$4 sm:$0xff]  }
 0x25a   : > { %13753 = vmatpush1.bf16.msra.mxu0 %v20051_v34  ;;  %v20086_v30 = vld [vmem:[%s22898_s13 + $0x2204] ss:$16 sps:$4 sm:$0xff]   ;;  %v20084_v34 = vld [vmem:[%s22898_s13 + $0x2200] ss:$16 sps:$4 sm:$0xff]  }
 0x25b   : > { %13794 = vmatpush1.bf16.msra.mxu1 %v20054_v41  ;;  %13754 = vmatprep.subr.bf16.mxu0 %v20059_v53  ;;  %v20089_v41 = vld [vmem:[%s22898_s13 + $0x21e4] ss:$16 sps:$4 sm:$0xff]   ;;  %v20090_v22 = vld [vmem:[%s22898_s13 + $0x23e0] ss:$16 sps:$4 sm:$0xff]  }
 0x25c   : > { %13795 = vmatprep.subr.bf16.mxu1 %v20062_v45  ;;  %v20092_v46 = vld [vmem:[%s22898_s13 + $0x23e4] ss:$16 sps:$4 sm:$0xff]   ;;  %v20093_v45 = vld [vmem:[%s22898_s13 + $0x21c0] ss:$16 sps:$4 sm:$0xff]  }
 0x25d   : > { %v20095_v44 = vld [vmem:[%s22898_s13 + $0x21c4] ss:$16 sps:$4 sm:$0xff]  }
 0x25e   : > { %13755 = vmatpush1.bf16.msra.mxu0 %v20057_v48  ;;  %v20098_v53 = vld [vmem:[%s22898_s13 + $0x23c4] ss:$16 sps:$4 sm:$0xff]   ;;  %v20096_v48 = vld [vmem:[%s22898_s13 + $0x23c0] ss:$16 sps:$4 sm:$0xff]  }
 0x25f   : > { %13796 = vmatpush1.bf16.msra.mxu1 %v20060_v49  ;;  %13756 = vmatprep.subr.bf16.mxu0 %v20065_v50  ;;  %v20101_v49 = vld [vmem:[%s22898_s13 + $0x21a4] ss:$16 sps:$4 sm:$0xff]  }
 0x260   : > { %13797 = vmatprep.subr.bf16.mxu1 %v20068_v27  ;;  %v20104_v50 = vld [vmem:[%s22898_s13 + $0x23a4] ss:$16 sps:$4 sm:$0xff]   ;;  %v20099_v27 = vld [vmem:[%s22898_s13 + $0x21a0] ss:$16 sps:$4 sm:$0xff]  }
 0x262   : > { %13757 = vmatpush1.bf16.msra.mxu0 %v20063_v52  ;;  %v20102_v52 = vld [vmem:[%s22898_s13 + $0x23a0] ss:$16 sps:$4 sm:$0xff]  }
 0x263   : > { %13798 = vmatpush1.bf16.msra.mxu1 %v20066_v26  ;;  %13758 = vmatprep.subr.bf16.mxu0 %v20071_v58  ;;  %v20107_v26 = vld [vmem:[%s22898_s13 + $0x2184] ss:$16 sps:$4 sm:$0xff]  }
 0x264   : > { %13799 = vmatprep.subr.bf16.mxu1 %v20074_v61  ;;  %v20110_v58 = vld [vmem:[%s22898_s13 + $0x2384] ss:$16 sps:$4 sm:$0xff]   ;;  %v20105_v61 = vld [vmem:[%s22898_s13 + $0x2180] ss:$16 sps:$4 sm:$0xff]  }
 0x266   : > { %13759 = vmatpush1.bf16.msra.mxu0 %v20069_v29  ;;  %v20108_v29 = vld [vmem:[%s22898_s13 + $0x2380] ss:$16 sps:$4 sm:$0xff]  }
 0x267   : > { %13800 = vmatpush1.bf16.msra.mxu1 %v20072_v62  ;;  %13760 = vmatprep.subr.bf16.mxu0 %v20077_v13  ;;  %v20113_v62 = vld [vmem:[%s22898_s13 + $0x2164] ss:$16 sps:$4 sm:$0xff]  }
 0x268   : > { %13801 = vmatprep.subr.bf16.mxu1 %v20080_v14  ;;  %v20116_v13 = vld [vmem:[%s22898_s13 + $0x2364] ss:$16 sps:$4 sm:$0xff]   ;;  %v20111_v14 = vld [vmem:[%s22898_s13 + $0x2160] ss:$16 sps:$4 sm:$0xff]  }
 0x26a   : > { %13761 = vmatpush1.bf16.msra.mxu0 %v20075_v15  ;;  %v20114_v15 = vld [vmem:[%s22898_s13 + $0x2360] ss:$16 sps:$4 sm:$0xff]  }
 0x26b   : > { %13802 = vmatpush1.bf16.msra.mxu1 %v20078_v19  ;;  %13762 = vmatprep.subr.bf16.mxu0 %v20083_v4  ;;  %v20119_v19 = vld [vmem:[%s22898_s13 + $0x2144] ss:$16 sps:$4 sm:$0xff]  }
 0x26c   : > { %13803 = vmatprep.subr.bf16.mxu1 %v20086_v30  ;;  %v20122_v4 = vld [vmem:[%s22898_s13 + $0x2344] ss:$16 sps:$4 sm:$0xff]   ;;  %v20117_v30 = vld [vmem:[%s22898_s13 + $0x2140] ss:$16 sps:$4 sm:$0xff]  }
 0x26e   : > { %13763 = vmatpush1.bf16.msra.mxu0 %v20081_v3  ;;  %v20120_v3 = vld [vmem:[%s22898_s13 + $0x2340] ss:$16 sps:$4 sm:$0xff]  }
 0x26f   : > { %13804 = vmatpush1.bf16.msra.mxu1 %v20084_v34  ;;  %13764 = vmatprep.subr.bf16.mxu0 %v20089_v41  ;;  %v20125_v34 = vld [vmem:[%s22898_s13 + $0x2124] ss:$16 sps:$4 sm:$0xff]  }
 0x270   : > { %13805 = vmatprep.subr.bf16.mxu1 %v20092_v46  ;;  %v20128_v41 = vld [vmem:[%s22898_s13 + $0x2324] ss:$16 sps:$4 sm:$0xff]   ;;  %v20123_v46 = vld [vmem:[%s22898_s13 + $0x2120] ss:$16 sps:$4 sm:$0xff]  }
 0x272   : > { %13765 = vmatpush2.bf16.msra.mxu0 %v20087_v28  ;;  %v20126_v28 = vld [vmem:[%s22898_s13 + $0x2320] ss:$16 sps:$4 sm:$0xff]  }
 0x273   : > { %13806 = vmatpush2.bf16.msra.mxu1 %v20090_v22  ;;  %13766 = vmatprep.subr.bf16.mxu0 %v20095_v44  ;;  %v20131_v22 = vld [vmem:[%s22898_s13 + $0x2104] ss:$16 sps:$4 sm:$0xff]  }
 0x274   : > { %13807 = vmatprep.subr.bf16.mxu1 %v20098_v53  ;;  %v20134_v44 = vld [vmem:[%s22898_s13 + $0x2304] ss:$16 sps:$4 sm:$0xff]   ;;  %v20129_v53 = vld [vmem:[%s22898_s13 + $0x2100] ss:$16 sps:$4 sm:$0xff]  }
 0x276   : > { %13767 = vmatpush2.bf16.msra.mxu0 %v20093_v45  ;;  %v20132_v45 = vld [vmem:[%s22898_s13 + $0x2300] ss:$16 sps:$4 sm:$0xff]  }
 0x277   : > { %13808 = vmatpush2.bf16.msra.mxu1 %v20096_v48  ;;  %13768 = vmatprep.subr.bf16.mxu0 %v20101_v49  ;;  %v20141_v48 = vld [vmem:[%s22898_s13 + $0x24e4] ss:$16 sps:$4 sm:$0xff]  }
 0x278   : > { %13809 = vmatprep.subr.bf16.mxu1 %v20104_v50  ;;  %v20144_v49 = vld [vmem:[%s22898_s13 + $0x26e4] ss:$16 sps:$4 sm:$0xff]   ;;  %v20139_v50 = vld [vmem:[%s22898_s13 + $0x24e0] ss:$16 sps:$4 sm:$0xff]  }
 0x27a   : > { %13769 = vmatpush2.bf16.msra.mxu0 %v20099_v27  ;;  %v20142_v27 = vld [vmem:[%s22898_s13 + $0x26e0] ss:$16 sps:$4 sm:$0xff]  }
 0x27b   : > { %13810 = vmatpush2.bf16.msra.mxu1 %v20102_v52  ;;  %13770 = vmatprep.subr.bf16.mxu0 %v20107_v26  ;;  %v23776_v52 = vcombine.low %v23685_v33, %v23685_v33  ;;  %v23780_v26 = vcombine.low %v23690_v57, %v23690_v57  ;;  %v20147_v33 = vld [vmem:[%s22898_s13 + $0x24c4] ss:$16 sps:$4 sm:$0xff]   ;;  %v20148_v57 = vld [vmem:[%s22898_s13 + $0x26c0] ss:$16 sps:$4 sm:$0xff]  }
 0x27c   : > { %13811 = vmatprep.subr.bf16.mxu1 %v20110_v58  ;;  %v23785_v58 = vld [vmem:[%s25971_s0 + $0x90] sm:$0xff] }
 0x27e   : > { %13771 = vmatpush2.bf16.msra.mxu0 %v20105_v61  ;;  %v23790_v61 = vld [vmem:[%s25971_s0 + $0x98] sm:$0xff] }
 0x27f   : > { %13812 = vmatpush2.bf16.msra.mxu1 %v20108_v29  ;;  %13772 = vmatprep.subr.bf16.mxu0 %v20113_v62  ;;  %v20150_v29 = vld [vmem:[%s22898_s13 + $0x26c4] ss:$16 sps:$4 sm:$0xff]   ;;  %v20145_v62 = vld [vmem:[%s22898_s13 + $0x24c0] ss:$16 sps:$4 sm:$0xff]  }
 0x280   : > { %13813 = vmatprep.subr.bf16.mxu1 %v20116_v13  ;;  %v23798_v13 = vcombine.high %v23785_v58, %v23785_v58 }
 0x282   : > { %13773 = vmatpush2.bf16.msra.mxu0 %v20111_v14  ;;  %v23802_v14 = vcombine.high %v23790_v61, %v23790_v61 }
 0x283   : > { %13814 = vmatpush2.bf16.msra.mxu1 %v20114_v15  ;;  %13774 = vmatprep.subr.bf16.mxu0 %v20119_v19 }
 0x284   : > { %13815 = vmatprep.subr.bf16.mxu1 %v20122_v4 }
 0x286   : > { %13775 = vmatpush2.bf16.msra.mxu0 %v20117_v30 }
 0x287   : > { %13816 = vmatpush2.bf16.msra.mxu1 %v20120_v3  ;;  %13776 = vmatprep.subr.bf16.mxu0 %v20125_v34  ;;  %v20153_v34 = vld [vmem:[%s22898_s13 + $0x24a4] ss:$16 sps:$4 sm:$0xff]  }
 0x288   : > { %13817 = vmatprep.subr.bf16.mxu1 %v20128_v41  ;;  %v20156_v41 = vld [vmem:[%s22898_s13 + $0x26a4] ss:$16 sps:$4 sm:$0xff]  }
 0x28a   : > { %13777 = vmatpush2.bf16.msra.mxu0 %v20123_v46 }
 0x28b   : > { %13818 = vmatpush2.bf16.msra.mxu1 %v20126_v28  ;;  %13778 = vmatprep.subr.bf16.mxu0 %v20131_v22  ;;  %v20151_v22 = vld [vmem:[%s22898_s13 + $0x24a0] ss:$16 sps:$4 sm:$0xff]  }
 0x28c   : > { %13819 = vmatprep.subr.bf16.mxu1 %v20134_v44  ;;  %v20154_v44 = vld [vmem:[%s22898_s13 + $0x26a0] ss:$16 sps:$4 sm:$0xff]  }
 0x28e   : > { %13779 = vmatpush2.bf16.msra.mxu0 %v20129_v53 }
 0x28f   : > { %13820 = vmatpush2.bf16.msra.mxu1 %v20132_v45  ;;  %13830 = vmatprep.subr.bf16.mxu0 %v20141_v48 }
 0x290   : > { %13871 = vmatprep.subr.bf16.mxu1 %v20144_v49 }
 0x291   : > { %v13536_v15 = vpop.f32.mrf.mxu0  ;;  %13781 = vmatmul.mubr.bf16.vlgmr.msra.gmra.mxu0 %v23776_v52 }
 0x292   : > { %v13577_v19 = vpop.f32.mrf.mxu1  ;;  %13822 = vmatmul.mubr.bf16.vlgmr.msra.gmra.mxu1 %v23780_v26  ;;  %v13537_v4 = vadd.f32 %v13536_v15, %v23709_v31  ;;  %13831 = vmatpush1.bf16.msra.mxu0 %v20139_v50  ;;  %v20162_v50 = vld [vmem:[%s22898_s13 + $0x2684] ss:$16 sps:$4 sm:$0xff]   ;;  %v20166_v15 = vld [vmem:[%s22898_s13 + $0x2660] ss:$16 sps:$4 sm:$0xff]  }
 0x293   : > { %13872 = vmatpush1.bf16.msra.mxu1 %v20142_v27  ;;  %v13538_v30 = vpop.f32.mrf.mxu0  ;;  %13832 = vmatprep.subr.bf16.mxu0 %v20147_v33  ;;  %v20157_v27 = vld [vmem:[%s22898_s13 + $0x2480] ss:$16 sps:$4 sm:$0xff]  }
 0x294   : > { %v13579_v3 = vpop.f32.mrf.mxu1  ;;  %13873 = vmatprep.subr.bf16.mxu1 %v20150_v29  ;;  %v23809_v46 = vadd.f32 %v13577_v19, %v13537_v4  ;;  %v13539_v28 = vadd.f32 %v13538_v30, %v23716_v42  ;;  %13862 = vmatprep.mubr.bf16.mxu0 %v23798_v13  ;;  %v20159_v42 = vld [vmem:[%s22898_s13 + $0x2484] ss:$16 sps:$4 sm:$0xff]   ;;  %v20160_v33 = vld [vmem:[%s22898_s13 + $0x2680] ss:$16 sps:$4 sm:$0xff]  }
 0x295   : > { %13903 = vmatprep.mubr.bf16.mxu1 %v23802_v14  ;;  %v13540_v31 = vpop.f32.mrf.mxu0  ;;  %v20165_v29 = vld [vmem:[%s22898_s13 + $0x2464] ss:$16 sps:$4 sm:$0xff]   ;;  %v20169_v30 = vld [vmem:[%s22898_s13 + $0x2440] ss:$16 sps:$4 sm:$0xff]  }
 0x296   : > { %v13581_v53 = vpop.f32.mrf.mxu1  ;;  %v23816_v45 = vadd.f32 %v13579_v3, %v13539_v28  ;;  %13833 = vmatpush1.bf16.msra.mxu0 %v20145_v62  ;;  %v20168_v62 = vld [vmem:[%s22898_s13 + $0x2664] ss:$16 sps:$4 sm:$0xff]   ;;  %v20172_v3 = vld [vmem:[%s22898_s13 + $0x2640] ss:$16 sps:$4 sm:$0xff]  }
 0x297   : > { %13874 = vmatpush1.bf16.msra.mxu1 %v20148_v57  ;;  %v13541_v48 = vpop.f32.mrf.mxu0  ;;  %13834 = vmatprep.subr.bf16.mxu0 %v20153_v34  ;;  %v20163_v57 = vld [vmem:[%s22898_s13 + $0x2460] ss:$16 sps:$4 sm:$0xff]   ;;  %v20171_v19 = vld [vmem:[%s22898_s13 + $0x2444] ss:$16 sps:$4 sm:$0xff]  }
 0x298   : > { %v13582_v49 = vpop.f32.mrf.mxu1  ;;  %13875 = vmatprep.subr.bf16.mxu1 %v20156_v41  ;;  %v20174_v4 = vld [vmem:[%s22898_s13 + $0x2644] ss:$16 sps:$4 sm:$0xff]   ;;  %v20175_v28 = vld [vmem:[%s22898_s13 + $0x2420] ss:$16 sps:$4 sm:$0xff]  }
 0x299   : > { %v20177_v34 = vld [vmem:[%s22898_s13 + $0x2424] ss:$16 sps:$4 sm:$0xff]   ;;  %v20181_v53 = vld [vmem:[%s22898_s13 + $0x2400] ss:$16 sps:$4 sm:$0xff]  }
 0x29a   : > { %13835 = vmatpush1.bf16.msra.mxu0 %v20151_v22  ;;  %v20180_v41 = vld [vmem:[%s22898_s13 + $0x2624] ss:$16 sps:$4 sm:$0xff]   ;;  %v20178_v22 = vld [vmem:[%s22898_s13 + $0x2620] ss:$16 sps:$4 sm:$0xff]  }
 0x29b   : > { %13876 = vmatpush1.bf16.msra.mxu1 %v20154_v44  ;;  %13836 = vmatprep.subr.bf16.mxu0 %v20159_v42  ;;  %v20183_v44 = vld [vmem:[%s22898_s13 + $0x2404] ss:$16 sps:$4 sm:$0xff]   ;;  %v20184_v48 = vld [vmem:[%s22898_s13 + $0x2600] ss:$16 sps:$4 sm:$0xff]  }
 0x29c   : > { %13877 = vmatprep.subr.bf16.mxu1 %v20162_v50  ;;  %v20186_v31 = vld [vmem:[%s22898_s13 + $0x2604] ss:$16 sps:$4 sm:$0xff]   ;;  %v20187_v50 = vld [vmem:[%s22898_s13 + $0x25e0] ss:$16 sps:$4 sm:$0xff]  }
 0x29d   : > { %v20189_v49 = vld [vmem:[%s22898_s13 + $0x25e4] ss:$16 sps:$4 sm:$0xff]  }
 0x29e   : > { %13837 = vmatpush1.bf16.msra.mxu0 %v20157_v27  ;;  %v20192_v42 = vld [vmem:[%s22898_s13 + $0x27e4] ss:$16 sps:$4 sm:$0xff]   ;;  %v20190_v27 = vld [vmem:[%s22898_s13 + $0x27e0] ss:$16 sps:$4 sm:$0xff]  }
 0x29f   : > { %13878 = vmatpush1.bf16.msra.mxu1 %v20160_v33  ;;  %13838 = vmatprep.subr.bf16.mxu0 %v20165_v29  ;;  %v20195_v33 = vld [vmem:[%s22898_s13 + $0x25c4] ss:$16 sps:$4 sm:$0xff]  }
 0x2a0   : > { %13879 = vmatprep.subr.bf16.mxu1 %v20168_v62  ;;  %v20198_v29 = vld [vmem:[%s22898_s13 + $0x27c4] ss:$16 sps:$4 sm:$0xff]   ;;  %v20193_v62 = vld [vmem:[%s22898_s13 + $0x25c0] ss:$16 sps:$4 sm:$0xff]  }
 0x2a2   : > { %13839 = vmatpush1.bf16.msra.mxu0 %v20163_v57  ;;  %v20196_v57 = vld [vmem:[%s22898_s13 + $0x27c0] ss:$16 sps:$4 sm:$0xff]  }
 0x2a3   : > { %13880 = vmatpush1.bf16.msra.mxu1 %v20166_v15  ;;  %13840 = vmatprep.subr.bf16.mxu0 %v20171_v19  ;;  %v20201_v15 = vld [vmem:[%s22898_s13 + $0x25a4] ss:$16 sps:$4 sm:$0xff]  }
 0x2a4   : > { %13881 = vmatprep.subr.bf16.mxu1 %v20174_v4  ;;  %v20204_v19 = vld [vmem:[%s22898_s13 + $0x27a4] ss:$16 sps:$4 sm:$0xff]   ;;  %v20199_v4 = vld [vmem:[%s22898_s13 + $0x25a0] ss:$16 sps:$4 sm:$0xff]  }
 0x2a6   : > { %13841 = vmatpush1.bf16.msra.mxu0 %v20169_v30  ;;  %v20202_v30 = vld [vmem:[%s22898_s13 + $0x27a0] ss:$16 sps:$4 sm:$0xff]  }
 0x2a7   : > { %13882 = vmatpush1.bf16.msra.mxu1 %v20172_v3  ;;  %13842 = vmatprep.subr.bf16.mxu0 %v20177_v34  ;;  %v20207_v3 = vld [vmem:[%s22898_s13 + $0x2584] ss:$16 sps:$4 sm:$0xff]  }
 0x2a8   : > { %13883 = vmatprep.subr.bf16.mxu1 %v20180_v41  ;;  %v20210_v34 = vld [vmem:[%s22898_s13 + $0x2784] ss:$16 sps:$4 sm:$0xff]   ;;  %v20205_v41 = vld [vmem:[%s22898_s13 + $0x2580] ss:$16 sps:$4 sm:$0xff]  }
 0x2aa   : > { %13843 = vmatpush1.bf16.msra.mxu0 %v20175_v28  ;;  %v20208_v28 = vld [vmem:[%s22898_s13 + $0x2780] ss:$16 sps:$4 sm:$0xff]  }
 0x2ab   : > { %13884 = vmatpush1.bf16.msra.mxu1 %v20178_v22  ;;  %13844 = vmatprep.subr.bf16.mxu0 %v20183_v44  ;;  %v20213_v22 = vld [vmem:[%s22898_s13 + $0x2564] ss:$16 sps:$4 sm:$0xff]  }
 0x2ac   : > { %13885 = vmatprep.subr.bf16.mxu1 %v20186_v31  ;;  %v20216_v44 = vld [vmem:[%s22898_s13 + $0x2764] ss:$16 sps:$4 sm:$0xff]   ;;  %v20211_v31 = vld [vmem:[%s22898_s13 + $0x2560] ss:$16 sps:$4 sm:$0xff]  }
 0x2ae   : > { %13845 = vmatpush1.bf16.msra.mxu0 %v20181_v53  ;;  %v20214_v53 = vld [vmem:[%s22898_s13 + $0x2760] ss:$16 sps:$4 sm:$0xff]  }
 0x2af   : > { %13886 = vmatpush1.bf16.msra.mxu1 %v20184_v48  ;;  %13846 = vmatprep.subr.bf16.mxu0 %v20189_v49  ;;  %v20219_v48 = vld [vmem:[%s22898_s13 + $0x2544] ss:$16 sps:$4 sm:$0xff]  }
 0x2b0   : > { %13887 = vmatprep.subr.bf16.mxu1 %v20192_v42  ;;  %v20222_v49 = vld [vmem:[%s22898_s13 + $0x2744] ss:$16 sps:$4 sm:$0xff]   ;;  %v20217_v42 = vld [vmem:[%s22898_s13 + $0x2540] ss:$16 sps:$4 sm:$0xff]  }
 0x2b2   : > { %13847 = vmatpush2.bf16.msra.mxu0 %v20187_v50  ;;  %v20220_v50 = vld [vmem:[%s22898_s13 + $0x2740] ss:$16 sps:$4 sm:$0xff]  }
 0x2b3   : > { %13888 = vmatpush2.bf16.msra.mxu1 %v20190_v27  ;;  %13848 = vmatprep.subr.bf16.mxu0 %v20195_v33  ;;  %v20225_v27 = vld [vmem:[%s22898_s13 + $0x2524] ss:$16 sps:$4 sm:$0xff]  }
 0x2b4   : > { %13889 = vmatprep.subr.bf16.mxu1 %v20198_v29  ;;  %v20228_v33 = vld [vmem:[%s22898_s13 + $0x2724] ss:$16 sps:$4 sm:$0xff]   ;;  %v20223_v29 = vld [vmem:[%s22898_s13 + $0x2520] ss:$16 sps:$4 sm:$0xff]  }
 0x2b6   : > { %13849 = vmatpush2.bf16.msra.mxu0 %v20193_v62  ;;  %v20226_v62 = vld [vmem:[%s22898_s13 + $0x2720] ss:$16 sps:$4 sm:$0xff]  }
 0x2b7   : > { %13890 = vmatpush2.bf16.msra.mxu1 %v20196_v57  ;;  %13850 = vmatprep.subr.bf16.mxu0 %v20201_v15  ;;  %v20231_v57 = vld [vmem:[%s22898_s13 + $0x2504] ss:$16 sps:$4 sm:$0xff]  }
 0x2b8   : > { %13891 = vmatprep.subr.bf16.mxu1 %v20204_v19  ;;  %v20234_v15 = vld [vmem:[%s22898_s13 + $0x2704] ss:$16 sps:$4 sm:$0xff]   ;;  %v20229_v19 = vld [vmem:[%s22898_s13 + $0x2500] ss:$16 sps:$4 sm:$0xff]  }
 0x2ba   : > { %13851 = vmatpush2.bf16.msra.mxu0 %v20199_v4  ;;  %v20232_v4 = vld [vmem:[%s22898_s13 + $0x2700] ss:$16 sps:$4 sm:$0xff]  }
 0x2bb   : > { %13892 = vmatpush2.bf16.msra.mxu1 %v20202_v30  ;;  %13852 = vmatprep.subr.bf16.mxu0 %v20207_v3  ;;  %v20241_v30 = vld [vmem:[%s22898_s13 + $0x28e4] ss:$16 sps:$4 sm:$0xff]  }
 0x2bc   : > { %13893 = vmatprep.subr.bf16.mxu1 %v20210_v34  ;;  %v20244_v3 = vld [vmem:[%s22898_s13 + $0x2ae4] ss:$16 sps:$4 sm:$0xff]   ;;  %v20239_v34 = vld [vmem:[%s22898_s13 + $0x28e0] ss:$16 sps:$4 sm:$0xff]  }
 0x2be   : > { %13853 = vmatpush2.bf16.msra.mxu0 %v20205_v41  ;;  %v20242_v41 = vld [vmem:[%s22898_s13 + $0x2ae0] ss:$16 sps:$4 sm:$0xff]  }
 0x2bf   : > { %13894 = vmatpush2.bf16.msra.mxu1 %v20208_v28  ;;  %13854 = vmatprep.subr.bf16.mxu0 %v20213_v22  ;;  %v23876_v28 = vcombine.low %v23785_v58, %v23785_v58  ;;  %v23880_v22 = vcombine.low %v23790_v61, %v23790_v61  ;;  %v20247_v58 = vld [vmem:[%s22898_s13 + $0x28c4] ss:$16 sps:$4 sm:$0xff]   ;;  %v20248_v61 = vld [vmem:[%s22898_s13 + $0x2ac0] ss:$16 sps:$4 sm:$0xff]  }
 0x2c0   : > { %13895 = vmatprep.subr.bf16.mxu1 %v20216_v44  ;;  %v23885_v44 = vld [vmem:[%s25971_s0 + $0xa0] sm:$0xff] }
 0x2c1   : > { %26006 = vst [vmem:[#allocation9_spill] sm:$0xff] %v23880_v22 }
 0x2c2   : > { %13855 = vmatpush2.bf16.msra.mxu0 %v20211_v31  ;;  %v23890_v31 = vld [vmem:[%s25971_s0 + $0xa8] sm:$0xff] }
 0x2c3   : > { %13896 = vmatpush2.bf16.msra.mxu1 %v20214_v53  ;;  %13856 = vmatprep.subr.bf16.mxu0 %v20219_v48  ;;  %v20250_v53 = vld [vmem:[%s22898_s13 + $0x2ac4] ss:$16 sps:$4 sm:$0xff]   ;;  %v20245_v48 = vld [vmem:[%s22898_s13 + $0x28c0] ss:$16 sps:$4 sm:$0xff]  }
 0x2c4   : > { %13897 = vmatprep.subr.bf16.mxu1 %v20222_v49  ;;  %v23898_v49 = vcombine.high %v23885_v44, %v23885_v44 }
 0x2c6   : > { %13857 = vmatpush2.bf16.msra.mxu0 %v20217_v42  ;;  %26007 = vst [vmem:[#allocation10_spill] sm:$0xff] %v23898_v49  ;;  %v23902_v42 = vcombine.high %v23890_v31, %v23890_v31 }
 0x2c7   : > { %13898 = vmatpush2.bf16.msra.mxu1 %v20220_v50  ;;  %13858 = vmatprep.subr.bf16.mxu0 %v20225_v27 }
 0x2c8   : > { %13899 = vmatprep.subr.bf16.mxu1 %v20228_v33  ;;  %26008 = vst [vmem:[#allocation11_spill] sm:$0xff] %v23902_v42 }
 0x2ca   : > { %13859 = vmatpush2.bf16.msra.mxu0 %v20223_v29 }
 0x2cb   : > { %13900 = vmatpush2.bf16.msra.mxu1 %v20226_v62  ;;  %13860 = vmatprep.subr.bf16.mxu0 %v20231_v57  ;;  %v20253_v57 = vld [vmem:[%s22898_s13 + $0x28a4] ss:$16 sps:$4 sm:$0xff]  }
 0x2cc   : > { %13901 = vmatprep.subr.bf16.mxu1 %v20234_v15  ;;  %v20256_v15 = vld [vmem:[%s22898_s13 + $0x2aa4] ss:$16 sps:$4 sm:$0xff]  }
 0x2ce   : > { %13861 = vmatpush2.bf16.msra.mxu0 %v20229_v19 }
 0x2cf   : > { %13902 = vmatpush2.bf16.msra.mxu1 %v20232_v4  ;;  %13912 = vmatprep.subr.bf16.mxu0 %v20241_v30  ;;  %v20251_v30 = vld [vmem:[%s22898_s13 + $0x28a0] ss:$16 sps:$4 sm:$0xff]  }
 0x2d0   : > { %13953 = vmatprep.subr.bf16.mxu1 %v20244_v3  ;;  %v20254_v3 = vld [vmem:[%s22898_s13 + $0x2aa0] ss:$16 sps:$4 sm:$0xff]  }
 0x2d1   : > { %v13618_v50 = vpop.f32.mrf.mxu0  ;;  %13863 = vmatmul.mubr.bf16.vlgmr.msra.gmra.mxu0 %v23876_v28 }
 0x2d2   : > { %v13659_v27 = vpop.f32.mrf.mxu1  ;;  %13904 = vmatmul.mubr.bf16.vlgmr.msra.gmra.mxu1 %v23880_v22  ;;  %v13619_v33 = vadd.f32 %v13618_v50, %v23809_v46  ;;  %13913 = vmatpush1.bf16.msra.mxu0 %v20239_v34  ;;  %v20262_v50 = vld [vmem:[%s22898_s13 + $0x2a84] ss:$16 sps:$4 sm:$0xff]  }
 0x2d3   : > { %13954 = vmatpush1.bf16.msra.mxu1 %v20242_v41  ;;  %v13620_v29 = vpop.f32.mrf.mxu0  ;;  %13914 = vmatprep.subr.bf16.mxu0 %v20247_v58 }
 0x2d4   : > { %v13661_v62 = vpop.f32.mrf.mxu1  ;;  %13955 = vmatprep.subr.bf16.mxu1 %v20250_v53  ;;  %v23909_v19 = vadd.f32 %v13659_v27, %v13619_v33  ;;  %v13621_v4 = vadd.f32 %v13620_v29, %v23816_v45  ;;  %13944 = vmatprep.mubr.bf16.mxu0 %v23898_v49  ;;  %v20259_v45 = vld [vmem:[%s22898_s13 + $0x2884] ss:$16 sps:$4 sm:$0xff]   ;;  %v20257_v27 = vld [vmem:[%s22898_s13 + $0x2880] ss:$16 sps:$4 sm:$0xff]  }
 0x2d5   : > { %13985 = vmatprep.mubr.bf16.mxu1 %v23902_v42  ;;  %v13622_v46 = vpop.f32.mrf.mxu0  ;;  %v20260_v33 = vld [vmem:[%s22898_s13 + $0x2a80] ss:$16 sps:$4 sm:$0xff]  }
 0x2d6   : > { %v13663_v34 = vpop.f32.mrf.mxu1  ;;  %v23916_v41 = vadd.f32 %v13661_v62, %v13621_v4  ;;  %13915 = vmatpush1.bf16.msra.mxu0 %v20245_v48  ;;  %v20265_v48 = vld [vmem:[%s22898_s13 + $0x2864] ss:$16 sps:$4 sm:$0xff]   ;;  %v20263_v29 = vld [vmem:[%s22898_s13 + $0x2860] ss:$16 sps:$4 sm:$0xff]  }
 0x2d7   : > { %13956 = vmatpush1.bf16.msra.mxu1 %v20248_v61  ;;  %v13623_v58 = vpop.f32.mrf.mxu0  ;;  %13916 = vmatprep.subr.bf16.mxu0 %v20253_v57  ;;  %v20268_v61 = vld [vmem:[%s22898_s13 + $0x2a64] ss:$16 sps:$4 sm:$0xff]   ;;  %v20266_v62 = vld [vmem:[%s22898_s13 + $0x2a60] ss:$16 sps:$4 sm:$0xff]  }
 0x2d8   : > { %v13664_v53 = vpop.f32.mrf.mxu1  ;;  %13957 = vmatprep.subr.bf16.mxu1 %v20256_v15  ;;  %v20271_v57 = vld [vmem:[%s22898_s13 + $0x2844] ss:$16 sps:$4 sm:$0xff]   ;;  %v20269_v4 = vld [vmem:[%s22898_s13 + $0x2840] ss:$16 sps:$4 sm:$0xff]  }
 0x2d9   : > { %v20274_v15 = vld [vmem:[%s22898_s13 + $0x2a44] ss:$16 sps:$4 sm:$0xff]   ;;  %v20275_v34 = vld [vmem:[%s22898_s13 + $0x2820] ss:$16 sps:$4 sm:$0xff]  }
 0x2da   : > { %13917 = vmatpush1.bf16.msra.mxu0 %v20251_v30  ;;  %v20272_v30 = vld [vmem:[%s22898_s13 + $0x2a40] ss:$16 sps:$4 sm:$0xff]   ;;  %v20280_v46 = vld [vmem:[%s22898_s13 + $0x2a24] ss:$16 sps:$4 sm:$0xff]  }
 0x2db   : > { %13958 = vmatpush1.bf16.msra.mxu1 %v20254_v3  ;;  %13918 = vmatprep.subr.bf16.mxu0 %v20259_v45  ;;  %v20277_v3 = vld [vmem:[%s22898_s13 + $0x2824] ss:$16 sps:$4 sm:$0xff]   ;;  %v20278_v58 = vld [vmem:[%s22898_s13 + $0x2a20] ss:$16 sps:$4 sm:$0xff]  }
 0x2dc   : > { %13959 = vmatprep.subr.bf16.mxu1 %v20262_v50  ;;  %v20283_v53 = vld [vmem:[%s22898_s13 + $0x2804] ss:$16 sps:$4 sm:$0xff]   ;;  %v20281_v50 = vld [vmem:[%s22898_s13 + $0x2800] ss:$16 sps:$4 sm:$0xff]  }
 0x2dd   : > { %v20286_v45 = vld [vmem:[%s22898_s13 + $0x2a04] ss:$16 sps:$4 sm:$0xff]   ;;  %v20351_v49 = vld [vmem:[%s22898_s13 + $0x2ca0] ss:$16 sps:$4 sm:$0xff]  }
 0x2de   : > { %13919 = vmatpush1.bf16.msra.mxu0 %v20257_v27  ;;  %v20284_v27 = vld [vmem:[%s22898_s13 + $0x2a00] ss:$16 sps:$4 sm:$0xff]  }
 0x2df   : > { %13960 = vmatpush1.bf16.msra.mxu1 %v20260_v33  ;;  %13920 = vmatprep.subr.bf16.mxu0 %v20265_v48  ;;  %v20289_v33 = vld [vmem:[%s22898_s13 + $0x29e4] ss:$16 sps:$4 sm:$0xff]  }
 0x2e0   : > { %13961 = vmatprep.subr.bf16.mxu1 %v20268_v61  ;;  %v20292_v48 = vld [vmem:[%s22898_s13 + $0x2be4] ss:$16 sps:$4 sm:$0xff]   ;;  %v20287_v61 = vld [vmem:[%s22898_s13 + $0x29e0] ss:$16 sps:$4 sm:$0xff]  }
 0x2e2   : > { %13921 = vmatpush1.bf16.msra.mxu0 %v20263_v29  ;;  %v20290_v29 = vld [vmem:[%s22898_s13 + $0x2be0] ss:$16 sps:$4 sm:$0xff]  }
 0x2e3   : > { %13962 = vmatpush1.bf16.msra.mxu1 %v20266_v62  ;;  %13922 = vmatprep.subr.bf16.mxu0 %v20271_v57  ;;  %v20295_v62 = vld [vmem:[%s22898_s13 + $0x29c4] ss:$16 sps:$4 sm:$0xff]  }
 0x2e4   : > { %13963 = vmatprep.subr.bf16.mxu1 %v20274_v15  ;;  %v20298_v57 = vld [vmem:[%s22898_s13 + $0x2bc4] ss:$16 sps:$4 sm:$0xff]   ;;  %v20293_v15 = vld [vmem:[%s22898_s13 + $0x29c0] ss:$16 sps:$4 sm:$0xff]  }
 0x2e6   : > { %13923 = vmatpush1.bf16.msra.mxu0 %v20269_v4  ;;  %v20296_v4 = vld [vmem:[%s22898_s13 + $0x2bc0] ss:$16 sps:$4 sm:$0xff]  }
 0x2e7   : > { %13964 = vmatpush1.bf16.msra.mxu1 %v20272_v30  ;;  %13924 = vmatprep.subr.bf16.mxu0 %v20277_v3  ;;  %v20301_v30 = vld [vmem:[%s22898_s13 + $0x29a4] ss:$16 sps:$4 sm:$0xff]  }
 0x2e8   : > { %13965 = vmatprep.subr.bf16.mxu1 %v20280_v46  ;;  %v20304_v3 = vld [vmem:[%s22898_s13 + $0x2ba4] ss:$16 sps:$4 sm:$0xff]   ;;  %v20299_v46 = vld [vmem:[%s22898_s13 + $0x29a0] ss:$16 sps:$4 sm:$0xff]  }
 0x2ea   : > { %13925 = vmatpush1.bf16.msra.mxu0 %v20275_v34  ;;  %v20302_v34 = vld [vmem:[%s22898_s13 + $0x2ba0] ss:$16 sps:$4 sm:$0xff]  }
 0x2eb   : > { %13966 = vmatpush1.bf16.msra.mxu1 %v20278_v58  ;;  %13926 = vmatprep.subr.bf16.mxu0 %v20283_v53  ;;  %v20307_v58 = vld [vmem:[%s22898_s13 + $0x2984] ss:$16 sps:$4 sm:$0xff]  }
 0x2ec   : > { %13967 = vmatprep.subr.bf16.mxu1 %v20286_v45  ;;  %v20310_v53 = vld [vmem:[%s22898_s13 + $0x2b84] ss:$16 sps:$4 sm:$0xff]   ;;  %v20305_v45 = vld [vmem:[%s22898_s13 + $0x2980] ss:$16 sps:$4 sm:$0xff]  }
 0x2ee   : > { %13927 = vmatpush1.bf16.msra.mxu0 %v20281_v50  ;;  %v20308_v50 = vld [vmem:[%s22898_s13 + $0x2b80] ss:$16 sps:$4 sm:$0xff]  }
 0x2ef   : > { %13968 = vmatpush1.bf16.msra.mxu1 %v20284_v27  ;;  %13928 = vmatprep.subr.bf16.mxu0 %v20289_v33  ;;  %v20313_v27 = vld [vmem:[%s22898_s13 + $0x2964] ss:$16 sps:$4 sm:$0xff]  }
 0x2f0   : > { %13969 = vmatprep.subr.bf16.mxu1 %v20292_v48  ;;  %v20316_v33 = vld [vmem:[%s22898_s13 + $0x2b64] ss:$16 sps:$4 sm:$0xff]   ;;  %v20311_v48 = vld [vmem:[%s22898_s13 + $0x2960] ss:$16 sps:$4 sm:$0xff]  }
 0x2f2   : > { %13929 = vmatpush2.bf16.msra.mxu0 %v20287_v61  ;;  %v20314_v61 = vld [vmem:[%s22898_s13 + $0x2b60] ss:$16 sps:$4 sm:$0xff]  }
 0x2f3   : > { %13970 = vmatpush2.bf16.msra.mxu1 %v20290_v29  ;;  %13930 = vmatprep.subr.bf16.mxu0 %v20295_v62  ;;  %v20319_v29 = vld [vmem:[%s22898_s13 + $0x2944] ss:$16 sps:$4 sm:$0xff]  }
 0x2f4   : > { %13971 = vmatprep.subr.bf16.mxu1 %v20298_v57  ;;  %v20322_v62 = vld [vmem:[%s22898_s13 + $0x2b44] ss:$16 sps:$4 sm:$0xff]   ;;  %v20317_v57 = vld [vmem:[%s22898_s13 + $0x2940] ss:$16 sps:$4 sm:$0xff]  }
 0x2f6   : > { %13931 = vmatpush2.bf16.msra.mxu0 %v20293_v15  ;;  %v20320_v15 = vld [vmem:[%s22898_s13 + $0x2b40] ss:$16 sps:$4 sm:$0xff]  }
 0x2f7   : > { %13972 = vmatpush2.bf16.msra.mxu1 %v20296_v4  ;;  %13932 = vmatprep.subr.bf16.mxu0 %v20301_v30  ;;  %v20325_v4 = vld [vmem:[%s22898_s13 + $0x2924] ss:$16 sps:$4 sm:$0xff]  }
 0x2f8   : > { %13973 = vmatprep.subr.bf16.mxu1 %v20304_v3  ;;  %v20328_v30 = vld [vmem:[%s22898_s13 + $0x2b24] ss:$16 sps:$4 sm:$0xff]   ;;  %v20323_v3 = vld [vmem:[%s22898_s13 + $0x2920] ss:$16 sps:$4 sm:$0xff]  }
 0x2fa   : > { %13933 = vmatpush2.bf16.msra.mxu0 %v20299_v46  ;;  %v20326_v46 = vld [vmem:[%s22898_s13 + $0x2b20] ss:$16 sps:$4 sm:$0xff]  }
 0x2fb   : > { %13974 = vmatpush2.bf16.msra.mxu1 %v20302_v34  ;;  %13934 = vmatprep.subr.bf16.mxu0 %v20307_v58  ;;  %v20331_v34 = vld [vmem:[%s22898_s13 + $0x2904] ss:$16 sps:$4 sm:$0xff]  }
 0x2fc   : > { %13975 = vmatprep.subr.bf16.mxu1 %v20310_v53  ;;  %v20334_v58 = vld [vmem:[%s22898_s13 + $0x2b04] ss:$16 sps:$4 sm:$0xff]   ;;  %v20329_v53 = vld [vmem:[%s22898_s13 + $0x2900] ss:$16 sps:$4 sm:$0xff]  }
 0x2fe   : > { %13935 = vmatpush2.bf16.msra.mxu0 %v20305_v45  ;;  %v20332_v45 = vld [vmem:[%s22898_s13 + $0x2b00] ss:$16 sps:$4 sm:$0xff]  }
 0x2ff   : > { %13976 = vmatpush2.bf16.msra.mxu1 %v20308_v50  ;;  %13936 = vmatprep.subr.bf16.mxu0 %v20313_v27  ;;  %v20341_v50 = vld [vmem:[%s22898_s13 + $0x2ce4] ss:$16 sps:$4 sm:$0xff]  }
 0x300   : > { %13977 = vmatprep.subr.bf16.mxu1 %v20316_v33  ;;  %v20344_v27 = vld [vmem:[%s22898_s13 + $0x2ee4] ss:$16 sps:$4 sm:$0xff]   ;;  %v20339_v33 = vld [vmem:[%s22898_s13 + $0x2ce0] ss:$16 sps:$4 sm:$0xff]  }
 0x302   : > { %13937 = vmatpush2.bf16.msra.mxu0 %v20311_v48  ;;  %v20342_v48 = vld [vmem:[%s22898_s13 + $0x2ee0] ss:$16 sps:$4 sm:$0xff]  }
 0x303   : > { %13978 = vmatpush2.bf16.msra.mxu1 %v20314_v61  ;;  %13938 = vmatprep.subr.bf16.mxu0 %v20319_v29  ;;  %v23976_v61 = vcombine.low %v23885_v44, %v23885_v44  ;;  %v23980_v29 = vcombine.low %v23890_v31, %v23890_v31  ;;  %v20347_v44 = vld [vmem:[%s22898_s13 + $0x2cc4] ss:$16 sps:$4 sm:$0xff]   ;;  %v20348_v31 = vld [vmem:[%s22898_s13 + $0x2ec0] ss:$16 sps:$4 sm:$0xff]  }
 0x304   : > { %13979 = vmatprep.subr.bf16.mxu1 %v20322_v62  ;;  %v23985_v62 = vld [vmem:[%s25971_s0 + $0xb0] sm:$0xff] }
 0x305   : > { %26009 = vst [vmem:[#allocation12_spill] sm:$0xff] %v23976_v61  ;;  %26010 = vst [vmem:[#allocation13_spill] sm:$0xff] %v23980_v29 }
 0x306   : > { %13939 = vmatpush2.bf16.msra.mxu0 %v20317_v57  ;;  %v23990_v57 = vld [vmem:[%s25971_s0 + $0xb8] sm:$0xff] }
 0x307   : > { %13980 = vmatpush2.bf16.msra.mxu1 %v20320_v15  ;;  %13940 = vmatprep.subr.bf16.mxu0 %v20325_v4  ;;  %v20350_v15 = vld [vmem:[%s22898_s13 + $0x2ec4] ss:$16 sps:$4 sm:$0xff]   ;;  %v20345_v4 = vld [vmem:[%s22898_s13 + $0x2cc0] ss:$16 sps:$4 sm:$0xff]  }
 0x308   : > { %13981 = vmatprep.subr.bf16.mxu1 %v20328_v30  ;;  %v23998_v30 = vcombine.high %v23985_v62, %v23985_v62 }
 0x30a   : > { %13941 = vmatpush2.bf16.msra.mxu0 %v20323_v3  ;;  %26011 = vst [vmem:[#allocation14_spill] sm:$0xff] %v23998_v30  ;;  %v24002_v3 = vcombine.high %v23990_v57, %v23990_v57 }
 0x30b   : > { %13982 = vmatpush2.bf16.msra.mxu1 %v20326_v46  ;;  %13942 = vmatprep.subr.bf16.mxu0 %v20331_v34 }
 0x30c   : > { %13983 = vmatprep.subr.bf16.mxu1 %v20334_v58  ;;  %26012 = vst [vmem:[#allocation15_spill] sm:$0xff] %v24002_v3 }
 0x30e   : > { %13943 = vmatpush2.bf16.msra.mxu0 %v20329_v53 }
 0x30f   : > { %13984 = vmatpush2.bf16.msra.mxu1 %v20332_v45  ;;  %13994 = vmatprep.subr.bf16.mxu0 %v20341_v50  ;;  %v20353_v50 = vld [vmem:[%s22898_s13 + $0x2ca4] ss:$16 sps:$4 sm:$0xff]  }
 0x310   : > { %14035 = vmatprep.subr.bf16.mxu1 %v20344_v27  ;;  %v20356_v27 = vld [vmem:[%s22898_s13 + $0x2ea4] ss:$16 sps:$4 sm:$0xff]  }
 0x311   : > { %v13700_v46 = vpop.f32.mrf.mxu0  ;;  %13945 = vmatmul.mubr.bf16.vlgmr.msra.gmra.mxu0 %v23976_v61  ;;  %v20354_v61 = vld [vmem:[%s22898_s13 + $0x2ea0] ss:$16 sps:$4 sm:$0xff]  }
 0x312   : > { %v13741_v34 = vpop.f32.mrf.mxu1  ;;  %13986 = vmatmul.mubr.bf16.vlgmr.msra.gmra.mxu1 %v23980_v29  ;;  %v13701_v58 = vadd.f32 %v13700_v46, %v23909_v19  ;;  %13995 = vmatpush1.bf16.msra.mxu0 %v20339_v33  ;;  %v20362_v46 = vld [vmem:[%s22898_s13 + $0x2e84] ss:$16 sps:$4 sm:$0xff]  }
 0x313   : > { %14036 = vmatpush1.bf16.msra.mxu1 %v20342_v48  ;;  %v13702_v53 = vpop.f32.mrf.mxu0  ;;  %13996 = vmatprep.subr.bf16.mxu0 %v20347_v44 }
 0x314   : > { %v13743_v45 = vpop.f32.mrf.mxu1  ;;  %14037 = vmatprep.subr.bf16.mxu1 %v20350_v15  ;;  %v24009_v42 = vadd.f32 %v13741_v34, %v13701_v58  ;;  %v13703_v22 = vadd.f32 %v13702_v53, %v23916_v41  ;;  %14026 = vmatprep.mubr.bf16.mxu0 %v23998_v30  ;;  %v20359_v41 = vld [vmem:[%s22898_s13 + $0x2c84] ss:$16 sps:$4 sm:$0xff]   ;;  %v20357_v34 = vld [vmem:[%s22898_s13 + $0x2c80] ss:$16 sps:$4 sm:$0xff]  }
 0x315   : > { %14067 = vmatprep.mubr.bf16.mxu1 %v24002_v3  ;;  %v13704_v19 = vpop.f32.mrf.mxu0  ;;  %v20360_v58 = vld [vmem:[%s22898_s13 + $0x2e80] ss:$16 sps:$4 sm:$0xff]  }
 0x316   : > { %v13745_v33 = vpop.f32.mrf.mxu1  ;;  %v24016_v48 = vadd.f32 %v13743_v45, %v13703_v22  ;;  %13997 = vmatpush1.bf16.msra.mxu0 %v20345_v4  ;;  %v20365_v22 = vld [vmem:[%s22898_s13 + $0x2c64] ss:$16 sps:$4 sm:$0xff]   ;;  %v20366_v53 = vld [vmem:[%s22898_s13 + $0x2e60] ss:$16 sps:$4 sm:$0xff]  }
 0x317   : > { %14038 = vmatpush1.bf16.msra.mxu1 %v20348_v31  ;;  %v13705_v44 = vpop.f32.mrf.mxu0  ;;  %13998 = vmatprep.subr.bf16.mxu0 %v20353_v50  ;;  %v20368_v4 = vld [vmem:[%s22898_s13 + $0x2e64] ss:$16 sps:$4 sm:$0xff]   ;;  %v20363_v31 = vld [vmem:[%s22898_s13 + $0x2c60] ss:$16 sps:$4 sm:$0xff]  }
 0x318   : > { %v13746_v15 = vpop.f32.mrf.mxu1  ;;  %14039 = vmatprep.subr.bf16.mxu1 %v20356_v27  ;;  %v20369_v45 = vld [vmem:[%s22898_s13 + $0x2c40] ss:$16 sps:$4 sm:$0xff]   ;;  %v20377_v27 = vld [vmem:[%s22898_s13 + $0x2c24] ss:$16 sps:$4 sm:$0xff]  }
 0x319   : > { %v20372_v50 = vld [vmem:[%s22898_s13 + $0x2e40] ss:$16 sps:$4 sm:$0xff]   ;;  %v20380_v19 = vld [vmem:[%s22898_s13 + $0x2e24] ss:$16 sps:$4 sm:$0xff]  }
 0x31a   : > { %13999 = vmatpush1.bf16.msra.mxu0 %v20351_v49  ;;  %v20371_v49 = vld [vmem:[%s22898_s13 + $0x2c44] ss:$16 sps:$4 sm:$0xff]   ;;  %v20375_v33 = vld [vmem:[%s22898_s13 + $0x2c20] ss:$16 sps:$4 sm:$0xff]  }
 0x31b   : > { %14040 = vmatpush1.bf16.msra.mxu1 %v20354_v61  ;;  %14000 = vmatprep.subr.bf16.mxu0 %v20359_v41  ;;  %v20374_v61 = vld [vmem:[%s22898_s13 + $0x2e44] ss:$16 sps:$4 sm:$0xff]   ;;  %v20378_v44 = vld [vmem:[%s22898_s13 + $0x2e20] ss:$16 sps:$4 sm:$0xff]  }
 0x31c   : > { %14041 = vmatprep.subr.bf16.mxu1 %v20362_v46  ;;  %v20383_v15 = vld [vmem:[%s22898_s13 + $0x2c04] ss:$16 sps:$4 sm:$0xff]   ;;  %v20381_v46 = vld [vmem:[%s22898_s13 + $0x2c00] ss:$16 sps:$4 sm:$0xff]  }
 0x31d   : > { %v20386_v41 = vld [vmem:[%s22898_s13 + $0x2e04] ss:$16 sps:$4 sm:$0xff]   ;;  %v20451_v30 = vld [vmem:[%s22898_s13 + $0x30a0] ss:$16 sps:$4 sm:$0xff]  }
 0x31e   : > { %14001 = vmatpush1.bf16.msra.mxu0 %v20357_v34  ;;  %v20384_v34 = vld [vmem:[%s22898_s13 + $0x2e00] ss:$16 sps:$4 sm:$0xff]  }
 0x31f   : > { %14042 = vmatpush1.bf16.msra.mxu1 %v20360_v58  ;;  %14002 = vmatprep.subr.bf16.mxu0 %v20365_v22  ;;  %v20389_v58 = vld [vmem:[%s22898_s13 + $0x2de4] ss:$16 sps:$4 sm:$0xff]  }
 0x320   : > { %14043 = vmatprep.subr.bf16.mxu1 %v20368_v4  ;;  %v20392_v22 = vld [vmem:[%s22898_s13 + $0x2fe4] ss:$16 sps:$4 sm:$0xff]   ;;  %v20387_v4 = vld [vmem:[%s22898_s13 + $0x2de0] ss:$16 sps:$4 sm:$0xff]  }
 0x322   : > { %14003 = vmatpush1.bf16.msra.mxu0 %v20363_v31  ;;  %v20390_v31 = vld [vmem:[%s22898_s13 + $0x2fe0] ss:$16 sps:$4 sm:$0xff]  }
 0x323   : > { %14044 = vmatpush1.bf16.msra.mxu1 %v20366_v53  ;;  %14004 = vmatprep.subr.bf16.mxu0 %v20371_v49  ;;  %v20395_v53 = vld [vmem:[%s22898_s13 + $0x2dc4] ss:$16 sps:$4 sm:$0xff]  }
 0x324   : > { %14045 = vmatprep.subr.bf16.mxu1 %v20374_v61  ;;  %v20398_v49 = vld [vmem:[%s22898_s13 + $0x2fc4] ss:$16 sps:$4 sm:$0xff]   ;;  %v20393_v61 = vld [vmem:[%s22898_s13 + $0x2dc0] ss:$16 sps:$4 sm:$0xff]  }
 0x326   : > { %14005 = vmatpush1.bf16.msra.mxu0 %v20369_v45  ;;  %v20396_v45 = vld [vmem:[%s22898_s13 + $0x2fc0] ss:$16 sps:$4 sm:$0xff]  }
 0x327   : > { %14046 = vmatpush1.bf16.msra.mxu1 %v20372_v50  ;;  %14006 = vmatprep.subr.bf16.mxu0 %v20377_v27  ;;  %v20401_v50 = vld [vmem:[%s22898_s13 + $0x2da4] ss:$16 sps:$4 sm:$0xff]  }
 0x328   : > { %14047 = vmatprep.subr.bf16.mxu1 %v20380_v19  ;;  %v20404_v27 = vld [vmem:[%s22898_s13 + $0x2fa4] ss:$16 sps:$4 sm:$0xff]   ;;  %v20399_v19 = vld [vmem:[%s22898_s13 + $0x2da0] ss:$16 sps:$4 sm:$0xff]  }
 0x32a   : > { %14007 = vmatpush1.bf16.msra.mxu0 %v20375_v33  ;;  %v20402_v33 = vld [vmem:[%s22898_s13 + $0x2fa0] ss:$16 sps:$4 sm:$0xff]  }
 0x32b   : > { %14048 = vmatpush1.bf16.msra.mxu1 %v20378_v44  ;;  %14008 = vmatprep.subr.bf16.mxu0 %v20383_v15  ;;  %v20407_v44 = vld [vmem:[%s22898_s13 + $0x2d84] ss:$16 sps:$4 sm:$0xff]  }
 0x32c   : > { %14049 = vmatprep.subr.bf16.mxu1 %v20386_v41  ;;  %v20410_v15 = vld [vmem:[%s22898_s13 + $0x2f84] ss:$16 sps:$4 sm:$0xff]   ;;  %v20405_v41 = vld [vmem:[%s22898_s13 + $0x2d80] ss:$16 sps:$4 sm:$0xff]  }
 0x32e   : > { %14009 = vmatpush1.bf16.msra.mxu0 %v20381_v46  ;;  %v20408_v46 = vld [vmem:[%s22898_s13 + $0x2f80] ss:$16 sps:$4 sm:$0xff]  }
 0x32f   : > { %14050 = vmatpush1.bf16.msra.mxu1 %v20384_v34  ;;  %14010 = vmatprep.subr.bf16.mxu0 %v20389_v58  ;;  %v20413_v34 = vld [vmem:[%s22898_s13 + $0x2d64] ss:$16 sps:$4 sm:$0xff]  }
 0x330   : > { %14051 = vmatprep.subr.bf16.mxu1 %v20392_v22  ;;  %v20416_v58 = vld [vmem:[%s22898_s13 + $0x2f64] ss:$16 sps:$4 sm:$0xff]   ;;  %v20411_v22 = vld [vmem:[%s22898_s13 + $0x2d60] ss:$16 sps:$4 sm:$0xff]  }
 0x332   : > { %14011 = vmatpush2.bf16.msra.mxu0 %v20387_v4  ;;  %v20414_v4 = vld [vmem:[%s22898_s13 + $0x2f60] ss:$16 sps:$4 sm:$0xff]  }
 0x333   : > { %14052 = vmatpush2.bf16.msra.mxu1 %v20390_v31  ;;  %14012 = vmatprep.subr.bf16.mxu0 %v20395_v53  ;;  %v20419_v31 = vld [vmem:[%s22898_s13 + $0x2d44] ss:$16 sps:$4 sm:$0xff]  }
 0x334   : > { %14053 = vmatprep.subr.bf16.mxu1 %v20398_v49  ;;  %v20422_v53 = vld [vmem:[%s22898_s13 + $0x2f44] ss:$16 sps:$4 sm:$0xff]   ;;  %v20417_v49 = vld [vmem:[%s22898_s13 + $0x2d40] ss:$16 sps:$4 sm:$0xff]  }
 0x336   : > { %14013 = vmatpush2.bf16.msra.mxu0 %v20393_v61  ;;  %v20420_v61 = vld [vmem:[%s22898_s13 + $0x2f40] ss:$16 sps:$4 sm:$0xff]  }
 0x337   : > { %14054 = vmatpush2.bf16.msra.mxu1 %v20396_v45  ;;  %14014 = vmatprep.subr.bf16.mxu0 %v20401_v50  ;;  %v20425_v45 = vld [vmem:[%s22898_s13 + $0x2d24] ss:$16 sps:$4 sm:$0xff]  }
 0x338   : > { %14055 = vmatprep.subr.bf16.mxu1 %v20404_v27  ;;  %v20428_v50 = vld [vmem:[%s22898_s13 + $0x2f24] ss:$16 sps:$4 sm:$0xff]   ;;  %v20423_v27 = vld [vmem:[%s22898_s13 + $0x2d20] ss:$16 sps:$4 sm:$0xff]  }
 0x33a   : > { %14015 = vmatpush2.bf16.msra.mxu0 %v20399_v19  ;;  %v20426_v19 = vld [vmem:[%s22898_s13 + $0x2f20] ss:$16 sps:$4 sm:$0xff]  }
 0x33b   : > { %14056 = vmatpush2.bf16.msra.mxu1 %v20402_v33  ;;  %14016 = vmatprep.subr.bf16.mxu0 %v20407_v44  ;;  %v20431_v33 = vld [vmem:[%s22898_s13 + $0x2d04] ss:$16 sps:$4 sm:$0xff]  }
 0x33c   : > { %14057 = vmatprep.subr.bf16.mxu1 %v20410_v15  ;;  %v20434_v44 = vld [vmem:[%s22898_s13 + $0x2f04] ss:$16 sps:$4 sm:$0xff]   ;;  %v20429_v15 = vld [vmem:[%s22898_s13 + $0x2d00] ss:$16 sps:$4 sm:$0xff]  }
 0x33e   : > { %14017 = vmatpush2.bf16.msra.mxu0 %v20405_v41  ;;  %v20432_v41 = vld [vmem:[%s22898_s13 + $0x2f00] ss:$16 sps:$4 sm:$0xff]  }
 0x33f   : > { %14058 = vmatpush2.bf16.msra.mxu1 %v20408_v46  ;;  %14018 = vmatprep.subr.bf16.mxu0 %v20413_v34  ;;  %v20441_v46 = vld [vmem:[%s22898_s13 + $0x30e4] ss:$16 sps:$4 sm:$0xff]  }
 0x340   : > { %14059 = vmatprep.subr.bf16.mxu1 %v20416_v58  ;;  %v20444_v34 = vld [vmem:[%s22898_s13 + $0x32e4] ss:$16 sps:$4 sm:$0xff]   ;;  %v20439_v58 = vld [vmem:[%s22898_s13 + $0x30e0] ss:$16 sps:$4 sm:$0xff]  }
 0x342   : > { %14019 = vmatpush2.bf16.msra.mxu0 %v20411_v22  ;;  %v20442_v22 = vld [vmem:[%s22898_s13 + $0x32e0] ss:$16 sps:$4 sm:$0xff]  }
 0x343   : > { %14060 = vmatpush2.bf16.msra.mxu1 %v20414_v4  ;;  %14020 = vmatprep.subr.bf16.mxu0 %v20419_v31  ;;  %v24076_v4 = vcombine.low %v23985_v62, %v23985_v62  ;;  %v24080_v31 = vcombine.low %v23990_v57, %v23990_v57  ;;  %v20447_v62 = vld [vmem:[%s22898_s13 + $0x30c4] ss:$16 sps:$4 sm:$0xff]   ;;  %v20448_v57 = vld [vmem:[%s22898_s13 + $0x32c0] ss:$16 sps:$4 sm:$0xff]  }
 0x344   : > { %14061 = vmatprep.subr.bf16.mxu1 %v20422_v53  ;;  %v24085_v53 = vld [vmem:[%s25971_s0 + $0xc0] sm:$0xff] }
 0x345   : > { %26013 = vst [vmem:[#allocation16_spill] sm:$0xff] %v24076_v4  ;;  %26014 = vst [vmem:[#allocation17_spill] sm:$0xff] %v24080_v31 }
 0x346   : > { %14021 = vmatpush2.bf16.msra.mxu0 %v20417_v49  ;;  %v24090_v49 = vld [vmem:[%s25971_s0 + $0xc8] sm:$0xff] }
 0x347   : > { %14062 = vmatpush2.bf16.msra.mxu1 %v20420_v61  ;;  %14022 = vmatprep.subr.bf16.mxu0 %v20425_v45  ;;  %v20450_v61 = vld [vmem:[%s22898_s13 + $0x32c4] ss:$16 sps:$4 sm:$0xff]   ;;  %v20445_v45 = vld [vmem:[%s22898_s13 + $0x30c0] ss:$16 sps:$4 sm:$0xff]  }
 0x348   : > { %14063 = vmatprep.subr.bf16.mxu1 %v20428_v50  ;;  %v24098_v50 = vcombine.high %v24085_v53, %v24085_v53 }
 0x34a   : > { %14023 = vmatpush2.bf16.msra.mxu0 %v20423_v27  ;;  %26015 = vst [vmem:[#allocation18_spill] sm:$0xff] %v24098_v50  ;;  %v24102_v27 = vcombine.high %v24090_v49, %v24090_v49 }
 0x34b   : > { %14064 = vmatpush2.bf16.msra.mxu1 %v20426_v19  ;;  %14024 = vmatprep.subr.bf16.mxu0 %v20431_v33 }
 0x34c   : > { %14065 = vmatprep.subr.bf16.mxu1 %v20434_v44  ;;  %26016 = vst [vmem:[#allocation19_spill] sm:$0xff] %v24102_v27 }
 0x34e   : > { %14025 = vmatpush2.bf16.msra.mxu0 %v20429_v15 }
 0x34f   : > { %14066 = vmatpush2.bf16.msra.mxu1 %v20432_v41  ;;  %14076 = vmatprep.subr.bf16.mxu0 %v20441_v46  ;;  %v20453_v46 = vld [vmem:[%s22898_s13 + $0x30a4] ss:$16 sps:$4 sm:$0xff]  }
 0x350   : > { %14117 = vmatprep.subr.bf16.mxu1 %v20444_v34  ;;  %v20456_v34 = vld [vmem:[%s22898_s13 + $0x32a4] ss:$16 sps:$4 sm:$0xff]  }
 0x351   : > { %v13782_v19 = vpop.f32.mrf.mxu0  ;;  %14027 = vmatmul.mubr.bf16.vlgmr.msra.gmra.mxu0 %v24076_v4  ;;  %v20454_v4 = vld [vmem:[%s22898_s13 + $0x32a0] ss:$16 sps:$4 sm:$0xff]  }
 0x352   : > { %v13823_v33 = vpop.f32.mrf.mxu1  ;;  %14068 = vmatmul.mubr.bf16.vlgmr.msra.gmra.mxu1 %v24080_v31  ;;  %v13783_v44 = vadd.f32 %v13782_v19, %v24009_v42  ;;  %14077 = vmatpush1.bf16.msra.mxu0 %v20439_v58  ;;  %v20462_v19 = vld [vmem:[%s22898_s13 + $0x3284] ss:$16 sps:$4 sm:$0xff]  }
 0x353   : > { %14118 = vmatpush1.bf16.msra.mxu1 %v20442_v22  ;;  %v13784_v15 = vpop.f32.mrf.mxu0  ;;  %14078 = vmatprep.subr.bf16.mxu0 %v20447_v62 }
 0x354   : > { %v13825_v41 = vpop.f32.mrf.mxu1  ;;  %14119 = vmatprep.subr.bf16.mxu1 %v20450_v61  ;;  %v24109_v3 = vadd.f32 %v13823_v33, %v13783_v44  ;;  %v13785_v29 = vadd.f32 %v13784_v15, %v24016_v48  ;;  %14108 = vmatprep.mubr.bf16.mxu0 %v24098_v50  ;;  %v20459_v48 = vld [vmem:[%s22898_s13 + $0x3084] ss:$16 sps:$4 sm:$0xff]   ;;  %v20457_v33 = vld [vmem:[%s22898_s13 + $0x3080] ss:$16 sps:$4 sm:$0xff]  }
 0x355   : > { %14149 = vmatprep.mubr.bf16.mxu1 %v24102_v27  ;;  %v13786_v42 = vpop.f32.mrf.mxu0  ;;  %v20460_v44 = vld [vmem:[%s22898_s13 + $0x3280] ss:$16 sps:$4 sm:$0xff]  }
 0x356   : > { %v13827_v58 = vpop.f32.mrf.mxu1  ;;  %v24116_v22 = vadd.f32 %v13825_v41, %v13785_v29  ;;  %14079 = vmatpush1.bf16.msra.mxu0 %v20445_v45  ;;  %v20465_v29 = vld [vmem:[%s22898_s13 + $0x3064] ss:$16 sps:$4 sm:$0xff]   ;;  %v20466_v15 = vld [vmem:[%s22898_s13 + $0x3260] ss:$16 sps:$4 sm:$0xff]  }
 0x357   : > { %14120 = vmatpush1.bf16.msra.mxu1 %v20448_v57  ;;  %v13787_v62 = vpop.f32.mrf.mxu0  ;;  %14080 = vmatprep.subr.bf16.mxu0 %v20453_v46  ;;  %v20468_v45 = vld [vmem:[%s22898_s13 + $0x3264] ss:$16 sps:$4 sm:$0xff]   ;;  %v20463_v57 = vld [vmem:[%s22898_s13 + $0x3060] ss:$16 sps:$4 sm:$0xff]  }
 0x358   : > { %v13828_v61 = vpop.f32.mrf.mxu1  ;;  %14121 = vmatprep.subr.bf16.mxu1 %v20456_v34  ;;  %v20469_v41 = vld [vmem:[%s22898_s13 + $0x3040] ss:$16 sps:$4 sm:$0xff]   ;;  %v20477_v34 = vld [vmem:[%s22898_s13 + $0x3024] ss:$16 sps:$4 sm:$0xff]  }
 0x359   : > { %v20472_v46 = vld [vmem:[%s22898_s13 + $0x3240] ss:$16 sps:$4 sm:$0xff]   ;;  %v20480_v42 = vld [vmem:[%s22898_s13 + $0x3224] ss:$16 sps:$4 sm:$0xff]  }
 0x35a   : > { %14081 = vmatpush1.bf16.msra.mxu0 %v20451_v30  ;;  %v20471_v30 = vld [vmem:[%s22898_s13 + $0x3044] ss:$16 sps:$4 sm:$0xff]   ;;  %v20475_v58 = vld [vmem:[%s22898_s13 + $0x3020] ss:$16 sps:$4 sm:$0xff]  }
 0x35b   : > { %14122 = vmatpush1.bf16.msra.mxu1 %v20454_v4  ;;  %14082 = vmatprep.subr.bf16.mxu0 %v20459_v48  ;;  %v20474_v4 = vld [vmem:[%s22898_s13 + $0x3244] ss:$16 sps:$4 sm:$0xff]   ;;  %v20478_v62 = vld [vmem:[%s22898_s13 + $0x3220] ss:$16 sps:$4 sm:$0xff]  }
 0x35c   : > { %14123 = vmatprep.subr.bf16.mxu1 %v20462_v19  ;;  %v20483_v61 = vld [vmem:[%s22898_s13 + $0x3004] ss:$16 sps:$4 sm:$0xff]   ;;  %v20481_v19 = vld [vmem:[%s22898_s13 + $0x3000] ss:$16 sps:$4 sm:$0xff]  }
 0x35d   : > { %v20486_v48 = vld [vmem:[%s22898_s13 + $0x3204] ss:$16 sps:$4 sm:$0xff]   ;;  %v20551_v50 = vld [vmem:[%s22898_s13 + $0x34a0] ss:$16 sps:$4 sm:$0xff]  }
 0x35e   : > { %14083 = vmatpush1.bf16.msra.mxu0 %v20457_v33  ;;  %v20484_v33 = vld [vmem:[%s22898_s13 + $0x3200] ss:$16 sps:$4 sm:$0xff]  }
 0x35f   : > { %14124 = vmatpush1.bf16.msra.mxu1 %v20460_v44  ;;  %14084 = vmatprep.subr.bf16.mxu0 %v20465_v29  ;;  %v20489_v44 = vld [vmem:[%s22898_s13 + $0x31e4] ss:$16 sps:$4 sm:$0xff]  }
 0x360   : > { %14125 = vmatprep.subr.bf16.mxu1 %v20468_v45  ;;  %v20492_v29 = vld [vmem:[%s22898_s13 + $0x33e4] ss:$16 sps:$4 sm:$0xff]   ;;  %v20487_v45 = vld [vmem:[%s22898_s13 + $0x31e0] ss:$16 sps:$4 sm:$0xff]  }
 0x362   : > { %14085 = vmatpush1.bf16.msra.mxu0 %v20463_v57  ;;  %v20490_v57 = vld [vmem:[%s22898_s13 + $0x33e0] ss:$16 sps:$4 sm:$0xff]  }
 0x363   : > { %14126 = vmatpush1.bf16.msra.mxu1 %v20466_v15  ;;  %14086 = vmatprep.subr.bf16.mxu0 %v20471_v30  ;;  %v20495_v15 = vld [vmem:[%s22898_s13 + $0x31c4] ss:$16 sps:$4 sm:$0xff]  }
 0x364   : > { %14127 = vmatprep.subr.bf16.mxu1 %v20474_v4  ;;  %v20498_v30 = vld [vmem:[%s22898_s13 + $0x33c4] ss:$16 sps:$4 sm:$0xff]   ;;  %v20493_v4 = vld [vmem:[%s22898_s13 + $0x31c0] ss:$16 sps:$4 sm:$0xff]  }
 0x366   : > { %14087 = vmatpush1.bf16.msra.mxu0 %v20469_v41  ;;  %v20496_v41 = vld [vmem:[%s22898_s13 + $0x33c0] ss:$16 sps:$4 sm:$0xff]  }
 0x367   : > { %14128 = vmatpush1.bf16.msra.mxu1 %v20472_v46  ;;  %14088 = vmatprep.subr.bf16.mxu0 %v20477_v34  ;;  %v20501_v46 = vld [vmem:[%s22898_s13 + $0x31a4] ss:$16 sps:$4 sm:$0xff]  }
 0x368   : > { %14129 = vmatprep.subr.bf16.mxu1 %v20480_v42  ;;  %v20504_v34 = vld [vmem:[%s22898_s13 + $0x33a4] ss:$16 sps:$4 sm:$0xff]   ;;  %v20499_v42 = vld [vmem:[%s22898_s13 + $0x31a0] ss:$16 sps:$4 sm:$0xff]  }
 0x36a   : > { %14089 = vmatpush1.bf16.msra.mxu0 %v20475_v58  ;;  %v20502_v58 = vld [vmem:[%s22898_s13 + $0x33a0] ss:$16 sps:$4 sm:$0xff]  }
 0x36b   : > { %14130 = vmatpush1.bf16.msra.mxu1 %v20478_v62  ;;  %14090 = vmatprep.subr.bf16.mxu0 %v20483_v61  ;;  %v20507_v62 = vld [vmem:[%s22898_s13 + $0x3184] ss:$16 sps:$4 sm:$0xff]  }
 0x36c   : > { %14131 = vmatprep.subr.bf16.mxu1 %v20486_v48  ;;  %v20510_v61 = vld [vmem:[%s22898_s13 + $0x3384] ss:$16 sps:$4 sm:$0xff]   ;;  %v20505_v48 = vld [vmem:[%s22898_s13 + $0x3180] ss:$16 sps:$4 sm:$0xff]  }
 0x36e   : > { %14091 = vmatpush1.bf16.msra.mxu0 %v20481_v19  ;;  %v20508_v19 = vld [vmem:[%s22898_s13 + $0x3380] ss:$16 sps:$4 sm:$0xff]  }
 0x36f   : > { %14132 = vmatpush1.bf16.msra.mxu1 %v20484_v33  ;;  %14092 = vmatprep.subr.bf16.mxu0 %v20489_v44  ;;  %v20513_v33 = vld [vmem:[%s22898_s13 + $0x3164] ss:$16 sps:$4 sm:$0xff]  }
 0x370   : > { %14133 = vmatprep.subr.bf16.mxu1 %v20492_v29  ;;  %v20516_v44 = vld [vmem:[%s22898_s13 + $0x3364] ss:$16 sps:$4 sm:$0xff]   ;;  %v20511_v29 = vld [vmem:[%s22898_s13 + $0x3160] ss:$16 sps:$4 sm:$0xff]  }
 0x372   : > { %14093 = vmatpush2.bf16.msra.mxu0 %v20487_v45  ;;  %v20514_v45 = vld [vmem:[%s22898_s13 + $0x3360] ss:$16 sps:$4 sm:$0xff]  }
 0x373   : > { %14134 = vmatpush2.bf16.msra.mxu1 %v20490_v57  ;;  %14094 = vmatprep.subr.bf16.mxu0 %v20495_v15  ;;  %v20519_v57 = vld [vmem:[%s22898_s13 + $0x3144] ss:$16 sps:$4 sm:$0xff]  }
 0x374   : > { %14135 = vmatprep.subr.bf16.mxu1 %v20498_v30  ;;  %v20522_v15 = vld [vmem:[%s22898_s13 + $0x3344] ss:$16 sps:$4 sm:$0xff]   ;;  %v20517_v30 = vld [vmem:[%s22898_s13 + $0x3140] ss:$16 sps:$4 sm:$0xff]  }
 0x376   : > { %14095 = vmatpush2.bf16.msra.mxu0 %v20493_v4  ;;  %v20520_v4 = vld [vmem:[%s22898_s13 + $0x3340] ss:$16 sps:$4 sm:$0xff]  }
 0x377   : > { %14136 = vmatpush2.bf16.msra.mxu1 %v20496_v41  ;;  %14096 = vmatprep.subr.bf16.mxu0 %v20501_v46  ;;  %v20525_v41 = vld [vmem:[%s22898_s13 + $0x3124] ss:$16 sps:$4 sm:$0xff]  }
 0x378   : > { %14137 = vmatprep.subr.bf16.mxu1 %v20504_v34  ;;  %v20528_v46 = vld [vmem:[%s22898_s13 + $0x3324] ss:$16 sps:$4 sm:$0xff]   ;;  %v20523_v34 = vld [vmem:[%s22898_s13 + $0x3120] ss:$16 sps:$4 sm:$0xff]  }
 0x37a   : > { %14097 = vmatpush2.bf16.msra.mxu0 %v20499_v42  ;;  %v20526_v42 = vld [vmem:[%s22898_s13 + $0x3320] ss:$16 sps:$4 sm:$0xff]  }
 0x37b   : > { %14138 = vmatpush2.bf16.msra.mxu1 %v20502_v58  ;;  %14098 = vmatprep.subr.bf16.mxu0 %v20507_v62  ;;  %v20531_v58 = vld [vmem:[%s22898_s13 + $0x3104] ss:$16 sps:$4 sm:$0xff]  }
 0x37c   : > { %14139 = vmatprep.subr.bf16.mxu1 %v20510_v61  ;;  %v20534_v62 = vld [vmem:[%s22898_s13 + $0x3304] ss:$16 sps:$4 sm:$0xff]   ;;  %v20529_v61 = vld [vmem:[%s22898_s13 + $0x3100] ss:$16 sps:$4 sm:$0xff]  }
 0x37e   : > { %14099 = vmatpush2.bf16.msra.mxu0 %v20505_v48  ;;  %v20532_v48 = vld [vmem:[%s22898_s13 + $0x3300] ss:$16 sps:$4 sm:$0xff]  }
 0x37f   : > { %14140 = vmatpush2.bf16.msra.mxu1 %v20508_v19  ;;  %14100 = vmatprep.subr.bf16.mxu0 %v20513_v33  ;;  %v20541_v19 = vld [vmem:[%s22898_s13 + $0x34e4] ss:$16 sps:$4 sm:$0xff]  }
 0x380   : > { %14141 = vmatprep.subr.bf16.mxu1 %v20516_v44  ;;  %v20544_v33 = vld [vmem:[%s22898_s13 + $0x36e4] ss:$16 sps:$4 sm:$0xff]   ;;  %v20539_v44 = vld [vmem:[%s22898_s13 + $0x34e0] ss:$16 sps:$4 sm:$0xff]  }
 0x382   : > { %14101 = vmatpush2.bf16.msra.mxu0 %v20511_v29  ;;  %v20542_v29 = vld [vmem:[%s22898_s13 + $0x36e0] ss:$16 sps:$4 sm:$0xff]  }
 0x383   : > { %14142 = vmatpush2.bf16.msra.mxu1 %v20514_v45  ;;  %14102 = vmatprep.subr.bf16.mxu0 %v20519_v57  ;;  %v24176_v45 = vcombine.low %v24085_v53, %v24085_v53  ;;  %v24180_v57 = vcombine.low %v24090_v49, %v24090_v49  ;;  %v20547_v53 = vld [vmem:[%s22898_s13 + $0x34c4] ss:$16 sps:$4 sm:$0xff]   ;;  %v20548_v49 = vld [vmem:[%s22898_s13 + $0x36c0] ss:$16 sps:$4 sm:$0xff]  }
 0x384   : > { %14143 = vmatprep.subr.bf16.mxu1 %v20522_v15  ;;  %v24185_v15 = vld [vmem:[%s25971_s0 + $0xd0] sm:$0xff] }
 0x385   : > { %26017 = vst [vmem:[#allocation20_spill] sm:$0xff] %v24176_v45  ;;  %26018 = vst [vmem:[#allocation21_spill] sm:$0xff] %v24180_v57 }
 0x386   : > { %14103 = vmatpush2.bf16.msra.mxu0 %v20517_v30  ;;  %v24190_v30 = vld [vmem:[%s25971_s0 + $0xd8] sm:$0xff] }
 0x387   : > { %14144 = vmatpush2.bf16.msra.mxu1 %v20520_v4  ;;  %14104 = vmatprep.subr.bf16.mxu0 %v20525_v41  ;;  %v20550_v4 = vld [vmem:[%s22898_s13 + $0x36c4] ss:$16 sps:$4 sm:$0xff]   ;;  %v20545_v41 = vld [vmem:[%s22898_s13 + $0x34c0] ss:$16 sps:$4 sm:$0xff]  }
 0x388   : > { %14145 = vmatprep.subr.bf16.mxu1 %v20528_v46  ;;  %v24198_v46 = vcombine.high %v24185_v15, %v24185_v15 }
 0x38a   : > { %14105 = vmatpush2.bf16.msra.mxu0 %v20523_v34  ;;  %26019 = vst [vmem:[#allocation22_spill] sm:$0xff] %v24198_v46  ;;  %v24202_v34 = vcombine.high %v24190_v30, %v24190_v30 }
 0x38b   : > { %14146 = vmatpush2.bf16.msra.mxu1 %v20526_v42  ;;  %14106 = vmatprep.subr.bf16.mxu0 %v20531_v58 }
 0x38c   : > { %14147 = vmatprep.subr.bf16.mxu1 %v20534_v62  ;;  %26020 = vst [vmem:[#allocation23_spill] sm:$0xff] %v24202_v34 }
 0x38e   : > { %14107 = vmatpush2.bf16.msra.mxu0 %v20529_v61 }
 0x38f   : > { %14148 = vmatpush2.bf16.msra.mxu1 %v20532_v48  ;;  %14158 = vmatprep.subr.bf16.mxu0 %v20541_v19  ;;  %v20553_v19 = vld [vmem:[%s22898_s13 + $0x34a4] ss:$16 sps:$4 sm:$0xff]  }
 0x390   : > { %14199 = vmatprep.subr.bf16.mxu1 %v20544_v33  ;;  %v20556_v33 = vld [vmem:[%s22898_s13 + $0x36a4] ss:$16 sps:$4 sm:$0xff]  }
 0x391   : > { %v13864_v42 = vpop.f32.mrf.mxu0  ;;  %14109 = vmatmul.mubr.bf16.vlgmr.msra.gmra.mxu0 %v24176_v45  ;;  %v20554_v45 = vld [vmem:[%s22898_s13 + $0x36a0] ss:$16 sps:$4 sm:$0xff]  }
 0x392   : > { %v13905_v58 = vpop.f32.mrf.mxu1  ;;  %14150 = vmatmul.mubr.bf16.vlgmr.msra.gmra.mxu1 %v24180_v57  ;;  %v13865_v62 = vadd.f32 %v13864_v42, %v24109_v3  ;;  %14159 = vmatpush1.bf16.msra.mxu0 %v20539_v44  ;;  %v20562_v42 = vld [vmem:[%s22898_s13 + $0x3684] ss:$16 sps:$4 sm:$0xff]  }
 0x393   : > { %14200 = vmatpush1.bf16.msra.mxu1 %v20542_v29  ;;  %v13866_v61 = vpop.f32.mrf.mxu0  ;;  %14160 = vmatprep.subr.bf16.mxu0 %v20547_v53 }
 0x394   : > { %v13907_v48 = vpop.f32.mrf.mxu1  ;;  %14201 = vmatprep.subr.bf16.mxu1 %v20550_v4  ;;  %v24209_v27 = vadd.f32 %v13905_v58, %v13865_v62  ;;  %v13867_v31 = vadd.f32 %v13866_v61, %v24116_v22  ;;  %14190 = vmatprep.mubr.bf16.mxu0 %v24198_v46  ;;  %v20559_v22 = vld [vmem:[%s22898_s13 + $0x3484] ss:$16 sps:$4 sm:$0xff]   ;;  %v20557_v58 = vld [vmem:[%s22898_s13 + $0x3480] ss:$16 sps:$4 sm:$0xff]  }
 0x395   : > { %14231 = vmatprep.mubr.bf16.mxu1 %v24202_v34  ;;  %v13868_v3 = vpop.f32.mrf.mxu0  ;;  %v20560_v62 = vld [vmem:[%s22898_s13 + $0x3680] ss:$16 sps:$4 sm:$0xff]  }
 0x396   : > { %v13909_v44 = vpop.f32.mrf.mxu1  ;;  %v24216_v29 = vadd.f32 %v13907_v48, %v13867_v31  ;;  %14161 = vmatpush1.bf16.msra.mxu0 %v20545_v41  ;;  %v20565_v31 = vld [vmem:[%s22898_s13 + $0x3464] ss:$16 sps:$4 sm:$0xff]   ;;  %v20566_v61 = vld [vmem:[%s22898_s13 + $0x3660] ss:$16 sps:$4 sm:$0xff]  }
 0x397   : > { %14202 = vmatpush1.bf16.msra.mxu1 %v20548_v49  ;;  %v13869_v53 = vpop.f32.mrf.mxu0  ;;  %14162 = vmatprep.subr.bf16.mxu0 %v20553_v19  ;;  %v20568_v41 = vld [vmem:[%s22898_s13 + $0x3664] ss:$16 sps:$4 sm:$0xff]   ;;  %v20563_v49 = vld [vmem:[%s22898_s13 + $0x3460] ss:$16 sps:$4 sm:$0xff]  }
 0x398   : > { %v13910_v4 = vpop.f32.mrf.mxu1  ;;  %14203 = vmatprep.subr.bf16.mxu1 %v20556_v33  ;;  %v20569_v48 = vld [vmem:[%s22898_s13 + $0x3440] ss:$16 sps:$4 sm:$0xff]   ;;  %v20577_v33 = vld [vmem:[%s22898_s13 + $0x3424] ss:$16 sps:$4 sm:$0xff]  }
 0x399   : > { %v20572_v19 = vld [vmem:[%s22898_s13 + $0x3640] ss:$16 sps:$4 sm:$0xff]   ;;  %v20580_v3 = vld [vmem:[%s22898_s13 + $0x3624] ss:$16 sps:$4 sm:$0xff]  }
 0x39a   : > { %14163 = vmatpush1.bf16.msra.mxu0 %v20551_v50  ;;  %v20571_v50 = vld [vmem:[%s22898_s13 + $0x3444] ss:$16 sps:$4 sm:$0xff]   ;;  %v20575_v44 = vld [vmem:[%s22898_s13 + $0x3420] ss:$16 sps:$4 sm:$0xff]  }
 0x39b   : > { %14204 = vmatpush1.bf16.msra.mxu1 %v20554_v45  ;;  %14164 = vmatprep.subr.bf16.mxu0 %v20559_v22  ;;  %v20574_v45 = vld [vmem:[%s22898_s13 + $0x3644] ss:$16 sps:$4 sm:$0xff]   ;;  %v20578_v53 = vld [vmem:[%s22898_s13 + $0x3620] ss:$16 sps:$4 sm:$0xff]  }
 0x39c   : > { %14205 = vmatprep.subr.bf16.mxu1 %v20562_v42  ;;  %v20583_v4 = vld [vmem:[%s22898_s13 + $0x3404] ss:$16 sps:$4 sm:$0xff]   ;;  %v20581_v42 = vld [vmem:[%s22898_s13 + $0x3400] ss:$16 sps:$4 sm:$0xff]  }
 0x39d   : > { %v20586_v22 = vld [vmem:[%s22898_s13 + $0x3604] ss:$16 sps:$4 sm:$0xff]   ;;  %v20651_v46 = vld [vmem:[%s22898_s13 + $0x38a0] ss:$16 sps:$4 sm:$0xff]  }
 0x39e   : > { %14165 = vmatpush1.bf16.msra.mxu0 %v20557_v58  ;;  %v20584_v58 = vld [vmem:[%s22898_s13 + $0x3600] ss:$16 sps:$4 sm:$0xff]  }
 0x39f   : > { %14206 = vmatpush1.bf16.msra.mxu1 %v20560_v62  ;;  %14166 = vmatprep.subr.bf16.mxu0 %v20565_v31  ;;  %v20589_v62 = vld [vmem:[%s22898_s13 + $0x35e4] ss:$16 sps:$4 sm:$0xff]  }
 0x3a0   : > { %14207 = vmatprep.subr.bf16.mxu1 %v20568_v41  ;;  %v20592_v31 = vld [vmem:[%s22898_s13 + $0x37e4] ss:$16 sps:$4 sm:$0xff]   ;;  %v20587_v41 = vld [vmem:[%s22898_s13 + $0x35e0] ss:$16 sps:$4 sm:$0xff]  }
 0x3a2   : > { %14167 = vmatpush1.bf16.msra.mxu0 %v20563_v49  ;;  %v20590_v49 = vld [vmem:[%s22898_s13 + $0x37e0] ss:$16 sps:$4 sm:$0xff]  }
 0x3a3   : > { %14208 = vmatpush1.bf16.msra.mxu1 %v20566_v61  ;;  %14168 = vmatprep.subr.bf16.mxu0 %v20571_v50  ;;  %v20595_v61 = vld [vmem:[%s22898_s13 + $0x35c4] ss:$16 sps:$4 sm:$0xff]  }
 0x3a4   : > { %14209 = vmatprep.subr.bf16.mxu1 %v20574_v45  ;;  %v20598_v50 = vld [vmem:[%s22898_s13 + $0x37c4] ss:$16 sps:$4 sm:$0xff]   ;;  %v20593_v45 = vld [vmem:[%s22898_s13 + $0x35c0] ss:$16 sps:$4 sm:$0xff]  }
 0x3a6   : > { %14169 = vmatpush1.bf16.msra.mxu0 %v20569_v48  ;;  %v20596_v48 = vld [vmem:[%s22898_s13 + $0x37c0] ss:$16 sps:$4 sm:$0xff]  }
 0x3a7   : > { %14210 = vmatpush1.bf16.msra.mxu1 %v20572_v19  ;;  %14170 = vmatprep.subr.bf16.mxu0 %v20577_v33  ;;  %v20601_v19 = vld [vmem:[%s22898_s13 + $0x35a4] ss:$16 sps:$4 sm:$0xff]  }
 0x3a8   : > { %14211 = vmatprep.subr.bf16.mxu1 %v20580_v3  ;;  %v20604_v33 = vld [vmem:[%s22898_s13 + $0x37a4] ss:$16 sps:$4 sm:$0xff]   ;;  %v20599_v3 = vld [vmem:[%s22898_s13 + $0x35a0] ss:$16 sps:$4 sm:$0xff]  }
 0x3aa   : > { %14171 = vmatpush1.bf16.msra.mxu0 %v20575_v44  ;;  %v20602_v44 = vld [vmem:[%s22898_s13 + $0x37a0] ss:$16 sps:$4 sm:$0xff]  }
 0x3ab   : > { %14212 = vmatpush1.bf16.msra.mxu1 %v20578_v53  ;;  %14172 = vmatprep.subr.bf16.mxu0 %v20583_v4  ;;  %v20607_v53 = vld [vmem:[%s22898_s13 + $0x3584] ss:$16 sps:$4 sm:$0xff]  }
 0x3ac   : > { %14213 = vmatprep.subr.bf16.mxu1 %v20586_v22  ;;  %v20610_v4 = vld [vmem:[%s22898_s13 + $0x3784] ss:$16 sps:$4 sm:$0xff]   ;;  %v20605_v22 = vld [vmem:[%s22898_s13 + $0x3580] ss:$16 sps:$4 sm:$0xff]  }
 0x3ae   : > { %14173 = vmatpush1.bf16.msra.mxu0 %v20581_v42  ;;  %v20608_v42 = vld [vmem:[%s22898_s13 + $0x3780] ss:$16 sps:$4 sm:$0xff]  }
 0x3af   : > { %14214 = vmatpush1.bf16.msra.mxu1 %v20584_v58  ;;  %14174 = vmatprep.subr.bf16.mxu0 %v20589_v62  ;;  %v20613_v58 = vld [vmem:[%s22898_s13 + $0x3564] ss:$16 sps:$4 sm:$0xff]  }
 0x3b0   : > { %14215 = vmatprep.subr.bf16.mxu1 %v20592_v31  ;;  %v20616_v62 = vld [vmem:[%s22898_s13 + $0x3764] ss:$16 sps:$4 sm:$0xff]   ;;  %v20611_v31 = vld [vmem:[%s22898_s13 + $0x3560] ss:$16 sps:$4 sm:$0xff]  }
 0x3b2   : > { %14175 = vmatpush2.bf16.msra.mxu0 %v20587_v41  ;;  %v20614_v41 = vld [vmem:[%s22898_s13 + $0x3760] ss:$16 sps:$4 sm:$0xff]  }
 0x3b3   : > { %14216 = vmatpush2.bf16.msra.mxu1 %v20590_v49  ;;  %14176 = vmatprep.subr.bf16.mxu0 %v20595_v61  ;;  %v20619_v49 = vld [vmem:[%s22898_s13 + $0x3544] ss:$16 sps:$4 sm:$0xff]  }
 0x3b4   : > { %14217 = vmatprep.subr.bf16.mxu1 %v20598_v50  ;;  %v20622_v61 = vld [vmem:[%s22898_s13 + $0x3744] ss:$16 sps:$4 sm:$0xff]   ;;  %v20617_v50 = vld [vmem:[%s22898_s13 + $0x3540] ss:$16 sps:$4 sm:$0xff]  }
 0x3b6   : > { %14177 = vmatpush2.bf16.msra.mxu0 %v20593_v45  ;;  %v20620_v45 = vld [vmem:[%s22898_s13 + $0x3740] ss:$16 sps:$4 sm:$0xff]  }
 0x3b7   : > { %14218 = vmatpush2.bf16.msra.mxu1 %v20596_v48  ;;  %14178 = vmatprep.subr.bf16.mxu0 %v20601_v19  ;;  %v20625_v48 = vld [vmem:[%s22898_s13 + $0x3524] ss:$16 sps:$4 sm:$0xff]  }
 0x3b8   : > { %14219 = vmatprep.subr.bf16.mxu1 %v20604_v33  ;;  %v20628_v19 = vld [vmem:[%s22898_s13 + $0x3724] ss:$16 sps:$4 sm:$0xff]   ;;  %v20623_v33 = vld [vmem:[%s22898_s13 + $0x3520] ss:$16 sps:$4 sm:$0xff]  }
 0x3ba   : > { %14179 = vmatpush2.bf16.msra.mxu0 %v20599_v3  ;;  %v20626_v3 = vld [vmem:[%s22898_s13 + $0x3720] ss:$16 sps:$4 sm:$0xff]  }
 0x3bb   : > { %14220 = vmatpush2.bf16.msra.mxu1 %v20602_v44  ;;  %14180 = vmatprep.subr.bf16.mxu0 %v20607_v53  ;;  %v20631_v44 = vld [vmem:[%s22898_s13 + $0x3504] ss:$16 sps:$4 sm:$0xff]  }
 0x3bc   : > { %14221 = vmatprep.subr.bf16.mxu1 %v20610_v4  ;;  %v20634_v53 = vld [vmem:[%s22898_s13 + $0x3704] ss:$16 sps:$4 sm:$0xff]   ;;  %v20629_v4 = vld [vmem:[%s22898_s13 + $0x3500] ss:$16 sps:$4 sm:$0xff]  }
 0x3be   : > { %14181 = vmatpush2.bf16.msra.mxu0 %v20605_v22  ;;  %v20632_v22 = vld [vmem:[%s22898_s13 + $0x3700] ss:$16 sps:$4 sm:$0xff]  }
 0x3bf   : > { %14222 = vmatpush2.bf16.msra.mxu1 %v20608_v42  ;;  %14182 = vmatprep.subr.bf16.mxu0 %v20613_v58  ;;  %v20641_v42 = vld [vmem:[%s22898_s13 + $0x38e4] ss:$16 sps:$4 sm:$0xff]  }
 0x3c0   : > { %14223 = vmatprep.subr.bf16.mxu1 %v20616_v62  ;;  %v20644_v58 = vld [vmem:[%s22898_s13 + $0x3ae4] ss:$16 sps:$4 sm:$0xff]   ;;  %v20639_v62 = vld [vmem:[%s22898_s13 + $0x38e0] ss:$16 sps:$4 sm:$0xff]  }
 0x3c2   : > { %14183 = vmatpush2.bf16.msra.mxu0 %v20611_v31  ;;  %v20642_v31 = vld [vmem:[%s22898_s13 + $0x3ae0] ss:$16 sps:$4 sm:$0xff]  }
 0x3c3   : > { %14224 = vmatpush2.bf16.msra.mxu1 %v20614_v41  ;;  %14184 = vmatprep.subr.bf16.mxu0 %v20619_v49  ;;  %v24276_v41 = vcombine.low %v24185_v15, %v24185_v15  ;;  %v24280_v49 = vcombine.low %v24190_v30, %v24190_v30  ;;  %v20647_v15 = vld [vmem:[%s22898_s13 + $0x38c4] ss:$16 sps:$4 sm:$0xff]   ;;  %v20648_v30 = vld [vmem:[%s22898_s13 + $0x3ac0] ss:$16 sps:$4 sm:$0xff]  }
 0x3c4   : > { %14225 = vmatprep.subr.bf16.mxu1 %v20622_v61  ;;  %v24285_v61 = vld [vmem:[%s25971_s0 + $0xe0] sm:$0xff] }
 0x3c5   : > { %26021 = vst [vmem:[#allocation24_spill] sm:$0xff] %v24276_v41  ;;  %26022 = vst [vmem:[#allocation25_spill] sm:$0xff] %v24280_v49 }
 0x3c6   : > { %14185 = vmatpush2.bf16.msra.mxu0 %v20617_v50  ;;  %v24290_v50 = vld [vmem:[%s25971_s0 + $0xe8] sm:$0xff] }
 0x3c7   : > { %14226 = vmatpush2.bf16.msra.mxu1 %v20620_v45  ;;  %14186 = vmatprep.subr.bf16.mxu0 %v20625_v48  ;;  %v20650_v45 = vld [vmem:[%s22898_s13 + $0x3ac4] ss:$16 sps:$4 sm:$0xff]   ;;  %v20645_v48 = vld [vmem:[%s22898_s13 + $0x38c0] ss:$16 sps:$4 sm:$0xff]  }
 0x3c8   : > { %14227 = vmatprep.subr.bf16.mxu1 %v20628_v19  ;;  %v24298_v19 = vcombine.high %v24285_v61, %v24285_v61 }
 0x3ca   : > { %14187 = vmatpush2.bf16.msra.mxu0 %v20623_v33  ;;  %26023 = vst [vmem:[#allocation26_spill] sm:$0xff] %v24298_v19  ;;  %v24302_v33 = vcombine.high %v24290_v50, %v24290_v50 }
 0x3cb   : > { %14228 = vmatpush2.bf16.msra.mxu1 %v20626_v3  ;;  %14188 = vmatprep.subr.bf16.mxu0 %v20631_v44 }
 0x3cc   : > { %14229 = vmatprep.subr.bf16.mxu1 %v20634_v53  ;;  %26024 = vst [vmem:[#allocation27_spill] sm:$0xff] %v24302_v33 }
 0x3ce   : > { %14189 = vmatpush2.bf16.msra.mxu0 %v20629_v4 }
 0x3cf   : > { %14230 = vmatpush2.bf16.msra.mxu1 %v20632_v22  ;;  %14240 = vmatprep.subr.bf16.mxu0 %v20641_v42  ;;  %v20653_v42 = vld [vmem:[%s22898_s13 + $0x38a4] ss:$16 sps:$4 sm:$0xff]  }
 0x3d0   : > { %14281 = vmatprep.subr.bf16.mxu1 %v20644_v58  ;;  %v20656_v58 = vld [vmem:[%s22898_s13 + $0x3aa4] ss:$16 sps:$4 sm:$0xff]  }
 0x3d1   : > { %v13946_v3 = vpop.f32.mrf.mxu0  ;;  %14191 = vmatmul.mubr.bf16.vlgmr.msra.gmra.mxu0 %v24276_v41  ;;  %v20654_v41 = vld [vmem:[%s22898_s13 + $0x3aa0] ss:$16 sps:$4 sm:$0xff]  }
 0x3d2   : > { %v13987_v44 = vpop.f32.mrf.mxu1  ;;  %14232 = vmatmul.mubr.bf16.vlgmr.msra.gmra.mxu1 %v24280_v49  ;;  %v13947_v53 = vadd.f32 %v13946_v3, %v24209_v27  ;;  %14241 = vmatpush1.bf16.msra.mxu0 %v20639_v62  ;;  %v20662_v3 = vld [vmem:[%s22898_s13 + $0x3a84] ss:$16 sps:$4 sm:$0xff]  }
 0x3d3   : > { %14282 = vmatpush1.bf16.msra.mxu1 %v20642_v31  ;;  %v13948_v4 = vpop.f32.mrf.mxu0  ;;  %14242 = vmatprep.subr.bf16.mxu0 %v20647_v15 }
 0x3d4   : > { %v13989_v22 = vpop.f32.mrf.mxu1  ;;  %14283 = vmatprep.subr.bf16.mxu1 %v20650_v45  ;;  %v24309_v34 = vadd.f32 %v13987_v44, %v13947_v53  ;;  %v13949_v57 = vadd.f32 %v13948_v4, %v24216_v29  ;;  %14272 = vmatprep.mubr.bf16.mxu0 %v24298_v19  ;;  %v20659_v29 = vld [vmem:[%s22898_s13 + $0x3884] ss:$16 sps:$4 sm:$0xff]   ;;  %v20657_v44 = vld [vmem:[%s22898_s13 + $0x3880] ss:$16 sps:$4 sm:$0xff]  }
 0x3d5   : > { %14313 = vmatprep.mubr.bf16.mxu1 %v24302_v33  ;;  %v13950_v27 = vpop.f32.mrf.mxu0  ;;  %v20660_v53 = vld [vmem:[%s22898_s13 + $0x3a80] ss:$16 sps:$4 sm:$0xff]  }
 0x3d6   : > { %v13991_v62 = vpop.f32.mrf.mxu1  ;;  %v24316_v31 = vadd.f32 %v13989_v22, %v13949_v57  ;;  %14243 = vmatpush1.bf16.msra.mxu0 %v20645_v48  ;;  %v20665_v57 = vld [vmem:[%s22898_s13 + $0x3864] ss:$16 sps:$4 sm:$0xff]   ;;  %v20666_v4 = vld [vmem:[%s22898_s13 + $0x3a60] ss:$16 sps:$4 sm:$0xff]  }
 0x3d7   : > { %14284 = vmatpush1.bf16.msra.mxu1 %v20648_v30  ;;  %v13951_v15 = vpop.f32.mrf.mxu0  ;;  %14244 = vmatprep.subr.bf16.mxu0 %v20653_v42  ;;  %v20668_v48 = vld [vmem:[%s22898_s13 + $0x3a64] ss:$16 sps:$4 sm:$0xff]   ;;  %v20663_v30 = vld [vmem:[%s22898_s13 + $0x3860] ss:$16 sps:$4 sm:$0xff]  }
 0x3d8   : > { %v13992_v45 = vpop.f32.mrf.mxu1  ;;  %14285 = vmatprep.subr.bf16.mxu1 %v20656_v58  ;;  %v20669_v22 = vld [vmem:[%s22898_s13 + $0x3840] ss:$16 sps:$4 sm:$0xff]   ;;  %v20677_v58 = vld [vmem:[%s22898_s13 + $0x3824] ss:$16 sps:$4 sm:$0xff]  }
 0x3d9   : > { %v20672_v42 = vld [vmem:[%s22898_s13 + $0x3a40] ss:$16 sps:$4 sm:$0xff]   ;;  %v20680_v27 = vld [vmem:[%s22898_s13 + $0x3a24] ss:$16 sps:$4 sm:$0xff]  }
 0x3da   : > { %14245 = vmatpush1.bf16.msra.mxu0 %v20651_v46  ;;  %v20671_v46 = vld [vmem:[%s22898_s13 + $0x3844] ss:$16 sps:$4 sm:$0xff]   ;;  %v20675_v62 = vld [vmem:[%s22898_s13 + $0x3820] ss:$16 sps:$4 sm:$0xff]  }
 0x3db   : > { %14286 = vmatpush1.bf16.msra.mxu1 %v20654_v41  ;;  %14246 = vmatprep.subr.bf16.mxu0 %v20659_v29  ;;  %v20674_v41 = vld [vmem:[%s22898_s13 + $0x3a44] ss:$16 sps:$4 sm:$0xff]   ;;  %v20678_v15 = vld [vmem:[%s22898_s13 + $0x3a20] ss:$16 sps:$4 sm:$0xff]  }
 0x3dc   : > { %14287 = vmatprep.subr.bf16.mxu1 %v20662_v3  ;;  %v20683_v45 = vld [vmem:[%s22898_s13 + $0x3804] ss:$16 sps:$4 sm:$0xff]   ;;  %v20681_v3 = vld [vmem:[%s22898_s13 + $0x3800] ss:$16 sps:$4 sm:$0xff]  }
 0x3dd   : > { %v20686_v29 = vld [vmem:[%s22898_s13 + $0x3a04] ss:$16 sps:$4 sm:$0xff]   ;;  %v20751_v19 = vld [vmem:[%s22898_s13 + $0x3ca0] ss:$16 sps:$4 sm:$0xff]  }
 0x3de   : > { %14247 = vmatpush1.bf16.msra.mxu0 %v20657_v44  ;;  %v20684_v44 = vld [vmem:[%s22898_s13 + $0x3a00] ss:$16 sps:$4 sm:$0xff]  }
 0x3df   : > { %14288 = vmatpush1.bf16.msra.mxu1 %v20660_v53  ;;  %14248 = vmatprep.subr.bf16.mxu0 %v20665_v57  ;;  %v20689_v53 = vld [vmem:[%s22898_s13 + $0x39e4] ss:$16 sps:$4 sm:$0xff]  }
 0x3e0   : > { %14289 = vmatprep.subr.bf16.mxu1 %v20668_v48  ;;  %v20692_v57 = vld [vmem:[%s22898_s13 + $0x3be4] ss:$16 sps:$4 sm:$0xff]   ;;  %v20687_v48 = vld [vmem:[%s22898_s13 + $0x39e0] ss:$16 sps:$4 sm:$0xff]  }
 0x3e2   : > { %14249 = vmatpush1.bf16.msra.mxu0 %v20663_v30  ;;  %v20690_v30 = vld [vmem:[%s22898_s13 + $0x3be0] ss:$16 sps:$4 sm:$0xff]  }
 0x3e3   : > { %14290 = vmatpush1.bf16.msra.mxu1 %v20666_v4  ;;  %14250 = vmatprep.subr.bf16.mxu0 %v20671_v46  ;;  %v20695_v4 = vld [vmem:[%s22898_s13 + $0x39c4] ss:$16 sps:$4 sm:$0xff]  }
 0x3e4   : > { %14291 = vmatprep.subr.bf16.mxu1 %v20674_v41  ;;  %v20698_v46 = vld [vmem:[%s22898_s13 + $0x3bc4] ss:$16 sps:$4 sm:$0xff]   ;;  %v20693_v41 = vld [vmem:[%s22898_s13 + $0x39c0] ss:$16 sps:$4 sm:$0xff]  }
 0x3e6   : > { %14251 = vmatpush1.bf16.msra.mxu0 %v20669_v22  ;;  %v20696_v22 = vld [vmem:[%s22898_s13 + $0x3bc0] ss:$16 sps:$4 sm:$0xff]  }
 0x3e7   : > { %14292 = vmatpush1.bf16.msra.mxu1 %v20672_v42  ;;  %14252 = vmatprep.subr.bf16.mxu0 %v20677_v58  ;;  %v20701_v42 = vld [vmem:[%s22898_s13 + $0x39a4] ss:$16 sps:$4 sm:$0xff]  }
 0x3e8   : > { %14293 = vmatprep.subr.bf16.mxu1 %v20680_v27  ;;  %v20704_v58 = vld [vmem:[%s22898_s13 + $0x3ba4] ss:$16 sps:$4 sm:$0xff]   ;;  %v20699_v27 = vld [vmem:[%s22898_s13 + $0x39a0] ss:$16 sps:$4 sm:$0xff]  }
 0x3ea   : > { %14253 = vmatpush1.bf16.msra.mxu0 %v20675_v62  ;;  %v20702_v62 = vld [vmem:[%s22898_s13 + $0x3ba0] ss:$16 sps:$4 sm:$0xff]  }
 0x3eb   : > { %14294 = vmatpush1.bf16.msra.mxu1 %v20678_v15  ;;  %14254 = vmatprep.subr.bf16.mxu0 %v20683_v45  ;;  %v20707_v15 = vld [vmem:[%s22898_s13 + $0x3984] ss:$16 sps:$4 sm:$0xff]  }
 0x3ec   : > { %14295 = vmatprep.subr.bf16.mxu1 %v20686_v29  ;;  %v20710_v45 = vld [vmem:[%s22898_s13 + $0x3b84] ss:$16 sps:$4 sm:$0xff]   ;;  %v20705_v29 = vld [vmem:[%s22898_s13 + $0x3980] ss:$16 sps:$4 sm:$0xff]  }
 0x3ee   : > { %14255 = vmatpush1.bf16.msra.mxu0 %v20681_v3  ;;  %v20708_v3 = vld [vmem:[%s22898_s13 + $0x3b80] ss:$16 sps:$4 sm:$0xff]  }
 0x3ef   : > { %14296 = vmatpush1.bf16.msra.mxu1 %v20684_v44  ;;  %14256 = vmatprep.subr.bf16.mxu0 %v20689_v53  ;;  %v20713_v44 = vld [vmem:[%s22898_s13 + $0x3964] ss:$16 sps:$4 sm:$0xff]  }
 0x3f0   : > { %14297 = vmatprep.subr.bf16.mxu1 %v20692_v57  ;;  %v20716_v53 = vld [vmem:[%s22898_s13 + $0x3b64] ss:$16 sps:$4 sm:$0xff]   ;;  %v20711_v57 = vld [vmem:[%s22898_s13 + $0x3960] ss:$16 sps:$4 sm:$0xff]  }
 0x3f2   : > { %14257 = vmatpush2.bf16.msra.mxu0 %v20687_v48  ;;  %v20714_v48 = vld [vmem:[%s22898_s13 + $0x3b60] ss:$16 sps:$4 sm:$0xff]  }
 0x3f3   : > { %14298 = vmatpush2.bf16.msra.mxu1 %v20690_v30  ;;  %14258 = vmatprep.subr.bf16.mxu0 %v20695_v4  ;;  %v20719_v30 = vld [vmem:[%s22898_s13 + $0x3944] ss:$16 sps:$4 sm:$0xff]  }
 0x3f4   : > { %14299 = vmatprep.subr.bf16.mxu1 %v20698_v46  ;;  %v20722_v4 = vld [vmem:[%s22898_s13 + $0x3b44] ss:$16 sps:$4 sm:$0xff]   ;;  %v20717_v46 = vld [vmem:[%s22898_s13 + $0x3940] ss:$16 sps:$4 sm:$0xff]  }
 0x3f6   : > { %14259 = vmatpush2.bf16.msra.mxu0 %v20693_v41  ;;  %v20720_v41 = vld [vmem:[%s22898_s13 + $0x3b40] ss:$16 sps:$4 sm:$0xff]  }
 0x3f7   : > { %14300 = vmatpush2.bf16.msra.mxu1 %v20696_v22  ;;  %14260 = vmatprep.subr.bf16.mxu0 %v20701_v42  ;;  %v20725_v22 = vld [vmem:[%s22898_s13 + $0x3924] ss:$16 sps:$4 sm:$0xff]  }
 0x3f8   : > { %14301 = vmatprep.subr.bf16.mxu1 %v20704_v58  ;;  %v20728_v42 = vld [vmem:[%s22898_s13 + $0x3b24] ss:$16 sps:$4 sm:$0xff]   ;;  %v20723_v58 = vld [vmem:[%s22898_s13 + $0x3920] ss:$16 sps:$4 sm:$0xff]  }
 0x3fa   : > { %14261 = vmatpush2.bf16.msra.mxu0 %v20699_v27  ;;  %v20726_v27 = vld [vmem:[%s22898_s13 + $0x3b20] ss:$16 sps:$4 sm:$0xff]  }
 0x3fb   : > { %14302 = vmatpush2.bf16.msra.mxu1 %v20702_v62  ;;  %14262 = vmatprep.subr.bf16.mxu0 %v20707_v15  ;;  %v20731_v62 = vld [vmem:[%s22898_s13 + $0x3904] ss:$16 sps:$4 sm:$0xff]  }
 0x3fc   : > { %14303 = vmatprep.subr.bf16.mxu1 %v20710_v45  ;;  %v20734_v15 = vld [vmem:[%s22898_s13 + $0x3b04] ss:$16 sps:$4 sm:$0xff]   ;;  %v20729_v45 = vld [vmem:[%s22898_s13 + $0x3900] ss:$16 sps:$4 sm:$0xff]  }
 0x3fe   : > { %14263 = vmatpush2.bf16.msra.mxu0 %v20705_v29  ;;  %v20732_v29 = vld [vmem:[%s22898_s13 + $0x3b00] ss:$16 sps:$4 sm:$0xff]  }
 0x3ff   : > { %14304 = vmatpush2.bf16.msra.mxu1 %v20708_v3  ;;  %14264 = vmatprep.subr.bf16.mxu0 %v20713_v44  ;;  %v20741_v3 = vld [vmem:[%s22898_s13 + $0x3ce4] ss:$16 sps:$4 sm:$0xff]  }
 0x400   : > { %14305 = vmatprep.subr.bf16.mxu1 %v20716_v53  ;;  %v20744_v44 = vld [vmem:[%s22898_s13 + $0x3ee4] ss:$16 sps:$4 sm:$0xff]  }
 0x401   : > { %v24375_v53 = vld [vmem:[%s25971_s0 + $0xf0] sm:$0xff] }
 0x402   : > { %14265 = vmatpush2.bf16.msra.mxu0 %v20711_v57  ;;  %v24380_v57 = vld [vmem:[%s25971_s0 + $0xf8] sm:$0xff] }
 0x403   : > { %14306 = vmatpush2.bf16.msra.mxu1 %v20714_v48  ;;  %14266 = vmatprep.subr.bf16.mxu0 %v20719_v30  ;;  %v20739_v48 = vld [vmem:[%s22898_s13 + $0x3ce0] ss:$16 sps:$4 sm:$0xff]  }
 0x404   : > { %14307 = vmatprep.subr.bf16.mxu1 %v20722_v4  ;;  %v20742_v30 = vld [vmem:[%s22898_s13 + $0x3ee0] ss:$16 sps:$4 sm:$0xff]   ;;  %v24386_v4 = vcombine.low %v24285_v61, %v24285_v61  ;;  %v24402_v61 = vcombine.high %v24380_v57, %v24380_v57 }
 0x406   : > { %14267 = vmatpush2.bf16.msra.mxu0 %v20717_v46  ;;  %26025 = vst [vmem:[#allocation28_spill] sm:$0xff] %v24386_v4  ;;  %v24390_v46 = vcombine.low %v24290_v50, %v24290_v50 }
 0x407   : > { %14308 = vmatpush2.bf16.msra.mxu1 %v20720_v41  ;;  %14268 = vmatprep.subr.bf16.mxu0 %v20725_v22  ;;  %v20747_v41 = vld [vmem:[%s22898_s13 + $0x3cc4] ss:$16 sps:$4 sm:$0xff]  }
 0x408   : > { %14309 = vmatprep.subr.bf16.mxu1 %v20728_v42  ;;  %v20750_v22 = vld [vmem:[%s22898_s13 + $0x3ec4] ss:$16 sps:$4 sm:$0xff]   ;;  %v20745_v42 = vld [vmem:[%s22898_s13 + $0x3cc0] ss:$16 sps:$4 sm:$0xff]  }
 0x40a   : > { %14269 = vmatpush2.bf16.msra.mxu0 %v20723_v58  ;;  %v20748_v58 = vld [vmem:[%s22898_s13 + $0x3ec0] ss:$16 sps:$4 sm:$0xff]  }
 0x40b   : > { %14310 = vmatpush2.bf16.msra.mxu1 %v20726_v27  ;;  %14270 = vmatprep.subr.bf16.mxu0 %v20731_v62  ;;  %v24398_v27 = vcombine.high %v24375_v53, %v24375_v53 }
 0x40c   : > { %14311 = vmatprep.subr.bf16.mxu1 %v20734_v15 }
 0x40e   : > { %14271 = vmatpush2.bf16.msra.mxu0 %v20729_v45 }
 0x40f   : > { %14312 = vmatpush2.bf16.msra.mxu1 %v20732_v29  ;;  %14322 = vmatprep.subr.bf16.mxu0 %v20741_v3  ;;  %v20753_v3 = vld [vmem:[%s22898_s13 + $0x3ca4] ss:$16 sps:$4 sm:$0xff]  }
 0x410   : > { %14363 = vmatprep.subr.bf16.mxu1 %v20744_v44  ;;  %v20756_v44 = vld [vmem:[%s22898_s13 + $0x3ea4] ss:$16 sps:$4 sm:$0xff]  }
 0x411   : > { %v14028_v50 = vpop.f32.mrf.mxu0  ;;  %14273 = vmatmul.mubr.bf16.vlgmr.msra.gmra.mxu0 %v24386_v4  ;;  %v20754_v4 = vld [vmem:[%s22898_s13 + $0x3ea0] ss:$16 sps:$4 sm:$0xff]  }
 0x412   : > { %v14069_v62 = vpop.f32.mrf.mxu1  ;;  %14314 = vmatmul.mubr.bf16.vlgmr.msra.gmra.mxu1 %v24390_v46  ;;  %v14029_v15 = vadd.f32 %v14028_v50, %v24309_v34  ;;  %14323 = vmatpush1.bf16.msra.mxu0 %v20739_v48  ;;  %v20762_v50 = vld [vmem:[%s22898_s13 + $0x3e84] ss:$16 sps:$4 sm:$0xff]  }
 0x413   : > { %14364 = vmatpush1.bf16.msra.mxu1 %v20742_v30  ;;  %v14030_v45 = vpop.f32.mrf.mxu0  ;;  %14324 = vmatprep.subr.bf16.mxu0 %v20747_v41 }
 0x414   : > { %v14071_v29 = vpop.f32.mrf.mxu1  ;;  %14365 = vmatprep.subr.bf16.mxu1 %v20750_v22  ;;  %v24409_v33 = vadd.f32 %v14069_v62, %v14029_v15  ;;  %v14031_v49 = vadd.f32 %v14030_v45, %v24316_v31  ;;  %14354 = vmatprep.mubr.bf16.mxu0 %v24398_v27  ;;  %v20759_v31 = vld [vmem:[%s22898_s13 + $0x3c84] ss:$16 sps:$4 sm:$0xff]   ;;  %v20757_v62 = vld [vmem:[%s22898_s13 + $0x3c80] ss:$16 sps:$4 sm:$0xff]  }
 0x415   : > { %14395 = vmatprep.mubr.bf16.mxu1 %v24402_v61  ;;  %v14032_v34 = vpop.f32.mrf.mxu0  ;;  %v20760_v15 = vld [vmem:[%s22898_s13 + $0x3e80] ss:$16 sps:$4 sm:$0xff]  }
 0x416   : > { %v14073_v48 = vpop.f32.mrf.mxu1  ;;  %v24416_v30 = vadd.f32 %v14071_v29, %v14031_v49  ;;  %14325 = vmatpush1.bf16.msra.mxu0 %v20745_v42  ;;  %v20765_v49 = vld [vmem:[%s22898_s13 + $0x3c64] ss:$16 sps:$4 sm:$0xff]   ;;  %v20766_v45 = vld [vmem:[%s22898_s13 + $0x3e60] ss:$16 sps:$4 sm:$0xff]  }
 0x417   : > { %14366 = vmatpush1.bf16.msra.mxu1 %v20748_v58  ;;  %v14033_v41 = vpop.f32.mrf.mxu0  ;;  %14326 = vmatprep.subr.bf16.mxu0 %v20753_v3  ;;  %v20768_v42 = vld [vmem:[%s22898_s13 + $0x3e64] ss:$16 sps:$4 sm:$0xff]   ;;  %v20763_v58 = vld [vmem:[%s22898_s13 + $0x3c60] ss:$16 sps:$4 sm:$0xff]  }
 0x418   : > { %v14074_v22 = vpop.f32.mrf.mxu1  ;;  %14367 = vmatprep.subr.bf16.mxu1 %v20756_v44  ;;  %v20769_v29 = vld [vmem:[%s22898_s13 + $0x3c40] ss:$16 sps:$4 sm:$0xff]   ;;  %v20777_v44 = vld [vmem:[%s22898_s13 + $0x3c24] ss:$16 sps:$4 sm:$0xff]  }
 0x419   : > { %v20772_v3 = vld [vmem:[%s22898_s13 + $0x3e40] ss:$16 sps:$4 sm:$0xff]   ;;  %v20780_v34 = vld [vmem:[%s22898_s13 + $0x3e24] ss:$16 sps:$4 sm:$0xff]  }
 0x41a   : > { %14327 = vmatpush1.bf16.msra.mxu0 %v20751_v19  ;;  %v20771_v19 = vld [vmem:[%s22898_s13 + $0x3c44] ss:$16 sps:$4 sm:$0xff]   ;;  %v20775_v48 = vld [vmem:[%s22898_s13 + $0x3c20] ss:$16 sps:$4 sm:$0xff]  }
 0x41b   : > { %14368 = vmatpush1.bf16.msra.mxu1 %v20754_v4  ;;  %14328 = vmatprep.subr.bf16.mxu0 %v20759_v31  ;;  %v20774_v4 = vld [vmem:[%s22898_s13 + $0x3e44] ss:$16 sps:$4 sm:$0xff]   ;;  %v20778_v41 = vld [vmem:[%s22898_s13 + $0x3e20] ss:$16 sps:$4 sm:$0xff]  }
 0x41c   : > { %14369 = vmatprep.subr.bf16.mxu1 %v20762_v50  ;;  %v20783_v22 = vld [vmem:[%s22898_s13 + $0x3c04] ss:$16 sps:$4 sm:$0xff]   ;;  %v20781_v50 = vld [vmem:[%s22898_s13 + $0x3c00] ss:$16 sps:$4 sm:$0xff]  }
 0x41d   : > { %v20786_v31 = vld [vmem:[%s22898_s13 + $0x3e04] ss:$16 sps:$4 sm:$0xff]  }
 0x41e   : > { %14329 = vmatpush1.bf16.msra.mxu0 %v20757_v62  ;;  %v20784_v62 = vld [vmem:[%s22898_s13 + $0x3e00] ss:$16 sps:$4 sm:$0xff]  }
 0x41f   : > { %14370 = vmatpush1.bf16.msra.mxu1 %v20760_v15  ;;  %14330 = vmatprep.subr.bf16.mxu0 %v20765_v49  ;;  %v20789_v15 = vld [vmem:[%s22898_s13 + $0x3de4] ss:$16 sps:$4 sm:$0xff]  }
 0x420   : > { %14371 = vmatprep.subr.bf16.mxu1 %v20768_v42  ;;  %v20792_v49 = vld [vmem:[%s22898_s13 + $0x3fe4] ss:$16 sps:$4 sm:$0xff]   ;;  %v20787_v42 = vld [vmem:[%s22898_s13 + $0x3de0] ss:$16 sps:$4 sm:$0xff]  }
 0x422   : > { %14331 = vmatpush1.bf16.msra.mxu0 %v20763_v58  ;;  %v20790_v58 = vld [vmem:[%s22898_s13 + $0x3fe0] ss:$16 sps:$4 sm:$0xff]  }
 0x423   : > { %14372 = vmatpush1.bf16.msra.mxu1 %v20766_v45  ;;  %14332 = vmatprep.subr.bf16.mxu0 %v20771_v19  ;;  %v20795_v45 = vld [vmem:[%s22898_s13 + $0x3dc4] ss:$16 sps:$4 sm:$0xff]  }
 0x424   : > { %14373 = vmatprep.subr.bf16.mxu1 %v20774_v4  ;;  %v20798_v19 = vld [vmem:[%s22898_s13 + $0x3fc4] ss:$16 sps:$4 sm:$0xff]   ;;  %v20793_v4 = vld [vmem:[%s22898_s13 + $0x3dc0] ss:$16 sps:$4 sm:$0xff]  }
 0x426   : > { %14333 = vmatpush1.bf16.msra.mxu0 %v20769_v29  ;;  %v20796_v29 = vld [vmem:[%s22898_s13 + $0x3fc0] ss:$16 sps:$4 sm:$0xff]  }
 0x427   : > { %14374 = vmatpush1.bf16.msra.mxu1 %v20772_v3  ;;  %14334 = vmatprep.subr.bf16.mxu0 %v20777_v44  ;;  %v20801_v3 = vld [vmem:[%s22898_s13 + $0x3da4] ss:$16 sps:$4 sm:$0xff]  }
 0x428   : > { %14375 = vmatprep.subr.bf16.mxu1 %v20780_v34  ;;  %v20804_v44 = vld [vmem:[%s22898_s13 + $0x3fa4] ss:$16 sps:$4 sm:$0xff]   ;;  %v20799_v34 = vld [vmem:[%s22898_s13 + $0x3da0] ss:$16 sps:$4 sm:$0xff]  }
 0x42a   : > { %14335 = vmatpush1.bf16.msra.mxu0 %v20775_v48  ;;  %v20802_v48 = vld [vmem:[%s22898_s13 + $0x3fa0] ss:$16 sps:$4 sm:$0xff]  }
 0x42b   : > { %14376 = vmatpush1.bf16.msra.mxu1 %v20778_v41  ;;  %14336 = vmatprep.subr.bf16.mxu0 %v20783_v22  ;;  %v20807_v41 = vld [vmem:[%s22898_s13 + $0x3d84] ss:$16 sps:$4 sm:$0xff]  }
 0x42c   : > { %14377 = vmatprep.subr.bf16.mxu1 %v20786_v31  ;;  %v20810_v22 = vld [vmem:[%s22898_s13 + $0x3f84] ss:$16 sps:$4 sm:$0xff]   ;;  %v20805_v31 = vld [vmem:[%s22898_s13 + $0x3d80] ss:$16 sps:$4 sm:$0xff]  }
 0x42e   : > { %14337 = vmatpush1.bf16.msra.mxu0 %v20781_v50  ;;  %v20808_v50 = vld [vmem:[%s22898_s13 + $0x3f80] ss:$16 sps:$4 sm:$0xff]  }
 0x42f   : > { %14378 = vmatpush1.bf16.msra.mxu1 %v20784_v62  ;;  %14338 = vmatprep.subr.bf16.mxu0 %v20789_v15  ;;  %v20813_v62 = vld [vmem:[%s22898_s13 + $0x3d64] ss:$16 sps:$4 sm:$0xff]  }
 0x430   : > { %14379 = vmatprep.subr.bf16.mxu1 %v20792_v49  ;;  %v20816_v15 = vld [vmem:[%s22898_s13 + $0x3f64] ss:$16 sps:$4 sm:$0xff]   ;;  %v20811_v49 = vld [vmem:[%s22898_s13 + $0x3d60] ss:$16 sps:$4 sm:$0xff]  }
 0x432   : > { %14339 = vmatpush2.bf16.msra.mxu0 %v20787_v42  ;;  %v20814_v42 = vld [vmem:[%s22898_s13 + $0x3f60] ss:$16 sps:$4 sm:$0xff]  }
 0x433   : > { %14380 = vmatpush2.bf16.msra.mxu1 %v20790_v58  ;;  %14340 = vmatprep.subr.bf16.mxu0 %v20795_v45  ;;  %v20819_v58 = vld [vmem:[%s22898_s13 + $0x3d44] ss:$16 sps:$4 sm:$0xff]  }
 0x434   : > { %14381 = vmatprep.subr.bf16.mxu1 %v20798_v19  ;;  %v20822_v45 = vld [vmem:[%s22898_s13 + $0x3f44] ss:$16 sps:$4 sm:$0xff]   ;;  %v20817_v19 = vld [vmem:[%s22898_s13 + $0x3d40] ss:$16 sps:$4 sm:$0xff]  }
 0x436   : > { %14341 = vmatpush2.bf16.msra.mxu0 %v20793_v4  ;;  %v20820_v4 = vld [vmem:[%s22898_s13 + $0x3f40] ss:$16 sps:$4 sm:$0xff]  }
 0x437   : > { %14382 = vmatpush2.bf16.msra.mxu1 %v20796_v29  ;;  %14342 = vmatprep.subr.bf16.mxu0 %v20801_v3  ;;  %v20825_v29 = vld [vmem:[%s22898_s13 + $0x3d24] ss:$16 sps:$4 sm:$0xff]  }
 0x438   : > { %14383 = vmatprep.subr.bf16.mxu1 %v20804_v44  ;;  %v20828_v3 = vld [vmem:[%s22898_s13 + $0x3f24] ss:$16 sps:$4 sm:$0xff]   ;;  %v20823_v44 = vld [vmem:[%s22898_s13 + $0x3d20] ss:$16 sps:$4 sm:$0xff]  }
 0x43a   : > { %14343 = vmatpush2.bf16.msra.mxu0 %v20799_v34  ;;  %v20826_v34 = vld [vmem:[%s22898_s13 + $0x3f20] ss:$16 sps:$4 sm:$0xff]  }
 0x43b   : > { %14384 = vmatpush2.bf16.msra.mxu1 %v20802_v48  ;;  %14344 = vmatprep.subr.bf16.mxu0 %v20807_v41  ;;  %v20831_v48 = vld [vmem:[%s22898_s13 + $0x3d04] ss:$16 sps:$4 sm:$0xff]  }
 0x43c   : > { %14385 = vmatprep.subr.bf16.mxu1 %v20810_v22  ;;  %v20834_v41 = vld [vmem:[%s22898_s13 + $0x3f04] ss:$16 sps:$4 sm:$0xff]   ;;  %v20829_v22 = vld [vmem:[%s22898_s13 + $0x3d00] ss:$16 sps:$4 sm:$0xff]  }
 0x43e   : > { %14345 = vmatpush2.bf16.msra.mxu0 %v20805_v31  ;;  %v20832_v31 = vld [vmem:[%s22898_s13 + $0x3f00] ss:$16 sps:$4 sm:$0xff]  }
 0x43f   : > { %14386 = vmatpush2.bf16.msra.mxu1 %v20808_v50  ;;  %14346 = vmatprep.subr.bf16.mxu0 %v20813_v62  ;;  %v20841_v50 = vld [vmem:[%s22898_s13 + $0x40e4] ss:$16 sps:$4 sm:$0xff]   ;;  %v20844_v62 = vld [vmem:[%s22898_s13 + $0xec] ss:$16 sps:$4 sm:$0xff]  }
 0x440   : > { %14387 = vmatprep.subr.bf16.mxu1 %v20816_v15  ;;  %v20839_v15 = vld [vmem:[%s22898_s13 + $0x40e0] ss:$16 sps:$4 sm:$0xff]  }
 0x442   : > { %14347 = vmatpush2.bf16.msra.mxu0 %v20811_v49  ;;  %v20842_v49 = vld [vmem:[%s22898_s13 + $0xe8] ss:$16 sps:$4 sm:$0xff]  }
 0x443   : > { %14388 = vmatpush2.bf16.msra.mxu1 %v20814_v42  ;;  %14348 = vmatprep.subr.bf16.mxu0 %v20819_v58  ;;  %v24476_v42 = vcombine.low %v24375_v53, %v24375_v53  ;;  %v24480_v58 = vcombine.low %v24380_v57, %v24380_v57 }
 0x444   : > { %14389 = vmatprep.subr.bf16.mxu1 %v20822_v45  ;;  %v20847_v45 = vld [vmem:[%s22898_s13 + $0x40c4] ss:$16 sps:$4 sm:$0xff]  }
 0x445   : > { %26026 = vst [vmem:[#allocation29_spill] sm:$0xff] %v24476_v42 }
 0x446   : > { %14349 = vmatpush2.bf16.msra.mxu0 %v20817_v19  ;;  %v20850_v19 = vld [vmem:[%s22898_s13 + $0xcc] ss:$16 sps:$4 sm:$0xff]  }
 0x447   : > { %14390 = vmatpush2.bf16.msra.mxu1 %v20820_v4  ;;  %14350 = vmatprep.subr.bf16.mxu0 %v20825_v29  ;;  %v20845_v4 = vld [vmem:[%s22898_s13 + $0x40c0] ss:$16 sps:$4 sm:$0xff]   ;;  %v20848_v29 = vld [vmem:[%s22898_s13 + $0xc8] ss:$16 sps:$4 sm:$0xff]  }
 0x448   : > { %14391 = vmatprep.subr.bf16.mxu1 %v20828_v3 }
 0x44a   : > { %14351 = vmatpush2.bf16.msra.mxu0 %v20823_v44 }
 0x44b   : > { %14392 = vmatpush2.bf16.msra.mxu1 %v20826_v34  ;;  %14352 = vmatprep.subr.bf16.mxu0 %v20831_v48  ;;  %v20853_v48 = vld [vmem:[%s22898_s13 + $0x40a4] ss:$16 sps:$4 sm:$0xff]  }
 0x44c   : > { %14393 = vmatprep.subr.bf16.mxu1 %v20834_v41  ;;  %v20856_v41 = vld [vmem:[%s22898_s13 + $0xac] ss:$16 sps:$4 sm:$0xff]  }
 0x44e   : > { %14353 = vmatpush2.bf16.msra.mxu0 %v20829_v22 }
 0x44f   : > { %14394 = vmatpush2.bf16.msra.mxu1 %v20832_v31  ;;  %14404 = vmatprep.subr.bf16.mxu0 %v20841_v50  ;;  %v20851_v50 = vld [vmem:[%s22898_s13 + $0x40a0] ss:$16 sps:$4 sm:$0xff]  }
 0x450   : > { %14445 = vmatprep.subr.bf16.mxu1 %v20844_v62  ;;  %v20854_v62 = vld [vmem:[%s22898_s13 + $0xa8] ss:$16 sps:$4 sm:$0xff]  }
 0x451   : > { %v14110_v3 = vpop.f32.mrf.mxu0  ;;  %14355 = vmatmul.mubr.bf16.vlgmr.msra.gmra.mxu0 %v24476_v42  ;;  %v22763_v42 = vmov 0  }
 0x452   : > { %v14151_v44 = vpop.f32.mrf.mxu1  ;;  %14396 = vmatmul.mubr.bf16.vlgmr.msra.gmra.mxu1 %v24480_v58  ;;  %v14111_v53 = vadd.f32 %v14110_v3, %v24409_v33  ;;  %14405 = vmatpush1.bf16.msra.mxu0 %v20839_v15  ;;  %v20862_v3 = vld [vmem:[%s22898_s13 + $0x8c] ss:$16 sps:$4 sm:$0xff]  }
 0x453   : > { %14446 = vmatpush1.bf16.msra.mxu1 %v20842_v49  ;;  %v14112_v57 = vpop.f32.mrf.mxu0  ;;  %14406 = vmatprep.subr.bf16.mxu0 %v20847_v45 }
 0x454   : > { %v14153_v34 = vpop.f32.mrf.mxu1  ;;  %14447 = vmatprep.subr.bf16.mxu1 %v20850_v19  ;;  %v24491_v22 = vadd.f32 %v14151_v44, %v14111_v53  ;;  %v14113_v31 = vadd.f32 %v14112_v57, %v24416_v30  ;;  %14436 = vmatprep.mubr.bf16.mxu0 %v22763_v42  ;;  %v20859_v19 = vld [vmem:[%s22898_s13 + $0x4084] ss:$16 sps:$4 sm:$0xff]   ;;  %v20860_v44 = vld [vmem:[%s22898_s13 + $0x88] ss:$16 sps:$4 sm:$0xff]   ;;  %v20863_v53 = vld [vmem:[%s22898_s13 + $0x4060] ss:$16 sps:$4 sm:$0xff]  }
 0x455   : > { %14477 = vmatprep.mubr.bf16.mxu1 %v22962_v47  ;;  %v14114_v33 = vpop.f32.mrf.mxu0  ;;  %v20857_v47 = vld [vmem:[%s22898_s13 + $0x4080] ss:$16 sps:$4 sm:$0xff]   ;;  %v20866_v57 = vld [vmem:[%s22898_s13 + $0x68] ss:$16 sps:$4 sm:$0xff]  }
 0x456   : > { %v14155_v15 = vpop.f32.mrf.mxu1  ;;  %v24498_v49 = vadd.f32 %v14153_v34, %v14113_v31  ;;  %14407 = vmatpush1.bf16.msra.mxu0 %v20845_v4  ;;  %v20865_v4 = vld [vmem:[%s22898_s13 + $0x4064] ss:$16 sps:$4 sm:$0xff]   ;;  %v20872_v31 = vld [vmem:[%s22898_s13 + $0x48] ss:$16 sps:$4 sm:$0xff]   ;;  %v20875_v33 = vld [vmem:[%s22898_s13 + $0x4020] ss:$16 sps:$4 sm:$0xff]  }
 0x457   : > { %14448 = vmatpush1.bf16.msra.mxu1 %v20848_v29  ;;  %v14115_v45 = vpop.f32.mrf.mxu0  ;;  %14408 = vmatprep.subr.bf16.mxu0 %v20853_v48  ;;  %v20868_v29 = vld [vmem:[%s22898_s13 + $0x6c] ss:$16 sps:$4 sm:$0xff]   ;;  %v20871_v34 = vld [vmem:[%s22898_s13 + $0x4044] ss:$16 sps:$4 sm:$0xff]   ;;  %v20878_v15 = vld [vmem:[%s22898_s13 + $0x28] ss:$16 sps:$4 sm:$0xff]  }
 0x458   : > { %v14156_v30 = vpop.f32.mrf.mxu1  ;;  %14449 = vmatprep.subr.bf16.mxu1 %v20856_v41  ;;  %v20874_v48 = vld [vmem:[%s22898_s13 + $0x4c] ss:$16 sps:$4 sm:$0xff]   ;;  %v20869_v41 = vld [vmem:[%s22898_s13 + $0x4040] ss:$16 sps:$4 sm:$0xff]   ;;  %v20883_v45 = vld [vmem:[%s22898_s13 + $0x4004] ss:$16 sps:$4 sm:$0xff]  }
 0x459   : > { %v20886_v30 = vld [vmem:[%s22898_s13 + $0xc] ss:$16 sps:$4 sm:$0xff]  }
 0x45a   : > { %14409 = vmatpush1.bf16.msra.mxu0 %v20851_v50  ;;  %v20877_v50 = vld [vmem:[%s22898_s13 + $0x4024] ss:$16 sps:$4 sm:$0xff]  }
 0x45b   : > { %14450 = vmatpush1.bf16.msra.mxu1 %v20854_v62  ;;  %14410 = vmatprep.subr.bf16.mxu0 %v20859_v19  ;;  %v20880_v62 = vld [vmem:[%s22898_s13 + $0x2c] ss:$16 sps:$4 sm:$0xff]   ;;  %v20881_v19 = vld [vmem:[%s22898_s13 + $0x4000] ss:$16 sps:$4 sm:$0xff]  }
 0x45c   : > { %14451 = vmatprep.subr.bf16.mxu1 %v20862_v3  ;;  %v20884_v3 = vld [vmem:[%s22898_s13 + $0x8] ss:$16 sps:$4 sm:$0xff]  }
 0x45e   : > { %14411 = vmatpush1.bf16.msra.mxu0 %v20857_v47  ;;  %v20887_v47 = vld [vmem:[%s25971_s0 + $0x100] ss:$0 sps:$4 sm:$0xff]  }
 0x45f   : > { %14452 = vmatpush1.bf16.msra.mxu1 %v20860_v44  ;;  %14412 = vmatprep.subr.bf16.mxu0 %v20865_v4  ;;  %v20890_v44 = vld [vmem:[%s22898_s13 + $0x1ec] ss:$16 sps:$4 sm:$0xff]  }
 0x460   : > { %14453 = vmatprep.subr.bf16.mxu1 %v20868_v29  ;;  %v20893_v4 = vld [vmem:[%s22898_s13 + $0x2ec] ss:$16 sps:$4 sm:$0xff]   ;;  %v20888_v29 = vld [vmem:[%s22898_s13 + $0x1e8] ss:$16 sps:$4 sm:$0xff]  }
 0x462   : > { %14413 = vmatpush1.bf16.msra.mxu0 %v20863_v53  ;;  %v20891_v53 = vld [vmem:[%s22898_s13 + $0x2e8] ss:$16 sps:$4 sm:$0xff]  }
 0x463   : > { %14454 = vmatpush1.bf16.msra.mxu1 %v20866_v57  ;;  %14414 = vmatprep.subr.bf16.mxu0 %v20871_v34  ;;  %v20896_v57 = vld [vmem:[%s22898_s13 + $0x1cc] ss:$16 sps:$4 sm:$0xff]  }
 0x464   : > { %14455 = vmatprep.subr.bf16.mxu1 %v20874_v48  ;;  %v20899_v34 = vld [vmem:[%s22898_s13 + $0x2cc] ss:$16 sps:$4 sm:$0xff]   ;;  %v20894_v48 = vld [vmem:[%s22898_s13 + $0x1c8] ss:$16 sps:$4 sm:$0xff]  }
 0x466   : > { %14415 = vmatpush1.bf16.msra.mxu0 %v20869_v41  ;;  %v20897_v41 = vld [vmem:[%s22898_s13 + $0x2c8] ss:$16 sps:$4 sm:$0xff]  }
 0x467   : > { %14456 = vmatpush1.bf16.msra.mxu1 %v20872_v31  ;;  %14416 = vmatprep.subr.bf16.mxu0 %v20877_v50  ;;  %v20902_v31 = vld [vmem:[%s22898_s13 + $0x1ac] ss:$16 sps:$4 sm:$0xff]  }
 0x468   : > { %14457 = vmatprep.subr.bf16.mxu1 %v20880_v62  ;;  %v20905_v50 = vld [vmem:[%s22898_s13 + $0x2ac] ss:$16 sps:$4 sm:$0xff]   ;;  %v20900_v62 = vld [vmem:[%s22898_s13 + $0x1a8] ss:$16 sps:$4 sm:$0xff]  }
 0x46a   : > { %14417 = vmatpush1.bf16.msra.mxu0 %v20875_v33  ;;  %v20903_v33 = vld [vmem:[%s22898_s13 + $0x2a8] ss:$16 sps:$4 sm:$0xff]  }
 0x46b   : > { %14458 = vmatpush1.bf16.msra.mxu1 %v20878_v15  ;;  %14418 = vmatprep.subr.bf16.mxu0 %v20883_v45  ;;  %v20908_v15 = vld [vmem:[%s22898_s13 + $0x18c] ss:$16 sps:$4 sm:$0xff]  }
 0x46c   : > { %14459 = vmatprep.subr.bf16.mxu1 %v20886_v30  ;;  %v20911_v45 = vld [vmem:[%s22898_s13 + $0x28c] ss:$16 sps:$4 sm:$0xff]   ;;  %v20906_v30 = vld [vmem:[%s22898_s13 + $0x188] ss:$16 sps:$4 sm:$0xff]  }
 0x46e   : > { %14419 = vmatpush1.bf16.msra.mxu0 %v20881_v19  ;;  %v20909_v19 = vld [vmem:[%s22898_s13 + $0x288] ss:$16 sps:$4 sm:$0xff]  }
 0x46f   : > { %14460 = vmatpush1.bf16.msra.mxu1 %v20884_v3  ;;  %14486 = vmatprep.subr.bf16.mxu0 %v20893_v4  ;;  %v20917_v3 = vld [vmem:[%s22898_s13 + $0x26c] ss:$16 sps:$4 sm:$0xff]  }
 0x470   : > { %14461 = vmatprep.subr.bf16.mxu1 %v20890_v44  ;;  %v20915_v44 = vld [vmem:[%s22898_s13 + $0x268] ss:$16 sps:$4 sm:$0xff]   ;;  %v20920_v4 = vld [vmem:[%s22898_s13 + $0x14c] ss:$16 sps:$4 sm:$0xff]  }
 0x471   : > { %14437 = vmatmul.mubr.bf16.vlgmr.msra.gmra.mxu0 %v20887_v47  ;;  %v20912_v47 = vld [vmem:[%s22898_s13 + $0x168] ss:$16 sps:$4 sm:$0xff]  }
 0x472   : > { %14487 = vmatpush1.bf16.msra.mxu0 %v20891_v53  ;;  %14518 = vmatprep.mubr.bf16.mxu0 %v22969_v51  ;;  %v20914_v51 = vld [vmem:[%s22898_s13 + $0x16c] ss:$16 sps:$4 sm:$0xff]   ;;  %v20918_v53 = vld [vmem:[%s22898_s13 + $0x148] ss:$16 sps:$4 sm:$0xff]  }
 0x473   : > { %14462 = vmatpush2.bf16.msra.mxu1 %v20888_v29  ;;  %14488 = vmatprep.subr.bf16.mxu0 %v20899_v34  ;;  %v20923_v29 = vld [vmem:[%s22898_s13 + $0x24c] ss:$16 sps:$4 sm:$0xff]  }
 0x474   : > { %14463 = vmatprep.subr.bf16.mxu1 %v20896_v57  ;;  %v20921_v57 = vld [vmem:[%s22898_s13 + $0x248] ss:$16 sps:$4 sm:$0xff]   ;;  %v20926_v34 = vld [vmem:[%s22898_s13 + $0x12c] ss:$16 sps:$4 sm:$0xff]  }
 0x476   : > { %14489 = vmatpush1.bf16.msra.mxu0 %v20897_v41  ;;  %v20924_v41 = vld [vmem:[%s22898_s13 + $0x128] ss:$16 sps:$4 sm:$0xff]  }
 0x477   : > { %14464 = vmatpush2.bf16.msra.mxu1 %v20894_v48  ;;  %14490 = vmatprep.subr.bf16.mxu0 %v20905_v50  ;;  %v20929_v48 = vld [vmem:[%s22898_s13 + $0x22c] ss:$16 sps:$4 sm:$0xff]  }
 0x478   : > { %14465 = vmatprep.subr.bf16.mxu1 %v20902_v31  ;;  %v20927_v31 = vld [vmem:[%s22898_s13 + $0x228] ss:$16 sps:$4 sm:$0xff]   ;;  %v20932_v50 = vld [vmem:[%s22898_s13 + $0x10c] ss:$16 sps:$4 sm:$0xff]  }
 0x47a   : > { %14491 = vmatpush1.bf16.msra.mxu0 %v20903_v33  ;;  %v20930_v33 = vld [vmem:[%s22898_s13 + $0x108] ss:$16 sps:$4 sm:$0xff]  }
 0x47b   : > { %14466 = vmatpush2.bf16.msra.mxu1 %v20900_v62  ;;  %14492 = vmatprep.subr.bf16.mxu0 %v20911_v45  ;;  %v20935_v62 = vld [vmem:[%s22898_s13 + $0x20c] ss:$16 sps:$4 sm:$0xff]  }
 0x47c   : > { %14467 = vmatprep.subr.bf16.mxu1 %v20908_v15  ;;  %v20933_v15 = vld [vmem:[%s22898_s13 + $0x208] ss:$16 sps:$4 sm:$0xff]   ;;  %v20938_v45 = vld [vmem:[%s22898_s13 + $0x3ec] ss:$16 sps:$4 sm:$0xff]  }
 0x47e   : > { %14493 = vmatpush1.bf16.msra.mxu0 %v20909_v19  ;;  %v20936_v19 = vld [vmem:[%s22898_s13 + $0x3e8] ss:$16 sps:$4 sm:$0xff]  }
 0x47f   : > { %14468 = vmatpush2.bf16.msra.mxu1 %v20906_v30  ;;  %14494 = vmatprep.subr.bf16.mxu0 %v20917_v3  ;;  %v20941_v30 = vld [vmem:[%s22898_s13 + $0x4ec] ss:$16 sps:$4 sm:$0xff]  }
 0x480   : > { %14469 = vmatprep.subr.bf16.mxu1 %v20914_v51  ;;  %v20939_v51 = vld [vmem:[%s22898_s13 + $0x4e8] ss:$16 sps:$4 sm:$0xff]   ;;  %v20944_v3 = vld [vmem:[%s22898_s13 + $0x3cc] ss:$16 sps:$4 sm:$0xff]  }
 0x482   : > { %14495 = vmatpush1.bf16.msra.mxu0 %v20915_v44  ;;  %v20942_v44 = vld [vmem:[%s22898_s13 + $0x3c8] ss:$16 sps:$4 sm:$0xff]  }
 0x483   : > { %14470 = vmatpush2.bf16.msra.mxu1 %v20912_v47  ;;  %14496 = vmatprep.subr.bf16.mxu0 %v20923_v29  ;;  %v20947_v47 = vld [vmem:[%s22898_s13 + $0x4cc] ss:$16 sps:$4 sm:$0xff]  }
 0x484   : > { %14471 = vmatprep.subr.bf16.mxu1 %v20920_v4  ;;  %v20945_v4 = vld [vmem:[%s22898_s13 + $0x4c8] ss:$16 sps:$4 sm:$0xff]  }
 0x486   : > { %14497 = vmatpush1.bf16.msra.mxu0 %v20921_v57 }
 0x487   : > { %14472 = vmatpush2.bf16.msra.mxu1 %v20918_v53  ;;  %14498 = vmatprep.subr.bf16.mxu0 %v20929_v48 }
 0x488   : > { %14473 = vmatprep.subr.bf16.mxu1 %v20926_v34 }
 0x48a   : > { %14499 = vmatpush1.bf16.msra.mxu0 %v20927_v31  ;;  %v20953_v31 = vld [vmem:[%s22898_s13 + $0x4ac] ss:$16 sps:$4 sm:$0xff]  }
 0x48b   : > { %14474 = vmatpush2.bf16.msra.mxu1 %v20924_v41  ;;  %14500 = vmatprep.subr.bf16.mxu0 %v20935_v62  ;;  %v20950_v41 = vld [vmem:[%s22898_s13 + $0x3ac] ss:$16 sps:$4 sm:$0xff]  }
 0x48c   : > { %14475 = vmatprep.subr.bf16.mxu1 %v20932_v50 }
 0x48e   : > { %14501 = vmatpush1.bf16.msra.mxu0 %v20933_v15  ;;  %v20951_v15 = vld [vmem:[%s22898_s13 + $0x4a8] ss:$16 sps:$4 sm:$0xff]  }
 0x48f   : > { %14476 = vmatpush2.bf16.msra.mxu1 %v20930_v33  ;;  %14502 = vmatprep.subr.bf16.mxu0 %v20938_v45  ;;  %v20948_v33 = vld [vmem:[%s22898_s13 + $0x3a8] ss:$16 sps:$4 sm:$0xff]  }
 0x490   : > { %14527 = vmatprep.subr.bf16.mxu1 %v20941_v30 }
 0x491   : > { %v14192_v29 = vpop.f32.mrf.mxu0 }
 0x492   : > { %v14233_v53 = vpop.f32.mrf.mxu1  ;;  %14478 = vmatmul.mubr.bf16.vlgmr.msra.gmra.mxu1 %v22991_v6  ;;  %v14193_v57 = vadd.f32 %v14192_v29, %v24491_v22  ;;  %14503 = vmatpush2.bf16.msra.mxu0 %v20936_v19  ;;  %v20963_v29 = vld [vmem:[%s22898_s13 + $0x468] ss:$16 sps:$4 sm:$0xff]  }
 0x493   : > { %14528 = vmatpush1.bf16.msra.mxu1 %v20939_v51  ;;  %v14194_v34 = vpop.f32.mrf.mxu0  ;;  %14504 = vmatprep.subr.bf16.mxu0 %v20944_v3  ;;  %v20959_v51 = vld [vmem:[%s22898_s13 + $0x48c] ss:$16 sps:$4 sm:$0xff]   ;;  %v20957_v3 = vld [vmem:[%s22898_s13 + $0x488] ss:$16 sps:$4 sm:$0xff]  }
 0x494   : > { %v14235_v48 = vpop.f32.mrf.mxu1  ;;  %14529 = vmatprep.subr.bf16.mxu1 %v20947_v47  ;;  %v24568_v50 = vadd.f32 %v14233_v53, %v14193_v57  ;;  %v14195_v62 = vadd.f32 %v14194_v34, %v24498_v49  ;;  %14559 = vmatprep.mubr.bf16.mxu1 %v23035_v36  ;;  %v20956_v49 = vld [vmem:[%s22898_s13 + $0x38c] ss:$16 sps:$4 sm:$0xff]   ;;  %v20954_v36 = vld [vmem:[%s22898_s13 + $0x388] ss:$16 sps:$4 sm:$0xff]  }
 0x495   : > { %v14196_v6 = vpop.f32.mrf.mxu0  ;;  %v20962_v47 = vld [vmem:[%s22898_s13 + $0x36c] ss:$16 sps:$4 sm:$0xff]   ;;  %v20966_v34 = vld [vmem:[%s22898_s13 + $0x348] ss:$16 sps:$4 sm:$0xff]  }
 0x496   : > { %v14237_v22 = vpop.f32.mrf.mxu1  ;;  %v24574_v45 = vadd.f32 %v14235_v48, %v14195_v62  ;;  %14505 = vmatpush2.bf16.msra.mxu0 %v20942_v44  ;;  %v20965_v44 = vld [vmem:[%s22898_s13 + $0x46c] ss:$16 sps:$4 sm:$0xff]   ;;  %v20969_v48 = vld [vmem:[%s22898_s13 + $0x448] ss:$16 sps:$4 sm:$0xff]  }
 0x497   : > { %14530 = vmatpush1.bf16.msra.mxu1 %v20945_v4  ;;  %v14197_v30 = vpop.f32.mrf.mxu0  ;;  %14506 = vmatprep.subr.bf16.mxu0 %v20950_v41  ;;  %v20960_v4 = vld [vmem:[%s22898_s13 + $0x368] ss:$16 sps:$4 sm:$0xff]   ;;  %v20968_v53 = vld [vmem:[%s22898_s13 + $0x34c] ss:$16 sps:$4 sm:$0xff]  }
 0x498   : > { %v14238_v19 = vpop.f32.mrf.mxu1  ;;  %14531 = vmatprep.subr.bf16.mxu1 %v20953_v31  ;;  %v20971_v57 = vld [vmem:[%s22898_s13 + $0x44c] ss:$16 sps:$4 sm:$0xff]   ;;  %v20972_v62 = vld [vmem:[%s22898_s13 + $0x328] ss:$16 sps:$4 sm:$0xff]  }
 0x499   : > { %v20974_v41 = vld [vmem:[%s22898_s13 + $0x32c] ss:$16 sps:$4 sm:$0xff]   ;;  %v20978_v22 = vld [vmem:[%s22898_s13 + $0x308] ss:$16 sps:$4 sm:$0xff]  }
 0x49a   : > { %14507 = vmatpush2.bf16.msra.mxu0 %v20948_v33  ;;  %v20977_v31 = vld [vmem:[%s22898_s13 + $0x42c] ss:$16 sps:$4 sm:$0xff]   ;;  %v20975_v33 = vld [vmem:[%s22898_s13 + $0x428] ss:$16 sps:$4 sm:$0xff]  }
 0x49b   : > { %14532 = vmatpush1.bf16.msra.mxu1 %v20951_v15  ;;  %14508 = vmatprep.subr.bf16.mxu0 %v20956_v49  ;;  %v20980_v15 = vld [vmem:[%s22898_s13 + $0x30c] ss:$16 sps:$4 sm:$0xff]   ;;  %v20981_v30 = vld [vmem:[%s22898_s13 + $0x408] ss:$16 sps:$4 sm:$0xff]  }
 0x49c   : > { %14533 = vmatprep.subr.bf16.mxu1 %v20959_v51  ;;  %v20983_v6 = vld [vmem:[%s22898_s13 + $0x40c] ss:$16 sps:$4 sm:$0xff]   ;;  %v20984_v51 = vld [vmem:[%s22898_s13 + $0x5e8] ss:$16 sps:$4 sm:$0xff]  }
 0x49d   : > { %v20986_v19 = vld [vmem:[%s22898_s13 + $0x5ec] ss:$16 sps:$4 sm:$0xff]  }
 0x49e   : > { %14509 = vmatpush2.bf16.msra.mxu0 %v20954_v36  ;;  %v20989_v49 = vld [vmem:[%s22898_s13 + $0x6ec] ss:$16 sps:$4 sm:$0xff]   ;;  %v20987_v36 = vld [vmem:[%s22898_s13 + $0x6e8] ss:$16 sps:$4 sm:$0xff]  }
 0x49f   : > { %14534 = vmatpush1.bf16.msra.mxu1 %v20957_v3  ;;  %14510 = vmatprep.subr.bf16.mxu0 %v20962_v47  ;;  %v20992_v3 = vld [vmem:[%s22898_s13 + $0x5cc] ss:$16 sps:$4 sm:$0xff]  }
 0x4a0   : > { %14535 = vmatprep.subr.bf16.mxu1 %v20965_v44  ;;  %v20995_v47 = vld [vmem:[%s22898_s13 + $0x6cc] ss:$16 sps:$4 sm:$0xff]   ;;  %v20990_v44 = vld [vmem:[%s22898_s13 + $0x5c8] ss:$16 sps:$4 sm:$0xff]  }
 0x4a2   : > { %14511 = vmatpush2.bf16.msra.mxu0 %v20960_v4  ;;  %v20993_v4 = vld [vmem:[%s22898_s13 + $0x6c8] ss:$16 sps:$4 sm:$0xff]  }
 0x4a3   : > { %14536 = vmatpush1.bf16.msra.mxu1 %v20963_v29  ;;  %14512 = vmatprep.subr.bf16.mxu0 %v20968_v53  ;;  %v20998_v29 = vld [vmem:[%s22898_s13 + $0x5ac] ss:$16 sps:$4 sm:$0xff]  }
 0x4a4   : > { %14537 = vmatprep.subr.bf16.mxu1 %v20971_v57  ;;  %v21001_v53 = vld [vmem:[%s22898_s13 + $0x6ac] ss:$16 sps:$4 sm:$0xff]   ;;  %v20996_v57 = vld [vmem:[%s22898_s13 + $0x5a8] ss:$16 sps:$4 sm:$0xff]  }
 0x4a6   : > { %14513 = vmatpush2.bf16.msra.mxu0 %v20966_v34  ;;  %v21004_v34 = vld [vmem:[%s22898_s13 + $0x58c] ss:$16 sps:$4 sm:$0xff]  }
 0x4a7   : > { %14538 = vmatpush1.bf16.msra.mxu1 %v20969_v48  ;;  %14514 = vmatprep.subr.bf16.mxu0 %v20974_v41  ;;  %v21007_v48 = vld [vmem:[%s22898_s13 + $0x68c] ss:$16 sps:$4 sm:$0xff]   ;;  %v21002_v41 = vld [vmem:[%s22898_s13 + $0x588] ss:$16 sps:$4 sm:$0xff]  }
 0x4a8   : > { %14539 = vmatprep.subr.bf16.mxu1 %v20977_v31  ;;  %v21005_v31 = vld [vmem:[%s22898_s13 + $0x688] ss:$16 sps:$4 sm:$0xff]  }
 0x4aa   : > { %14515 = vmatpush2.bf16.msra.mxu0 %v20972_v62  ;;  %v21013_v62 = vld [vmem:[%s22898_s13 + $0x66c] ss:$16 sps:$4 sm:$0xff]  }
 0x4ab   : > { %14540 = vmatpush1.bf16.msra.mxu1 %v20975_v33  ;;  %14516 = vmatprep.subr.bf16.mxu0 %v20980_v15  ;;  %v21008_v33 = vld [vmem:[%s22898_s13 + $0x568] ss:$16 sps:$4 sm:$0xff]  }
 0x4ac   : > { %14541 = vmatprep.subr.bf16.mxu1 %v20983_v6  ;;  %v21011_v15 = vld [vmem:[%s22898_s13 + $0x668] ss:$16 sps:$4 sm:$0xff]   ;;  %v21016_v6 = vld [vmem:[%s22898_s13 + $0x54c] ss:$16 sps:$4 sm:$0xff]  }
 0x4ae   : > { %14517 = vmatpush2.bf16.msra.mxu0 %v20978_v22  ;;  %v21019_v22 = vld [vmem:[%s22898_s13 + $0x64c] ss:$16 sps:$4 sm:$0xff]  }
 0x4af   : > { %14542 = vmatpush1.bf16.msra.mxu1 %v20981_v30  ;;  %14568 = vmatprep.subr.bf16.mxu0 %v20989_v49  ;;  %v21014_v30 = vld [vmem:[%s22898_s13 + $0x548] ss:$16 sps:$4 sm:$0xff]   ;;  %v21022_v49 = vld [vmem:[%s22898_s13 + $0x52c] ss:$16 sps:$4 sm:$0xff]  }
 0x4b0   : > { %14543 = vmatprep.subr.bf16.mxu1 %v20986_v19  ;;  %v21017_v19 = vld [vmem:[%s22898_s13 + $0x648] ss:$16 sps:$4 sm:$0xff]  }
 0x4b1   : > { %14519 = vmatmul.mubr.bf16.vlgmr.msra.gmra.mxu0 %v22993_v7  ;;  %v20999_v7 = vld [vmem:[%s22898_s13 + $0x6a8] ss:$16 sps:$4 sm:$0xff]  }
 0x4b2   : > { %14569 = vmatpush1.bf16.msra.mxu0 %v20987_v36  ;;  %14600 = vmatprep.mubr.bf16.mxu0 %v23039_v37  ;;  %v21010_v37 = vld [vmem:[%s22898_s13 + $0x56c] ss:$16 sps:$4 sm:$0xff]   ;;  %v21020_v36 = vld [vmem:[%s22898_s13 + $0x528] ss:$16 sps:$4 sm:$0xff]  }
 0x4b3   : > { %14544 = vmatpush2.bf16.msra.mxu1 %v20984_v51  ;;  %14570 = vmatprep.subr.bf16.mxu0 %v20995_v47  ;;  %v21025_v51 = vld [vmem:[%s22898_s13 + $0x62c] ss:$16 sps:$4 sm:$0xff]  }
 0x4b4   : > { %14545 = vmatprep.subr.bf16.mxu1 %v20992_v3  ;;  %v21023_v3 = vld [vmem:[%s22898_s13 + $0x628] ss:$16 sps:$4 sm:$0xff]   ;;  %v21028_v47 = vld [vmem:[%s22898_s13 + $0x50c] ss:$16 sps:$4 sm:$0xff]  }
 0x4b6   : > { %14571 = vmatpush1.bf16.msra.mxu0 %v20993_v4  ;;  %v21026_v4 = vld [vmem:[%s22898_s13 + $0x508] ss:$16 sps:$4 sm:$0xff]  }
 0x4b7   : > { %14546 = vmatpush2.bf16.msra.mxu1 %v20990_v44  ;;  %14572 = vmatprep.subr.bf16.mxu0 %v21001_v53  ;;  %v21031_v44 = vld [vmem:[%s22898_s13 + $0x60c] ss:$16 sps:$4 sm:$0xff]  }
 0x4b8   : > { %14547 = vmatprep.subr.bf16.mxu1 %v20998_v29  ;;  %v21029_v29 = vld [vmem:[%s22898_s13 + $0x608] ss:$16 sps:$4 sm:$0xff]   ;;  %v21034_v53 = vld [vmem:[%s22898_s13 + $0x7ec] ss:$16 sps:$4 sm:$0xff]  }
 0x4ba   : > { %14573 = vmatpush1.bf16.msra.mxu0 %v20999_v7  ;;  %v21032_v7 = vld [vmem:[%s22898_s13 + $0x7e8] ss:$16 sps:$4 sm:$0xff]  }
 0x4bb   : > { %14548 = vmatpush2.bf16.msra.mxu1 %v20996_v57  ;;  %14574 = vmatprep.subr.bf16.mxu0 %v21007_v48  ;;  %v21037_v57 = vld [vmem:[%s22898_s13 + $0x8ec] ss:$16 sps:$4 sm:$0xff]  }
 0x4bc   : > { %14549 = vmatprep.subr.bf16.mxu1 %v21004_v34  ;;  %v21035_v34 = vld [vmem:[%s22898_s13 + $0x8e8] ss:$16 sps:$4 sm:$0xff]   ;;  %v21040_v48 = vld [vmem:[%s22898_s13 + $0x7cc] ss:$16 sps:$4 sm:$0xff]  }
 0x4be   : > { %14575 = vmatpush1.bf16.msra.mxu0 %v21005_v31 }
 0x4bf   : > { %14550 = vmatpush2.bf16.msra.mxu1 %v21002_v41  ;;  %14576 = vmatprep.subr.bf16.mxu0 %v21013_v62  ;;  %v21043_v41 = vld [vmem:[%s22898_s13 + $0x8cc] ss:$16 sps:$4 sm:$0xff]  }
 0x4c0   : > { %14551 = vmatprep.subr.bf16.mxu1 %v21010_v37 }
 0x4c2   : > { %14577 = vmatpush1.bf16.msra.mxu0 %v21011_v15  ;;  %v21041_v15 = vld [vmem:[%s22898_s13 + $0x8c8] ss:$16 sps:$4 sm:$0xff]  }
 0x4c3   : > { %14552 = vmatpush2.bf16.msra.mxu1 %v21008_v33  ;;  %14578 = vmatprep.subr.bf16.mxu0 %v21019_v22  ;;  %v21038_v33 = vld [vmem:[%s22898_s13 + $0x7c8] ss:$16 sps:$4 sm:$0xff]  }
 0x4c4   : > { %14553 = vmatprep.subr.bf16.mxu1 %v21016_v6 }
 0x4c6   : > { %14579 = vmatpush1.bf16.msra.mxu0 %v21017_v19  ;;  %v21049_v19 = vld [vmem:[%s22898_s13 + $0x8ac] ss:$16 sps:$4 sm:$0xff]  }
 0x4c7   : > { %14554 = vmatpush2.bf16.msra.mxu1 %v21014_v30  ;;  %14580 = vmatprep.subr.bf16.mxu0 %v21025_v51  ;;  %v21046_v30 = vld [vmem:[%s22898_s13 + $0x7ac] ss:$16 sps:$4 sm:$0xff]  }
 0x4c8   : > { %14555 = vmatprep.subr.bf16.mxu1 %v21022_v49 }
 0x4ca   : > { %14581 = vmatpush1.bf16.msra.mxu0 %v21023_v3  ;;  %v21044_v3 = vld [vmem:[%s22898_s13 + $0x7a8] ss:$16 sps:$4 sm:$0xff]  }
 0x4cb   : > { %14556 = vmatpush2.bf16.msra.mxu1 %v21020_v36  ;;  %14582 = vmatprep.subr.bf16.mxu0 %v21031_v44 }
 0x4cc   : > { %14557 = vmatprep.subr.bf16.mxu1 %v21028_v47  ;;  %v21047_v47 = vld [vmem:[%s22898_s13 + $0x8a8] ss:$16 sps:$4 sm:$0xff]  }
 0x4ce   : > { %14583 = vmatpush1.bf16.msra.mxu0 %v21029_v29  ;;  %v21050_v29 = vld [vmem:[%s22898_s13 + $0x788] ss:$16 sps:$4 sm:$0xff]  }
 0x4cf   : > { %14558 = vmatpush2.bf16.msra.mxu1 %v21026_v4  ;;  %14584 = vmatprep.subr.bf16.mxu0 %v21034_v53  ;;  %v21053_v53 = vld [vmem:[%s22898_s13 + $0x888] ss:$16 sps:$4 sm:$0xff]  }
 0x4d0   : > { %14609 = vmatprep.subr.bf16.mxu1 %v21037_v57  ;;  %v21058_v57 = vld [vmem:[%s22898_s13 + $0x76c] ss:$16 sps:$4 sm:$0xff]  }
 0x4d1   : > { %v14274_v31 = vpop.f32.mrf.mxu0 }
 0x4d2   : > { %v14315_v37 = vpop.f32.mrf.mxu1  ;;  %14560 = vmatmul.mubr.bf16.vlgmr.msra.gmra.mxu1 %v23083_v16  ;;  %v14275_v62 = vadd.f32 %v14274_v31, %v24568_v50  ;;  %14585 = vmatpush2.bf16.msra.mxu0 %v21032_v7  ;;  %v21061_v7 = vld [vmem:[%s22898_s13 + $0x86c] ss:$16 sps:$4 sm:$0xff]  }
 0x4d3   : > { %14610 = vmatpush1.bf16.msra.mxu1 %v21035_v34  ;;  %v14276_v6 = vpop.f32.mrf.mxu0  ;;  %14586 = vmatprep.subr.bf16.mxu0 %v21040_v48  ;;  %v21056_v34 = vld [vmem:[%s22898_s13 + $0x768] ss:$16 sps:$4 sm:$0xff]   ;;  %v21067_v31 = vld [vmem:[%s22898_s13 + $0x84c] ss:$16 sps:$4 sm:$0xff]  }
 0x4d4   : > { %v14317_v22 = vpop.f32.mrf.mxu1  ;;  %14611 = vmatprep.subr.bf16.mxu1 %v21043_v41  ;;  %v24642_v49 = vadd.f32 %v14315_v37, %v14275_v62  ;;  %v14277_v16 = vadd.f32 %v14276_v6, %v24574_v45  ;;  %14641 = vmatprep.mubr.bf16.mxu1 %v23105_v24  ;;  %v21052_v45 = vld [vmem:[%s22898_s13 + $0x78c] ss:$16 sps:$4 sm:$0xff]   ;;  %v21059_v48 = vld [vmem:[%s22898_s13 + $0x868] ss:$16 sps:$4 sm:$0xff]  }
 0x4d5   : > { %v14278_v50 = vpop.f32.mrf.mxu0  ;;  %v21055_v24 = vld [vmem:[%s22898_s13 + $0x88c] ss:$16 sps:$4 sm:$0xff]   ;;  %v21062_v37 = vld [vmem:[%s22898_s13 + $0x748] ss:$16 sps:$4 sm:$0xff]  }
 0x4d6   : > { %v14319_v51 = vpop.f32.mrf.mxu1  ;;  %v24646_v36 = vadd.f32 %v14317_v22, %v14277_v16  ;;  %14587 = vmatpush2.bf16.msra.mxu0 %v21038_v33  ;;  %v21064_v41 = vld [vmem:[%s22898_s13 + $0x74c] ss:$16 sps:$4 sm:$0xff]   ;;  %v21065_v62 = vld [vmem:[%s22898_s13 + $0x848] ss:$16 sps:$4 sm:$0xff]  }
 0x4d7   : > { %14612 = vmatpush1.bf16.msra.mxu1 %v21041_v15  ;;  %v14279_v44 = vpop.f32.mrf.mxu0  ;;  %14588 = vmatprep.subr.bf16.mxu0 %v21046_v30  ;;  %v21070_v33 = vld [vmem:[%s22898_s13 + $0x72c] ss:$16 sps:$4 sm:$0xff]   ;;  %v21068_v6 = vld [vmem:[%s22898_s13 + $0x728] ss:$16 sps:$4 sm:$0xff]  }
 0x4d8   : > { %v14320_v4 = vpop.f32.mrf.mxu1  ;;  %14613 = vmatprep.subr.bf16.mxu1 %v21049_v19  ;;  %v21073_v15 = vld [vmem:[%s22898_s13 + $0x82c] ss:$16 sps:$4 sm:$0xff]   ;;  %v21071_v22 = vld [vmem:[%s22898_s13 + $0x828] ss:$16 sps:$4 sm:$0xff]  }
 0x4d9   : > { %v21076_v30 = vld [vmem:[%s22898_s13 + $0x70c] ss:$16 sps:$4 sm:$0xff]   ;;  %v21074_v16 = vld [vmem:[%s22898_s13 + $0x708] ss:$16 sps:$4 sm:$0xff]  }
 0x4da   : > { %14589 = vmatpush2.bf16.msra.mxu0 %v21044_v3  ;;  %v21079_v19 = vld [vmem:[%s22898_s13 + $0x80c] ss:$16 sps:$4 sm:$0xff]   ;;  %v21077_v50 = vld [vmem:[%s22898_s13 + $0x808] ss:$16 sps:$4 sm:$0xff]  }
 0x4db   : > { %14614 = vmatpush1.bf16.msra.mxu1 %v21047_v47  ;;  %14590 = vmatprep.subr.bf16.mxu0 %v21052_v45  ;;  %v21082_v51 = vld [vmem:[%s22898_s13 + $0x9ec] ss:$16 sps:$4 sm:$0xff]   ;;  %v21080_v47 = vld [vmem:[%s22898_s13 + $0x9e8] ss:$16 sps:$4 sm:$0xff]  }
 0x4dc   : > { %14615 = vmatprep.subr.bf16.mxu1 %v21055_v24  ;;  %v21085_v3 = vld [vmem:[%s22898_s13 + $0xaec] ss:$16 sps:$4 sm:$0xff]   ;;  %v21083_v44 = vld [vmem:[%s22898_s13 + $0xae8] ss:$16 sps:$4 sm:$0xff]  }
 0x4dd   : > { %v21088_v4 = vld [vmem:[%s22898_s13 + $0x9cc] ss:$16 sps:$4 sm:$0xff]   ;;  %v21086_v24 = vld [vmem:[%s22898_s13 + $0x9c8] ss:$16 sps:$4 sm:$0xff]  }
 0x4de   : > { %14591 = vmatpush2.bf16.msra.mxu0 %v21050_v29  ;;  %v21091_v45 = vld [vmem:[%s22898_s13 + $0xacc] ss:$16 sps:$4 sm:$0xff]   ;;  %v21089_v29 = vld [vmem:[%s22898_s13 + $0xac8] ss:$16 sps:$4 sm:$0xff]  }
 0x4df   : > { %14616 = vmatpush1.bf16.msra.mxu1 %v21053_v53  ;;  %14592 = vmatprep.subr.bf16.mxu0 %v21058_v57  ;;  %v21094_v53 = vld [vmem:[%s22898_s13 + $0x9ac] ss:$16 sps:$4 sm:$0xff]  }
 0x4e0   : > { %14617 = vmatprep.subr.bf16.mxu1 %v21061_v7  ;;  %v21097_v57 = vld [vmem:[%s22898_s13 + $0xaac] ss:$16 sps:$4 sm:$0xff]   ;;  %v21092_v7 = vld [vmem:[%s22898_s13 + $0x9a8] ss:$16 sps:$4 sm:$0xff]  }
 0x4e2   : > { %14593 = vmatpush2.bf16.msra.mxu0 %v21056_v34  ;;  %v21100_v34 = vld [vmem:[%s22898_s13 + $0x98c] ss:$16 sps:$4 sm:$0xff]  }
 0x4e3   : > { %14618 = vmatpush1.bf16.msra.mxu1 %v21059_v48  ;;  %14594 = vmatprep.subr.bf16.mxu0 %v21064_v41  ;;  %v21103_v48 = vld [vmem:[%s22898_s13 + $0xa8c] ss:$16 sps:$4 sm:$0xff]   ;;  %v21098_v41 = vld [vmem:[%s22898_s13 + $0x988] ss:$16 sps:$4 sm:$0xff]  }
 0x4e4   : > { %14619 = vmatprep.subr.bf16.mxu1 %v21067_v31  ;;  %v21101_v31 = vld [vmem:[%s22898_s13 + $0xa88] ss:$16 sps:$4 sm:$0xff]  }
 0x4e6   : > { %14595 = vmatpush2.bf16.msra.mxu0 %v21062_v37  ;;  %v21109_v37 = vld [vmem:[%s22898_s13 + $0xa6c] ss:$16 sps:$4 sm:$0xff]  }
 0x4e7   : > { %14620 = vmatpush1.bf16.msra.mxu1 %v21065_v62  ;;  %14596 = vmatprep.subr.bf16.mxu0 %v21070_v33  ;;  %v21104_v62 = vld [vmem:[%s22898_s13 + $0x968] ss:$16 sps:$4 sm:$0xff]  }
 0x4e8   : > { %14621 = vmatprep.subr.bf16.mxu1 %v21073_v15  ;;  %v21107_v33 = vld [vmem:[%s22898_s13 + $0xa68] ss:$16 sps:$4 sm:$0xff]   ;;  %v21112_v15 = vld [vmem:[%s22898_s13 + $0x94c] ss:$16 sps:$4 sm:$0xff]  }
 0x4ea   : > { %14597 = vmatpush2.bf16.msra.mxu0 %v21068_v6  ;;  %v21115_v6 = vld [vmem:[%s22898_s13 + $0xa4c] ss:$16 sps:$4 sm:$0xff]  }
 0x4eb   : > { %14622 = vmatpush1.bf16.msra.mxu1 %v21071_v22  ;;  %14598 = vmatprep.subr.bf16.mxu0 %v21076_v30  ;;  %v21110_v22 = vld [vmem:[%s22898_s13 + $0x948] ss:$16 sps:$4 sm:$0xff]  }
 0x4ec   : > { %14623 = vmatprep.subr.bf16.mxu1 %v21079_v19  ;;  %v21113_v30 = vld [vmem:[%s22898_s13 + $0xa48] ss:$16 sps:$4 sm:$0xff]   ;;  %v21118_v19 = vld [vmem:[%s22898_s13 + $0x92c] ss:$16 sps:$4 sm:$0xff]  }
 0x4ee   : > { %14599 = vmatpush2.bf16.msra.mxu0 %v21074_v16  ;;  %v21121_v16 = vld [vmem:[%s22898_s13 + $0xa2c] ss:$16 sps:$4 sm:$0xff]  }
 0x4ef   : > { %14624 = vmatpush1.bf16.msra.mxu1 %v21077_v50  ;;  %14650 = vmatprep.subr.bf16.mxu0 %v21085_v3  ;;  %v21116_v50 = vld [vmem:[%s22898_s13 + $0x928] ss:$16 sps:$4 sm:$0xff]   ;;  %v21124_v3 = vld [vmem:[%s22898_s13 + $0x90c] ss:$16 sps:$4 sm:$0xff]  }
 0x4f0   : > { %14625 = vmatprep.subr.bf16.mxu1 %v21082_v51  ;;  %v21119_v51 = vld [vmem:[%s22898_s13 + $0xa28] ss:$16 sps:$4 sm:$0xff]  }
 0x4f1   : > { %14601 = vmatmul.mubr.bf16.vlgmr.msra.gmra.mxu0 %v23087_v17  ;;  %v21095_v17 = vld [vmem:[%s22898_s13 + $0xaa8] ss:$16 sps:$4 sm:$0xff]  }
 0x4f2   : > { %14651 = vmatpush1.bf16.msra.mxu0 %v21083_v44  ;;  %14682 = vmatprep.mubr.bf16.mxu0 %v23109_v25  ;;  %v21106_v25 = vld [vmem:[%s22898_s13 + $0x96c] ss:$16 sps:$4 sm:$0xff]   ;;  %v21122_v44 = vld [vmem:[%s22898_s13 + $0x908] ss:$16 sps:$4 sm:$0xff]  }
 0x4f3   : > { %14626 = vmatpush2.bf16.msra.mxu1 %v21080_v47  ;;  %14652 = vmatprep.subr.bf16.mxu0 %v21091_v45  ;;  %v21127_v47 = vld [vmem:[%s22898_s13 + $0xa0c] ss:$16 sps:$4 sm:$0xff]  }
 0x4f4   : > { %14627 = vmatprep.subr.bf16.mxu1 %v21088_v4  ;;  %v21125_v4 = vld [vmem:[%s22898_s13 + $0xa08] ss:$16 sps:$4 sm:$0xff]   ;;  %v21130_v45 = vld [vmem:[%s22898_s13 + $0xbec] ss:$16 sps:$4 sm:$0xff]  }
 0x4f6   : > { %14653 = vmatpush1.bf16.msra.mxu0 %v21089_v29  ;;  %v21128_v29 = vld [vmem:[%s22898_s13 + $0xbe8] ss:$16 sps:$4 sm:$0xff]  }
 0x4f7   : > { %14628 = vmatpush2.bf16.msra.mxu1 %v21086_v24  ;;  %14654 = vmatprep.subr.bf16.mxu0 %v21097_v57  ;;  %v21133_v24 = vld [vmem:[%s22898_s13 + $0xcec] ss:$16 sps:$4 sm:$0xff]  }
 0x4f8   : > { %14629 = vmatprep.subr.bf16.mxu1 %v21094_v53  ;;  %v21131_v53 = vld [vmem:[%s22898_s13 + $0xce8] ss:$16 sps:$4 sm:$0xff]   ;;  %v21136_v57 = vld [vmem:[%s22898_s13 + $0xbcc] ss:$16 sps:$4 sm:$0xff]  }
 0x4fa   : > { %14655 = vmatpush1.bf16.msra.mxu0 %v21095_v17 }
 0x4fb   : > { %14630 = vmatpush2.bf16.msra.mxu1 %v21092_v7  ;;  %14656 = vmatprep.subr.bf16.mxu0 %v21103_v48  ;;  %v21139_v7 = vld [vmem:[%s22898_s13 + $0xccc] ss:$16 sps:$4 sm:$0xff]  }
 0x4fc   : > { %14631 = vmatprep.subr.bf16.mxu1 %v21100_v34 }
 0x4fe   : > { %14657 = vmatpush1.bf16.msra.mxu0 %v21101_v31  ;;  %v21137_v31 = vld [vmem:[%s22898_s13 + $0xcc8] ss:$16 sps:$4 sm:$0xff]  }
 0x4ff   : > { %14632 = vmatpush2.bf16.msra.mxu1 %v21098_v41  ;;  %14658 = vmatprep.subr.bf16.mxu0 %v21109_v37  ;;  %v21134_v41 = vld [vmem:[%s22898_s13 + $0xbc8] ss:$16 sps:$4 sm:$0xff]  }
 0x500   : > { %14633 = vmatprep.subr.bf16.mxu1 %v21106_v25 }
 0x502   : > { %14659 = vmatpush1.bf16.msra.mxu0 %v21107_v33  ;;  %v21145_v33 = vld [vmem:[%s22898_s13 + $0xcac] ss:$16 sps:$4 sm:$0xff]  }
 0x503   : > { %14634 = vmatpush2.bf16.msra.mxu1 %v21104_v62  ;;  %14660 = vmatprep.subr.bf16.mxu0 %v21115_v6  ;;  %v21142_v62 = vld [vmem:[%s22898_s13 + $0xbac] ss:$16 sps:$4 sm:$0xff]  }
 0x504   : > { %14635 = vmatprep.subr.bf16.mxu1 %v21112_v15 }
 0x506   : > { %14661 = vmatpush1.bf16.msra.mxu0 %v21113_v30  ;;  %v21140_v30 = vld [vmem:[%s22898_s13 + $0xba8] ss:$16 sps:$4 sm:$0xff]  }
 0x507   : > { %14636 = vmatpush2.bf16.msra.mxu1 %v21110_v22  ;;  %14662 = vmatprep.subr.bf16.mxu0 %v21121_v16 }
 0x508   : > { %14637 = vmatprep.subr.bf16.mxu1 %v21118_v19  ;;  %v21143_v19 = vld [vmem:[%s22898_s13 + $0xca8] ss:$16 sps:$4 sm:$0xff]  }
 0x50a   : > { %14663 = vmatpush1.bf16.msra.mxu0 %v21119_v51  ;;  %v21146_v51 = vld [vmem:[%s22898_s13 + $0xb88] ss:$16 sps:$4 sm:$0xff]  }
 0x50b   : > { %14638 = vmatpush2.bf16.msra.mxu1 %v21116_v50  ;;  %14664 = vmatprep.subr.bf16.mxu0 %v21127_v47  ;;  %v21154_v47 = vld [vmem:[%s22898_s13 + $0xb6c] ss:$16 sps:$4 sm:$0xff]  }
 0x50c   : > { %14639 = vmatprep.subr.bf16.mxu1 %v21124_v3  ;;  %v21149_v3 = vld [vmem:[%s22898_s13 + $0xc88] ss:$16 sps:$4 sm:$0xff]  }
 0x50e   : > { %14665 = vmatpush1.bf16.msra.mxu0 %v21125_v4  ;;  %v21152_v4 = vld [vmem:[%s22898_s13 + $0xb68] ss:$16 sps:$4 sm:$0xff]  }
 0x50f   : > { %14640 = vmatpush2.bf16.msra.mxu1 %v21122_v44  ;;  %14666 = vmatprep.subr.bf16.mxu0 %v21130_v45  ;;  %v21157_v44 = vld [vmem:[%s22898_s13 + $0xc6c] ss:$16 sps:$4 sm:$0xff]   ;;  %v21155_v45 = vld [vmem:[%s22898_s13 + $0xc68] ss:$16 sps:$4 sm:$0xff]  }
 0x510   : > { %14691 = vmatprep.subr.bf16.mxu1 %v21133_v24  ;;  %v21160_v24 = vld [vmem:[%s22898_s13 + $0xb4c] ss:$16 sps:$4 sm:$0xff]  }
 0x511   : > { %v14356_v17 = vpop.f32.mrf.mxu0 }
 0x512   : > { %v14397_v34 = vpop.f32.mrf.mxu1  ;;  %14642 = vmatmul.mubr.bf16.vlgmr.msra.gmra.mxu1 %v23183_v38  ;;  %v14357_v48 = vadd.f32 %v14356_v17, %v24642_v49  ;;  %14667 = vmatpush2.bf16.msra.mxu0 %v21128_v29  ;;  %v21163_v29 = vld [vmem:[%s22898_s13 + $0xc4c] ss:$16 sps:$4 sm:$0xff]  }
 0x513   : > { %14692 = vmatpush1.bf16.msra.mxu1 %v21131_v53  ;;  %v14358_v25 = vpop.f32.mrf.mxu0  ;;  %14668 = vmatprep.subr.bf16.mxu0 %v21136_v57  ;;  %v21158_v53 = vld [vmem:[%s22898_s13 + $0xb48] ss:$16 sps:$4 sm:$0xff]   ;;  %v21169_v17 = vld [vmem:[%s22898_s13 + $0xc2c] ss:$16 sps:$4 sm:$0xff]  }
 0x514   : > { %v14399_v37 = vpop.f32.mrf.mxu1  ;;  %14693 = vmatprep.subr.bf16.mxu1 %v21139_v7  ;;  %v24716_v15 = vadd.f32 %v14397_v34, %v14357_v48  ;;  %v14359_v38 = vadd.f32 %v14358_v25, %v24646_v36  ;;  %14723 = vmatprep.mubr.bf16.mxu1 %v23199_v23  ;;  %v21148_v36 = vld [vmem:[%s22898_s13 + $0xb8c] ss:$16 sps:$4 sm:$0xff]   ;;  %v21161_v57 = vld [vmem:[%s22898_s13 + $0xc48] ss:$16 sps:$4 sm:$0xff]  }
 0x515   : > { %v14360_v49 = vpop.f32.mrf.mxu0  ;;  %v21151_v23 = vld [vmem:[%s22898_s13 + $0xc8c] ss:$16 sps:$4 sm:$0xff]   ;;  %v21164_v34 = vld [vmem:[%s22898_s13 + $0xb28] ss:$16 sps:$4 sm:$0xff]  }
 0x516   : > { %v14401_v6 = vpop.f32.mrf.mxu1  ;;  %v24720_v22 = vadd.f32 %v14399_v37, %v14359_v38  ;;  %14669 = vmatpush2.bf16.msra.mxu0 %v21134_v41  ;;  %v21166_v7 = vld [vmem:[%s22898_s13 + $0xb2c] ss:$16 sps:$4 sm:$0xff]   ;;  %v21167_v48 = vld [vmem:[%s22898_s13 + $0xc28] ss:$16 sps:$4 sm:$0xff]  }
 0x517   : > { %14694 = vmatpush1.bf16.msra.mxu1 %v21137_v31  ;;  %v14361_v16 = vpop.f32.mrf.mxu0  ;;  %14670 = vmatprep.subr.bf16.mxu0 %v21142_v62  ;;  %v21172_v41 = vld [vmem:[%s22898_s13 + $0xb0c] ss:$16 sps:$4 sm:$0xff]   ;;  %v21170_v25 = vld [vmem:[%s22898_s13 + $0xb08] ss:$16 sps:$4 sm:$0xff]  }
 0x518   : > { %v14402_v50 = vpop.f32.mrf.mxu1  ;;  %14695 = vmatprep.subr.bf16.mxu1 %v21145_v33  ;;  %v21175_v31 = vld [vmem:[%s22898_s13 + $0xc0c] ss:$16 sps:$4 sm:$0xff]   ;;  %v21173_v37 = vld [vmem:[%s22898_s13 + $0xc08] ss:$16 sps:$4 sm:$0xff]  }
 0x519   : > { %v21178_v62 = vld [vmem:[%s22898_s13 + $0xdec] ss:$16 sps:$4 sm:$0xff]   ;;  %v21176_v38 = vld [vmem:[%s22898_s13 + $0xde8] ss:$16 sps:$4 sm:$0xff]  }
 0x51a   : > { %14671 = vmatpush2.bf16.msra.mxu0 %v21140_v30  ;;  %v21181_v33 = vld [vmem:[%s22898_s13 + $0xeec] ss:$16 sps:$4 sm:$0xff]   ;;  %v21179_v49 = vld [vmem:[%s22898_s13 + $0xee8] ss:$16 sps:$4 sm:$0xff]  }
 0x51b   : > { %14696 = vmatpush1.bf16.msra.mxu1 %v21143_v19  ;;  %14672 = vmatprep.subr.bf16.mxu0 %v21148_v36  ;;  %v21184_v6 = vld [vmem:[%s22898_s13 + $0xdcc] ss:$16 sps:$4 sm:$0xff]   ;;  %v21182_v50 = vld [vmem:[%s22898_s13 + $0xdc8] ss:$16 sps:$4 sm:$0xff]  }
 0x51c   : > { %14697 = vmatprep.subr.bf16.mxu1 %v21151_v23  ;;  %v21187_v30 = vld [vmem:[%s22898_s13 + $0xecc] ss:$16 sps:$4 sm:$0xff]   ;;  %v21185_v36 = vld [vmem:[%s22898_s13 + $0xec8] ss:$16 sps:$4 sm:$0xff]  }
 0x51e   : > { %14673 = vmatpush2.bf16.msra.mxu0 %v21146_v51  ;;  %v21190_v51 = vld [vmem:[%s22898_s13 + $0xdac] ss:$16 sps:$4 sm:$0xff]  }
 0x51f   : > { %14698 = vmatpush1.bf16.msra.mxu1 %v21149_v3  ;;  %14674 = vmatprep.subr.bf16.mxu0 %v21154_v47  ;;  %v21193_v3 = vld [vmem:[%s22898_s13 + $0xeac] ss:$16 sps:$4 sm:$0xff]   ;;  %v21188_v47 = vld [vmem:[%s22898_s13 + $0xda8] ss:$16 sps:$4 sm:$0xff]  }
 0x520   : > { %14699 = vmatprep.subr.bf16.mxu1 %v21157_v44  ;;  %v21191_v44 = vld [vmem:[%s22898_s13 + $0xea8] ss:$16 sps:$4 sm:$0xff]  }
 0x522   : > { %14675 = vmatpush2.bf16.msra.mxu0 %v21152_v4 }
 0x523   : > { %14700 = vmatpush1.bf16.msra.mxu1 %v21155_v45  ;;  %14676 = vmatprep.subr.bf16.mxu0 %v21160_v24  ;;  %v21196_v45 = vld [vmem:[%s22898_s13 + $0xd8c] ss:$16 sps:$4 sm:$0xff]  }
 0x524   : > { %14701 = vmatprep.subr.bf16.mxu1 %v21163_v29  ;;  %v21199_v24 = vld [vmem:[%s22898_s13 + $0xe8c] ss:$16 sps:$4 sm:$0xff]  }
 0x525   : > { %v21202_v29 = vld [vmem:[%s22898_s13 + $0xd6c] ss:$16 sps:$4 sm:$0xff]  }
 0x526   : > { %14677 = vmatpush2.bf16.msra.mxu0 %v21158_v53  ;;  %v21205_v53 = vld [vmem:[%s22898_s13 + $0xe6c] ss:$16 sps:$4 sm:$0xff]  }
 0x527   : > { %14702 = vmatpush1.bf16.msra.mxu1 %v21161_v57  ;;  %14678 = vmatprep.subr.bf16.mxu0 %v21166_v7  ;;  %v21200_v57 = vld [vmem:[%s22898_s13 + $0xd68] ss:$16 sps:$4 sm:$0xff]  }
 0x528   : > { %14703 = vmatprep.subr.bf16.mxu1 %v21169_v17  ;;  %v21203_v7 = vld [vmem:[%s22898_s13 + $0xe68] ss:$16 sps:$4 sm:$0xff]   ;;  %v21208_v17 = vld [vmem:[%s22898_s13 + $0xd4c] ss:$16 sps:$4 sm:$0xff]  }
 0x52a   : > { %14679 = vmatpush2.bf16.msra.mxu0 %v21164_v34  ;;  %v21211_v34 = vld [vmem:[%s22898_s13 + $0xe4c] ss:$16 sps:$4 sm:$0xff]  }
 0x52b   : > { %14704 = vmatpush1.bf16.msra.mxu1 %v21167_v48  ;;  %14680 = vmatprep.subr.bf16.mxu0 %v21172_v41  ;;  %v21206_v48 = vld [vmem:[%s22898_s13 + $0xd48] ss:$16 sps:$4 sm:$0xff]  }
 0x52c   : > { %14705 = vmatprep.subr.bf16.mxu1 %v21175_v31  ;;  %v21209_v41 = vld [vmem:[%s22898_s13 + $0xe48] ss:$16 sps:$4 sm:$0xff]   ;;  %v21214_v31 = vld [vmem:[%s22898_s13 + $0xd2c] ss:$16 sps:$4 sm:$0xff]  }
 0x52e   : > { %14681 = vmatpush2.bf16.msra.mxu0 %v21170_v25  ;;  %v21217_v25 = vld [vmem:[%s22898_s13 + $0xe2c] ss:$16 sps:$4 sm:$0xff]  }
 0x52f   : > { %14706 = vmatpush1.bf16.msra.mxu1 %v21173_v37  ;;  %14732 = vmatprep.subr.bf16.mxu0 %v21181_v33  ;;  %v21212_v37 = vld [vmem:[%s22898_s13 + $0xd28] ss:$16 sps:$4 sm:$0xff]   ;;  %v21220_v33 = vld [vmem:[%s22898_s13 + $0xd0c] ss:$16 sps:$4 sm:$0xff]  }
 0x530   : > { %14707 = vmatprep.subr.bf16.mxu1 %v21178_v62  ;;  %v21215_v62 = vld [vmem:[%s22898_s13 + $0xe28] ss:$16 sps:$4 sm:$0xff]  }
 0x531   : > { %v14438_v19 = vpop.f32.mrf.mxu0  ;;  %14683 = vmatmul.mubr.bf16.vlgmr.msra.gmra.mxu0 %v23187_v39 }
 0x532   : > { %v24752_v16 = vadd.f32 %v14438_v19, %v24716_v15  ;;  %14733 = vmatpush1.bf16.msra.mxu0 %v21179_v49  ;;  %14764 = vmatprep.mubr.bf16.mxu0 %v23203_v43  ;;  %v21197_v43 = vld [vmem:[%s22898_s13 + $0xe88] ss:$16 sps:$4 sm:$0xff]   ;;  %v21229_v19 = vld [vmem:[%s22898_s13 + $0x10ec] ss:$16 sps:$4 sm:$0xff]  }
 0x533   : > { %14708 = vmatpush2.bf16.msra.mxu1 %v21176_v38  ;;  %v14440_v23 = vpop.f32.mrf.mxu0  ;;  %14734 = vmatprep.subr.bf16.mxu0 %v21187_v30  ;;  %v21223_v38 = vld [vmem:[%s22898_s13 + $0xe0c] ss:$16 sps:$4 sm:$0xff]   ;;  %v21218_v49 = vld [vmem:[%s22898_s13 + $0xd08] ss:$16 sps:$4 sm:$0xff]  }
 0x534   : > { %14709 = vmatprep.subr.bf16.mxu1 %v21184_v6  ;;  %v24759_v39 = vadd.f32 %v14440_v23, %v24720_v22  ;;  %v21194_v22 = vld [vmem:[%s22898_s13 + $0xd88] ss:$16 sps:$4 sm:$0xff]   ;;  %v21226_v30 = vld [vmem:[%s22898_s13 + $0xfec] ss:$16 sps:$4 sm:$0xff]  }
 0x535   : > { %v14442_v15 = vpop.f32.mrf.mxu0  ;;  %v21221_v6 = vld [vmem:[%s22898_s13 + $0xe08] ss:$16 sps:$4 sm:$0xff]   ;;  %v21232_v23 = vld [vmem:[%s22898_s13 + $0xfcc] ss:$16 sps:$4 sm:$0xff]  }
 0x536   : > { %14735 = vmatpush1.bf16.msra.mxu0 %v21185_v36  ;;  %v21227_v36 = vld [vmem:[%s22898_s13 + $0x10e8] ss:$16 sps:$4 sm:$0xff]  }
 0x537   : > { %14710 = vmatpush2.bf16.msra.mxu1 %v21182_v50  ;;  %v14443_v4 = vpop.f32.mrf.mxu0  ;;  %14736 = vmatprep.subr.bf16.mxu0 %v21193_v3  ;;  %v21224_v50 = vld [vmem:[%s22898_s13 + $0xfe8] ss:$16 sps:$4 sm:$0xff]  }
 0x538   : > { %14711 = vmatprep.subr.bf16.mxu1 %v21190_v51  ;;  %v21235_v51 = vld [vmem:[%s22898_s13 + $0x10cc] ss:$16 sps:$4 sm:$0xff]   ;;  %v21230_v15 = vld [vmem:[%s22898_s13 + $0xfc8] ss:$16 sps:$4 sm:$0xff]  }
 0x539   : > { %v21238_v4 = vld [vmem:[%s22898_s13 + $0xfac] ss:$16 sps:$4 sm:$0xff]  }
 0x53a   : > { %14737 = vmatpush1.bf16.msra.mxu0 %v21191_v44 }
 0x53b   : > { %14712 = vmatpush2.bf16.msra.mxu1 %v21188_v47  ;;  %14738 = vmatprep.subr.bf16.mxu0 %v21199_v24  ;;  %v21233_v47 = vld [vmem:[%s22898_s13 + $0x10c8] ss:$16 sps:$4 sm:$0xff]  }
 0x53c   : > { %14713 = vmatprep.subr.bf16.mxu1 %v21196_v45  ;;  %v21241_v45 = vld [vmem:[%s22898_s13 + $0x10ac] ss:$16 sps:$4 sm:$0xff]  }
 0x53e   : > { %14739 = vmatpush1.bf16.msra.mxu0 %v21197_v43 }
 0x53f   : > { %14714 = vmatpush2.bf16.msra.mxu1 %v21194_v22  ;;  %14740 = vmatprep.subr.bf16.mxu0 %v21205_v53  ;;  %v21239_v22 = vld [vmem:[%s22898_s13 + $0x10a8] ss:$16 sps:$4 sm:$0xff]   ;;  %v21247_v53 = vld [vmem:[%s22898_s13 + $0x108c] ss:$16 sps:$4 sm:$0xff]  }
 0x540   : > { %14715 = vmatprep.subr.bf16.mxu1 %v21202_v29  ;;  %v21244_v29 = vld [vmem:[%s22898_s13 + $0xf8c] ss:$16 sps:$4 sm:$0xff]  }
 0x542   : > { %14741 = vmatpush1.bf16.msra.mxu0 %v21203_v7  ;;  %v21250_v7 = vld [vmem:[%s22898_s13 + $0xf6c] ss:$16 sps:$4 sm:$0xff]  }
 0x543   : > { %14716 = vmatpush2.bf16.msra.mxu1 %v21200_v57  ;;  %14742 = vmatprep.subr.bf16.mxu0 %v21211_v34  ;;  %v21242_v57 = vld [vmem:[%s22898_s13 + $0xf88] ss:$16 sps:$4 sm:$0xff]  }
 0x544   : > { %14717 = vmatprep.subr.bf16.mxu1 %v21208_v17  ;;  %v21253_v17 = vld [vmem:[%s22898_s13 + $0x106c] ss:$16 sps:$4 sm:$0xff]   ;;  %v21248_v34 = vld [vmem:[%s22898_s13 + $0xf68] ss:$16 sps:$4 sm:$0xff]  }
 0x546   : > { %14743 = vmatpush1.bf16.msra.mxu0 %v21209_v41  ;;  %v21256_v41 = vld [vmem:[%s22898_s13 + $0xf4c] ss:$16 sps:$4 sm:$0xff]  }
 0x547   : > { %14718 = vmatpush2.bf16.msra.mxu1 %v21206_v48  ;;  %14744 = vmatprep.subr.bf16.mxu0 %v21217_v25  ;;  %v21251_v48 = vld [vmem:[%s22898_s13 + $0x1068] ss:$16 sps:$4 sm:$0xff]  }
 0x548   : > { %14719 = vmatprep.subr.bf16.mxu1 %v21214_v31  ;;  %v21259_v31 = vld [vmem:[%s22898_s13 + $0x104c] ss:$16 sps:$4 sm:$0xff]   ;;  %v21254_v25 = vld [vmem:[%s22898_s13 + $0xf48] ss:$16 sps:$4 sm:$0xff]  }
 0x54a   : > { %14745 = vmatpush1.bf16.msra.mxu0 %v21215_v62  ;;  %v21262_v62 = vld [vmem:[%s22898_s13 + $0xf2c] ss:$16 sps:$4 sm:$0xff]  }
 0x54b   : > { %14720 = vmatpush2.bf16.msra.mxu1 %v21212_v37  ;;  %14746 = vmatprep.subr.bf16.mxu0 %v21223_v38  ;;  %v21257_v37 = vld [vmem:[%s22898_s13 + $0x1048] ss:$16 sps:$4 sm:$0xff]  }
 0x54c   : > { %14721 = vmatprep.subr.bf16.mxu1 %v21220_v33  ;;  %v21265_v33 = vld [vmem:[%s22898_s13 + $0x102c] ss:$16 sps:$4 sm:$0xff]   ;;  %v21260_v38 = vld [vmem:[%s22898_s13 + $0xf28] ss:$16 sps:$4 sm:$0xff]  }
 0x54e   : > { %14747 = vmatpush1.bf16.msra.mxu0 %v21221_v6  ;;  %v21268_v6 = vld [vmem:[%s22898_s13 + $0xf0c] ss:$16 sps:$4 sm:$0xff]  }
 0x54f   : > { %14722 = vmatpush2.bf16.msra.mxu1 %v21218_v49  ;;  %14748 = vmatprep.subr.bf16.mxu0 %v21226_v30  ;;  %v21263_v49 = vld [vmem:[%s22898_s13 + $0x1028] ss:$16 sps:$4 sm:$0xff]   ;;  %v21271_v30 = vld [vmem:[%s22898_s13 + $0x100c] ss:$16 sps:$4 sm:$0xff]  }
 0x550   : > { %14773 = vmatprep.subr.bf16.mxu1 %v21229_v19  ;;  %v2454_v19 = vsub.s32 2, %v23264_v54 }
 0x552   : > { %v24790_v3 = vpop.f32.mrf.mxu1  ;;  %14724 = vmatmul.mubr.bf16.vlgmr.msra.gmra.mxu1 %v23277_v0  ;;  %14749 = vmatpush2.bf16.msra.mxu0 %v21224_v50  ;;  %v21236_v0 = vld [vmem:[%s22898_s13 + $0xfa8] ss:$16 sps:$4 sm:$0xff]   ;;  %v2458_v50 = vsub.s32 3, %v23264_v54  ;;  %v21280_v54 = vld [vmem:[%s22898_s13 + $0x11cc] ss:$16 sps:$4 sm:$0xff]  }
 0x553   : > { %14774 = vmatpush1.bf16.msra.mxu1 %v21227_v36  ;;  %14750 = vmatprep.subr.bf16.mxu0 %v21232_v23  ;;  %v21266_v36 = vld [vmem:[%s22898_s13 + $0xf08] ss:$16 sps:$4 sm:$0xff]  }
 0x554   : > { %v24795_v44 = vpop.f32.mrf.mxu1  ;;  %14775 = vmatprep.subr.bf16.mxu1 %v21235_v51  ;;  %14805 = vmatprep.mubr.bf16.mxu1 %v23298_v9  ;;  %v21245_v9 = vld [vmem:[%s22898_s13 + $0x1088] ss:$16 sps:$4 sm:$0xff]   ;;  %v21274_v51 = vld [vmem:[%s22898_s13 + $0x11ec] ss:$16 sps:$4 sm:$0xff]  }
 0x555   : > { %v21269_v23 = vld [vmem:[%s22898_s13 + $0x1008] ss:$16 sps:$4 sm:$0xff]  }
 0x556   : > { %v14483_v24 = vpop.f32.mrf.mxu1  ;;  %14751 = vmatpush2.bf16.msra.mxu0 %v21230_v15  ;;  %v21277_v15 = vld [vmem:[%s22898_s13 + $0x12ec] ss:$16 sps:$4 sm:$0xff]  }
 0x557   : > { %14776 = vmatpush1.bf16.msra.mxu1 %v21233_v47  ;;  %14752 = vmatprep.subr.bf16.mxu0 %v21238_v4  ;;  %v22616_v47 = vld [vmem:[%s22907_s24] sm:$0xf]  ;;  %v21272_v24 = vld [vmem:[%s22898_s13 + $0x11e8] ss:$16 sps:$4 sm:$0xff]   ;;  %s16885_s24 = sshll.u32 %s22894_s27, 10 }
 0x558   : > { %v14484_v43 = vpop.f32.mrf.mxu1  ;;  %14777 = vmatprep.subr.bf16.mxu1 %v21241_v45  ;;  %v2455_v4 = vrot.slane %v22616_v47, %v2454_v19  ;;  %v2459_v45 = vrot.slane %v22616_v47, %v2458_v50  ;;  %v21307_v19 = vld [vmem:[%s22898_s13 + $0x124c] ss:$16 sps:$4 sm:$0xff]   ;;  %v21302_v50 = vld [vmem:[%s22898_s13 + $0x1148] ss:$16 sps:$4 sm:$0xff]   ;;  %s25632_s11 = scalar_lea.vmem [#allocation6], %s16885_s24 }
 0x559   : > { %v21311_v47 = vld [vmem:[%s22898_s13 + $0x1228] ss:$16 sps:$4 sm:$0xff]  }
 0x55a   : > { %14753 = vmatpush2.bf16.msra.mxu0 %v21236_v0  ;;  %v21275_v0 = vld [vmem:[%s22898_s13 + $0x12e8] ss:$16 sps:$4 sm:$0xff]   ;;  %v14480_v43 = vadd.f32 %v24790_v3, %v2455_v4  ;;  %v21289_v3 = vld [vmem:[%s22898_s13 + $0x12ac] ss:$16 sps:$4 sm:$0xff]  }
 0x55b   : > { %14778 = vmatpush1.bf16.msra.mxu1 %v21239_v22  ;;  %14754 = vmatprep.subr.bf16.mxu0 %v21244_v29  ;;  %v21283_v22 = vld [vmem:[%s22898_s13 + $0x12cc] ss:$16 sps:$4 sm:$0xff]  }
 0x55c   : > { %14779 = vmatprep.subr.bf16.mxu1 %v21247_v53  ;;  %v14482_v53 = vadd.f32 %v24795_v44, %v2459_v45  ;;  %v21316_v4 = vld [vmem:[%s22898_s13 + $0x110c] ss:$16 sps:$4 sm:$0xff]  }
 0x55d   : > { %v21319_v45 = vld [vmem:[%s22898_s13 + $0x120c] ss:$16 sps:$4 sm:$0xff]  }
 0x55e   : > { %14755 = vmatpush2.bf16.msra.mxu0 %v21242_v57 }
 0x55f   : > { %14780 = vmatpush1.bf16.msra.mxu1 %v21245_v9  ;;  %14756 = vmatprep.subr.bf16.mxu0 %v21250_v7  ;;  %v21278_v9 = vld [vmem:[%s22898_s13 + $0x11c8] ss:$16 sps:$4 sm:$0xff]  }
 0x560   : > { %14781 = vmatprep.subr.bf16.mxu1 %v21253_v17  ;;  %v21281_v7 = vld [vmem:[%s22898_s13 + $0x12c8] ss:$16 sps:$4 sm:$0xff]  }
 0x562   : > { %14757 = vmatpush2.bf16.msra.mxu0 %v21248_v34  ;;  %v21286_v34 = vld [vmem:[%s22898_s13 + $0x11ac] ss:$16 sps:$4 sm:$0xff]  }
 0x563   : > { %14782 = vmatpush1.bf16.msra.mxu1 %v21251_v48  ;;  %14758 = vmatprep.subr.bf16.mxu0 %v21256_v41  ;;  %v21284_v48 = vld [vmem:[%s22898_s13 + $0x11a8] ss:$16 sps:$4 sm:$0xff]  }
 0x564   : > { %14783 = vmatprep.subr.bf16.mxu1 %v21259_v31  ;;  %v21287_v41 = vld [vmem:[%s22898_s13 + $0x12a8] ss:$16 sps:$4 sm:$0xff]  }
 0x566   : > { %14759 = vmatpush2.bf16.msra.mxu0 %v21254_v25  ;;  %v21292_v25 = vld [vmem:[%s22898_s13 + $0x118c] ss:$16 sps:$4 sm:$0xff]  }
 0x567   : > { %14784 = vmatpush1.bf16.msra.mxu1 %v21257_v37  ;;  %14760 = vmatprep.subr.bf16.mxu0 %v21262_v62  ;;  %v21295_v37 = vld [vmem:[%s22898_s13 + $0x128c] ss:$16 sps:$4 sm:$0xff]   ;;  %v21290_v62 = vld [vmem:[%s22898_s13 + $0x1188] ss:$16 sps:$4 sm:$0xff]  }
 0x568   : > { %14785 = vmatprep.subr.bf16.mxu1 %v21265_v33  ;;  %v21298_v33 = vld [vmem:[%s22898_s13 + $0x116c] ss:$16 sps:$4 sm:$0xff]  }
 0x56a   : > { %14761 = vmatpush2.bf16.msra.mxu0 %v21260_v38  ;;  %v21301_v38 = vld [vmem:[%s22898_s13 + $0x126c] ss:$16 sps:$4 sm:$0xff]  }
 0x56b   : > { %14786 = vmatpush1.bf16.msra.mxu1 %v21263_v49  ;;  %14762 = vmatprep.subr.bf16.mxu0 %v21268_v6  ;;  %v21296_v49 = vld [vmem:[%s22898_s13 + $0x1168] ss:$16 sps:$4 sm:$0xff]  }
 0x56c   : > { %14787 = vmatprep.subr.bf16.mxu1 %v21271_v30  ;;  %v21299_v6 = vld [vmem:[%s22898_s13 + $0x1268] ss:$16 sps:$4 sm:$0xff]   ;;  %v21304_v30 = vld [vmem:[%s22898_s13 + $0x114c] ss:$16 sps:$4 sm:$0xff]  }
 0x56e   : > { %14763 = vmatpush2.bf16.msra.mxu0 %v21266_v36  ;;  %v21305_v36 = vld [vmem:[%s22898_s13 + $0x1248] ss:$16 sps:$4 sm:$0xff]  }
 0x56f   : > { %14788 = vmatpush1.bf16.msra.mxu1 %v21269_v23  ;;  %14814 = vmatprep.subr.bf16.mxu0 %v21277_v15  ;;  %v21310_v23 = vld [vmem:[%s22898_s13 + $0x112c] ss:$16 sps:$4 sm:$0xff]   ;;  %v21308_v15 = vld [vmem:[%s22898_s13 + $0x1128] ss:$16 sps:$4 sm:$0xff]  }
 0x570   : > { %14789 = vmatprep.subr.bf16.mxu1 %v21274_v51  ;;  %v21313_v51 = vld [vmem:[%s22898_s13 + $0x122c] ss:$16 sps:$4 sm:$0xff]  }
 0x571   : > { %v14520_v29 = vpop.f32.mrf.mxu0  ;;  %14765 = vmatmul.mubr.bf16.vlgmr.msra.gmra.mxu0 %v23281_v1 }
 0x572   : > { %v24834_v57 = vadd.f32 %v14520_v29, %v14480_v43  ;;  %14815 = vmatpush1.bf16.msra.mxu0 %v21275_v0  ;;  %14846 = vmatprep.mubr.bf16.mxu0 %v23302_v10  ;;  %v21293_v10 = vld [vmem:[%s22898_s13 + $0x1288] ss:$16 sps:$4 sm:$0xff]  }
 0x573   : > { %14790 = vmatpush2.bf16.msra.mxu1 %v21272_v24  ;;  %v14522_v17 = vpop.f32.mrf.mxu0  ;;  %14816 = vmatprep.subr.bf16.mxu0 %v21283_v22  ;;  %v21314_v24 = vld [vmem:[%s22898_s13 + $0x1108] ss:$16 sps:$4 sm:$0xff]   ;;  %v21325_v22 = vld [vmem:[%s22898_s13 + $0x14ec] ss:$16 sps:$4 sm:$0xff]  }
 0x574   : > { %14791 = vmatprep.subr.bf16.mxu1 %v21280_v54  ;;  %v24840_v1 = vadd.f32 %v14522_v17, %v14482_v53  ;;  %v21317_v0 = vld [vmem:[%s22898_s13 + $0x1208] ss:$16 sps:$4 sm:$0xff]   ;;  %v21322_v54 = vld [vmem:[%s22898_s13 + $0x13ec] ss:$16 sps:$4 sm:$0xff]  }
 0x575   : > { %v14524_v44 = vpop.f32.mrf.mxu0  ;;  %v21320_v43 = vld [vmem:[%s22898_s13 + $0x13e8] ss:$16 sps:$4 sm:$0xff]   ;;  %v21328_v53 = vld [vmem:[%s22898_s13 + $0x13cc] ss:$16 sps:$4 sm:$0xff]  }
 0x576   : > { %14817 = vmatpush1.bf16.msra.mxu0 %v21281_v7  ;;  %v21323_v29 = vld [vmem:[%s22898_s13 + $0x14e8] ss:$16 sps:$4 sm:$0xff]  }
 0x577   : > { %14792 = vmatpush2.bf16.msra.mxu1 %v21278_v9  ;;  %v14525_v31 = vpop.f32.mrf.mxu0  ;;  %14818 = vmatprep.subr.bf16.mxu0 %v21289_v3  ;;  %v21331_v9 = vld [vmem:[%s22898_s13 + $0x14cc] ss:$16 sps:$4 sm:$0xff]   ;;  %v21329_v3 = vld [vmem:[%s22898_s13 + $0x14c8] ss:$16 sps:$4 sm:$0xff]  }
 0x578   : > { %14793 = vmatprep.subr.bf16.mxu1 %v21286_v34  ;;  %v21326_v34 = vld [vmem:[%s22898_s13 + $0x13c8] ss:$16 sps:$4 sm:$0xff]  }
 0x579   : > { %v21332_v31 = vld [vmem:[%s22898_s13 + $0x13a8] ss:$16 sps:$4 sm:$0xff]  }
 0x57a   : > { %14819 = vmatpush1.bf16.msra.mxu0 %v21287_v41  ;;  %v21337_v41 = vld [vmem:[%s22898_s13 + $0x14ac] ss:$16 sps:$4 sm:$0xff]  }
 0x57b   : > { %14794 = vmatpush2.bf16.msra.mxu1 %v21284_v48  ;;  %14820 = vmatprep.subr.bf16.mxu0 %v21295_v37  ;;  %v21334_v48 = vld [vmem:[%s22898_s13 + $0x13ac] ss:$16 sps:$4 sm:$0xff]  }
 0x57c   : > { %14795 = vmatprep.subr.bf16.mxu1 %v21292_v25  ;;  %v21335_v25 = vld [vmem:[%s22898_s13 + $0x14a8] ss:$16 sps:$4 sm:$0xff]  }
 0x57e   : > { %14821 = vmatpush1.bf16.msra.mxu0 %v21293_v10  ;;  %v21343_v10 = vld [vmem:[%s22898_s13 + $0x148c] ss:$16 sps:$4 sm:$0xff]  }
 0x57f   : > { %14796 = vmatpush2.bf16.msra.mxu1 %v21290_v62  ;;  %14822 = vmatprep.subr.bf16.mxu0 %v21301_v38  ;;  %v21340_v62 = vld [vmem:[%s22898_s13 + $0x138c] ss:$16 sps:$4 sm:$0xff]  }
 0x580   : > { %14797 = vmatprep.subr.bf16.mxu1 %v21298_v33  ;;  %v21346_v33 = vld [vmem:[%s22898_s13 + $0x136c] ss:$16 sps:$4 sm:$0xff]  }
 0x581   : > { %v21349_v38 = vld [vmem:[%s22898_s13 + $0x146c] ss:$16 sps:$4 sm:$0xff]  }
 0x582   : > { %14823 = vmatpush1.bf16.msra.mxu0 %v21299_v6  ;;  %v21347_v6 = vld [vmem:[%s22898_s13 + $0x1468] ss:$16 sps:$4 sm:$0xff]  }
 0x583   : > { %14798 = vmatpush2.bf16.msra.mxu1 %v21296_v49  ;;  %14824 = vmatprep.subr.bf16.mxu0 %v21307_v19  ;;  %v21344_v49 = vld [vmem:[%s22898_s13 + $0x1368] ss:$16 sps:$4 sm:$0xff]   ;;  %v21355_v19 = vld [vmem:[%s22898_s13 + $0x144c] ss:$16 sps:$4 sm:$0xff]  }
 0x584   : > { %14799 = vmatprep.subr.bf16.mxu1 %v21304_v30  ;;  %v21352_v30 = vld [vmem:[%s22898_s13 + $0x134c] ss:$16 sps:$4 sm:$0xff]  }
 0x586   : > { %14825 = vmatpush1.bf16.msra.mxu0 %v21305_v36  ;;  %v21353_v36 = vld [vmem:[%s22898_s13 + $0x1448] ss:$16 sps:$4 sm:$0xff]  }
 0x587   : > { %14800 = vmatpush2.bf16.msra.mxu1 %v21302_v50  ;;  %14826 = vmatprep.subr.bf16.mxu0 %v21313_v51  ;;  %v21350_v50 = vld [vmem:[%s22898_s13 + $0x1348] ss:$16 sps:$4 sm:$0xff]   ;;  %v21361_v51 = vld [vmem:[%s22898_s13 + $0x142c] ss:$16 sps:$4 sm:$0xff]  }
 0x588   : > { %14801 = vmatprep.subr.bf16.mxu1 %v21310_v23  ;;  %v21358_v23 = vld [vmem:[%s22898_s13 + $0x132c] ss:$16 sps:$4 sm:$0xff]  }
 0x58a   : > { %14827 = vmatpush1.bf16.msra.mxu0 %v21311_v47  ;;  %v21359_v47 = vld [vmem:[%s22898_s13 + $0x1428] ss:$16 sps:$4 sm:$0xff]  }
 0x58b   : > { %14802 = vmatpush2.bf16.msra.mxu1 %v21308_v15  ;;  %14828 = vmatprep.subr.bf16.mxu0 %v21319_v45  ;;  %v21356_v15 = vld [vmem:[%s22898_s13 + $0x1328] ss:$16 sps:$4 sm:$0xff]   ;;  %v21367_v45 = vld [vmem:[%s22898_s13 + $0x140c] ss:$16 sps:$4 sm:$0xff]  }
 0x58c   : > { %14803 = vmatprep.subr.bf16.mxu1 %v21316_v4  ;;  %v21364_v4 = vld [vmem:[%s22898_s13 + $0x130c] ss:$16 sps:$4 sm:$0xff]  }
 0x58e   : > { %14829 = vmatpush1.bf16.msra.mxu0 %v21317_v0  ;;  %v21365_v0 = vld [vmem:[%s22898_s13 + $0x1408] ss:$16 sps:$4 sm:$0xff]  }
 0x58f   : > { %14804 = vmatpush2.bf16.msra.mxu1 %v21314_v24  ;;  %14830 = vmatprep.subr.bf16.mxu0 %v21322_v54  ;;  %v21362_v24 = vld [vmem:[%s22898_s13 + $0x1308] ss:$16 sps:$4 sm:$0xff]   ;;  %v21370_v54 = vld [vmem:[%s22898_s13 + $0x15ec] ss:$16 sps:$4 sm:$0xff]  }
 0x590   : > { %14855 = vmatprep.subr.bf16.mxu1 %v21325_v22  ;;  %v21373_v22 = vld [vmem:[%s22898_s13 + $0x16ec] ss:$16 sps:$4 sm:$0xff]  }
 0x592   : > { %v14561_v7 = vpop.f32.mrf.mxu1  ;;  %14806 = vmatmul.mubr.bf16.vlgmr.msra.gmra.mxu1 %v23376_v59  ;;  %14831 = vmatpush2.bf16.msra.mxu0 %v21320_v43  ;;  %v21368_v43 = vld [vmem:[%s22898_s13 + $0x15e8] ss:$16 sps:$4 sm:$0xff]  }
 0x593   : > { %v24873_v17 = vadd.f32 %v14561_v7, %v24834_v57  ;;  %14856 = vmatpush1.bf16.msra.mxu1 %v21323_v29  ;;  %14832 = vmatprep.subr.bf16.mxu0 %v21328_v53  ;;  %v21371_v29 = vld [vmem:[%s22898_s13 + $0x16e8] ss:$16 sps:$4 sm:$0xff]   ;;  %v21376_v53 = vld [vmem:[%s22898_s13 + $0x15cc] ss:$16 sps:$4 sm:$0xff]  }
 0x594   : > { %v14563_v44 = vpop.f32.mrf.mxu1  ;;  %14857 = vmatprep.subr.bf16.mxu1 %v21331_v9  ;;  %14887 = vmatprep.mubr.bf16.mxu1 %v23398_v35  ;;  %v21341_v35 = vld [vmem:[%s22898_s13 + $0x1488] ss:$16 sps:$4 sm:$0xff]   ;;  %v21379_v9 = vld [vmem:[%s22898_s13 + $0x16cc] ss:$16 sps:$4 sm:$0xff]  }
 0x595   : > { %v24880_v59 = vadd.f32 %v14563_v44, %v24840_v1  ;;  %v21338_v1 = vld [vmem:[%s22898_s13 + $0x1388] ss:$16 sps:$4 sm:$0xff]  }
 0x596   : > { %v14565_v57 = vpop.f32.mrf.mxu1  ;;  %14833 = vmatpush2.bf16.msra.mxu0 %v21326_v34  ;;  %v21377_v44 = vld [vmem:[%s22898_s13 + $0x16c8] ss:$16 sps:$4 sm:$0xff]  }
 0x597   : > { %14858 = vmatpush1.bf16.msra.mxu1 %v21329_v3  ;;  %14834 = vmatprep.subr.bf16.mxu0 %v21334_v48  ;;  %v21374_v3 = vld [vmem:[%s22898_s13 + $0x15c8] ss:$16 sps:$4 sm:$0xff]   ;;  %v21385_v57 = vld [vmem:[%s22898_s13 + $0x16ac] ss:$16 sps:$4 sm:$0xff]  }
 0x598   : > { %v14566_v37 = vpop.f32.mrf.mxu1  ;;  %14859 = vmatprep.subr.bf16.mxu1 %v21337_v41  ;;  %v21382_v41 = vld [vmem:[%s22898_s13 + $0x15ac] ss:$16 sps:$4 sm:$0xff]  }
 0x59a   : > { %14835 = vmatpush2.bf16.msra.mxu0 %v21332_v31  ;;  %v21380_v31 = vld [vmem:[%s22898_s13 + $0x15a8] ss:$16 sps:$4 sm:$0xff]  }
 0x59b   : > { %14860 = vmatpush1.bf16.msra.mxu1 %v21335_v25  ;;  %14836 = vmatprep.subr.bf16.mxu0 %v21340_v62  ;;  %v21383_v25 = vld [vmem:[%s22898_s13 + $0x16a8] ss:$16 sps:$4 sm:$0xff]   ;;  %v21388_v62 = vld [vmem:[%s22898_s13 + $0x158c] ss:$16 sps:$4 sm:$0xff]  }
 0x59c   : > { %14861 = vmatprep.subr.bf16.mxu1 %v21343_v10  ;;  %v21391_v10 = vld [vmem:[%s22898_s13 + $0x168c] ss:$16 sps:$4 sm:$0xff]  }
 0x59e   : > { %14837 = vmatpush2.bf16.msra.mxu0 %v21338_v1  ;;  %v21394_v1 = vld [vmem:[%s22898_s13 + $0x156c] ss:$16 sps:$4 sm:$0xff]  }
 0x59f   : > { %14862 = vmatpush1.bf16.msra.mxu1 %v21341_v35  ;;  %14838 = vmatprep.subr.bf16.mxu0 %v21346_v33  ;;  %v21397_v35 = vld [vmem:[%s22898_s13 + $0x166c] ss:$16 sps:$4 sm:$0xff]   ;;  %v21392_v33 = vld [vmem:[%s22898_s13 + $0x1568] ss:$16 sps:$4 sm:$0xff]  }
 0x5a0   : > { %14863 = vmatprep.subr.bf16.mxu1 %v21349_v38  ;;  %v21395_v38 = vld [vmem:[%s22898_s13 + $0x1668] ss:$16 sps:$4 sm:$0xff]  }
 0x5a2   : > { %14839 = vmatpush2.bf16.msra.mxu0 %v21344_v49  ;;  %v21400_v49 = vld [vmem:[%s22898_s13 + $0x154c] ss:$16 sps:$4 sm:$0xff]  }
 0x5a3   : > { %14864 = vmatpush1.bf16.msra.mxu1 %v21347_v6  ;;  %14840 = vmatprep.subr.bf16.mxu0 %v21352_v30  ;;  %v21403_v6 = vld [vmem:[%s22898_s13 + $0x164c] ss:$16 sps:$4 sm:$0xff]   ;;  %v21398_v30 = vld [vmem:[%s22898_s13 + $0x1548] ss:$16 sps:$4 sm:$0xff]  }
 0x5a4   : > { %14865 = vmatprep.subr.bf16.mxu1 %v21355_v19  ;;  %v21401_v19 = vld [vmem:[%s22898_s13 + $0x1648] ss:$16 sps:$4 sm:$0xff]  }
 0x5a6   : > { %14841 = vmatpush2.bf16.msra.mxu0 %v21350_v50  ;;  %v21406_v50 = vld [vmem:[%s22898_s13 + $0x152c] ss:$16 sps:$4 sm:$0xff]  }
 0x5a7   : > { %14866 = vmatpush1.bf16.msra.mxu1 %v21353_v36  ;;  %14842 = vmatprep.subr.bf16.mxu0 %v21358_v23  ;;  %v21409_v36 = vld [vmem:[%s22898_s13 + $0x162c] ss:$16 sps:$4 sm:$0xff]   ;;  %v21404_v23 = vld [vmem:[%s22898_s13 + $0x1528] ss:$16 sps:$4 sm:$0xff]  }
 0x5a8   : > { %14867 = vmatprep.subr.bf16.mxu1 %v21361_v51  ;;  %v21407_v51 = vld [vmem:[%s22898_s13 + $0x1628] ss:$16 sps:$4 sm:$0xff]  }
 0x5aa   : > { %14843 = vmatpush2.bf16.msra.mxu0 %v21356_v15  ;;  %v21412_v15 = vld [vmem:[%s22898_s13 + $0x150c] ss:$16 sps:$4 sm:$0xff]  }
 0x5ab   : > { %14868 = vmatpush1.bf16.msra.mxu1 %v21359_v47  ;;  %14844 = vmatprep.subr.bf16.mxu0 %v21364_v4  ;;  %v21415_v47 = vld [vmem:[%s22898_s13 + $0x160c] ss:$16 sps:$4 sm:$0xff]   ;;  %v21410_v4 = vld [vmem:[%s22898_s13 + $0x1508] ss:$16 sps:$4 sm:$0xff]  }
 0x5ac   : > { %14869 = vmatprep.subr.bf16.mxu1 %v21367_v45  ;;  %v21413_v45 = vld [vmem:[%s22898_s13 + $0x1608] ss:$16 sps:$4 sm:$0xff]  }
 0x5ae   : > { %14845 = vmatpush2.bf16.msra.mxu0 %v21362_v24  ;;  %v21418_v24 = vld [vmem:[%s22898_s13 + $0x17ec] ss:$16 sps:$4 sm:$0xff]  }
 0x5af   : > { %14870 = vmatpush1.bf16.msra.mxu1 %v21365_v0  ;;  %14896 = vmatprep.subr.bf16.mxu0 %v21373_v22  ;;  %v21421_v0 = vld [vmem:[%s22898_s13 + $0x18ec] ss:$16 sps:$4 sm:$0xff]   ;;  %v21419_v22 = vld [vmem:[%s22898_s13 + $0x18e8] ss:$16 sps:$4 sm:$0xff]  }
 0x5b0   : > { %14871 = vmatprep.subr.bf16.mxu1 %v21370_v54  ;;  %v21416_v54 = vld [vmem:[%s22898_s13 + $0x17e8] ss:$16 sps:$4 sm:$0xff]  }
 0x5b1   : > { %v14602_v7 = vpop.f32.mrf.mxu0  ;;  %14847 = vmatmul.mubr.bf16.vlgmr.msra.gmra.mxu0 %v23380_v60 }
 0x5b2   : > { %v24913_v34 = vadd.f32 %v14602_v7, %v24873_v17  ;;  %14897 = vmatpush1.bf16.msra.mxu0 %v21371_v29  ;;  %14928 = vmatprep.mubr.bf16.mxu0 %v23402_v5  ;;  %v21389_v5 = vld [vmem:[%s22898_s13 + $0x1688] ss:$16 sps:$4 sm:$0xff]   ;;  %v21427_v29 = vld [vmem:[%s22898_s13 + $0x18cc] ss:$16 sps:$4 sm:$0xff]  }
 0x5b3   : > { %14872 = vmatpush2.bf16.msra.mxu1 %v21368_v43  ;;  %v14604_v48 = vpop.f32.mrf.mxu0  ;;  %14898 = vmatprep.subr.bf16.mxu0 %v21379_v9  ;;  %v21424_v43 = vld [vmem:[%s22898_s13 + $0x17cc] ss:$16 sps:$4 sm:$0xff]   ;;  %v21422_v7 = vld [vmem:[%s22898_s13 + $0x17c8] ss:$16 sps:$4 sm:$0xff]  }
 0x5b4   : > { %14873 = vmatprep.subr.bf16.mxu1 %v21376_v53  ;;  %v24920_v60 = vadd.f32 %v14604_v48, %v24880_v59  ;;  %v21386_v59 = vld [vmem:[%s22898_s13 + $0x1588] ss:$16 sps:$4 sm:$0xff]   ;;  %v21430_v48 = vld [vmem:[%s22898_s13 + $0x17ac] ss:$16 sps:$4 sm:$0xff]  }
 0x5b5   : > { %v14606_v17 = vpop.f32.mrf.mxu0 }
 0x5b6   : > { %14899 = vmatpush1.bf16.msra.mxu0 %v21377_v44  ;;  %v21431_v17 = vld [vmem:[%s22898_s13 + $0x18a8] ss:$16 sps:$4 sm:$0xff]  }
 0x5b7   : > { %14874 = vmatpush2.bf16.msra.mxu1 %v21374_v3  ;;  %v14607_v37 = vpop.f32.mrf.mxu0  ;;  %14900 = vmatprep.subr.bf16.mxu0 %v21385_v57  ;;  %v21425_v3 = vld [vmem:[%s22898_s13 + $0x18c8] ss:$16 sps:$4 sm:$0xff]  }
 0x5b8   : > { %14875 = vmatprep.subr.bf16.mxu1 %v21382_v41  ;;  %v21433_v41 = vld [vmem:[%s22898_s13 + $0x18ac] ss:$16 sps:$4 sm:$0xff]   ;;  %v21428_v57 = vld [vmem:[%s22898_s13 + $0x17a8] ss:$16 sps:$4 sm:$0xff]  }
 0x5b9   : > { %v21439_v37 = vld [vmem:[%s22898_s13 + $0x188c] ss:$16 sps:$4 sm:$0xff]  }
 0x5ba   : > { %14901 = vmatpush1.bf16.msra.mxu0 %v21383_v25  ;;  %v21436_v25 = vld [vmem:[%s22898_s13 + $0x178c] ss:$16 sps:$4 sm:$0xff]  }
 0x5bb   : > { %14876 = vmatpush2.bf16.msra.mxu1 %v21380_v31  ;;  %14902 = vmatprep.subr.bf16.mxu0 %v21391_v10  ;;  %v21445_v10 = vld [vmem:[%s22898_s13 + $0x186c] ss:$16 sps:$4 sm:$0xff]  }
 0x5bc   : > { %14877 = vmatprep.subr.bf16.mxu1 %v21388_v62  ;;  %v21442_v62 = vld [vmem:[%s22898_s13 + $0x176c] ss:$16 sps:$4 sm:$0xff]  }
 0x5be   : > { %14903 = vmatpush1.bf16.msra.mxu0 %v21389_v5  ;;  %v21443_v5 = vld [vmem:[%s22898_s13 + $0x1868] ss:$16 sps:$4 sm:$0xff]  }
 0x5bf   : > { %14878 = vmatpush2.bf16.msra.mxu1 %v21386_v59  ;;  %14904 = vmatprep.subr.bf16.mxu0 %v21397_v35  ;;  %v21440_v59 = vld [vmem:[%s22898_s13 + $0x1768] ss:$16 sps:$4 sm:$0xff]   ;;  %v21451_v35 = vld [vmem:[%s22898_s13 + $0x184c] ss:$16 sps:$4 sm:$0xff]  }
 0x5c0   : > { %14879 = vmatprep.subr.bf16.mxu1 %v21394_v1  ;;  %v21448_v1 = vld [vmem:[%s22898_s13 + $0x174c] ss:$16 sps:$4 sm:$0xff]  }
 0x5c2   : > { %14905 = vmatpush1.bf16.msra.mxu0 %v21395_v38  ;;  %v21449_v38 = vld [vmem:[%s22898_s13 + $0x1848] ss:$16 sps:$4 sm:$0xff]  }
 0x5c3   : > { %14880 = vmatpush2.bf16.msra.mxu1 %v21392_v33  ;;  %14906 = vmatprep.subr.bf16.mxu0 %v21403_v6  ;;  %v21446_v33 = vld [vmem:[%s22898_s13 + $0x1748] ss:$16 sps:$4 sm:$0xff]   ;;  %v21457_v6 = vld [vmem:[%s22898_s13 + $0x182c] ss:$16 sps:$4 sm:$0xff]  }
 0x5c4   : > { %14881 = vmatprep.subr.bf16.mxu1 %v21400_v49  ;;  %v21454_v49 = vld [vmem:[%s22898_s13 + $0x172c] ss:$16 sps:$4 sm:$0xff]  }
 0x5c6   : > { %14907 = vmatpush1.bf16.msra.mxu0 %v21401_v19  ;;  %v21455_v19 = vld [vmem:[%s22898_s13 + $0x1828] ss:$16 sps:$4 sm:$0xff]  }
 0x5c7   : > { %14882 = vmatpush2.bf16.msra.mxu1 %v21398_v30  ;;  %14908 = vmatprep.subr.bf16.mxu0 %v21409_v36  ;;  %v21452_v30 = vld [vmem:[%s22898_s13 + $0x1728] ss:$16 sps:$4 sm:$0xff]   ;;  %v21463_v36 = vld [vmem:[%s22898_s13 + $0x180c] ss:$16 sps:$4 sm:$0xff]  }
 0x5c8   : > { %14883 = vmatprep.subr.bf16.mxu1 %v21406_v50  ;;  %v21460_v50 = vld [vmem:[%s22898_s13 + $0x170c] ss:$16 sps:$4 sm:$0xff]  }
 0x5ca   : > { %14909 = vmatpush1.bf16.msra.mxu0 %v21407_v51  ;;  %v21461_v51 = vld [vmem:[%s22898_s13 + $0x1808] ss:$16 sps:$4 sm:$0xff]  }
 0x5cb   : > { %14884 = vmatpush2.bf16.msra.mxu1 %v21404_v23  ;;  %14910 = vmatprep.subr.bf16.mxu0 %v21415_v47  ;;  %v21458_v23 = vld [vmem:[%s22898_s13 + $0x1708] ss:$16 sps:$4 sm:$0xff]   ;;  %v21469_v47 = vld [vmem:[%s22898_s13 + $0x1aec] ss:$16 sps:$4 sm:$0xff]  }
 0x5cc   : > { %14885 = vmatprep.subr.bf16.mxu1 %v21412_v15  ;;  %v21466_v15 = vld [vmem:[%s22898_s13 + $0x19ec] ss:$16 sps:$4 sm:$0xff]  }
 0x5ce   : > { %14911 = vmatpush1.bf16.msra.mxu0 %v21413_v45  ;;  %v21467_v45 = vld [vmem:[%s22898_s13 + $0x1ae8] ss:$16 sps:$4 sm:$0xff]  }
 0x5cf   : > { %14886 = vmatpush2.bf16.msra.mxu1 %v21410_v4  ;;  %14912 = vmatprep.subr.bf16.mxu0 %v21418_v24  ;;  %v21464_v4 = vld [vmem:[%s22898_s13 + $0x19e8] ss:$16 sps:$4 sm:$0xff]   ;;  %v21472_v24 = vld [vmem:[%s22898_s13 + $0x19cc] ss:$16 sps:$4 sm:$0xff]  }
 0x5d0   : > { %14937 = vmatprep.subr.bf16.mxu1 %v21421_v0  ;;  %v21475_v0 = vld [vmem:[%s22898_s13 + $0x1acc] ss:$16 sps:$4 sm:$0xff]  }
 0x5d2   : > { %v14643_v53 = vpop.f32.mrf.mxu1  ;;  %14888 = vmatmul.mubr.bf16.vlgmr.msra.gmra.mxu1 %v23476_v2  ;;  %14913 = vmatpush2.bf16.msra.mxu0 %v21416_v54 }
 0x5d3   : > { %v24953_v9 = vadd.f32 %v14643_v53, %v24913_v34  ;;  %14938 = vmatpush1.bf16.msra.mxu1 %v21419_v22  ;;  %14914 = vmatprep.subr.bf16.mxu0 %v21424_v43  ;;  %v21470_v43 = vld [vmem:[%s22898_s13 + $0x19c8] ss:$16 sps:$4 sm:$0xff]  }
 0x5d4   : > { %v14645_v44 = vpop.f32.mrf.mxu1  ;;  %14939 = vmatprep.subr.bf16.mxu1 %v21427_v29  ;;  %14969 = vmatprep.mubr.bf16.mxu1 %v23498_v11  ;;  %v21437_v11 = vld [vmem:[%s22898_s13 + $0x1888] ss:$16 sps:$4 sm:$0xff]  }
 0x5d5   : > { %v24960_v2 = vadd.f32 %v14645_v44, %v24920_v60  ;;  %v21434_v60 = vld [vmem:[%s22898_s13 + $0x1788] ss:$16 sps:$4 sm:$0xff]  }
 0x5d6   : > { %v14647_v34 = vpop.f32.mrf.mxu1  ;;  %14915 = vmatpush2.bf16.msra.mxu0 %v21422_v7  ;;  %v21473_v29 = vld [vmem:[%s22898_s13 + $0x1ac8] ss:$16 sps:$4 sm:$0xff]   ;;  %v21478_v7 = vld [vmem:[%s22898_s13 + $0x19ac] ss:$16 sps:$4 sm:$0xff]  }
 0x5d7   : > { %14940 = vmatpush1.bf16.msra.mxu1 %v21425_v3  ;;  %14916 = vmatprep.subr.bf16.mxu0 %v21430_v48  ;;  %v21481_v3 = vld [vmem:[%s22898_s13 + $0x1aac] ss:$16 sps:$4 sm:$0xff]   ;;  %v21476_v44 = vld [vmem:[%s22898_s13 + $0x19a8] ss:$16 sps:$4 sm:$0xff]  }
 0x5d8   : > { %v14648_v31 = vpop.f32.mrf.mxu1  ;;  %14941 = vmatprep.subr.bf16.mxu1 %v21433_v41  ;;  %v21479_v48 = vld [vmem:[%s22898_s13 + $0x1aa8] ss:$16 sps:$4 sm:$0xff]   ;;  %v21484_v34 = vld [vmem:[%s22898_s13 + $0x198c] ss:$16 sps:$4 sm:$0xff]  }
 0x5d9   : > { %v21493_v31 = vld [vmem:[%s22898_s13 + $0x1a6c] ss:$16 sps:$4 sm:$0xff]  }
 0x5da   : > { %14917 = vmatpush2.bf16.msra.mxu0 %v21428_v57  ;;  %v21487_v57 = vld [vmem:[%s22898_s13 + $0x1a8c] ss:$16 sps:$4 sm:$0xff]  }
 0x5db   : > { %14942 = vmatpush1.bf16.msra.mxu1 %v21431_v17  ;;  %14918 = vmatprep.subr.bf16.mxu0 %v21436_v25  ;;  %v21490_v17 = vld [vmem:[%s22898_s13 + $0x196c] ss:$16 sps:$4 sm:$0xff]   ;;  %v21488_v25 = vld [vmem:[%s22898_s13 + $0x1968] ss:$16 sps:$4 sm:$0xff]  }
 0x5dc   : > { %14943 = vmatprep.subr.bf16.mxu1 %v21439_v37  ;;  %v21491_v37 = vld [vmem:[%s22898_s13 + $0x1a68] ss:$16 sps:$4 sm:$0xff]  }
 0x5de   : > { %14919 = vmatpush2.bf16.msra.mxu0 %v21434_v60  ;;  %v21496_v60 = vld [vmem:[%s22898_s13 + $0x194c] ss:$16 sps:$4 sm:$0xff]  }
 0x5df   : > { %14944 = vmatpush1.bf16.msra.mxu1 %v21437_v11  ;;  %14920 = vmatprep.subr.bf16.mxu0 %v21442_v62  ;;  %v21499_v11 = vld [vmem:[%s22898_s13 + $0x1a4c] ss:$16 sps:$4 sm:$0xff]   ;;  %v21494_v62 = vld [vmem:[%s22898_s13 + $0x1948] ss:$16 sps:$4 sm:$0xff]  }
 0x5e0   : > { %14945 = vmatprep.subr.bf16.mxu1 %v21445_v10  ;;  %v21497_v10 = vld [vmem:[%s22898_s13 + $0x1a48] ss:$16 sps:$4 sm:$0xff]  }
 0x5e2   : > { %14921 = vmatpush2.bf16.msra.mxu0 %v21440_v59  ;;  %v21502_v59 = vld [vmem:[%s22898_s13 + $0x192c] ss:$16 sps:$4 sm:$0xff]  }
 0x5e3   : > { %14946 = vmatpush1.bf16.msra.mxu1 %v21443_v5  ;;  %14922 = vmatprep.subr.bf16.mxu0 %v21448_v1  ;;  %v21505_v5 = vld [vmem:[%s22898_s13 + $0x1a2c] ss:$16 sps:$4 sm:$0xff]   ;;  %v21500_v1 = vld [vmem:[%s22898_s13 + $0x1928] ss:$16 sps:$4 sm:$0xff]  }
 0x5e4   : > { %14947 = vmatprep.subr.bf16.mxu1 %v21451_v35  ;;  %v21503_v35 = vld [vmem:[%s22898_s13 + $0x1a28] ss:$16 sps:$4 sm:$0xff]  }
 0x5e6   : > { %14923 = vmatpush2.bf16.msra.mxu0 %v21446_v33  ;;  %v21508_v33 = vld [vmem:[%s22898_s13 + $0x190c] ss:$16 sps:$4 sm:$0xff]  }
 0x5e7   : > { %14948 = vmatpush1.bf16.msra.mxu1 %v21449_v38  ;;  %14924 = vmatprep.subr.bf16.mxu0 %v21454_v49  ;;  %v21511_v38 = vld [vmem:[%s22898_s13 + $0x1a0c] ss:$16 sps:$4 sm:$0xff]   ;;  %v21506_v49 = vld [vmem:[%s22898_s13 + $0x1908] ss:$16 sps:$4 sm:$0xff]  }
 0x5e8   : > { %14949 = vmatprep.subr.bf16.mxu1 %v21457_v6  ;;  %v21509_v6 = vld [vmem:[%s22898_s13 + $0x1a08] ss:$16 sps:$4 sm:$0xff]  }
 0x5ea   : > { %14925 = vmatpush2.bf16.msra.mxu0 %v21452_v30  ;;  %v21514_v30 = vld [vmem:[%s22898_s13 + $0x1bec] ss:$16 sps:$4 sm:$0xff]  }
 0x5eb   : > { %14950 = vmatpush1.bf16.msra.mxu1 %v21455_v19  ;;  %14926 = vmatprep.subr.bf16.mxu0 %v21460_v50  ;;  %v21517_v19 = vld [vmem:[%s22898_s13 + $0x1cec] ss:$16 sps:$4 sm:$0xff]   ;;  %v21512_v50 = vld [vmem:[%s22898_s13 + $0x1be8] ss:$16 sps:$4 sm:$0xff]  }
 0x5ec   : > { %14951 = vmatprep.subr.bf16.mxu1 %v21463_v36  ;;  %v21515_v36 = vld [vmem:[%s22898_s13 + $0x1ce8] ss:$16 sps:$4 sm:$0xff]  }
 0x5ee   : > { %14927 = vmatpush2.bf16.msra.mxu0 %v21458_v23  ;;  %v21520_v23 = vld [vmem:[%s22898_s13 + $0x1bcc] ss:$16 sps:$4 sm:$0xff]  }
 0x5ef   : > { %14952 = vmatpush1.bf16.msra.mxu1 %v21461_v51  ;;  %14978 = vmatprep.subr.bf16.mxu0 %v21469_v47  ;;  %v21523_v51 = vld [vmem:[%s22898_s13 + $0x1ccc] ss:$16 sps:$4 sm:$0xff]  }
 0x5f0   : > { %14953 = vmatprep.subr.bf16.mxu1 %v21466_v15 }
 0x5f1   : > { %v14684_v54 = vpop.f32.mrf.mxu0  ;;  %14929 = vmatmul.mubr.bf16.vlgmr.msra.gmra.mxu0 %v23480_v63 }
 0x5f2   : > { %v24993_v22 = vadd.f32 %v14684_v54, %v24953_v9  ;;  %14979 = vmatpush1.bf16.msra.mxu0 %v21467_v45  ;;  %15010 = vmatprep.mubr.bf16.mxu0 %v23502_v12  ;;  %v21485_v12 = vld [vmem:[%s22898_s13 + $0x1a88] ss:$16 sps:$4 sm:$0xff]   ;;  %v21529_v54 = vld [vmem:[%s22898_s13 + $0x1cac] ss:$16 sps:$4 sm:$0xff]  }
 0x5f3   : > { %14954 = vmatpush2.bf16.msra.mxu1 %v21464_v4  ;;  %v14686_v53 = vpop.f32.mrf.mxu0  ;;  %14980 = vmatprep.subr.bf16.mxu0 %v21475_v0  ;;  %v21518_v4 = vld [vmem:[%s22898_s13 + $0x1bc8] ss:$16 sps:$4 sm:$0xff]   ;;  %v21526_v0 = vld [vmem:[%s22898_s13 + $0x1bac] ss:$16 sps:$4 sm:$0xff]  }
 0x5f4   : > { %14955 = vmatprep.subr.bf16.mxu1 %v21472_v24  ;;  %v25000_v63 = vadd.f32 %v14686_v53, %v24960_v2  ;;  %v21482_v2 = vld [vmem:[%s22898_s13 + $0x1988] ss:$16 sps:$4 sm:$0xff]  }
 0x5f5   : > { %v14688_v9 = vpop.f32.mrf.mxu0  ;;  %v21521_v45 = vld [vmem:[%s22898_s13 + $0x1cc8] ss:$16 sps:$4 sm:$0xff]  }
 0x5f6   : > { %14981 = vmatpush1.bf16.msra.mxu0 %v21473_v29  ;;  %v21527_v29 = vld [vmem:[%s22898_s13 + $0x1ca8] ss:$16 sps:$4 sm:$0xff]   ;;  %v21538_v9 = vld [vmem:[%s22898_s13 + $0x1b6c] ss:$16 sps:$4 sm:$0xff]  }
 0x5f7   : > { %14956 = vmatpush2.bf16.msra.mxu1 %v21470_v43  ;;  %v14689_v41 = vpop.f32.mrf.mxu0  ;;  %14982 = vmatprep.subr.bf16.mxu0 %v21481_v3  ;;  %v21524_v43 = vld [vmem:[%s22898_s13 + $0x1ba8] ss:$16 sps:$4 sm:$0xff]   ;;  %v21535_v3 = vld [vmem:[%s22898_s13 + $0x1c8c] ss:$16 sps:$4 sm:$0xff]  }
 0x5f8   : > { %14957 = vmatprep.subr.bf16.mxu1 %v21478_v7  ;;  %v21532_v7 = vld [vmem:[%s22898_s13 + $0x1b8c] ss:$16 sps:$4 sm:$0xff]   ;;  %v21539_v41 = vld [vmem:[%s22898_s13 + $0x1c68] ss:$16 sps:$4 sm:$0xff]  }
 0x5fa   : > { %14983 = vmatpush1.bf16.msra.mxu0 %v21479_v48  ;;  %v21536_v48 = vld [vmem:[%s22898_s13 + $0x1b68] ss:$16 sps:$4 sm:$0xff]  }
 0x5fb   : > { %14958 = vmatpush2.bf16.msra.mxu1 %v21476_v44  ;;  %14984 = vmatprep.subr.bf16.mxu0 %v21487_v57  ;;  %v21541_v44 = vld [vmem:[%s22898_s13 + $0x1c6c] ss:$16 sps:$4 sm:$0xff]  }
 0x5fc   : > { %14959 = vmatprep.subr.bf16.mxu1 %v21484_v34  ;;  %v21544_v34 = vld [vmem:[%s22898_s13 + $0x1b4c] ss:$16 sps:$4 sm:$0xff]  }
 0x5fd   : > { %v21547_v57 = vld [vmem:[%s22898_s13 + $0x1c4c] ss:$16 sps:$4 sm:$0xff]  }
 0x5fe   : > { %14985 = vmatpush1.bf16.msra.mxu0 %v21485_v12  ;;  %v21545_v12 = vld [vmem:[%s22898_s13 + $0x1c48] ss:$16 sps:$4 sm:$0xff]  }
 0x5ff   : > { %14960 = vmatpush2.bf16.msra.mxu1 %v21482_v2  ;;  %14986 = vmatprep.subr.bf16.mxu0 %v21493_v31  ;;  %v21542_v2 = vld [vmem:[%s22898_s13 + $0x1b48] ss:$16 sps:$4 sm:$0xff]   ;;  %v21553_v31 = vld [vmem:[%s22898_s13 + $0x1c2c] ss:$16 sps:$4 sm:$0xff]  }
 0x600   : > { %14961 = vmatprep.subr.bf16.mxu1 %v21490_v17  ;;  %v21550_v17 = vld [vmem:[%s22898_s13 + $0x1b2c] ss:$16 sps:$4 sm:$0xff]  }
 0x602   : > { %14987 = vmatpush1.bf16.msra.mxu0 %v21491_v37  ;;  %v21551_v37 = vld [vmem:[%s22898_s13 + $0x1c28] ss:$16 sps:$4 sm:$0xff]  }
 0x603   : > { %14962 = vmatpush2.bf16.msra.mxu1 %v21488_v25  ;;  %14988 = vmatprep.subr.bf16.mxu0 %v21499_v11  ;;  %v21548_v25 = vld [vmem:[%s22898_s13 + $0x1b28] ss:$16 sps:$4 sm:$0xff]   ;;  %v21559_v11 = vld [vmem:[%s22898_s13 + $0x1c0c] ss:$16 sps:$4 sm:$0xff]  }
 0x604   : > { %14963 = vmatprep.subr.bf16.mxu1 %v21496_v60  ;;  %v21556_v60 = vld [vmem:[%s22898_s13 + $0x1b0c] ss:$16 sps:$4 sm:$0xff]  }
 0x606   : > { %14989 = vmatpush1.bf16.msra.mxu0 %v21497_v10  ;;  %v21557_v10 = vld [vmem:[%s22898_s13 + $0x1c08] ss:$16 sps:$4 sm:$0xff]  }
 0x607   : > { %14964 = vmatpush2.bf16.msra.mxu1 %v21494_v62  ;;  %14990 = vmatprep.subr.bf16.mxu0 %v21505_v5  ;;  %v21554_v62 = vld [vmem:[%s22898_s13 + $0x1b08] ss:$16 sps:$4 sm:$0xff]   ;;  %v21565_v5 = vld [vmem:[%s22898_s13 + $0x1eec] ss:$16 sps:$4 sm:$0xff]  }
 0x608   : > { %14965 = vmatprep.subr.bf16.mxu1 %v21502_v59  ;;  %v21562_v59 = vld [vmem:[%s22898_s13 + $0x1dec] ss:$16 sps:$4 sm:$0xff]  }
 0x60a   : > { %14991 = vmatpush1.bf16.msra.mxu0 %v21503_v35  ;;  %v21563_v35 = vld [vmem:[%s22898_s13 + $0x1ee8] ss:$16 sps:$4 sm:$0xff]  }
 0x60b   : > { %14966 = vmatpush2.bf16.msra.mxu1 %v21500_v1  ;;  %14992 = vmatprep.subr.bf16.mxu0 %v21511_v38  ;;  %v21560_v1 = vld [vmem:[%s22898_s13 + $0x1de8] ss:$16 sps:$4 sm:$0xff]   ;;  %v21571_v38 = vld [vmem:[%s22898_s13 + $0x1ecc] ss:$16 sps:$4 sm:$0xff]  }
 0x60c   : > { %14967 = vmatprep.subr.bf16.mxu1 %v21508_v33  ;;  %v21568_v33 = vld [vmem:[%s22898_s13 + $0x1dcc] ss:$16 sps:$4 sm:$0xff]  }
 0x60e   : > { %14993 = vmatpush1.bf16.msra.mxu0 %v21509_v6 }
 0x60f   : > { %14968 = vmatpush2.bf16.msra.mxu1 %v21506_v49  ;;  %14994 = vmatprep.subr.bf16.mxu0 %v21514_v30  ;;  %v21566_v30 = vld [vmem:[%s22898_s13 + $0x1dc8] ss:$16 sps:$4 sm:$0xff]  }
 0x610   : > { %15019 = vmatprep.subr.bf16.mxu1 %v21517_v19  ;;  %v21569_v19 = vld [vmem:[%s22898_s13 + $0x1ec8] ss:$16 sps:$4 sm:$0xff]  }
 0x612   : > { %v14725_v15 = vpop.f32.mrf.mxu1  ;;  %14970 = vmatmul.mubr.bf16.vlgmr.msra.gmra.mxu1 %v23576_v20  ;;  %14995 = vmatpush2.bf16.msra.mxu0 %v21512_v50 }
 0x613   : > { %v25033_v47 = vadd.f32 %v14725_v15, %v24993_v22  ;;  %15020 = vmatpush1.bf16.msra.mxu1 %v21515_v36  ;;  %14996 = vmatprep.subr.bf16.mxu0 %v21520_v23  ;;  %v21574_v36 = vld [vmem:[%s22898_s13 + $0x1dac] ss:$16 sps:$4 sm:$0xff]   ;;  %v21572_v15 = vld [vmem:[%s22898_s13 + $0x1da8] ss:$16 sps:$4 sm:$0xff]  }
 0x614   : > { %v14727_v24 = vpop.f32.mrf.mxu1  ;;  %15021 = vmatprep.subr.bf16.mxu1 %v21523_v51  ;;  %15051 = vmatprep.mubr.bf16.mxu1 %v23598_v18  ;;  %v21533_v18 = vld [vmem:[%s22898_s13 + $0x1c88] ss:$16 sps:$4 sm:$0xff]   ;;  %v21577_v23 = vld [vmem:[%s22898_s13 + $0x1eac] ss:$16 sps:$4 sm:$0xff]  }
 0x615   : > { %v25040_v20 = vadd.f32 %v14727_v24, %v25000_v63  ;;  %v21530_v63 = vld [vmem:[%s22898_s13 + $0x1b88] ss:$16 sps:$4 sm:$0xff]   ;;  %v21583_v24 = vld [vmem:[%s22898_s13 + $0x1e8c] ss:$16 sps:$4 sm:$0xff]  }
 0x616   : > { %v14729_v22 = vpop.f32.mrf.mxu1  ;;  %14997 = vmatpush2.bf16.msra.mxu0 %v21518_v4 }
 0x617   : > { %15022 = vmatpush1.bf16.msra.mxu1 %v21521_v45  ;;  %14998 = vmatprep.subr.bf16.mxu0 %v21526_v0  ;;  %v21580_v45 = vld [vmem:[%s22898_s13 + $0x1d8c] ss:$16 sps:$4 sm:$0xff]   ;;  %v21578_v0 = vld [vmem:[%s22898_s13 + $0x1d88] ss:$16 sps:$4 sm:$0xff]  }
 0x618   : > { %v14730_v53 = vpop.f32.mrf.mxu1  ;;  %15023 = vmatprep.subr.bf16.mxu1 %v21529_v54  ;;  %v21586_v54 = vld [vmem:[%s22898_s13 + $0x1d6c] ss:$16 sps:$4 sm:$0xff]   ;;  %v21584_v22 = vld [vmem:[%s22898_s13 + $0x1d68] ss:$16 sps:$4 sm:$0xff]  }
 0x619   : > { %v21595_v53 = vld [vmem:[%s22898_s13 + $0x1e4c] ss:$16 sps:$4 sm:$0xff]  }
 0x61a   : > { %14999 = vmatpush2.bf16.msra.mxu0 %v21524_v43  ;;  %v21587_v43 = vld [vmem:[%s22898_s13 + $0x1e68] ss:$16 sps:$4 sm:$0xff]  }
 0x61b   : > { %15024 = vmatpush1.bf16.msra.mxu1 %v21527_v29  ;;  %15000 = vmatprep.subr.bf16.mxu0 %v21532_v7  ;;  %v21592_v29 = vld [vmem:[%s22898_s13 + $0x1d4c] ss:$16 sps:$4 sm:$0xff]   ;;  %v21590_v7 = vld [vmem:[%s22898_s13 + $0x1d48] ss:$16 sps:$4 sm:$0xff]  }
 0x61c   : > { %15025 = vmatprep.subr.bf16.mxu1 %v21535_v3  ;;  %v21593_v3 = vld [vmem:[%s22898_s13 + $0x1e48] ss:$16 sps:$4 sm:$0xff]  }
 0x61e   : > { %15001 = vmatpush2.bf16.msra.mxu0 %v21530_v63  ;;  %v21598_v63 = vld [vmem:[%s22898_s13 + $0x1d2c] ss:$16 sps:$4 sm:$0xff]  }
 0x61f   : > { %15026 = vmatpush1.bf16.msra.mxu1 %v21533_v18  ;;  %15002 = vmatprep.subr.bf16.mxu0 %v21538_v9  ;;  %v21601_v18 = vld [vmem:[%s22898_s13 + $0x1e2c] ss:$16 sps:$4 sm:$0xff]   ;;  %v21596_v9 = vld [vmem:[%s22898_s13 + $0x1d28] ss:$16 sps:$4 sm:$0xff]  }
 0x620   : > { %15027 = vmatprep.subr.bf16.mxu1 %v21541_v44  ;;  %v21599_v44 = vld [vmem:[%s22898_s13 + $0x1e28] ss:$16 sps:$4 sm:$0xff]  }
 0x622   : > { %15003 = vmatpush2.bf16.msra.mxu0 %v21536_v48  ;;  %v21604_v48 = vld [vmem:[%s22898_s13 + $0x1d0c] ss:$16 sps:$4 sm:$0xff]  }
 0x623   : > { %15028 = vmatpush1.bf16.msra.mxu1 %v21539_v41  ;;  %15004 = vmatprep.subr.bf16.mxu0 %v21544_v34  ;;  %v21607_v41 = vld [vmem:[%s22898_s13 + $0x1e0c] ss:$16 sps:$4 sm:$0xff]   ;;  %v21602_v34 = vld [vmem:[%s22898_s13 + $0x1d08] ss:$16 sps:$4 sm:$0xff]  }
 0x624   : > { %15029 = vmatprep.subr.bf16.mxu1 %v21547_v57  ;;  %v21605_v57 = vld [vmem:[%s22898_s13 + $0x1e08] ss:$16 sps:$4 sm:$0xff]  }
 0x626   : > { %15005 = vmatpush2.bf16.msra.mxu0 %v21542_v2  ;;  %v21610_v2 = vld [vmem:[%s22898_s13 + $0x1fec] ss:$16 sps:$4 sm:$0xff]  }
 0x627   : > { %15030 = vmatpush1.bf16.msra.mxu1 %v21545_v12  ;;  %15006 = vmatprep.subr.bf16.mxu0 %v21550_v17  ;;  %v21613_v12 = vld [vmem:[%s22898_s13 + $0x20ec] ss:$16 sps:$4 sm:$0xff]   ;;  %v21608_v17 = vld [vmem:[%s22898_s13 + $0x1fe8] ss:$16 sps:$4 sm:$0xff]  }
 0x628   : > { %15031 = vmatprep.subr.bf16.mxu1 %v21553_v31  ;;  %v21611_v31 = vld [vmem:[%s22898_s13 + $0x20e8] ss:$16 sps:$4 sm:$0xff]  }
 0x62a   : > { %15007 = vmatpush2.bf16.msra.mxu0 %v21548_v25  ;;  %v21616_v25 = vld [vmem:[%s22898_s13 + $0x1fcc] ss:$16 sps:$4 sm:$0xff]  }
 0x62b   : > { %15032 = vmatpush1.bf16.msra.mxu1 %v21551_v37  ;;  %15008 = vmatprep.subr.bf16.mxu0 %v21556_v60  ;;  %v21619_v37 = vld [vmem:[%s22898_s13 + $0x20cc] ss:$16 sps:$4 sm:$0xff]  }
 0x62c   : > { %15033 = vmatprep.subr.bf16.mxu1 %v21559_v11 }
 0x62e   : > { %15009 = vmatpush2.bf16.msra.mxu0 %v21554_v62  ;;  %v21614_v62 = vld [vmem:[%s22898_s13 + $0x1fc8] ss:$16 sps:$4 sm:$0xff]  }
 0x62f   : > { %15034 = vmatpush1.bf16.msra.mxu1 %v21557_v10  ;;  %15060 = vmatprep.subr.bf16.mxu0 %v21565_v5  ;;  %v21617_v10 = vld [vmem:[%s22898_s13 + $0x20c8] ss:$16 sps:$4 sm:$0xff]   ;;  %v21622_v5 = vld [vmem:[%s22898_s13 + $0x1fac] ss:$16 sps:$4 sm:$0xff]  }
 0x630   : > { %15035 = vmatprep.subr.bf16.mxu1 %v21562_v59 }
 0x631   : > { %v14766_v49 = vpop.f32.mrf.mxu0  ;;  %15011 = vmatmul.mubr.bf16.vlgmr.msra.gmra.mxu0 %v23580_v21 }
 0x632   : > { %v25073_v6 = vadd.f32 %v14766_v49, %v25033_v47  ;;  %15061 = vmatpush1.bf16.msra.mxu0 %v21563_v35  ;;  %15092 = vmatprep.mubr.bf16.mxu0 %v23602_v32  ;;  %v21575_v47 = vld [vmem:[%s22898_s13 + $0x1ea8] ss:$16 sps:$4 sm:$0xff]  }
 0x633   : > { %15036 = vmatpush2.bf16.msra.mxu1 %v21560_v1  ;;  %v14768_v50 = vpop.f32.mrf.mxu0  ;;  %15062 = vmatprep.subr.bf16.mxu0 %v21571_v38  ;;  %v21581_v32 = vld [vmem:[%s22898_s13 + $0x1e88] ss:$16 sps:$4 sm:$0xff]   ;;  %v21625_v1 = vld [vmem:[%s22898_s13 + $0x20ac] ss:$16 sps:$4 sm:$0xff]  }
 0x634   : > { %15037 = vmatprep.subr.bf16.mxu1 %v21568_v33  ;;  %v25080_v21 = vadd.f32 %v14768_v50, %v25040_v20  ;;  %v21589_v20 = vld [vmem:[%s22898_s13 + $0x1e6c] ss:$16 sps:$4 sm:$0xff]   ;;  %v21620_v33 = vld [vmem:[%s22898_s13 + $0x1fa8] ss:$16 sps:$4 sm:$0xff]  }
 0x635   : > { %v14770_v51 = vpop.f32.mrf.mxu0  ;;  %v21623_v38 = vld [vmem:[%s22898_s13 + $0x20a8] ss:$16 sps:$4 sm:$0xff]   ;;  %v21634_v50 = vld [vmem:[%s22898_s13 + $0x1f6c] ss:$16 sps:$4 sm:$0xff]  }
 0x636   : > { %15063 = vmatpush1.bf16.msra.mxu0 %v21569_v19  ;;  %v21626_v19 = vld [vmem:[%s22898_s13 + $0x1f88] ss:$16 sps:$4 sm:$0xff]   ;;  %v21640_v51 = vld [vmem:[%s22898_s13 + $0x1f4c] ss:$16 sps:$4 sm:$0xff]  }
 0x637   : > { %15038 = vmatpush2.bf16.msra.mxu1 %v21566_v30  ;;  %v14771_v4 = vpop.f32.mrf.mxu0  ;;  %15064 = vmatprep.subr.bf16.mxu0 %v21577_v23  ;;  %v21631_v30 = vld [vmem:[%s22898_s13 + $0x208c] ss:$16 sps:$4 sm:$0xff]   ;;  %v21632_v23 = vld [vmem:[%s22898_s13 + $0x1f68] ss:$16 sps:$4 sm:$0xff]  }
 0x638   : > { %15039 = vmatprep.subr.bf16.mxu1 %v21574_v36  ;;  %v21637_v36 = vld [vmem:[%s22898_s13 + $0x206c] ss:$16 sps:$4 sm:$0xff]   ;;  %v21641_v4 = vld [vmem:[%s22898_s13 + $0x2048] ss:$16 sps:$4 sm:$0xff]  }
 0x63a   : > { %15065 = vmatpush1.bf16.msra.mxu0 %v21575_v47  ;;  %v21638_v47 = vld [vmem:[%s22898_s13 + $0x1f48] ss:$16 sps:$4 sm:$0xff]  }
 0x63b   : > { %15040 = vmatpush2.bf16.msra.mxu1 %v21572_v15  ;;  %15066 = vmatprep.subr.bf16.mxu0 %v21583_v24  ;;  %v21643_v15 = vld [vmem:[%s22898_s13 + $0x204c] ss:$16 sps:$4 sm:$0xff]  }
 0x63c   : > { %15041 = vmatprep.subr.bf16.mxu1 %v21580_v45  ;;  %v21646_v45 = vld [vmem:[%s22898_s13 + $0x1f2c] ss:$16 sps:$4 sm:$0xff]  }
 0x63d   : > { %v21649_v24 = vld [vmem:[%s22898_s13 + $0x202c] ss:$16 sps:$4 sm:$0xff]  }
 0x63e   : > { %15067 = vmatpush1.bf16.msra.mxu0 %v21581_v32  ;;  %v21647_v32 = vld [vmem:[%s22898_s13 + $0x2028] ss:$16 sps:$4 sm:$0xff]  }
 0x63f   : > { %15042 = vmatpush2.bf16.msra.mxu1 %v21578_v0  ;;  %15068 = vmatprep.subr.bf16.mxu0 %v21589_v20  ;;  %v21644_v0 = vld [vmem:[%s22898_s13 + $0x1f28] ss:$16 sps:$4 sm:$0xff]   ;;  %v21655_v20 = vld [vmem:[%s22898_s13 + $0x200c] ss:$16 sps:$4 sm:$0xff]  }
 0x640   : > { %15043 = vmatprep.subr.bf16.mxu1 %v21586_v54  ;;  %v21652_v54 = vld [vmem:[%s22898_s13 + $0x1f0c] ss:$16 sps:$4 sm:$0xff]  }
 0x642   : > { %15069 = vmatpush1.bf16.msra.mxu0 %v21587_v43  ;;  %v21653_v43 = vld [vmem:[%s22898_s13 + $0x2008] ss:$16 sps:$4 sm:$0xff]  }
 0x643   : > { %15044 = vmatpush2.bf16.msra.mxu1 %v21584_v22  ;;  %15070 = vmatprep.subr.bf16.mxu0 %v21595_v53  ;;  %v21650_v22 = vld [vmem:[%s22898_s13 + $0x1f08] ss:$16 sps:$4 sm:$0xff]   ;;  %v21661_v53 = vld [vmem:[%s22898_s13 + $0x22ec] ss:$16 sps:$4 sm:$0xff]  }
 0x644   : > { %15045 = vmatprep.subr.bf16.mxu1 %v21592_v29  ;;  %v21658_v29 = vld [vmem:[%s22898_s13 + $0x21ec] ss:$16 sps:$4 sm:$0xff]  }
 0x646   : > { %15071 = vmatpush1.bf16.msra.mxu0 %v21593_v3  ;;  %v21659_v3 = vld [vmem:[%s22898_s13 + $0x22e8] ss:$16 sps:$4 sm:$0xff]  }
 0x647   : > { %15046 = vmatpush2.bf16.msra.mxu1 %v21590_v7  ;;  %15072 = vmatprep.subr.bf16.mxu0 %v21601_v18  ;;  %v21656_v7 = vld [vmem:[%s22898_s13 + $0x21e8] ss:$16 sps:$4 sm:$0xff]   ;;  %v21667_v18 = vld [vmem:[%s22898_s13 + $0x22cc] ss:$16 sps:$4 sm:$0xff]  }
 0x648   : > { %15047 = vmatprep.subr.bf16.mxu1 %v21598_v63  ;;  %v21664_v63 = vld [vmem:[%s22898_s13 + $0x21cc] ss:$16 sps:$4 sm:$0xff]  }
 0x64a   : > { %15073 = vmatpush1.bf16.msra.mxu0 %v21599_v44 }
 0x64b   : > { %15048 = vmatpush2.bf16.msra.mxu1 %v21596_v9  ;;  %15074 = vmatprep.subr.bf16.mxu0 %v21607_v41  ;;  %v21665_v41 = vld [vmem:[%s22898_s13 + $0x22c8] ss:$16 sps:$4 sm:$0xff]  }
 0x64c   : > { %15049 = vmatprep.subr.bf16.mxu1 %v21604_v48  ;;  %v21662_v48 = vld [vmem:[%s22898_s13 + $0x21c8] ss:$16 sps:$4 sm:$0xff]  }
 0x64e   : > { %15075 = vmatpush1.bf16.msra.mxu0 %v21605_v57  ;;  %v21670_v57 = vld [vmem:[%s22898_s13 + $0x21ac] ss:$16 sps:$4 sm:$0xff]  }
 0x64f   : > { %15050 = vmatpush2.bf16.msra.mxu1 %v21602_v34  ;;  %15076 = vmatprep.subr.bf16.mxu0 %v21610_v2  ;;  %v21673_v2 = vld [vmem:[%s22898_s13 + $0x22ac] ss:$16 sps:$4 sm:$0xff]  }
 0x650   : > { %15101 = vmatprep.subr.bf16.mxu1 %v21613_v12 }
 0x652   : > { %v14807_v60 = vpop.f32.mrf.mxu1  ;;  %15052 = vmatmul.mubr.bf16.vlgmr.msra.gmra.mxu1 %v23676_v55  ;;  %15077 = vmatpush2.bf16.msra.mxu0 %v21608_v17  ;;  %v21668_v17 = vld [vmem:[%s22898_s13 + $0x21a8] ss:$16 sps:$4 sm:$0xff]  }
 0x653   : > { %v25113_v11 = vadd.f32 %v14807_v60, %v25073_v6  ;;  %15102 = vmatpush1.bf16.msra.mxu1 %v21611_v31  ;;  %15078 = vmatprep.subr.bf16.mxu0 %v21616_v25  ;;  %v21628_v6 = vld [vmem:[%s22898_s13 + $0x1f8c] ss:$16 sps:$4 sm:$0xff]   ;;  %v21671_v31 = vld [vmem:[%s22898_s13 + $0x22a8] ss:$16 sps:$4 sm:$0xff]  }
 0x654   : > { %v14809_v59 = vpop.f32.mrf.mxu1  ;;  %15103 = vmatprep.subr.bf16.mxu1 %v21619_v37  ;;  %15133 = vmatprep.mubr.bf16.mxu1 %v23698_v40  ;;  %v21629_v40 = vld [vmem:[%s22898_s13 + $0x2088] ss:$16 sps:$4 sm:$0xff]   ;;  %v21676_v37 = vld [vmem:[%s22898_s13 + $0x218c] ss:$16 sps:$4 sm:$0xff]  }
 0x655   : > { %v25120_v55 = vadd.f32 %v14809_v59, %v25080_v21  ;;  %v21635_v21 = vld [vmem:[%s22898_s13 + $0x2068] ss:$16 sps:$4 sm:$0xff]   ;;  %v21679_v60 = vld [vmem:[%s22898_s13 + $0x228c] ss:$16 sps:$4 sm:$0xff]  }
 0x656   : > { %v14811_v35 = vpop.f32.mrf.mxu1  ;;  %15079 = vmatpush2.bf16.msra.mxu0 %v21614_v62  ;;  %v21682_v62 = vld [vmem:[%s22898_s13 + $0x216c] ss:$16 sps:$4 sm:$0xff]   ;;  %v21680_v59 = vld [vmem:[%s22898_s13 + $0x2168] ss:$16 sps:$4 sm:$0xff]  }
 0x657   : > { %15104 = vmatpush1.bf16.msra.mxu1 %v21617_v10  ;;  %15080 = vmatprep.subr.bf16.mxu0 %v21622_v5  ;;  %v21685_v10 = vld [vmem:[%s22898_s13 + $0x226c] ss:$16 sps:$4 sm:$0xff]   ;;  %v21683_v5 = vld [vmem:[%s22898_s13 + $0x2268] ss:$16 sps:$4 sm:$0xff]  }
 0x658   : > { %v14812_v49 = vpop.f32.mrf.mxu1  ;;  %15105 = vmatprep.subr.bf16.mxu1 %v21625_v1  ;;  %v21688_v1 = vld [vmem:[%s22898_s13 + $0x214c] ss:$16 sps:$4 sm:$0xff]   ;;  %v21686_v35 = vld [vmem:[%s22898_s13 + $0x2148] ss:$16 sps:$4 sm:$0xff]  }
 0x659   : > { %v21697_v49 = vld [vmem:[%s22898_s13 + $0x222c] ss:$16 sps:$4 sm:$0xff]  }
 0x65a   : > { %15081 = vmatpush2.bf16.msra.mxu0 %v21620_v33  ;;  %v21689_v33 = vld [vmem:[%s22898_s13 + $0x2248] ss:$16 sps:$4 sm:$0xff]  }
 0x65b   : > { %15106 = vmatpush1.bf16.msra.mxu1 %v21623_v38  ;;  %15082 = vmatprep.subr.bf16.mxu0 %v21628_v6  ;;  %v21694_v38 = vld [vmem:[%s22898_s13 + $0x212c] ss:$16 sps:$4 sm:$0xff]   ;;  %v21692_v6 = vld [vmem:[%s22898_s13 + $0x2128] ss:$16 sps:$4 sm:$0xff]  }
 0x65c   : > { %15107 = vmatprep.subr.bf16.mxu1 %v21631_v30  ;;  %v21695_v30 = vld [vmem:[%s22898_s13 + $0x2228] ss:$16 sps:$4 sm:$0xff]  }
 0x65e   : > { %15083 = vmatpush2.bf16.msra.mxu0 %v21626_v19  ;;  %v21700_v19 = vld [vmem:[%s22898_s13 + $0x210c] ss:$16 sps:$4 sm:$0xff]  }
 0x65f   : > { %15108 = vmatpush1.bf16.msra.mxu1 %v21629_v40  ;;  %15084 = vmatprep.subr.bf16.mxu0 %v21634_v50  ;;  %v21703_v40 = vld [vmem:[%s22898_s13 + $0x220c] ss:$16 sps:$4 sm:$0xff]   ;;  %v21698_v50 = vld [vmem:[%s22898_s13 + $0x2108] ss:$16 sps:$4 sm:$0xff]  }
 0x660   : > { %15109 = vmatprep.subr.bf16.mxu1 %v21637_v36  ;;  %v21701_v36 = vld [vmem:[%s22898_s13 + $0x2208] ss:$16 sps:$4 sm:$0xff]  }
 0x662   : > { %15085 = vmatpush2.bf16.msra.mxu0 %v21632_v23  ;;  %v21706_v23 = vld [vmem:[%s22898_s13 + $0x23ec] ss:$16 sps:$4 sm:$0xff]  }
 0x663   : > { %15110 = vmatpush1.bf16.msra.mxu1 %v21635_v21  ;;  %15086 = vmatprep.subr.bf16.mxu0 %v21640_v51  ;;  %v21709_v21 = vld [vmem:[%s22898_s13 + $0x24ec] ss:$16 sps:$4 sm:$0xff]   ;;  %v21704_v51 = vld [vmem:[%s22898_s13 + $0x23e8] ss:$16 sps:$4 sm:$0xff]  }
 0x664   : > { %15111 = vmatprep.subr.bf16.mxu1 %v21643_v15  ;;  %v21707_v15 = vld [vmem:[%s22898_s13 + $0x24e8] ss:$16 sps:$4 sm:$0xff]  }
 0x666   : > { %15087 = vmatpush2.bf16.msra.mxu0 %v21638_v47  ;;  %v21712_v47 = vld [vmem:[%s22898_s13 + $0x23cc] ss:$16 sps:$4 sm:$0xff]  }
 0x667   : > { %15112 = vmatpush1.bf16.msra.mxu1 %v21641_v4  ;;  %15088 = vmatprep.subr.bf16.mxu0 %v21646_v45  ;;  %v21715_v4 = vld [vmem:[%s22898_s13 + $0x24cc] ss:$16 sps:$4 sm:$0xff]  }
 0x668   : > { %15113 = vmatprep.subr.bf16.mxu1 %v21649_v24 }
 0x66a   : > { %15089 = vmatpush2.bf16.msra.mxu0 %v21644_v0  ;;  %v21710_v0 = vld [vmem:[%s22898_s13 + $0x23c8] ss:$16 sps:$4 sm:$0xff]  }
 0x66b   : > { %15114 = vmatpush1.bf16.msra.mxu1 %v21647_v32  ;;  %15090 = vmatprep.subr.bf16.mxu0 %v21652_v54  ;;  %v21713_v32 = vld [vmem:[%s22898_s13 + $0x24c8] ss:$16 sps:$4 sm:$0xff]  }
 0x66c   : > { %15115 = vmatprep.subr.bf16.mxu1 %v21655_v20  ;;  %v21718_v20 = vld [vmem:[%s22898_s13 + $0x23ac] ss:$16 sps:$4 sm:$0xff]  }
 0x66e   : > { %15091 = vmatpush2.bf16.msra.mxu0 %v21650_v22  ;;  %v21721_v22 = vld [vmem:[%s22898_s13 + $0x24ac] ss:$16 sps:$4 sm:$0xff]  }
 0x66f   : > { %15116 = vmatpush1.bf16.msra.mxu1 %v21653_v43  ;;  %15142 = vmatprep.subr.bf16.mxu0 %v21661_v53  ;;  %v21719_v53 = vld [vmem:[%s22898_s13 + $0x24a8] ss:$16 sps:$4 sm:$0xff]  }
 0x670   : > { %15117 = vmatprep.subr.bf16.mxu1 %v21658_v29  ;;  %v21716_v29 = vld [vmem:[%s22898_s13 + $0x23a8] ss:$16 sps:$4 sm:$0xff]  }
 0x671   : > { %v14848_v9 = vpop.f32.mrf.mxu0  ;;  %15093 = vmatmul.mubr.bf16.vlgmr.msra.gmra.mxu0 %v23680_v56 }
 0x672   : > { %v25153_v44 = vadd.f32 %v14848_v9, %v25113_v11  ;;  %15143 = vmatpush1.bf16.msra.mxu0 %v21659_v3  ;;  %15174 = vmatprep.mubr.bf16.mxu0 %v23702_v8  ;;  %v21674_v11 = vld [vmem:[%s22898_s13 + $0x2188] ss:$16 sps:$4 sm:$0xff]   ;;  %v21724_v3 = vld [vmem:[%s22898_s13 + $0x238c] ss:$16 sps:$4 sm:$0xff]  }
 0x673   : > { %15118 = vmatpush2.bf16.msra.mxu1 %v21656_v7  ;;  %v14850_v34 = vpop.f32.mrf.mxu0  ;;  %15144 = vmatprep.subr.bf16.mxu0 %v21667_v18  ;;  %v21677_v8 = vld [vmem:[%s22898_s13 + $0x2288] ss:$16 sps:$4 sm:$0xff]   ;;  %v21730_v9 = vld [vmem:[%s22898_s13 + $0x236c] ss:$16 sps:$4 sm:$0xff]  }
 0x674   : > { %15119 = vmatprep.subr.bf16.mxu1 %v21664_v63  ;;  %v25160_v56 = vadd.f32 %v14850_v34, %v25120_v55  ;;  %v21691_v55 = vld [vmem:[%s22898_s13 + $0x224c] ss:$16 sps:$4 sm:$0xff]   ;;  %v21722_v18 = vld [vmem:[%s22898_s13 + $0x2388] ss:$16 sps:$4 sm:$0xff]  }
 0x675   : > { %v14852_v12 = vpop.f32.mrf.mxu0  ;;  %v21727_v63 = vld [vmem:[%s22898_s13 + $0x248c] ss:$16 sps:$4 sm:$0xff]  }
 0x676   : > { %15145 = vmatpush1.bf16.msra.mxu0 %v21665_v41  ;;  %v21731_v41 = vld [vmem:[%s22898_s13 + $0x2468] ss:$16 sps:$4 sm:$0xff]   ;;  %v21736_v34 = vld [vmem:[%s22898_s13 + $0x234c] ss:$16 sps:$4 sm:$0xff]  }
 0x677   : > { %15120 = vmatpush2.bf16.msra.mxu1 %v21662_v48  ;;  %v14853_v25 = vpop.f32.mrf.mxu0  ;;  %15146 = vmatprep.subr.bf16.mxu0 %v21673_v2  ;;  %v21728_v48 = vld [vmem:[%s22898_s13 + $0x2368] ss:$16 sps:$4 sm:$0xff]   ;;  %v21742_v12 = vld [vmem:[%s22898_s13 + $0x232c] ss:$16 sps:$4 sm:$0xff]  }
 0x678   : > { %15121 = vmatprep.subr.bf16.mxu1 %v21670_v57  ;;  %v21739_v57 = vld [vmem:[%s22898_s13 + $0x244c] ss:$16 sps:$4 sm:$0xff]   ;;  %v21734_v2 = vld [vmem:[%s22898_s13 + $0x2348] ss:$16 sps:$4 sm:$0xff]  }
 0x679   : > { %v21743_v25 = vld [vmem:[%s22898_s13 + $0x2428] ss:$16 sps:$4 sm:$0xff]  }
 0x67a   : > { %15147 = vmatpush1.bf16.msra.mxu0 %v21671_v31  ;;  %v21740_v31 = vld [vmem:[%s22898_s13 + $0x2328] ss:$16 sps:$4 sm:$0xff]  }
 0x67b   : > { %15122 = vmatpush2.bf16.msra.mxu1 %v21668_v17  ;;  %15148 = vmatprep.subr.bf16.mxu0 %v21679_v60  ;;  %v21745_v17 = vld [vmem:[%s22898_s13 + $0x242c] ss:$16 sps:$4 sm:$0xff]  }
 0x67c   : > { %15123 = vmatprep.subr.bf16.mxu1 %v21676_v37  ;;  %v21748_v37 = vld [vmem:[%s22898_s13 + $0x230c] ss:$16 sps:$4 sm:$0xff]  }
 0x67d   : > { %v21751_v60 = vld [vmem:[%s22898_s13 + $0x240c] ss:$16 sps:$4 sm:$0xff]  }
 0x67e   : > { %15149 = vmatpush1.bf16.msra.mxu0 %v21677_v8  ;;  %v21749_v8 = vld [vmem:[%s22898_s13 + $0x2408] ss:$16 sps:$4 sm:$0xff]  }
 0x67f   : > { %15124 = vmatpush2.bf16.msra.mxu1 %v21674_v11  ;;  %15150 = vmatprep.subr.bf16.mxu0 %v21685_v10  ;;  %v21746_v11 = vld [vmem:[%s22898_s13 + $0x2308] ss:$16 sps:$4 sm:$0xff]   ;;  %v21757_v10 = vld [vmem:[%s22898_s13 + $0x26ec] ss:$16 sps:$4 sm:$0xff]  }
 0x680   : > { %15125 = vmatprep.subr.bf16.mxu1 %v21682_v62  ;;  %v21754_v62 = vld [vmem:[%s22898_s13 + $0x25ec] ss:$16 sps:$4 sm:$0xff]  }
 0x682   : > { %15151 = vmatpush1.bf16.msra.mxu0 %v21683_v5  ;;  %v21755_v5 = vld [vmem:[%s22898_s13 + $0x26e8] ss:$16 sps:$4 sm:$0xff]  }
 0x683   : > { %15126 = vmatpush2.bf16.msra.mxu1 %v21680_v59  ;;  %15152 = vmatprep.subr.bf16.mxu0 %v21691_v55  ;;  %v21752_v59 = vld [vmem:[%s22898_s13 + $0x25e8] ss:$16 sps:$4 sm:$0xff]   ;;  %v21763_v55 = vld [vmem:[%s22898_s13 + $0x26cc] ss:$16 sps:$4 sm:$0xff]  }
 0x684   : > { %15127 = vmatprep.subr.bf16.mxu1 %v21688_v1  ;;  %v21760_v1 = vld [vmem:[%s22898_s13 + $0x25cc] ss:$16 sps:$4 sm:$0xff]  }
 0x686   : > { %15153 = vmatpush1.bf16.msra.mxu0 %v21689_v33 }
 0x687   : > { %15128 = vmatpush2.bf16.msra.mxu1 %v21686_v35  ;;  %15154 = vmatprep.subr.bf16.mxu0 %v21697_v49  ;;  %v21761_v49 = vld [vmem:[%s22898_s13 + $0x26c8] ss:$16 sps:$4 sm:$0xff]  }
 0x688   : > { %15129 = vmatprep.subr.bf16.mxu1 %v21694_v38  ;;  %v21758_v38 = vld [vmem:[%s22898_s13 + $0x25c8] ss:$16 sps:$4 sm:$0xff]  }
 0x68a   : > { %15155 = vmatpush1.bf16.msra.mxu0 %v21695_v30  ;;  %v21766_v30 = vld [vmem:[%s22898_s13 + $0x25ac] ss:$16 sps:$4 sm:$0xff]  }
 0x68b   : > { %15130 = vmatpush2.bf16.msra.mxu1 %v21692_v6  ;;  %15156 = vmatprep.subr.bf16.mxu0 %v21703_v40 }
 0x68c   : > { %15131 = vmatprep.subr.bf16.mxu1 %v21700_v19  ;;  %v21769_v19 = vld [vmem:[%s22898_s13 + $0x26ac] ss:$16 sps:$4 sm:$0xff]  }
 0x68e   : > { %15157 = vmatpush1.bf16.msra.mxu0 %v21701_v36  ;;  %v21767_v36 = vld [vmem:[%s22898_s13 + $0x26a8] ss:$16 sps:$4 sm:$0xff]  }
 0x68f   : > { %15132 = vmatpush2.bf16.msra.mxu1 %v21698_v50  ;;  %15158 = vmatprep.subr.bf16.mxu0 %v21706_v23  ;;  %v21764_v50 = vld [vmem:[%s22898_s13 + $0x25a8] ss:$16 sps:$4 sm:$0xff]  }
 0x690   : > { %15183 = vmatprep.subr.bf16.mxu1 %v21709_v21  ;;  %v21772_v21 = vld [vmem:[%s22898_s13 + $0x258c] ss:$16 sps:$4 sm:$0xff]  }
 0x692   : > { %v14889_v45 = vpop.f32.mrf.mxu1  ;;  %15134 = vmatmul.mubr.bf16.vlgmr.msra.gmra.mxu1 %v23776_v52  ;;  %15159 = vmatpush2.bf16.msra.mxu0 %v21704_v51  ;;  %v21775_v51 = vld [vmem:[%s22898_s13 + $0x268c] ss:$16 sps:$4 sm:$0xff]  }
 0x693   : > { %v25193_v24 = vadd.f32 %v14889_v45, %v25153_v44  ;;  %15184 = vmatpush1.bf16.msra.mxu1 %v21707_v15  ;;  %15160 = vmatprep.subr.bf16.mxu0 %v21712_v47  ;;  %v21733_v44 = vld [vmem:[%s22898_s13 + $0x246c] ss:$16 sps:$4 sm:$0xff]   ;;  %v21770_v15 = vld [vmem:[%s22898_s13 + $0x2588] ss:$16 sps:$4 sm:$0xff]  }
 0x694   : > { %v14891_v54 = vpop.f32.mrf.mxu1  ;;  %15185 = vmatprep.subr.bf16.mxu1 %v21715_v4  ;;  %15215 = vmatprep.mubr.bf16.mxu1 %v23798_v13  ;;  %v21725_v13 = vld [vmem:[%s22898_s13 + $0x2488] ss:$16 sps:$4 sm:$0xff]   ;;  %v21778_v47 = vld [vmem:[%s22898_s13 + $0x256c] ss:$16 sps:$4 sm:$0xff]  }
 0x695   : > { %v25200_v52 = vadd.f32 %v14891_v54, %v25160_v56  ;;  %v21737_v56 = vld [vmem:[%s22898_s13 + $0x2448] ss:$16 sps:$4 sm:$0xff]   ;;  %v21781_v4 = vld [vmem:[%s22898_s13 + $0x266c] ss:$16 sps:$4 sm:$0xff]  }
 0x696   : > { %v14893_v43 = vpop.f32.mrf.mxu1  ;;  %15161 = vmatpush2.bf16.msra.mxu0 %v21710_v0  ;;  %v21776_v45 = vld [vmem:[%s22898_s13 + $0x2568] ss:$16 sps:$4 sm:$0xff]   ;;  %v21784_v0 = vld [vmem:[%s22898_s13 + $0x254c] ss:$16 sps:$4 sm:$0xff]  }
 0x697   : > { %15186 = vmatpush1.bf16.msra.mxu1 %v21713_v32  ;;  %15162 = vmatprep.subr.bf16.mxu0 %v21718_v20  ;;  %v21787_v32 = vld [vmem:[%s22898_s13 + $0x264c] ss:$16 sps:$4 sm:$0xff]   ;;  %v21782_v54 = vld [vmem:[%s22898_s13 + $0x2548] ss:$16 sps:$4 sm:$0xff]  }
 0x698   : > { %v14894_v7 = vpop.f32.mrf.mxu1  ;;  %15187 = vmatprep.subr.bf16.mxu1 %v21721_v22  ;;  %v21785_v20 = vld [vmem:[%s22898_s13 + $0x2648] ss:$16 sps:$4 sm:$0xff]   ;;  %v21790_v22 = vld [vmem:[%s22898_s13 + $0x252c] ss:$16 sps:$4 sm:$0xff]  }
 0x699   : > { %v21788_v43 = vld [vmem:[%s22898_s13 + $0x2528] ss:$16 sps:$4 sm:$0xff]   ;;  %v21799_v7 = vld [vmem:[%s22898_s13 + $0x260c] ss:$16 sps:$4 sm:$0xff]  }
 0x69a   : > { %15163 = vmatpush2.bf16.msra.mxu0 %v21716_v29  ;;  %v21791_v29 = vld [vmem:[%s22898_s13 + $0x2628] ss:$16 sps:$4 sm:$0xff]  }
 0x69b   : > { %15188 = vmatpush1.bf16.msra.mxu1 %v21719_v53  ;;  %15164 = vmatprep.subr.bf16.mxu0 %v21724_v3  ;;  %v21796_v53 = vld [vmem:[%s22898_s13 + $0x250c] ss:$16 sps:$4 sm:$0xff]   ;;  %v21794_v3 = vld [vmem:[%s22898_s13 + $0x2508] ss:$16 sps:$4 sm:$0xff]  }
 0x69c   : > { %15189 = vmatprep.subr.bf16.mxu1 %v21727_v63  ;;  %v21797_v63 = vld [vmem:[%s22898_s13 + $0x2608] ss:$16 sps:$4 sm:$0xff]  }
 0x69e   : > { %15165 = vmatpush2.bf16.msra.mxu0 %v21722_v18  ;;  %v21802_v18 = vld [vmem:[%s22898_s13 + $0x27ec] ss:$16 sps:$4 sm:$0xff]  }
 0x69f   : > { %15190 = vmatpush1.bf16.msra.mxu1 %v21725_v13  ;;  %15166 = vmatprep.subr.bf16.mxu0 %v21730_v9  ;;  %v21805_v13 = vld [vmem:[%s22898_s13 + $0x28ec] ss:$16 sps:$4 sm:$0xff]   ;;  %v21800_v9 = vld [vmem:[%s22898_s13 + $0x27e8] ss:$16 sps:$4 sm:$0xff]  }
 0x6a0   : > { %15191 = vmatprep.subr.bf16.mxu1 %v21733_v44  ;;  %v21803_v44 = vld [vmem:[%s22898_s13 + $0x28e8] ss:$16 sps:$4 sm:$0xff]  }
 0x6a2   : > { %15167 = vmatpush2.bf16.msra.mxu0 %v21728_v48  ;;  %v21808_v48 = vld [vmem:[%s22898_s13 + $0x27cc] ss:$16 sps:$4 sm:$0xff]  }
 0x6a3   : > { %15192 = vmatpush1.bf16.msra.mxu1 %v21731_v41  ;;  %15168 = vmatprep.subr.bf16.mxu0 %v21736_v34  ;;  %v21811_v41 = vld [vmem:[%s22898_s13 + $0x28cc] ss:$16 sps:$4 sm:$0xff]  }
 0x6a4   : > { %15193 = vmatprep.subr.bf16.mxu1 %v21739_v57 }
 0x6a6   : > { %15169 = vmatpush2.bf16.msra.mxu0 %v21734_v2  ;;  %v21806_v2 = vld [vmem:[%s22898_s13 + $0x27c8] ss:$16 sps:$4 sm:$0xff]  }
 0x6a7   : > { %15194 = vmatpush1.bf16.msra.mxu1 %v21737_v56  ;;  %15170 = vmatprep.subr.bf16.mxu0 %v21742_v12  ;;  %v21809_v56 = vld [vmem:[%s22898_s13 + $0x28c8] ss:$16 sps:$4 sm:$0xff]  }
 0x6a8   : > { %15195 = vmatprep.subr.bf16.mxu1 %v21745_v17  ;;  %v21814_v17 = vld [vmem:[%s22898_s13 + $0x27ac] ss:$16 sps:$4 sm:$0xff]  }
 0x6aa   : > { %15171 = vmatpush2.bf16.msra.mxu0 %v21740_v31  ;;  %v21817_v31 = vld [vmem:[%s22898_s13 + $0x28ac] ss:$16 sps:$4 sm:$0xff]  }
 0x6ab   : > { %15196 = vmatpush1.bf16.msra.mxu1 %v21743_v25  ;;  %15172 = vmatprep.subr.bf16.mxu0 %v21748_v37  ;;  %v26027_v25 = vld [vmem:[#allocation10_spill] sm:$0xff] }
 0x6ac   : > { %15197 = vmatprep.subr.bf16.mxu1 %v21751_v60  ;;  %v21812_v60 = vld [vmem:[%s22898_s13 + $0x27a8] ss:$16 sps:$4 sm:$0xff]  }
 0x6ae   : > { %15173 = vmatpush2.bf16.msra.mxu0 %v21746_v11  ;;  %v21815_v11 = vld [vmem:[%s22898_s13 + $0x28a8] ss:$16 sps:$4 sm:$0xff]  }
 0x6af   : > { %15198 = vmatpush1.bf16.msra.mxu1 %v21749_v8  ;;  %15224 = vmatprep.subr.bf16.mxu0 %v21757_v10  ;;  %v21823_v10 = vld [vmem:[%s22898_s13 + $0x288c] ss:$16 sps:$4 sm:$0xff]  }
 0x6b0   : > { %15199 = vmatprep.subr.bf16.mxu1 %v21754_v62  ;;  %v21820_v62 = vld [vmem:[%s22898_s13 + $0x278c] ss:$16 sps:$4 sm:$0xff]  }
 0x6b1   : > { %v14930_v35 = vpop.f32.mrf.mxu0  ;;  %15175 = vmatmul.mubr.bf16.vlgmr.msra.gmra.mxu0 %v23780_v26 }
 0x6b2   : > { %v25233_v33 = vadd.f32 %v14930_v35, %v25193_v24  ;;  %15225 = vmatpush1.bf16.msra.mxu0 %v21755_v5  ;;  %15256 = vmatprep.mubr.bf16.mxu0 %v23802_v14  ;;  %v21773_v14 = vld [vmem:[%s22898_s13 + $0x2688] ss:$16 sps:$4 sm:$0xff]  }
 0x6b3   : > { %15200 = vmatpush2.bf16.msra.mxu1 %v21752_v59  ;;  %v14932_v6 = vpop.f32.mrf.mxu0  ;;  %15226 = vmatprep.subr.bf16.mxu0 %v21763_v55  ;;  %v21779_v24 = vld [vmem:[%s22898_s13 + $0x2668] ss:$16 sps:$4 sm:$0xff]   ;;  %v21829_v55 = vld [vmem:[%s22898_s13 + $0x286c] ss:$16 sps:$4 sm:$0xff]  }
 0x6b4   : > { %15201 = vmatprep.subr.bf16.mxu1 %v21760_v1  ;;  %v25240_v26 = vadd.f32 %v14932_v6, %v25200_v52  ;;  %v21793_v52 = vld [vmem:[%s22898_s13 + $0x262c] ss:$16 sps:$4 sm:$0xff]   ;;  %v21818_v59 = vld [vmem:[%s22898_s13 + $0x2788] ss:$16 sps:$4 sm:$0xff]  }
 0x6b5   : > { %v14934_v40 = vpop.f32.mrf.mxu0  ;;  %v21821_v5 = vld [vmem:[%s22898_s13 + $0x2888] ss:$16 sps:$4 sm:$0xff]   ;;  %v21826_v1 = vld [vmem:[%s22898_s13 + $0x276c] ss:$16 sps:$4 sm:$0xff]  }
 0x6b6   : > { %15227 = vmatpush1.bf16.msra.mxu0 %v21761_v49  ;;  %v21824_v35 = vld [vmem:[%s22898_s13 + $0x2768] ss:$16 sps:$4 sm:$0xff]   ;;  %v21835_v49 = vld [vmem:[%s22898_s13 + $0x284c] ss:$16 sps:$4 sm:$0xff]  }
 0x6b7   : > { %15202 = vmatpush2.bf16.msra.mxu1 %v21758_v38  ;;  %v14935_v23 = vpop.f32.mrf.mxu0  ;;  %15228 = vmatprep.subr.bf16.mxu0 %v21769_v19  ;;  %v21832_v38 = vld [vmem:[%s22898_s13 + $0x274c] ss:$16 sps:$4 sm:$0xff]   ;;  %v21830_v6 = vld [vmem:[%s22898_s13 + $0x2748] ss:$16 sps:$4 sm:$0xff]  }
 0x6b8   : > { %15203 = vmatprep.subr.bf16.mxu1 %v21766_v30  ;;  %v21833_v30 = vld [vmem:[%s22898_s13 + $0x2848] ss:$16 sps:$4 sm:$0xff]   ;;  %v21838_v19 = vld [vmem:[%s22898_s13 + $0x272c] ss:$16 sps:$4 sm:$0xff]  }
 0x6b9   : > { %v21836_v40 = vld [vmem:[%s22898_s13 + $0x2728] ss:$16 sps:$4 sm:$0xff]   ;;  %v21847_v23 = vld [vmem:[%s22898_s13 + $0x280c] ss:$16 sps:$4 sm:$0xff]  }
 0x6ba   : > { %15229 = vmatpush1.bf16.msra.mxu0 %v21767_v36  ;;  %v21844_v36 = vld [vmem:[%s22898_s13 + $0x270c] ss:$16 sps:$4 sm:$0xff]  }
 0x6bb   : > { %15204 = vmatpush2.bf16.msra.mxu1 %v21764_v50  ;;  %15230 = vmatprep.subr.bf16.mxu0 %v21775_v51  ;;  %v21839_v50 = vld [vmem:[%s22898_s13 + $0x2828] ss:$16 sps:$4 sm:$0xff]  }
 0x6bc   : > { %15205 = vmatprep.subr.bf16.mxu1 %v21772_v21  ;;  %v21842_v21 = vld [vmem:[%s22898_s13 + $0x2708] ss:$16 sps:$4 sm:$0xff]  }
 0x6bd   : > { %v21845_v51 = vld [vmem:[%s22898_s13 + $0x2808] ss:$16 sps:$4 sm:$0xff]  }
 0x6be   : > { %15231 = vmatpush1.bf16.msra.mxu0 %v21773_v14  ;;  %v21853_v14 = vld [vmem:[%s22898_s13 + $0x2aec] ss:$16 sps:$4 sm:$0xff]  }
 0x6bf   : > { %15206 = vmatpush2.bf16.msra.mxu1 %v21770_v15  ;;  %15232 = vmatprep.subr.bf16.mxu0 %v21781_v4  ;;  %v21850_v15 = vld [vmem:[%s22898_s13 + $0x29ec] ss:$16 sps:$4 sm:$0xff]   ;;  %v21851_v4 = vld [vmem:[%s22898_s13 + $0x2ae8] ss:$16 sps:$4 sm:$0xff]  }
 0x6c0   : > { %15207 = vmatprep.subr.bf16.mxu1 %v21778_v47  ;;  %v21848_v47 = vld [vmem:[%s22898_s13 + $0x29e8] ss:$16 sps:$4 sm:$0xff]  }
 0x6c2   : > { %15233 = vmatpush1.bf16.msra.mxu0 %v21779_v24  ;;  %v21859_v24 = vld [vmem:[%s22898_s13 + $0x2acc] ss:$16 sps:$4 sm:$0xff]  }
 0x6c3   : > { %15208 = vmatpush2.bf16.msra.mxu1 %v21776_v45  ;;  %15234 = vmatprep.subr.bf16.mxu0 %v21787_v32  ;;  %v21856_v45 = vld [vmem:[%s22898_s13 + $0x29cc] ss:$16 sps:$4 sm:$0xff]  }
 0x6c4   : > { %15209 = vmatprep.subr.bf16.mxu1 %v21784_v0  ;;  %v26028_v32 = vld [vmem:[#allocation9_spill] sm:$0xff] }
 0x6c6   : > { %15235 = vmatpush1.bf16.msra.mxu0 %v21785_v20  ;;  %v21854_v20 = vld [vmem:[%s22898_s13 + $0x29c8] ss:$16 sps:$4 sm:$0xff]  }
 0x6c7   : > { %15210 = vmatpush2.bf16.msra.mxu1 %v21782_v54  ;;  %15236 = vmatprep.subr.bf16.mxu0 %v21793_v52 }
 0x6c8   : > { %15211 = vmatprep.subr.bf16.mxu1 %v21790_v22  ;;  %v21857_v22 = vld [vmem:[%s22898_s13 + $0x2ac8] ss:$16 sps:$4 sm:$0xff]  }
 0x6ca   : > { %15237 = vmatpush1.bf16.msra.mxu0 %v21791_v29  ;;  %v21865_v29 = vld [vmem:[%s22898_s13 + $0x2aac] ss:$16 sps:$4 sm:$0xff]  }
 0x6cb   : > { %15212 = vmatpush2.bf16.msra.mxu1 %v21788_v43  ;;  %15238 = vmatprep.subr.bf16.mxu0 %v21799_v7  ;;  %v21862_v43 = vld [vmem:[%s22898_s13 + $0x29ac] ss:$16 sps:$4 sm:$0xff]  }
 0x6cc   : > { %15213 = vmatprep.subr.bf16.mxu1 %v21796_v53  ;;  %v26029_v7 = vld [vmem:[#allocation11_spill] sm:$0xff] }
 0x6ce   : > { %15239 = vmatpush1.bf16.msra.mxu0 %v21797_v63  ;;  %v21860_v63 = vld [vmem:[%s22898_s13 + $0x29a8] ss:$16 sps:$4 sm:$0xff]  }
 0x6cf   : > { %15214 = vmatpush2.bf16.msra.mxu1 %v21794_v3  ;;  %15240 = vmatprep.subr.bf16.mxu0 %v21802_v18  ;;  %v21863_v18 = vld [vmem:[%s22898_s13 + $0x2aa8] ss:$16 sps:$4 sm:$0xff]  }
 0x6d0   : > { %15265 = vmatprep.subr.bf16.mxu1 %v21805_v13 }
 0x6d2   : > { %v14971_v34 = vpop.f32.mrf.mxu1  ;;  %15216 = vmatmul.mubr.bf16.vlgmr.msra.gmra.mxu1 %v23876_v28  ;;  %15241 = vmatpush2.bf16.msra.mxu0 %v21800_v9  ;;  %v21868_v9 = vld [vmem:[%s22898_s13 + $0x298c] ss:$16 sps:$4 sm:$0xff]  }
 0x6d3   : > { %v25273_v57 = vadd.f32 %v14971_v34, %v25233_v33  ;;  %15266 = vmatpush1.bf16.msra.mxu1 %v21803_v44  ;;  %15242 = vmatprep.subr.bf16.mxu0 %v21808_v48  ;;  %v21827_v33 = vld [vmem:[%s22898_s13 + $0x2868] ss:$16 sps:$4 sm:$0xff]   ;;  %v21871_v44 = vld [vmem:[%s22898_s13 + $0x2a8c] ss:$16 sps:$4 sm:$0xff]  }
 0x6d4   : > { %v14973_v12 = vpop.f32.mrf.mxu1  ;;  %15267 = vmatprep.subr.bf16.mxu1 %v21811_v41  ;;  %15297 = vmatprep.mubr.bf16.mxu1 %v26027_v25  ;;  %v21866_v48 = vld [vmem:[%s22898_s13 + $0x2988] ss:$16 sps:$4 sm:$0xff]   ;;  %v21874_v34 = vld [vmem:[%s22898_s13 + $0x296c] ss:$16 sps:$4 sm:$0xff]  }
 0x6d5   : > { %v25280_v28 = vadd.f32 %v14973_v12, %v25240_v26  ;;  %v21841_v26 = vld [vmem:[%s22898_s13 + $0x282c] ss:$16 sps:$4 sm:$0xff]   ;;  %v21869_v41 = vld [vmem:[%s22898_s13 + $0x2a88] ss:$16 sps:$4 sm:$0xff]  }
 0x6d6   : > { %v14975_v37 = vpop.f32.mrf.mxu1  ;;  %15243 = vmatpush2.bf16.msra.mxu0 %v21806_v2  ;;  %v21872_v2 = vld [vmem:[%s22898_s13 + $0x2968] ss:$16 sps:$4 sm:$0xff]   ;;  %v21880_v12 = vld [vmem:[%s22898_s13 + $0x294c] ss:$16 sps:$4 sm:$0xff]  }
 0x6d7   : > { %15268 = vmatpush1.bf16.msra.mxu1 %v21809_v56  ;;  %15244 = vmatprep.subr.bf16.mxu0 %v21814_v17  ;;  %v21875_v56 = vld [vmem:[%s22898_s13 + $0x2a68] ss:$16 sps:$4 sm:$0xff]   ;;  %v21883_v17 = vld [vmem:[%s22898_s13 + $0x2a4c] ss:$16 sps:$4 sm:$0xff]  }
 0x6d8   : > { %v14976_v8 = vpop.f32.mrf.mxu1  ;;  %15269 = vmatprep.subr.bf16.mxu1 %v21817_v31  ;;  %v21878_v31 = vld [vmem:[%s22898_s13 + $0x2948] ss:$16 sps:$4 sm:$0xff]   ;;  %v21886_v25 = vld [vmem:[%s22898_s13 + $0x292c] ss:$16 sps:$4 sm:$0xff]  }
 0x6d9   : > { %v21889_v37 = vld [vmem:[%s22898_s13 + $0x2a2c] ss:$16 sps:$4 sm:$0xff]  }
 0x6da   : > { %15245 = vmatpush2.bf16.msra.mxu0 %v21812_v60  ;;  %v21884_v60 = vld [vmem:[%s22898_s13 + $0x2928] ss:$16 sps:$4 sm:$0xff]   ;;  %v21892_v8 = vld [vmem:[%s22898_s13 + $0x290c] ss:$16 sps:$4 sm:$0xff]  }
 0x6db   : > { %15270 = vmatpush1.bf16.msra.mxu1 %v21815_v11  ;;  %15246 = vmatprep.subr.bf16.mxu0 %v21820_v62  ;;  %v21887_v11 = vld [vmem:[%s22898_s13 + $0x2a28] ss:$16 sps:$4 sm:$0xff]   ;;  %v21895_v62 = vld [vmem:[%s22898_s13 + $0x2a0c] ss:$16 sps:$4 sm:$0xff]  }
 0x6dc   : > { %15271 = vmatprep.subr.bf16.mxu1 %v21823_v10  ;;  %v21890_v10 = vld [vmem:[%s22898_s13 + $0x2908] ss:$16 sps:$4 sm:$0xff]  }
 0x6de   : > { %15247 = vmatpush2.bf16.msra.mxu0 %v21818_v59  ;;  %v21893_v59 = vld [vmem:[%s22898_s13 + $0x2a08] ss:$16 sps:$4 sm:$0xff]  }
 0x6df   : > { %15272 = vmatpush1.bf16.msra.mxu1 %v21821_v5  ;;  %15248 = vmatprep.subr.bf16.mxu0 %v21826_v1  ;;  %v21898_v5 = vld [vmem:[%s22898_s13 + $0x2bec] ss:$16 sps:$4 sm:$0xff]  }
 0x6e0   : > { %15273 = vmatprep.subr.bf16.mxu1 %v21829_v55  ;;  %v21901_v1 = vld [vmem:[%s22898_s13 + $0x2cec] ss:$16 sps:$4 sm:$0xff]   ;;  %v21896_v55 = vld [vmem:[%s22898_s13 + $0x2be8] ss:$16 sps:$4 sm:$0xff]  }
 0x6e2   : > { %15249 = vmatpush2.bf16.msra.mxu0 %v21824_v35  ;;  %v21899_v35 = vld [vmem:[%s22898_s13 + $0x2ce8] ss:$16 sps:$4 sm:$0xff]  }
 0x6e3   : > { %15274 = vmatpush1.bf16.msra.mxu1 %v21827_v33  ;;  %15250 = vmatprep.subr.bf16.mxu0 %v21832_v38  ;;  %v21904_v33 = vld [vmem:[%s22898_s13 + $0x2bcc] ss:$16 sps:$4 sm:$0xff]  }
 0x6e4   : > { %15275 = vmatprep.subr.bf16.mxu1 %v21835_v49  ;;  %v21907_v38 = vld [vmem:[%s22898_s13 + $0x2ccc] ss:$16 sps:$4 sm:$0xff]  }
 0x6e6   : > { %15251 = vmatpush2.bf16.msra.mxu0 %v21830_v6  ;;  %v26030_v6 = vld [vmem:[#allocation12_spill] sm:$0xff] }
 0x6e7   : > { %15276 = vmatpush1.bf16.msra.mxu1 %v21833_v30  ;;  %15252 = vmatprep.subr.bf16.mxu0 %v21838_v19  ;;  %v21902_v19 = vld [vmem:[%s22898_s13 + $0x2bc8] ss:$16 sps:$4 sm:$0xff]  }
 0x6e8   : > { %15277 = vmatprep.subr.bf16.mxu1 %v21841_v26  ;;  %v21905_v26 = vld [vmem:[%s22898_s13 + $0x2cc8] ss:$16 sps:$4 sm:$0xff]  }
 0x6ea   : > { %15253 = vmatpush2.bf16.msra.mxu0 %v21836_v40 }
 0x6eb   : > { %15278 = vmatpush1.bf16.msra.mxu1 %v21839_v50  ;;  %15254 = vmatprep.subr.bf16.mxu0 %v21844_v36  ;;  %v21910_v50 = vld [vmem:[%s22898_s13 + $0x2bac] ss:$16 sps:$4 sm:$0xff]  }
 0x6ec   : > { %15279 = vmatprep.subr.bf16.mxu1 %v21847_v23  ;;  %v21913_v36 = vld [vmem:[%s22898_s13 + $0x2cac] ss:$16 sps:$4 sm:$0xff]  }
 0x6ee   : > { %15255 = vmatpush2.bf16.msra.mxu0 %v21842_v21  ;;  %v26031_v21 = vld [vmem:[#allocation14_spill] sm:$0xff] }
 0x6ef   : > { %15280 = vmatpush1.bf16.msra.mxu1 %v21845_v51  ;;  %15306 = vmatprep.subr.bf16.mxu0 %v21853_v14  ;;  %v21911_v14 = vld [vmem:[%s22898_s13 + $0x2ca8] ss:$16 sps:$4 sm:$0xff]  }
 0x6f0   : > { %15281 = vmatprep.subr.bf16.mxu1 %v21850_v15  ;;  %v21908_v15 = vld [vmem:[%s22898_s13 + $0x2ba8] ss:$16 sps:$4 sm:$0xff]  }
 0x6f1   : > { %v15012_v0 = vpop.f32.mrf.mxu0  ;;  %15257 = vmatmul.mubr.bf16.vlgmr.msra.gmra.mxu0 %v26028_v32  ;;  %v21922_v32 = vld [vmem:[%s22898_s13 + $0x2b6c] ss:$16 sps:$4 sm:$0xff]  }
 0x6f2   : > { %v25313_v54 = vadd.f32 %v15012_v0, %v25273_v57  ;;  %15307 = vmatpush1.bf16.msra.mxu0 %v21851_v4  ;;  %15338 = vmatprep.mubr.bf16.mxu0 %v26029_v7  ;;  %v21877_v57 = vld [vmem:[%s22898_s13 + $0x2a6c] ss:$16 sps:$4 sm:$0xff]   ;;  %v21917_v0 = vld [vmem:[%s22898_s13 + $0x2c88] ss:$16 sps:$4 sm:$0xff]  }
 0x6f3   : > { %15282 = vmatpush2.bf16.msra.mxu1 %v21848_v47  ;;  %v15014_v52 = vpop.f32.mrf.mxu0  ;;  %15308 = vmatprep.subr.bf16.mxu0 %v21859_v24  ;;  %v21916_v4 = vld [vmem:[%s22898_s13 + $0x2b8c] ss:$16 sps:$4 sm:$0xff]   ;;  %v21914_v24 = vld [vmem:[%s22898_s13 + $0x2b88] ss:$16 sps:$4 sm:$0xff]  }
 0x6f4   : > { %15283 = vmatprep.subr.bf16.mxu1 %v21856_v45  ;;  %v25320_v53 = vadd.f32 %v15014_v52, %v25280_v28  ;;  %v21881_v28 = vld [vmem:[%s22898_s13 + $0x2a48] ss:$16 sps:$4 sm:$0xff]   ;;  %v21919_v45 = vld [vmem:[%s22898_s13 + $0x2c8c] ss:$16 sps:$4 sm:$0xff]  }
 0x6f5   : > { %v15016_v3 = vpop.f32.mrf.mxu0  ;;  %v21928_v52 = vld [vmem:[%s22898_s13 + $0x2b4c] ss:$16 sps:$4 sm:$0xff]  }
 0x6f6   : > { %15309 = vmatpush1.bf16.msra.mxu0 %v21857_v22  ;;  %v21923_v22 = vld [vmem:[%s22898_s13 + $0x2c68] ss:$16 sps:$4 sm:$0xff]   ;;  %v21934_v7 = vld [vmem:[%s22898_s13 + $0x2b2c] ss:$16 sps:$4 sm:$0xff]  }
 0x6f7   : > { %15284 = vmatpush2.bf16.msra.mxu1 %v21854_v20  ;;  %v15017_v13 = vpop.f32.mrf.mxu0  ;;  %15310 = vmatprep.subr.bf16.mxu0 %v21865_v29  ;;  %v21920_v20 = vld [vmem:[%s22898_s13 + $0x2b68] ss:$16 sps:$4 sm:$0xff]   ;;  %v21937_v3 = vld [vmem:[%s22898_s13 + $0x2c2c] ss:$16 sps:$4 sm:$0xff]  }
 0x6f8   : > { %15285 = vmatprep.subr.bf16.mxu1 %v21862_v43  ;;  %v21931_v43 = vld [vmem:[%s22898_s13 + $0x2c4c] ss:$16 sps:$4 sm:$0xff]   ;;  %v21926_v29 = vld [vmem:[%s22898_s13 + $0x2b48] ss:$16 sps:$4 sm:$0xff]  }
 0x6f9   : > { %v21940_v13 = vld [vmem:[%s22898_s13 + $0x2b0c] ss:$16 sps:$4 sm:$0xff]  }
 0x6fa   : > { %15311 = vmatpush1.bf16.msra.mxu0 %v21863_v18  ;;  %v21935_v18 = vld [vmem:[%s22898_s13 + $0x2c28] ss:$16 sps:$4 sm:$0xff]  }
 0x6fb   : > { %15286 = vmatpush2.bf16.msra.mxu1 %v21860_v63  ;;  %15312 = vmatprep.subr.bf16.mxu0 %v21871_v44  ;;  %v21932_v63 = vld [vmem:[%s22898_s13 + $0x2b28] ss:$16 sps:$4 sm:$0xff]  }
 0x6fc   : > { %15287 = vmatprep.subr.bf16.mxu1 %v21868_v9  ;;  %v21943_v9 = vld [vmem:[%s22898_s13 + $0x2c0c] ss:$16 sps:$4 sm:$0xff]   ;;  %v21938_v44 = vld [vmem:[%s22898_s13 + $0x2b08] ss:$16 sps:$4 sm:$0xff]  }
 0x6fe   : > { %15313 = vmatpush1.bf16.msra.mxu0 %v21869_v41  ;;  %v21946_v41 = vld [vmem:[%s22898_s13 + $0x2dec] ss:$16 sps:$4 sm:$0xff]  }
 0x6ff   : > { %15288 = vmatpush2.bf16.msra.mxu1 %v21866_v48  ;;  %15314 = vmatprep.subr.bf16.mxu0 %v21877_v57  ;;  %v21941_v48 = vld [vmem:[%s22898_s13 + $0x2c08] ss:$16 sps:$4 sm:$0xff]  }
 0x700   : > { %15289 = vmatprep.subr.bf16.mxu1 %v21874_v34  ;;  %v21949_v34 = vld [vmem:[%s22898_s13 + $0x2eec] ss:$16 sps:$4 sm:$0xff]   ;;  %v21944_v57 = vld [vmem:[%s22898_s13 + $0x2de8] ss:$16 sps:$4 sm:$0xff]  }
 0x702   : > { %15315 = vmatpush1.bf16.msra.mxu0 %v21875_v56  ;;  %v21952_v56 = vld [vmem:[%s22898_s13 + $0x2dcc] ss:$16 sps:$4 sm:$0xff]  }
 0x703   : > { %15290 = vmatpush2.bf16.msra.mxu1 %v21872_v2  ;;  %15316 = vmatprep.subr.bf16.mxu0 %v21883_v17  ;;  %v21947_v2 = vld [vmem:[%s22898_s13 + $0x2ee8] ss:$16 sps:$4 sm:$0xff]  }
 0x704   : > { %15291 = vmatprep.subr.bf16.mxu1 %v21880_v12  ;;  %v21955_v12 = vld [vmem:[%s22898_s13 + $0x2ecc] ss:$16 sps:$4 sm:$0xff]  }
 0x706   : > { %15317 = vmatpush1.bf16.msra.mxu0 %v21881_v28 }
 0x707   : > { %15292 = vmatpush2.bf16.msra.mxu1 %v21878_v31  ;;  %15318 = vmatprep.subr.bf16.mxu0 %v21889_v37  ;;  %v26032_v31 = vld [vmem:[#allocation13_spill] sm:$0xff] }
 0x708   : > { %15293 = vmatprep.subr.bf16.mxu1 %v21886_v25  ;;  %v21950_v25 = vld [vmem:[%s22898_s13 + $0x2dc8] ss:$16 sps:$4 sm:$0xff]  }
 0x709   : > { %v21953_v37 = vld [vmem:[%s22898_s13 + $0x2ec8] ss:$16 sps:$4 sm:$0xff]  }
 0x70a   : > { %15319 = vmatpush1.bf16.msra.mxu0 %v21887_v11  ;;  %v21958_v11 = vld [vmem:[%s22898_s13 + $0x2dac] ss:$16 sps:$4 sm:$0xff]  }
 0x70b   : > { %15294 = vmatpush2.bf16.msra.mxu1 %v21884_v60  ;;  %15320 = vmatprep.subr.bf16.mxu0 %v21895_v62 }
 0x70c   : > { %15295 = vmatprep.subr.bf16.mxu1 %v21892_v8  ;;  %v21961_v8 = vld [vmem:[%s22898_s13 + $0x2eac] ss:$16 sps:$4 sm:$0xff]  }
 0x70e   : > { %15321 = vmatpush1.bf16.msra.mxu0 %v21893_v59 }
 0x70f   : > { %15296 = vmatpush2.bf16.msra.mxu1 %v21890_v10  ;;  %15322 = vmatprep.subr.bf16.mxu0 %v21898_v5  ;;  %v26033_v10 = vld [vmem:[#allocation15_spill] sm:$0xff] }
 0x710   : > { %15347 = vmatprep.subr.bf16.mxu1 %v21901_v1  ;;  %v21956_v5 = vld [vmem:[%s22898_s13 + $0x2da8] ss:$16 sps:$4 sm:$0xff]  }
 0x711   : > { %v21959_v1 = vld [vmem:[%s22898_s13 + $0x2ea8] ss:$16 sps:$4 sm:$0xff]  }
 0x712   : > { %v15053_v49 = vpop.f32.mrf.mxu1  ;;  %15298 = vmatmul.mubr.bf16.vlgmr.msra.gmra.mxu1 %v26030_v6  ;;  %15323 = vmatpush2.bf16.msra.mxu0 %v21896_v55  ;;  %v21970_v6 = vld [vmem:[%s22898_s13 + $0x2d6c] ss:$16 sps:$4 sm:$0xff]  }
 0x713   : > { %v25353_v30 = vadd.f32 %v15053_v49, %v25313_v54  ;;  %15348 = vmatpush1.bf16.msra.mxu1 %v21899_v35  ;;  %15324 = vmatprep.subr.bf16.mxu0 %v21904_v33  ;;  %v21925_v54 = vld [vmem:[%s22898_s13 + $0x2c6c] ss:$16 sps:$4 sm:$0xff]   ;;  %v21965_v49 = vld [vmem:[%s22898_s13 + $0x2e88] ss:$16 sps:$4 sm:$0xff]  }
 0x714   : > { %v15055_v40 = vpop.f32.mrf.mxu1  ;;  %15349 = vmatprep.subr.bf16.mxu1 %v21907_v38  ;;  %15379 = vmatprep.mubr.bf16.mxu1 %v26031_v21  ;;  %v21964_v35 = vld [vmem:[%s22898_s13 + $0x2d8c] ss:$16 sps:$4 sm:$0xff]   ;;  %v21962_v38 = vld [vmem:[%s22898_s13 + $0x2d88] ss:$16 sps:$4 sm:$0xff]  }
 0x715   : > { %v25360_v23 = vadd.f32 %v15055_v40, %v25320_v53  ;;  %v21929_v53 = vld [vmem:[%s22898_s13 + $0x2c48] ss:$16 sps:$4 sm:$0xff]   ;;  %v21967_v33 = vld [vmem:[%s22898_s13 + $0x2e8c] ss:$16 sps:$4 sm:$0xff]  }
 0x716   : > { %v15057_v51 = vpop.f32.mrf.mxu1  ;;  %15325 = vmatpush2.bf16.msra.mxu0 %v21902_v19  ;;  %v21968_v19 = vld [vmem:[%s22898_s13 + $0x2d68] ss:$16 sps:$4 sm:$0xff]   ;;  %v21976_v40 = vld [vmem:[%s22898_s13 + $0x2d4c] ss:$16 sps:$4 sm:$0xff]  }
 0x717   : > { %15350 = vmatpush1.bf16.msra.mxu1 %v21905_v26  ;;  %15326 = vmatprep.subr.bf16.mxu0 %v21910_v50  ;;  %v21971_v26 = vld [vmem:[%s22898_s13 + $0x2e68] ss:$16 sps:$4 sm:$0xff]   ;;  %v21979_v50 = vld [vmem:[%s22898_s13 + $0x2e4c] ss:$16 sps:$4 sm:$0xff]  }
 0x718   : > { %v15058_v47 = vpop.f32.mrf.mxu1  ;;  %15351 = vmatprep.subr.bf16.mxu1 %v21913_v36  ;;  %v21974_v36 = vld [vmem:[%s22898_s13 + $0x2d48] ss:$16 sps:$4 sm:$0xff]   ;;  %v21982_v21 = vld [vmem:[%s22898_s13 + $0x2d2c] ss:$16 sps:$4 sm:$0xff]  }
 0x719   : > { %v21985_v51 = vld [vmem:[%s22898_s13 + $0x2e2c] ss:$16 sps:$4 sm:$0xff]  }
 0x71a   : > { %15327 = vmatpush2.bf16.msra.mxu0 %v21908_v15  ;;  %v21980_v15 = vld [vmem:[%s22898_s13 + $0x2d28] ss:$16 sps:$4 sm:$0xff]   ;;  %v21988_v47 = vld [vmem:[%s22898_s13 + $0x2d0c] ss:$16 sps:$4 sm:$0xff]  }
 0x71b   : > { %15352 = vmatpush1.bf16.msra.mxu1 %v21911_v14  ;;  %15328 = vmatprep.subr.bf16.mxu0 %v21916_v4  ;;  %v21983_v14 = vld [vmem:[%s22898_s13 + $0x2e28] ss:$16 sps:$4 sm:$0xff]   ;;  %v21991_v4 = vld [vmem:[%s22898_s13 + $0x2e0c] ss:$16 sps:$4 sm:$0xff]  }
 0x71c   : > { %15353 = vmatprep.subr.bf16.mxu1 %v21919_v45  ;;  %v21986_v45 = vld [vmem:[%s22898_s13 + $0x2d08] ss:$16 sps:$4 sm:$0xff]  }
 0x71e   : > { %15329 = vmatpush2.bf16.msra.mxu0 %v21914_v24  ;;  %v21989_v24 = vld [vmem:[%s22898_s13 + $0x2e08] ss:$16 sps:$4 sm:$0xff]  }
 0x71f   : > { %15354 = vmatpush1.bf16.msra.mxu1 %v21917_v0  ;;  %15330 = vmatprep.subr.bf16.mxu0 %v21922_v32  ;;  %v21994_v0 = vld [vmem:[%s22898_s13 + $0x2fec] ss:$16 sps:$4 sm:$0xff]  }
 0x720   : > { %15355 = vmatprep.subr.bf16.mxu1 %v21925_v54  ;;  %v21997_v32 = vld [vmem:[%s22898_s13 + $0x30ec] ss:$16 sps:$4 sm:$0xff]   ;;  %v21992_v54 = vld [vmem:[%s22898_s13 + $0x2fe8] ss:$16 sps:$4 sm:$0xff]  }
 0x722   : > { %15331 = vmatpush2.bf16.msra.mxu0 %v21920_v20  ;;  %v21995_v20 = vld [vmem:[%s22898_s13 + $0x30e8] ss:$16 sps:$4 sm:$0xff]  }
 0x723   : > { %15356 = vmatpush1.bf16.msra.mxu1 %v21923_v22  ;;  %15332 = vmatprep.subr.bf16.mxu0 %v21928_v52  ;;  %v22000_v22 = vld [vmem:[%s22898_s13 + $0x2fcc] ss:$16 sps:$4 sm:$0xff]  }
 0x724   : > { %15357 = vmatprep.subr.bf16.mxu1 %v21931_v43  ;;  %v22003_v52 = vld [vmem:[%s22898_s13 + $0x30cc] ss:$16 sps:$4 sm:$0xff]  }
 0x726   : > { %15333 = vmatpush2.bf16.msra.mxu0 %v21926_v29  ;;  %v26034_v29 = vld [vmem:[#allocation16_spill] sm:$0xff] }
 0x727   : > { %15358 = vmatpush1.bf16.msra.mxu1 %v21929_v53  ;;  %15334 = vmatprep.subr.bf16.mxu0 %v21934_v7  ;;  %v21998_v7 = vld [vmem:[%s22898_s13 + $0x2fc8] ss:$16 sps:$4 sm:$0xff]  }
 0x728   : > { %15359 = vmatprep.subr.bf16.mxu1 %v21937_v3  ;;  %v22001_v3 = vld [vmem:[%s22898_s13 + $0x30c8] ss:$16 sps:$4 sm:$0xff]  }
 0x72a   : > { %15335 = vmatpush2.bf16.msra.mxu0 %v21932_v63 }
 0x72b   : > { %15360 = vmatpush1.bf16.msra.mxu1 %v21935_v18  ;;  %15336 = vmatprep.subr.bf16.mxu0 %v21940_v13  ;;  %v22006_v18 = vld [vmem:[%s22898_s13 + $0x2fac] ss:$16 sps:$4 sm:$0xff]  }
 0x72c   : > { %15361 = vmatprep.subr.bf16.mxu1 %v21943_v9  ;;  %v22009_v13 = vld [vmem:[%s22898_s13 + $0x30ac] ss:$16 sps:$4 sm:$0xff]  }
 0x72e   : > { %15337 = vmatpush2.bf16.msra.mxu0 %v21938_v44  ;;  %v26035_v44 = vld [vmem:[#allocation18_spill] sm:$0xff] }
 0x72f   : > { %15362 = vmatpush1.bf16.msra.mxu1 %v21941_v48  ;;  %15388 = vmatprep.subr.bf16.mxu0 %v21949_v34  ;;  %v22007_v34 = vld [vmem:[%s22898_s13 + $0x30a8] ss:$16 sps:$4 sm:$0xff]  }
 0x730   : > { %15363 = vmatprep.subr.bf16.mxu1 %v21946_v41  ;;  %v22004_v41 = vld [vmem:[%s22898_s13 + $0x2fa8] ss:$16 sps:$4 sm:$0xff]  }
 0x731   : > { %v15094_v17 = vpop.f32.mrf.mxu0  ;;  %15339 = vmatmul.mubr.bf16.vlgmr.msra.gmra.mxu0 %v26032_v31  ;;  %v22018_v31 = vld [vmem:[%s22898_s13 + $0x2f6c] ss:$16 sps:$4 sm:$0xff]  }
 0x732   : > { %v25393_v28 = vadd.f32 %v15094_v17, %v25353_v30  ;;  %15389 = vmatpush1.bf16.msra.mxu0 %v21947_v2  ;;  %15420 = vmatprep.mubr.bf16.mxu0 %v26033_v10  ;;  %v21973_v30 = vld [vmem:[%s22898_s13 + $0x2e6c] ss:$16 sps:$4 sm:$0xff]   ;;  %v22013_v17 = vld [vmem:[%s22898_s13 + $0x3088] ss:$16 sps:$4 sm:$0xff]  }
 0x733   : > { %15364 = vmatpush2.bf16.msra.mxu1 %v21944_v57  ;;  %v15096_v60 = vpop.f32.mrf.mxu0  ;;  %15390 = vmatprep.subr.bf16.mxu0 %v21955_v12  ;;  %v22012_v2 = vld [vmem:[%s22898_s13 + $0x2f8c] ss:$16 sps:$4 sm:$0xff]   ;;  %v22010_v12 = vld [vmem:[%s22898_s13 + $0x2f88] ss:$16 sps:$4 sm:$0xff]  }
 0x734   : > { %15365 = vmatprep.subr.bf16.mxu1 %v21952_v56  ;;  %v25400_v62 = vadd.f32 %v15096_v60, %v25360_v23  ;;  %v21977_v23 = vld [vmem:[%s22898_s13 + $0x2e48] ss:$16 sps:$4 sm:$0xff]   ;;  %v22015_v56 = vld [vmem:[%s22898_s13 + $0x308c] ss:$16 sps:$4 sm:$0xff]  }
 0x735   : > { %v15098_v59 = vpop.f32.mrf.mxu0  ;;  %v22024_v60 = vld [vmem:[%s22898_s13 + $0x2f4c] ss:$16 sps:$4 sm:$0xff]  }
 0x736   : > { %15391 = vmatpush1.bf16.msra.mxu0 %v21953_v37  ;;  %v22019_v37 = vld [vmem:[%s22898_s13 + $0x3068] ss:$16 sps:$4 sm:$0xff]   ;;  %v22030_v10 = vld [vmem:[%s22898_s13 + $0x2f2c] ss:$16 sps:$4 sm:$0xff]  }
 0x737   : > { %15366 = vmatpush2.bf16.msra.mxu1 %v21950_v25  ;;  %v15099_v55 = vpop.f32.mrf.mxu0  ;;  %15392 = vmatprep.subr.bf16.mxu0 %v21961_v8  ;;  %v22016_v25 = vld [vmem:[%s22898_s13 + $0x2f68] ss:$16 sps:$4 sm:$0xff]   ;;  %v22033_v59 = vld [vmem:[%s22898_s13 + $0x302c] ss:$16 sps:$4 sm:$0xff]  }
 0x738   : > { %15367 = vmatprep.subr.bf16.mxu1 %v21958_v11  ;;  %v22027_v11 = vld [vmem:[%s22898_s13 + $0x304c] ss:$16 sps:$4 sm:$0xff]   ;;  %v22022_v8 = vld [vmem:[%s22898_s13 + $0x2f48] ss:$16 sps:$4 sm:$0xff]  }
 0x739   : > { %v22036_v55 = vld [vmem:[%s22898_s13 + $0x2f0c] ss:$16 sps:$4 sm:$0xff]  }
 0x73a   : > { %15393 = vmatpush1.bf16.msra.mxu0 %v21959_v1  ;;  %v22031_v1 = vld [vmem:[%s22898_s13 + $0x3028] ss:$16 sps:$4 sm:$0xff]  }
 0x73b   : > { %15368 = vmatpush2.bf16.msra.mxu1 %v21956_v5  ;;  %15394 = vmatprep.subr.bf16.mxu0 %v21967_v33  ;;  %v22028_v5 = vld [vmem:[%s22898_s13 + $0x2f28] ss:$16 sps:$4 sm:$0xff]  }
 0x73c   : > { %15369 = vmatprep.subr.bf16.mxu1 %v21964_v35  ;;  %v22039_v35 = vld [vmem:[%s22898_s13 + $0x300c] ss:$16 sps:$4 sm:$0xff]   ;;  %v22034_v33 = vld [vmem:[%s22898_s13 + $0x2f08] ss:$16 sps:$4 sm:$0xff]  }
 0x73e   : > { %15395 = vmatpush1.bf16.msra.mxu0 %v21965_v49  ;;  %v22042_v49 = vld [vmem:[%s22898_s13 + $0x31ec] ss:$16 sps:$4 sm:$0xff]  }
 0x73f   : > { %15370 = vmatpush2.bf16.msra.mxu1 %v21962_v38  ;;  %15396 = vmatprep.subr.bf16.mxu0 %v21973_v30  ;;  %v22037_v38 = vld [vmem:[%s22898_s13 + $0x3008] ss:$16 sps:$4 sm:$0xff]  }
 0x740   : > { %15371 = vmatprep.subr.bf16.mxu1 %v21970_v6  ;;  %v22045_v6 = vld [vmem:[%s22898_s13 + $0x32ec] ss:$16 sps:$4 sm:$0xff]   ;;  %v22040_v30 = vld [vmem:[%s22898_s13 + $0x31e8] ss:$16 sps:$4 sm:$0xff]  }
 0x742   : > { %15397 = vmatpush1.bf16.msra.mxu0 %v21971_v26  ;;  %v22048_v26 = vld [vmem:[%s22898_s13 + $0x31cc] ss:$16 sps:$4 sm:$0xff]  }
 0x743   : > { %15372 = vmatpush2.bf16.msra.mxu1 %v21968_v19  ;;  %15398 = vmatprep.subr.bf16.mxu0 %v21979_v50  ;;  %v22043_v19 = vld [vmem:[%s22898_s13 + $0x32e8] ss:$16 sps:$4 sm:$0xff]  }
 0x744   : > { %15373 = vmatprep.subr.bf16.mxu1 %v21976_v40  ;;  %v22051_v40 = vld [vmem:[%s22898_s13 + $0x32cc] ss:$16 sps:$4 sm:$0xff]  }
 0x746   : > { %15399 = vmatpush1.bf16.msra.mxu0 %v21977_v23 }
 0x747   : > { %15374 = vmatpush2.bf16.msra.mxu1 %v21974_v36  ;;  %15400 = vmatprep.subr.bf16.mxu0 %v21985_v51  ;;  %v26036_v36 = vld [vmem:[#allocation17_spill] sm:$0xff] }
 0x748   : > { %15375 = vmatprep.subr.bf16.mxu1 %v21982_v21  ;;  %v22046_v21 = vld [vmem:[%s22898_s13 + $0x31c8] ss:$16 sps:$4 sm:$0xff]  }
 0x749   : > { %v22049_v51 = vld [vmem:[%s22898_s13 + $0x32c8] ss:$16 sps:$4 sm:$0xff]  }
 0x74a   : > { %15401 = vmatpush1.bf16.msra.mxu0 %v21983_v14  ;;  %v22054_v14 = vld [vmem:[%s22898_s13 + $0x31ac] ss:$16 sps:$4 sm:$0xff]  }
 0x74b   : > { %15376 = vmatpush2.bf16.msra.mxu1 %v21980_v15  ;;  %15402 = vmatprep.subr.bf16.mxu0 %v21991_v4 }
 0x74c   : > { %15377 = vmatprep.subr.bf16.mxu1 %v21988_v47  ;;  %v22057_v47 = vld [vmem:[%s22898_s13 + $0x32ac] ss:$16 sps:$4 sm:$0xff]  }
 0x74e   : > { %15403 = vmatpush1.bf16.msra.mxu0 %v21989_v24 }
 0x74f   : > { %15378 = vmatpush2.bf16.msra.mxu1 %v21986_v45  ;;  %15404 = vmatprep.subr.bf16.mxu0 %v21994_v0  ;;  %v26037_v45 = vld [vmem:[#allocation19_spill] sm:$0xff] }
 0x750   : > { %15429 = vmatprep.subr.bf16.mxu1 %v21997_v32  ;;  %v22052_v0 = vld [vmem:[%s22898_s13 + $0x31a8] ss:$16 sps:$4 sm:$0xff]  }
 0x751   : > { %v22055_v32 = vld [vmem:[%s22898_s13 + $0x32a8] ss:$16 sps:$4 sm:$0xff]  }
 0x752   : > { %v15135_v43 = vpop.f32.mrf.mxu1  ;;  %15380 = vmatmul.mubr.bf16.vlgmr.msra.gmra.mxu1 %v26034_v29  ;;  %15405 = vmatpush2.bf16.msra.mxu0 %v21992_v54  ;;  %v22066_v29 = vld [vmem:[%s22898_s13 + $0x316c] ss:$16 sps:$4 sm:$0xff]  }
 0x753   : > { %v25433_v53 = vadd.f32 %v15135_v43, %v25393_v28  ;;  %15430 = vmatpush1.bf16.msra.mxu1 %v21995_v20  ;;  %15406 = vmatprep.subr.bf16.mxu0 %v22000_v22  ;;  %v22021_v28 = vld [vmem:[%s22898_s13 + $0x306c] ss:$16 sps:$4 sm:$0xff]   ;;  %v22061_v43 = vld [vmem:[%s22898_s13 + $0x3288] ss:$16 sps:$4 sm:$0xff]  }
 0x754   : > { %v15137_v63 = vpop.f32.mrf.mxu1  ;;  %15431 = vmatprep.subr.bf16.mxu1 %v22003_v52  ;;  %15461 = vmatprep.mubr.bf16.mxu1 %v26035_v44  ;;  %v22060_v20 = vld [vmem:[%s22898_s13 + $0x318c] ss:$16 sps:$4 sm:$0xff]   ;;  %v22058_v52 = vld [vmem:[%s22898_s13 + $0x3188] ss:$16 sps:$4 sm:$0xff]  }
 0x755   : > { %v25440_v9 = vadd.f32 %v15137_v63, %v25400_v62  ;;  %v22025_v62 = vld [vmem:[%s22898_s13 + $0x3048] ss:$16 sps:$4 sm:$0xff]   ;;  %v22063_v22 = vld [vmem:[%s22898_s13 + $0x328c] ss:$16 sps:$4 sm:$0xff]  }
 0x756   : > { %v15139_v48 = vpop.f32.mrf.mxu1  ;;  %15407 = vmatpush2.bf16.msra.mxu0 %v21998_v7  ;;  %v22064_v7 = vld [vmem:[%s22898_s13 + $0x3168] ss:$16 sps:$4 sm:$0xff]   ;;  %v22072_v63 = vld [vmem:[%s22898_s13 + $0x314c] ss:$16 sps:$4 sm:$0xff]  }
 0x757   : > { %15432 = vmatpush1.bf16.msra.mxu1 %v22001_v3  ;;  %15408 = vmatprep.subr.bf16.mxu0 %v22006_v18  ;;  %v22067_v3 = vld [vmem:[%s22898_s13 + $0x3268] ss:$16 sps:$4 sm:$0xff]   ;;  %v22075_v18 = vld [vmem:[%s22898_s13 + $0x324c] ss:$16 sps:$4 sm:$0xff]  }
 0x758   : > { %v15140_v57 = vpop.f32.mrf.mxu1  ;;  %15433 = vmatprep.subr.bf16.mxu1 %v22009_v13  ;;  %v22070_v13 = vld [vmem:[%s22898_s13 + $0x3148] ss:$16 sps:$4 sm:$0xff]   ;;  %v22078_v44 = vld [vmem:[%s22898_s13 + $0x312c] ss:$16 sps:$4 sm:$0xff]  }
 0x759   : > { %v22081_v48 = vld [vmem:[%s22898_s13 + $0x322c] ss:$16 sps:$4 sm:$0xff]  }
 0x75a   : > { %15409 = vmatpush2.bf16.msra.mxu0 %v22004_v41  ;;  %v22076_v41 = vld [vmem:[%s22898_s13 + $0x3128] ss:$16 sps:$4 sm:$0xff]   ;;  %v22084_v57 = vld [vmem:[%s22898_s13 + $0x310c] ss:$16 sps:$4 sm:$0xff]  }
 0x75b   : > { %15434 = vmatpush1.bf16.msra.mxu1 %v22007_v34  ;;  %15410 = vmatprep.subr.bf16.mxu0 %v22012_v2  ;;  %v22079_v34 = vld [vmem:[%s22898_s13 + $0x3228] ss:$16 sps:$4 sm:$0xff]   ;;  %v22087_v2 = vld [vmem:[%s22898_s13 + $0x320c] ss:$16 sps:$4 sm:$0xff]  }
 0x75c   : > { %15435 = vmatprep.subr.bf16.mxu1 %v22015_v56  ;;  %v22082_v56 = vld [vmem:[%s22898_s13 + $0x3108] ss:$16 sps:$4 sm:$0xff]  }
 0x75e   : > { %15411 = vmatpush2.bf16.msra.mxu0 %v22010_v12  ;;  %v22085_v12 = vld [vmem:[%s22898_s13 + $0x3208] ss:$16 sps:$4 sm:$0xff]  }
 0x75f   : > { %15436 = vmatpush1.bf16.msra.mxu1 %v22013_v17  ;;  %15412 = vmatprep.subr.bf16.mxu0 %v22018_v31  ;;  %v22090_v17 = vld [vmem:[%s22898_s13 + $0x33ec] ss:$16 sps:$4 sm:$0xff]  }
 0x760   : > { %15437 = vmatprep.subr.bf16.mxu1 %v22021_v28  ;;  %v22093_v31 = vld [vmem:[%s22898_s13 + $0x34ec] ss:$16 sps:$4 sm:$0xff]   ;;  %v22088_v28 = vld [vmem:[%s22898_s13 + $0x33e8] ss:$16 sps:$4 sm:$0xff]  }
 0x762   : > { %15413 = vmatpush2.bf16.msra.mxu0 %v22016_v25  ;;  %v22091_v25 = vld [vmem:[%s22898_s13 + $0x34e8] ss:$16 sps:$4 sm:$0xff]  }
 0x763   : > { %15438 = vmatpush1.bf16.msra.mxu1 %v22019_v37  ;;  %15414 = vmatprep.subr.bf16.mxu0 %v22024_v60  ;;  %v22096_v37 = vld [vmem:[%s22898_s13 + $0x33cc] ss:$16 sps:$4 sm:$0xff]  }
 0x764   : > { %15439 = vmatprep.subr.bf16.mxu1 %v22027_v11  ;;  %v22099_v60 = vld [vmem:[%s22898_s13 + $0x34cc] ss:$16 sps:$4 sm:$0xff]  }
 0x766   : > { %15415 = vmatpush2.bf16.msra.mxu0 %v22022_v8  ;;  %v26038_v8 = vld [vmem:[#allocation20_spill] sm:$0xff] }
 0x767   : > { %15440 = vmatpush1.bf16.msra.mxu1 %v22025_v62  ;;  %15416 = vmatprep.subr.bf16.mxu0 %v22030_v10  ;;  %v22094_v10 = vld [vmem:[%s22898_s13 + $0x33c8] ss:$16 sps:$4 sm:$0xff]  }
 0x768   : > { %15441 = vmatprep.subr.bf16.mxu1 %v22033_v59  ;;  %v22097_v59 = vld [vmem:[%s22898_s13 + $0x34c8] ss:$16 sps:$4 sm:$0xff]  }
 0x76a   : > { %15417 = vmatpush2.bf16.msra.mxu0 %v22028_v5 }
 0x76b   : > { %15442 = vmatpush1.bf16.msra.mxu1 %v22031_v1  ;;  %15418 = vmatprep.subr.bf16.mxu0 %v22036_v55  ;;  %v22102_v1 = vld [vmem:[%s22898_s13 + $0x33ac] ss:$16 sps:$4 sm:$0xff]  }
 0x76c   : > { %15443 = vmatprep.subr.bf16.mxu1 %v22039_v35  ;;  %v22105_v55 = vld [vmem:[%s22898_s13 + $0x34ac] ss:$16 sps:$4 sm:$0xff]  }
 0x76e   : > { %15419 = vmatpush2.bf16.msra.mxu0 %v22034_v33  ;;  %v26039_v33 = vld [vmem:[#allocation22_spill] sm:$0xff] }
 0x76f   : > { %15444 = vmatpush1.bf16.msra.mxu1 %v22037_v38  ;;  %15470 = vmatprep.subr.bf16.mxu0 %v22045_v6  ;;  %v22103_v6 = vld [vmem:[%s22898_s13 + $0x34a8] ss:$16 sps:$4 sm:$0xff]  }
 0x770   : > { %15445 = vmatprep.subr.bf16.mxu1 %v22042_v49  ;;  %v22100_v49 = vld [vmem:[%s22898_s13 + $0x33a8] ss:$16 sps:$4 sm:$0xff]  }
 0x771   : > { %v15176_v50 = vpop.f32.mrf.mxu0  ;;  %15421 = vmatmul.mubr.bf16.vlgmr.msra.gmra.mxu0 %v26036_v36  ;;  %v22114_v36 = vld [vmem:[%s22898_s13 + $0x336c] ss:$16 sps:$4 sm:$0xff]  }
 0x772   : > { %v25473_v23 = vadd.f32 %v15176_v50, %v25433_v53  ;;  %15471 = vmatpush1.bf16.msra.mxu0 %v22043_v19  ;;  %15502 = vmatprep.mubr.bf16.mxu0 %v26037_v45  ;;  %v22069_v53 = vld [vmem:[%s22898_s13 + $0x326c] ss:$16 sps:$4 sm:$0xff]   ;;  %v22109_v50 = vld [vmem:[%s22898_s13 + $0x3488] ss:$16 sps:$4 sm:$0xff]  }
 0x773   : > { %15446 = vmatpush2.bf16.msra.mxu1 %v22040_v30  ;;  %v15178_v15 = vpop.f32.mrf.mxu0  ;;  %15472 = vmatprep.subr.bf16.mxu0 %v22051_v40  ;;  %v22108_v19 = vld [vmem:[%s22898_s13 + $0x338c] ss:$16 sps:$4 sm:$0xff]   ;;  %v22106_v40 = vld [vmem:[%s22898_s13 + $0x3388] ss:$16 sps:$4 sm:$0xff]  }
 0x774   : > { %15447 = vmatprep.subr.bf16.mxu1 %v22048_v26  ;;  %v25480_v4 = vadd.f32 %v15178_v15, %v25440_v9  ;;  %v22073_v9 = vld [vmem:[%s22898_s13 + $0x3248] ss:$16 sps:$4 sm:$0xff]   ;;  %v22111_v26 = vld [vmem:[%s22898_s13 + $0x348c] ss:$16 sps:$4 sm:$0xff]  }
 0x775   : > { %v15180_v24 = vpop.f32.mrf.mxu0  ;;  %v22120_v15 = vld [vmem:[%s22898_s13 + $0x334c] ss:$16 sps:$4 sm:$0xff]  }
 0x776   : > { %15473 = vmatpush1.bf16.msra.mxu0 %v22049_v51  ;;  %v22115_v51 = vld [vmem:[%s22898_s13 + $0x3468] ss:$16 sps:$4 sm:$0xff]   ;;  %v22126_v45 = vld [vmem:[%s22898_s13 + $0x332c] ss:$16 sps:$4 sm:$0xff]  }
 0x777   : > { %15448 = vmatpush2.bf16.msra.mxu1 %v22046_v21  ;;  %v15181_v54 = vpop.f32.mrf.mxu0  ;;  %15474 = vmatprep.subr.bf16.mxu0 %v22057_v47  ;;  %v22112_v21 = vld [vmem:[%s22898_s13 + $0x3368] ss:$16 sps:$4 sm:$0xff]   ;;  %v22129_v24 = vld [vmem:[%s22898_s13 + $0x342c] ss:$16 sps:$4 sm:$0xff]  }
 0x778   : > { %15449 = vmatprep.subr.bf16.mxu1 %v22054_v14  ;;  %v22123_v14 = vld [vmem:[%s22898_s13 + $0x344c] ss:$16 sps:$4 sm:$0xff]   ;;  %v22118_v47 = vld [vmem:[%s22898_s13 + $0x3348] ss:$16 sps:$4 sm:$0xff]  }
 0x779   : > { %v22132_v54 = vld [vmem:[%s22898_s13 + $0x330c] ss:$16 sps:$4 sm:$0xff]  }
 0x77a   : > { %15475 = vmatpush1.bf16.msra.mxu0 %v22055_v32  ;;  %v22127_v32 = vld [vmem:[%s22898_s13 + $0x3428] ss:$16 sps:$4 sm:$0xff]  }
 0x77b   : > { %15450 = vmatpush2.bf16.msra.mxu1 %v22052_v0  ;;  %15476 = vmatprep.subr.bf16.mxu0 %v22063_v22  ;;  %v22124_v0 = vld [vmem:[%s22898_s13 + $0x3328] ss:$16 sps:$4 sm:$0xff]  }
 0x77c   : > { %15451 = vmatprep.subr.bf16.mxu1 %v22060_v20  ;;  %v22135_v20 = vld [vmem:[%s22898_s13 + $0x340c] ss:$16 sps:$4 sm:$0xff]   ;;  %v22130_v22 = vld [vmem:[%s22898_s13 + $0x3308] ss:$16 sps:$4 sm:$0xff]  }
 0x77e   : > { %15477 = vmatpush1.bf16.msra.mxu0 %v22061_v43  ;;  %v22138_v43 = vld [vmem:[%s22898_s13 + $0x35ec] ss:$16 sps:$4 sm:$0xff]  }
 0x77f   : > { %15452 = vmatpush2.bf16.msra.mxu1 %v22058_v52  ;;  %15478 = vmatprep.subr.bf16.mxu0 %v22069_v53  ;;  %v22133_v52 = vld [vmem:[%s22898_s13 + $0x3408] ss:$16 sps:$4 sm:$0xff]  }
 0x780   : > { %15453 = vmatprep.subr.bf16.mxu1 %v22066_v29  ;;  %v22141_v29 = vld [vmem:[%s22898_s13 + $0x36ec] ss:$16 sps:$4 sm:$0xff]   ;;  %v22136_v53 = vld [vmem:[%s22898_s13 + $0x35e8] ss:$16 sps:$4 sm:$0xff]  }
 0x782   : > { %15479 = vmatpush1.bf16.msra.mxu0 %v22067_v3  ;;  %v22144_v3 = vld [vmem:[%s22898_s13 + $0x35cc] ss:$16 sps:$4 sm:$0xff]  }
 0x783   : > { %15454 = vmatpush2.bf16.msra.mxu1 %v22064_v7  ;;  %15480 = vmatprep.subr.bf16.mxu0 %v22075_v18  ;;  %v22139_v7 = vld [vmem:[%s22898_s13 + $0x36e8] ss:$16 sps:$4 sm:$0xff]  }
 0x784   : > { %15455 = vmatprep.subr.bf16.mxu1 %v22072_v63  ;;  %v22147_v63 = vld [vmem:[%s22898_s13 + $0x36cc] ss:$16 sps:$4 sm:$0xff]  }
 0x786   : > { %15481 = vmatpush1.bf16.msra.mxu0 %v22073_v9 }
 0x787   : > { %15456 = vmatpush2.bf16.msra.mxu1 %v22070_v13  ;;  %15482 = vmatprep.subr.bf16.mxu0 %v22081_v48  ;;  %v26040_v13 = vld [vmem:[#allocation21_spill] sm:$0xff] }
 0x788   : > { %15457 = vmatprep.subr.bf16.mxu1 %v22078_v44  ;;  %v22142_v44 = vld [vmem:[%s22898_s13 + $0x35c8] ss:$16 sps:$4 sm:$0xff]  }
 0x789   : > { %v22145_v48 = vld [vmem:[%s22898_s13 + $0x36c8] ss:$16 sps:$4 sm:$0xff]  }
 0x78a   : > { %15483 = vmatpush1.bf16.msra.mxu0 %v22079_v34  ;;  %v22150_v34 = vld [vmem:[%s22898_s13 + $0x35ac] ss:$16 sps:$4 sm:$0xff]  }
 0x78b   : > { %15458 = vmatpush2.bf16.msra.mxu1 %v22076_v41  ;;  %15484 = vmatprep.subr.bf16.mxu0 %v22087_v2 }
 0x78c   : > { %15459 = vmatprep.subr.bf16.mxu1 %v22084_v57  ;;  %v22153_v57 = vld [vmem:[%s22898_s13 + $0x36ac] ss:$16 sps:$4 sm:$0xff]  }
 0x78e   : > { %15485 = vmatpush1.bf16.msra.mxu0 %v22085_v12 }
 0x78f   : > { %15460 = vmatpush2.bf16.msra.mxu1 %v22082_v56  ;;  %15486 = vmatprep.subr.bf16.mxu0 %v22090_v17  ;;  %v26041_v56 = vld [vmem:[#allocation23_spill] sm:$0xff] }
 0x790   : > { %15511 = vmatprep.subr.bf16.mxu1 %v22093_v31  ;;  %v22148_v17 = vld [vmem:[%s22898_s13 + $0x35a8] ss:$16 sps:$4 sm:$0xff]  }
 0x791   : > { %v22151_v31 = vld [vmem:[%s22898_s13 + $0x36a8] ss:$16 sps:$4 sm:$0xff]  }
 0x792   : > { %v15217_v11 = vpop.f32.mrf.mxu1  ;;  %15462 = vmatmul.mubr.bf16.vlgmr.msra.gmra.mxu1 %v26038_v8  ;;  %15487 = vmatpush2.bf16.msra.mxu0 %v22088_v28  ;;  %v22162_v8 = vld [vmem:[%s22898_s13 + $0x356c] ss:$16 sps:$4 sm:$0xff]  }
 0x793   : > { %v25513_v62 = vadd.f32 %v15217_v11, %v25473_v23  ;;  %15512 = vmatpush1.bf16.msra.mxu1 %v22091_v25  ;;  %15488 = vmatprep.subr.bf16.mxu0 %v22096_v37  ;;  %v22117_v23 = vld [vmem:[%s22898_s13 + $0x346c] ss:$16 sps:$4 sm:$0xff]   ;;  %v22157_v11 = vld [vmem:[%s22898_s13 + $0x3688] ss:$16 sps:$4 sm:$0xff]  }
 0x794   : > { %v15219_v5 = vpop.f32.mrf.mxu1  ;;  %15513 = vmatprep.subr.bf16.mxu1 %v22099_v60  ;;  %15543 = vmatprep.mubr.bf16.mxu1 %v26039_v33  ;;  %v22156_v25 = vld [vmem:[%s22898_s13 + $0x358c] ss:$16 sps:$4 sm:$0xff]   ;;  %v22154_v60 = vld [vmem:[%s22898_s13 + $0x3588] ss:$16 sps:$4 sm:$0xff]  }
 0x795   : > { %v25520_v35 = vadd.f32 %v15219_v5, %v25480_v4  ;;  %v22121_v4 = vld [vmem:[%s22898_s13 + $0x3448] ss:$16 sps:$4 sm:$0xff]   ;;  %v22159_v37 = vld [vmem:[%s22898_s13 + $0x368c] ss:$16 sps:$4 sm:$0xff]  }
 0x796   : > { %v15221_v38 = vpop.f32.mrf.mxu1  ;;  %15489 = vmatpush2.bf16.msra.mxu0 %v22094_v10  ;;  %v22160_v10 = vld [vmem:[%s22898_s13 + $0x3568] ss:$16 sps:$4 sm:$0xff]   ;;  %v22168_v5 = vld [vmem:[%s22898_s13 + $0x354c] ss:$16 sps:$4 sm:$0xff]  }
 0x797   : > { %15514 = vmatpush1.bf16.msra.mxu1 %v22097_v59  ;;  %15490 = vmatprep.subr.bf16.mxu0 %v22102_v1  ;;  %v22163_v59 = vld [vmem:[%s22898_s13 + $0x3668] ss:$16 sps:$4 sm:$0xff]   ;;  %v22171_v1 = vld [vmem:[%s22898_s13 + $0x364c] ss:$16 sps:$4 sm:$0xff]  }
 0x798   : > { %v15222_v30 = vpop.f32.mrf.mxu1  ;;  %15515 = vmatprep.subr.bf16.mxu1 %v22105_v55  ;;  %v22166_v55 = vld [vmem:[%s22898_s13 + $0x3548] ss:$16 sps:$4 sm:$0xff]   ;;  %v22174_v33 = vld [vmem:[%s22898_s13 + $0x352c] ss:$16 sps:$4 sm:$0xff]  }
 0x799   : > { %v22177_v38 = vld [vmem:[%s22898_s13 + $0x362c] ss:$16 sps:$4 sm:$0xff]  }
 0x79a   : > { %15491 = vmatpush2.bf16.msra.mxu0 %v22100_v49  ;;  %v22172_v49 = vld [vmem:[%s22898_s13 + $0x3528] ss:$16 sps:$4 sm:$0xff]   ;;  %v22180_v30 = vld [vmem:[%s22898_s13 + $0x350c] ss:$16 sps:$4 sm:$0xff]  }
 0x79b   : > { %15516 = vmatpush1.bf16.msra.mxu1 %v22103_v6  ;;  %15492 = vmatprep.subr.bf16.mxu0 %v22108_v19  ;;  %v22175_v6 = vld [vmem:[%s22898_s13 + $0x3628] ss:$16 sps:$4 sm:$0xff]   ;;  %v22183_v19 = vld [vmem:[%s22898_s13 + $0x360c] ss:$16 sps:$4 sm:$0xff]  }
 0x79c   : > { %15517 = vmatprep.subr.bf16.mxu1 %v22111_v26  ;;  %v22178_v26 = vld [vmem:[%s22898_s13 + $0x3508] ss:$16 sps:$4 sm:$0xff]  }
 0x79e   : > { %15493 = vmatpush2.bf16.msra.mxu0 %v22106_v40  ;;  %v22181_v40 = vld [vmem:[%s22898_s13 + $0x3608] ss:$16 sps:$4 sm:$0xff]  }
 0x79f   : > { %15518 = vmatpush1.bf16.msra.mxu1 %v22109_v50  ;;  %15494 = vmatprep.subr.bf16.mxu0 %v22114_v36  ;;  %v22186_v50 = vld [vmem:[%s22898_s13 + $0x37ec] ss:$16 sps:$4 sm:$0xff]  }
 0x7a0   : > { %15519 = vmatprep.subr.bf16.mxu1 %v22117_v23  ;;  %v22189_v36 = vld [vmem:[%s22898_s13 + $0x38ec] ss:$16 sps:$4 sm:$0xff]   ;;  %v22184_v23 = vld [vmem:[%s22898_s13 + $0x37e8] ss:$16 sps:$4 sm:$0xff]  }
 0x7a2   : > { %15495 = vmatpush2.bf16.msra.mxu0 %v22112_v21  ;;  %v22187_v21 = vld [vmem:[%s22898_s13 + $0x38e8] ss:$16 sps:$4 sm:$0xff]  }
 0x7a3   : > { %15520 = vmatpush1.bf16.msra.mxu1 %v22115_v51  ;;  %15496 = vmatprep.subr.bf16.mxu0 %v22120_v15  ;;  %v22192_v51 = vld [vmem:[%s22898_s13 + $0x37cc] ss:$16 sps:$4 sm:$0xff]  }
 0x7a4   : > { %15521 = vmatprep.subr.bf16.mxu1 %v22123_v14  ;;  %v22195_v15 = vld [vmem:[%s22898_s13 + $0x38cc] ss:$16 sps:$4 sm:$0xff]  }
 0x7a6   : > { %15497 = vmatpush2.bf16.msra.mxu0 %v22118_v47  ;;  %v26042_v47 = vld [vmem:[#allocation24_spill] sm:$0xff] }
 0x7a7   : > { %15522 = vmatpush1.bf16.msra.mxu1 %v22121_v4  ;;  %15498 = vmatprep.subr.bf16.mxu0 %v22126_v45  ;;  %v22190_v45 = vld [vmem:[%s22898_s13 + $0x37c8] ss:$16 sps:$4 sm:$0xff]  }
 0x7a8   : > { %15523 = vmatprep.subr.bf16.mxu1 %v22129_v24  ;;  %v22193_v24 = vld [vmem:[%s22898_s13 + $0x38c8] ss:$16 sps:$4 sm:$0xff]  }
 0x7aa   : > { %15499 = vmatpush2.bf16.msra.mxu0 %v22124_v0 }
 0x7ab   : > { %15524 = vmatpush1.bf16.msra.mxu1 %v22127_v32  ;;  %15500 = vmatprep.subr.bf16.mxu0 %v22132_v54  ;;  %v22198_v32 = vld [vmem:[%s22898_s13 + $0x37ac] ss:$16 sps:$4 sm:$0xff]  }
 0x7ac   : > { %15525 = vmatprep.subr.bf16.mxu1 %v22135_v20  ;;  %v22201_v54 = vld [vmem:[%s22898_s13 + $0x38ac] ss:$16 sps:$4 sm:$0xff]  }
 0x7ae   : > { %15501 = vmatpush2.bf16.msra.mxu0 %v22130_v22  ;;  %v26043_v22 = vld [vmem:[#allocation26_spill] sm:$0xff] }
 0x7af   : > { %15526 = vmatpush1.bf16.msra.mxu1 %v22133_v52  ;;  %15552 = vmatprep.subr.bf16.mxu0 %v22141_v29  ;;  %v22199_v29 = vld [vmem:[%s22898_s13 + $0x38a8] ss:$16 sps:$4 sm:$0xff]  }
 0x7b0   : > { %15527 = vmatprep.subr.bf16.mxu1 %v22138_v43  ;;  %v22196_v43 = vld [vmem:[%s22898_s13 + $0x37a8] ss:$16 sps:$4 sm:$0xff]  }
 0x7b1   : > { %v15258_v18 = vpop.f32.mrf.mxu0  ;;  %15503 = vmatmul.mubr.bf16.vlgmr.msra.gmra.mxu0 %v26040_v13  ;;  %v22210_v13 = vld [vmem:[%s22898_s13 + $0x376c] ss:$16 sps:$4 sm:$0xff]  }
 0x7b2   : > { %v25553_v9 = vadd.f32 %v15258_v18, %v25513_v62  ;;  %15553 = vmatpush1.bf16.msra.mxu0 %v22139_v7  ;;  %15584 = vmatprep.mubr.bf16.mxu0 %v26041_v56  ;;  %v22165_v62 = vld [vmem:[%s22898_s13 + $0x366c] ss:$16 sps:$4 sm:$0xff]   ;;  %v22205_v18 = vld [vmem:[%s22898_s13 + $0x3888] ss:$16 sps:$4 sm:$0xff]  }
 0x7b3   : > { %15528 = vmatpush2.bf16.msra.mxu1 %v22136_v53  ;;  %v15260_v41 = vpop.f32.mrf.mxu0  ;;  %15554 = vmatprep.subr.bf16.mxu0 %v22147_v63  ;;  %v22204_v7 = vld [vmem:[%s22898_s13 + $0x378c] ss:$16 sps:$4 sm:$0xff]   ;;  %v22202_v63 = vld [vmem:[%s22898_s13 + $0x3788] ss:$16 sps:$4 sm:$0xff]  }
 0x7b4   : > { %15529 = vmatprep.subr.bf16.mxu1 %v22144_v3  ;;  %v25560_v2 = vadd.f32 %v15260_v41, %v25520_v35  ;;  %v22169_v35 = vld [vmem:[%s22898_s13 + $0x3648] ss:$16 sps:$4 sm:$0xff]   ;;  %v22207_v3 = vld [vmem:[%s22898_s13 + $0x388c] ss:$16 sps:$4 sm:$0xff]  }
 0x7b5   : > { %v15262_v12 = vpop.f32.mrf.mxu0  ;;  %v22216_v41 = vld [vmem:[%s22898_s13 + $0x374c] ss:$16 sps:$4 sm:$0xff]  }
 0x7b6   : > { %15555 = vmatpush1.bf16.msra.mxu0 %v22145_v48  ;;  %v22211_v48 = vld [vmem:[%s22898_s13 + $0x3868] ss:$16 sps:$4 sm:$0xff]   ;;  %v22222_v56 = vld [vmem:[%s22898_s13 + $0x372c] ss:$16 sps:$4 sm:$0xff]  }
 0x7b7   : > { %15530 = vmatpush2.bf16.msra.mxu1 %v22142_v44  ;;  %v15263_v28 = vpop.f32.mrf.mxu0  ;;  %15556 = vmatprep.subr.bf16.mxu0 %v22153_v57  ;;  %v22208_v44 = vld [vmem:[%s22898_s13 + $0x3768] ss:$16 sps:$4 sm:$0xff]   ;;  %v22225_v12 = vld [vmem:[%s22898_s13 + $0x382c] ss:$16 sps:$4 sm:$0xff]  }
 0x7b8   : > { %15531 = vmatprep.subr.bf16.mxu1 %v22150_v34  ;;  %v22219_v34 = vld [vmem:[%s22898_s13 + $0x384c] ss:$16 sps:$4 sm:$0xff]   ;;  %v22214_v57 = vld [vmem:[%s22898_s13 + $0x3748] ss:$16 sps:$4 sm:$0xff]  }
 0x7b9   : > { %v22228_v28 = vld [vmem:[%s22898_s13 + $0x370c] ss:$16 sps:$4 sm:$0xff]  }
 0x7ba   : > { %15557 = vmatpush1.bf16.msra.mxu0 %v22151_v31  ;;  %v22223_v31 = vld [vmem:[%s22898_s13 + $0x3828] ss:$16 sps:$4 sm:$0xff]  }
 0x7bb   : > { %15532 = vmatpush2.bf16.msra.mxu1 %v22148_v17  ;;  %15558 = vmatprep.subr.bf16.mxu0 %v22159_v37  ;;  %v22220_v17 = vld [vmem:[%s22898_s13 + $0x3728] ss:$16 sps:$4 sm:$0xff]  }
 0x7bc   : > { %15533 = vmatprep.subr.bf16.mxu1 %v22156_v25  ;;  %v22231_v25 = vld [vmem:[%s22898_s13 + $0x380c] ss:$16 sps:$4 sm:$0xff]   ;;  %v22226_v37 = vld [vmem:[%s22898_s13 + $0x3708] ss:$16 sps:$4 sm:$0xff]  }
 0x7be   : > { %15559 = vmatpush1.bf16.msra.mxu0 %v22157_v11  ;;  %v22234_v11 = vld [vmem:[%s22898_s13 + $0x39ec] ss:$16 sps:$4 sm:$0xff]  }
 0x7bf   : > { %15534 = vmatpush2.bf16.msra.mxu1 %v22154_v60  ;;  %15560 = vmatprep.subr.bf16.mxu0 %v22165_v62  ;;  %v22229_v60 = vld [vmem:[%s22898_s13 + $0x3808] ss:$16 sps:$4 sm:$0xff]  }
 0x7c0   : > { %15535 = vmatprep.subr.bf16.mxu1 %v22162_v8  ;;  %v22237_v8 = vld [vmem:[%s22898_s13 + $0x3aec] ss:$16 sps:$4 sm:$0xff]   ;;  %v22232_v62 = vld [vmem:[%s22898_s13 + $0x39e8] ss:$16 sps:$4 sm:$0xff]  }
 0x7c2   : > { %15561 = vmatpush1.bf16.msra.mxu0 %v22163_v59  ;;  %v22240_v59 = vld [vmem:[%s22898_s13 + $0x39cc] ss:$16 sps:$4 sm:$0xff]  }
 0x7c3   : > { %15536 = vmatpush2.bf16.msra.mxu1 %v22160_v10  ;;  %15562 = vmatprep.subr.bf16.mxu0 %v22171_v1  ;;  %v22235_v10 = vld [vmem:[%s22898_s13 + $0x3ae8] ss:$16 sps:$4 sm:$0xff]  }
 0x7c4   : > { %15537 = vmatprep.subr.bf16.mxu1 %v22168_v5  ;;  %v22243_v5 = vld [vmem:[%s22898_s13 + $0x3acc] ss:$16 sps:$4 sm:$0xff]   ;;  %v22238_v1 = vld [vmem:[%s22898_s13 + $0x39c8] ss:$16 sps:$4 sm:$0xff]  }
 0x7c6   : > { %15563 = vmatpush1.bf16.msra.mxu0 %v22169_v35 }
 0x7c7   : > { %15538 = vmatpush2.bf16.msra.mxu1 %v22166_v55  ;;  %15564 = vmatprep.subr.bf16.mxu0 %v22177_v38  ;;  %v22241_v55 = vld [vmem:[%s22898_s13 + $0x3ac8] ss:$16 sps:$4 sm:$0xff]   ;;  %v22246_v38 = vld [vmem:[%s22898_s13 + $0x39ac] ss:$16 sps:$4 sm:$0xff]  }
 0x7c8   : > { %15539 = vmatprep.subr.bf16.mxu1 %v22174_v33  ;;  %v26044_v33 = vld [vmem:[#allocation25_spill] sm:$0xff] }
 0x7ca   : > { %15565 = vmatpush1.bf16.msra.mxu0 %v22175_v6 }
 0x7cb   : > { %15540 = vmatpush2.bf16.msra.mxu1 %v22172_v49  ;;  %15566 = vmatprep.subr.bf16.mxu0 %v22183_v19 }
 0x7cc   : > { %15541 = vmatprep.subr.bf16.mxu1 %v22180_v30  ;;  %v22249_v30 = vld [vmem:[%s22898_s13 + $0x3aac] ss:$16 sps:$4 sm:$0xff]  }
 0x7ce   : > { %15567 = vmatpush1.bf16.msra.mxu0 %v22181_v40  ;;  %v22247_v40 = vld [vmem:[%s22898_s13 + $0x3aa8] ss:$16 sps:$4 sm:$0xff]  }
 0x7cf   : > { %15542 = vmatpush2.bf16.msra.mxu1 %v22178_v26  ;;  %15568 = vmatprep.subr.bf16.mxu0 %v22186_v50  ;;  %v22244_v26 = vld [vmem:[%s22898_s13 + $0x39a8] ss:$16 sps:$4 sm:$0xff]  }
 0x7d0   : > { %15593 = vmatprep.subr.bf16.mxu1 %v22189_v36  ;;  %v26045_v50 = vld [vmem:[#allocation27_spill] sm:$0xff] }
 0x7d2   : > { %v15299_v14 = vpop.f32.mrf.mxu1  ;;  %15544 = vmatmul.mubr.bf16.vlgmr.msra.gmra.mxu1 %v26042_v47  ;;  %15569 = vmatpush2.bf16.msra.mxu0 %v22184_v23  ;;  %v22258_v47 = vld [vmem:[%s22898_s13 + $0x396c] ss:$16 sps:$4 sm:$0xff]  }
 0x7d3   : > { %v25593_v4 = vadd.f32 %v15299_v14, %v25553_v9  ;;  %15594 = vmatpush1.bf16.msra.mxu1 %v22187_v21  ;;  %15570 = vmatprep.subr.bf16.mxu0 %v22192_v51  ;;  %v22213_v9 = vld [vmem:[%s22898_s13 + $0x386c] ss:$16 sps:$4 sm:$0xff]   ;;  %v22253_v14 = vld [vmem:[%s22898_s13 + $0x3a88] ss:$16 sps:$4 sm:$0xff]  }
 0x7d4   : > { %v15301_v0 = vpop.f32.mrf.mxu1  ;;  %15595 = vmatprep.subr.bf16.mxu1 %v22195_v15  ;;  %15625 = vmatprep.mubr.bf16.mxu1 %v26043_v22  ;;  %v22252_v21 = vld [vmem:[%s22898_s13 + $0x398c] ss:$16 sps:$4 sm:$0xff]   ;;  %v22250_v15 = vld [vmem:[%s22898_s13 + $0x3988] ss:$16 sps:$4 sm:$0xff]  }
 0x7d5   : > { %v25600_v20 = vadd.f32 %v15301_v0, %v25560_v2  ;;  %v22217_v2 = vld [vmem:[%s22898_s13 + $0x3848] ss:$16 sps:$4 sm:$0xff]   ;;  %v22255_v51 = vld [vmem:[%s22898_s13 + $0x3a8c] ss:$16 sps:$4 sm:$0xff]  }
 0x7d6   : > { %v15303_v52 = vpop.f32.mrf.mxu1  ;;  %15571 = vmatpush2.bf16.msra.mxu0 %v22190_v45  ;;  %v22256_v45 = vld [vmem:[%s22898_s13 + $0x3968] ss:$16 sps:$4 sm:$0xff]   ;;  %v22264_v0 = vld [vmem:[%s22898_s13 + $0x394c] ss:$16 sps:$4 sm:$0xff]  }
 0x7d7   : > { %15596 = vmatpush1.bf16.msra.mxu1 %v22193_v24  ;;  %15572 = vmatprep.subr.bf16.mxu0 %v22198_v32  ;;  %v22259_v24 = vld [vmem:[%s22898_s13 + $0x3a68] ss:$16 sps:$4 sm:$0xff]   ;;  %v22267_v32 = vld [vmem:[%s22898_s13 + $0x3a4c] ss:$16 sps:$4 sm:$0xff]  }
 0x7d8   : > { %v15304_v53 = vpop.f32.mrf.mxu1  ;;  %15597 = vmatprep.subr.bf16.mxu1 %v22201_v54  ;;  %v22262_v54 = vld [vmem:[%s22898_s13 + $0x3948] ss:$16 sps:$4 sm:$0xff]   ;;  %v22270_v22 = vld [vmem:[%s22898_s13 + $0x392c] ss:$16 sps:$4 sm:$0xff]  }
 0x7d9   : > { %v22273_v52 = vld [vmem:[%s22898_s13 + $0x3a2c] ss:$16 sps:$4 sm:$0xff]  }
 0x7da   : > { %15573 = vmatpush2.bf16.msra.mxu0 %v22196_v43  ;;  %v22268_v43 = vld [vmem:[%s22898_s13 + $0x3928] ss:$16 sps:$4 sm:$0xff]   ;;  %v22276_v53 = vld [vmem:[%s22898_s13 + $0x390c] ss:$16 sps:$4 sm:$0xff]  }
 0x7db   : > { %15598 = vmatpush1.bf16.msra.mxu1 %v22199_v29  ;;  %15574 = vmatprep.subr.bf16.mxu0 %v22204_v7  ;;  %v22271_v29 = vld [vmem:[%s22898_s13 + $0x3a28] ss:$16 sps:$4 sm:$0xff]   ;;  %v22279_v7 = vld [vmem:[%s22898_s13 + $0x3a0c] ss:$16 sps:$4 sm:$0xff]  }
 0x7dc   : > { %15599 = vmatprep.subr.bf16.mxu1 %v22207_v3  ;;  %v22274_v3 = vld [vmem:[%s22898_s13 + $0x3908] ss:$16 sps:$4 sm:$0xff]  }
 0x7de   : > { %15575 = vmatpush2.bf16.msra.mxu0 %v22202_v63  ;;  %v22277_v63 = vld [vmem:[%s22898_s13 + $0x3a08] ss:$16 sps:$4 sm:$0xff]  }
 0x7df   : > { %15600 = vmatpush1.bf16.msra.mxu1 %v22205_v18  ;;  %15576 = vmatprep.subr.bf16.mxu0 %v22210_v13  ;;  %v22282_v18 = vld [vmem:[%s22898_s13 + $0x3bec] ss:$16 sps:$4 sm:$0xff]  }
 0x7e0   : > { %15601 = vmatprep.subr.bf16.mxu1 %v22213_v9  ;;  %v22285_v13 = vld [vmem:[%s22898_s13 + $0x3cec] ss:$16 sps:$4 sm:$0xff]   ;;  %v22280_v9 = vld [vmem:[%s22898_s13 + $0x3be8] ss:$16 sps:$4 sm:$0xff]  }
 0x7e2   : > { %15577 = vmatpush2.bf16.msra.mxu0 %v22208_v44  ;;  %v22283_v44 = vld [vmem:[%s22898_s13 + $0x3ce8] ss:$16 sps:$4 sm:$0xff]  }
 0x7e3   : > { %15602 = vmatpush1.bf16.msra.mxu1 %v22211_v48  ;;  %15578 = vmatprep.subr.bf16.mxu0 %v22216_v41  ;;  %v22288_v48 = vld [vmem:[%s22898_s13 + $0x3bcc] ss:$16 sps:$4 sm:$0xff]  }
 0x7e4   : > { %15603 = vmatprep.subr.bf16.mxu1 %v22219_v34  ;;  %v22291_v41 = vld [vmem:[%s22898_s13 + $0x3ccc] ss:$16 sps:$4 sm:$0xff]   ;;  %v22286_v34 = vld [vmem:[%s22898_s13 + $0x3bc8] ss:$16 sps:$4 sm:$0xff]  }
 0x7e6   : > { %15579 = vmatpush2.bf16.msra.mxu0 %v22214_v57  ;;  %v22289_v57 = vld [vmem:[%s22898_s13 + $0x3cc8] ss:$16 sps:$4 sm:$0xff]  }
 0x7e7   : > { %15604 = vmatpush1.bf16.msra.mxu1 %v22217_v2  ;;  %15580 = vmatprep.subr.bf16.mxu0 %v22222_v56  ;;  %v26046_v56 = vld [vmem:[#allocation28_spill] sm:$0xff] }
 0x7e8   : > { %15605 = vmatprep.subr.bf16.mxu1 %v22225_v12  ;;  %v22294_v12 = vld [vmem:[%s22898_s13 + $0x3bac] ss:$16 sps:$4 sm:$0xff]  }
 0x7ea   : > { %15581 = vmatpush2.bf16.msra.mxu0 %v22220_v17 }
 0x7eb   : > { %15606 = vmatpush1.bf16.msra.mxu1 %v22223_v31  ;;  %15582 = vmatprep.subr.bf16.mxu0 %v22228_v28  ;;  %v22297_v28 = vld [vmem:[%s22898_s13 + $0x3cac] ss:$16 sps:$4 sm:$0xff]  }
 0x7ec   : > { %15607 = vmatprep.subr.bf16.mxu1 %v22231_v25 }
 0x7ee   : > { %15583 = vmatpush2.bf16.msra.mxu0 %v22226_v37  ;;  %v22292_v37 = vld [vmem:[%s22898_s13 + $0x3ba8] ss:$16 sps:$4 sm:$0xff]  }
 0x7ef   : > { %15608 = vmatpush1.bf16.msra.mxu1 %v22229_v60  ;;  %15634 = vmatprep.subr.bf16.mxu0 %v22237_v8  ;;  %v22295_v60 = vld [vmem:[%s22898_s13 + $0x3ca8] ss:$16 sps:$4 sm:$0xff]  }
 0x7f0   : > { %15609 = vmatprep.subr.bf16.mxu1 %v22234_v11 }
 0x7f1   : > { %v15340_v35 = vpop.f32.mrf.mxu0  ;;  %15585 = vmatmul.mubr.bf16.vlgmr.msra.gmra.mxu0 %v26044_v33  ;;  %v22312_v33 = vld [vmem:[%s22898_s13 + $0x3b4c] ss:$16 sps:$4 sm:$0xff]  }
 0x7f2   : > { %v25639_v49 = vadd.f32 %v15340_v35, %v25593_v4  ;;  %15635 = vmatpush1.bf16.msra.mxu0 %v22235_v10  ;;  %15666 = vmatprep.mubr.bf16.mxu0 %v26045_v50  ;;  %v22261_v4 = vld [vmem:[%s22898_s13 + $0x3a6c] ss:$16 sps:$4 sm:$0xff]   ;;  %v22307_v35 = vld [vmem:[%s22898_s13 + $0x3c68] ss:$16 sps:$4 sm:$0xff]  }
 0x7f3   : > { %15610 = vmatpush2.bf16.msra.mxu1 %v22232_v62  ;;  %v15342_v6 = vpop.f32.mrf.mxu0  ;;  %15636 = vmatprep.subr.bf16.mxu0 %v22243_v5  ;;  %v22300_v62 = vld [vmem:[%s22898_s13 + $0x3b8c] ss:$16 sps:$4 sm:$0xff]   ;;  %v22301_v5 = vld [vmem:[%s22898_s13 + $0x3c88] ss:$16 sps:$4 sm:$0xff]  }
 0x7f4   : > { %15611 = vmatprep.subr.bf16.mxu1 %v22240_v59  ;;  %v25643_v19 = vadd.f32 %v15342_v6, %v25600_v20  ;;  %v22265_v20 = vld [vmem:[%s22898_s13 + $0x3a48] ss:$16 sps:$4 sm:$0xff]   ;;  %v22303_v10 = vld [vmem:[%s22898_s13 + $0x3c8c] ss:$16 sps:$4 sm:$0xff]  }
 0x7f5   : > { %v15344_v36 = vpop.f32.mrf.mxu0  ;;  %v22298_v59 = vld [vmem:[%s22898_s13 + $0x3b88] ss:$16 sps:$4 sm:$0xff]   ;;  %v22324_v50 = vld [vmem:[%s22898_s13 + $0x3b0c] ss:$16 sps:$4 sm:$0xff]  }
 0x7f6   : > { %15637 = vmatpush1.bf16.msra.mxu0 %v22241_v55  ;;  %v22304_v55 = vld [vmem:[%s22898_s13 + $0x3b68] ss:$16 sps:$4 sm:$0xff]   ;;  %v22327_v36 = vld [vmem:[%s22898_s13 + $0x3c0c] ss:$16 sps:$4 sm:$0xff]  }
 0x7f7   : > { %15612 = vmatpush2.bf16.msra.mxu1 %v22238_v1  ;;  %v15345_v23 = vpop.f32.mrf.mxu0  ;;  %15638 = vmatprep.subr.bf16.mxu0 %v22249_v30  ;;  %v22306_v1 = vld [vmem:[%s22898_s13 + $0x3b6c] ss:$16 sps:$4 sm:$0xff]   ;;  %v22313_v6 = vld [vmem:[%s22898_s13 + $0x3c48] ss:$16 sps:$4 sm:$0xff]  }
 0x7f8   : > { %15613 = vmatprep.subr.bf16.mxu1 %v22246_v38  ;;  %v22315_v38 = vld [vmem:[%s22898_s13 + $0x3c4c] ss:$16 sps:$4 sm:$0xff]   ;;  %v22322_v23 = vld [vmem:[%s22898_s13 + $0x3b08] ss:$16 sps:$4 sm:$0xff]  }
 0x7f9   : > { %v22318_v30 = vld [vmem:[%s22898_s13 + $0x3b2c] ss:$16 sps:$4 sm:$0xff]  }
 0x7fa   : > { %15639 = vmatpush1.bf16.msra.mxu0 %v22247_v40  ;;  %v22319_v40 = vld [vmem:[%s22898_s13 + $0x3c28] ss:$16 sps:$4 sm:$0xff]  }
 0x7fb   : > { %15614 = vmatpush2.bf16.msra.mxu1 %v22244_v26  ;;  %15640 = vmatprep.subr.bf16.mxu0 %v22255_v51  ;;  %v22316_v26 = vld [vmem:[%s22898_s13 + $0x3b28] ss:$16 sps:$4 sm:$0xff]   ;;  %v22330_v51 = vld [vmem:[%s22898_s13 + $0x3dec] ss:$16 sps:$4 sm:$0xff]  }
 0x7fc   : > { %15615 = vmatprep.subr.bf16.mxu1 %v22252_v21  ;;  %v22325_v21 = vld [vmem:[%s22898_s13 + $0x3c08] ss:$16 sps:$4 sm:$0xff]  }
 0x7fe   : > { %15641 = vmatpush1.bf16.msra.mxu0 %v22253_v14  ;;  %v22328_v14 = vld [vmem:[%s22898_s13 + $0x3de8] ss:$16 sps:$4 sm:$0xff]  }
 0x7ff   : > { %15616 = vmatpush2.bf16.msra.mxu1 %v22250_v15  ;;  %15642 = vmatprep.subr.bf16.mxu0 %v22261_v4  ;;  %v22333_v15 = vld [vmem:[%s22898_s13 + $0x3eec] ss:$16 sps:$4 sm:$0xff]  }
 0x800   : > { %15617 = vmatprep.subr.bf16.mxu1 %v22258_v47  ;;  %v22331_v47 = vld [vmem:[%s22898_s13 + $0x3ee8] ss:$16 sps:$4 sm:$0xff]   ;;  %v22336_v4 = vld [vmem:[%s22898_s13 + $0x3dcc] ss:$16 sps:$4 sm:$0xff]  }
 0x802   : > { %15643 = vmatpush1.bf16.msra.mxu0 %v22259_v24 }
 0x803   : > { %15618 = vmatpush2.bf16.msra.mxu1 %v22256_v45  ;;  %15644 = vmatprep.subr.bf16.mxu0 %v22267_v32  ;;  %v22339_v45 = vld [vmem:[%s22898_s13 + $0x3ecc] ss:$16 sps:$4 sm:$0xff]   ;;  %v22334_v32 = vld [vmem:[%s22898_s13 + $0x3dc8] ss:$16 sps:$4 sm:$0xff]  }
 0x804   : > { %15619 = vmatprep.subr.bf16.mxu1 %v22264_v0 }
 0x806   : > { %15645 = vmatpush1.bf16.msra.mxu0 %v22265_v20 }
 0x807   : > { %15620 = vmatpush2.bf16.msra.mxu1 %v22262_v54  ;;  %15646 = vmatprep.subr.bf16.mxu0 %v22273_v52  ;;  %v22337_v54 = vld [vmem:[%s22898_s13 + $0x3ec8] ss:$16 sps:$4 sm:$0xff]   ;;  %v22345_v52 = vld [vmem:[%s22898_s13 + $0x3eac] ss:$16 sps:$4 sm:$0xff]  }
 0x808   : > { %15621 = vmatprep.subr.bf16.mxu1 %v22270_v22  ;;  %v22342_v22 = vld [vmem:[%s22898_s13 + $0x3dac] ss:$16 sps:$4 sm:$0xff]  }
 0x80a   : > { %15647 = vmatpush1.bf16.msra.mxu0 %v22271_v29  ;;  %v22340_v29 = vld [vmem:[%s22898_s13 + $0x3da8] ss:$16 sps:$4 sm:$0xff]  }
 0x80b   : > { %15622 = vmatpush2.bf16.msra.mxu1 %v22268_v43  ;;  %15648 = vmatprep.subr.bf16.mxu0 %v22279_v7 }
 0x80c   : > { %15623 = vmatprep.subr.bf16.mxu1 %v22276_v53  ;;  %v22343_v53 = vld [vmem:[%s22898_s13 + $0x3ea8] ss:$16 sps:$4 sm:$0xff]  }
 0x80e   : > { %15649 = vmatpush1.bf16.msra.mxu0 %v22277_v63  ;;  %v22351_v63 = vld [vmem:[%s22898_s13 + $0x3e8c] ss:$16 sps:$4 sm:$0xff]  }
 0x80f   : > { %15624 = vmatpush2.bf16.msra.mxu1 %v22274_v3  ;;  %15650 = vmatprep.subr.bf16.mxu0 %v22282_v18  ;;  %v22348_v3 = vld [vmem:[%s22898_s13 + $0x3d8c] ss:$16 sps:$4 sm:$0xff]   ;;  %v22346_v18 = vld [vmem:[%s22898_s13 + $0x3d88] ss:$16 sps:$4 sm:$0xff]  }
 0x810   : > { %15675 = vmatprep.subr.bf16.mxu1 %v22285_v13  ;;  %v22354_v13 = vld [vmem:[%s22898_s13 + $0x3d6c] ss:$16 sps:$4 sm:$0xff]  }
 0x812   : > { %v15381_v2 = vpop.f32.mrf.mxu1  ;;  %15626 = vmatmul.mubr.bf16.vlgmr.msra.gmra.mxu1 %v26046_v56  ;;  %15651 = vmatpush2.bf16.msra.mxu0 %v22280_v9  ;;  %v22357_v9 = vld [vmem:[%s22898_s13 + $0x3e6c] ss:$16 sps:$4 sm:$0xff]  }
 0x813   : > { %v25679_v17 = vadd.f32 %v15381_v2, %v25639_v49  ;;  %15676 = vmatpush1.bf16.msra.mxu1 %v22283_v44  ;;  %15652 = vmatprep.subr.bf16.mxu0 %v22288_v48  ;;  %v22310_v49 = vld [vmem:[%s22898_s13 + $0x3b48] ss:$16 sps:$4 sm:$0xff]   ;;  %v22366_v56 = vld [vmem:[%s22898_s13 + $0x3d2c] ss:$16 sps:$4 sm:$0xff]  }
 0x814   : > { %v15383_v31 = vpop.f32.mrf.mxu1  ;;  %15677 = vmatprep.subr.bf16.mxu1 %v22291_v41  ;;  %15707 = vmatprep.mubr.bf16.mxu1 %v24398_v27  ;;  %v22309_v27 = vld [vmem:[%s22898_s13 + $0x3c6c] ss:$16 sps:$4 sm:$0xff]   ;;  %v22352_v44 = vld [vmem:[%s22898_s13 + $0x3d68] ss:$16 sps:$4 sm:$0xff]  }
 0x815   : > { %v25683_v25 = vadd.f32 %v15383_v31, %v25643_v19  ;;  %v22321_v19 = vld [vmem:[%s22898_s13 + $0x3c2c] ss:$16 sps:$4 sm:$0xff]   ;;  %v22355_v48 = vld [vmem:[%s22898_s13 + $0x3e68] ss:$16 sps:$4 sm:$0xff]  }
 0x816   : > { %v15385_v11 = vpop.f32.mrf.mxu1  ;;  %15653 = vmatpush2.bf16.msra.mxu0 %v22286_v34  ;;  %v22360_v41 = vld [vmem:[%s22898_s13 + $0x3d4c] ss:$16 sps:$4 sm:$0xff]   ;;  %v22361_v2 = vld [vmem:[%s22898_s13 + $0x3e48] ss:$16 sps:$4 sm:$0xff]  }
 0x817   : > { %15678 = vmatpush1.bf16.msra.mxu1 %v22289_v57  ;;  %15654 = vmatprep.subr.bf16.mxu0 %v22294_v12  ;;  %v22363_v34 = vld [vmem:[%s22898_s13 + $0x3e4c] ss:$16 sps:$4 sm:$0xff]   ;;  %v22358_v57 = vld [vmem:[%s22898_s13 + $0x3d48] ss:$16 sps:$4 sm:$0xff]  }
 0x818   : > { %v15386_v8 = vpop.f32.mrf.mxu1  ;;  %15679 = vmatprep.subr.bf16.mxu1 %v22297_v28  ;;  %v22369_v12 = vld [vmem:[%s22898_s13 + $0x3e2c] ss:$16 sps:$4 sm:$0xff]   ;;  %v22367_v31 = vld [vmem:[%s22898_s13 + $0x3e28] ss:$16 sps:$4 sm:$0xff]  }
 0x819   : > { %v22372_v28 = vld [vmem:[%s22898_s13 + $0x3d0c] ss:$16 sps:$4 sm:$0xff]  }
 0x81a   : > { %15655 = vmatpush2.bf16.msra.mxu0 %v22292_v37  ;;  %v22370_v37 = vld [vmem:[%s22898_s13 + $0x3d08] ss:$16 sps:$4 sm:$0xff]   ;;  %v22378_v11 = vld [vmem:[%s22898_s13 + $0x3fec] ss:$16 sps:$4 sm:$0xff]  }
 0x81b   : > { %15680 = vmatpush1.bf16.msra.mxu1 %v22295_v60  ;;  %15656 = vmatprep.subr.bf16.mxu0 %v22300_v62  ;;  %v22373_v60 = vld [vmem:[%s22898_s13 + $0x3e08] ss:$16 sps:$4 sm:$0xff]   ;;  %v22381_v8 = vld [vmem:[%s22898_s13 + $0x40ec] ss:$16 sps:$4 sm:$0xff]  }
 0x81c   : > { %15681 = vmatprep.subr.bf16.mxu1 %v22303_v10  ;;  %v22376_v62 = vld [vmem:[%s22898_s13 + $0x3fe8] ss:$16 sps:$4 sm:$0xff]  }
 0x81d   : > { %v22379_v10 = vld [vmem:[%s22898_s13 + $0x40e8] ss:$16 sps:$4 sm:$0xff]  }
 0x81e   : > { %15657 = vmatpush2.bf16.msra.mxu0 %v22298_v59  ;;  %v22384_v59 = vld [vmem:[%s22898_s13 + $0x3fcc] ss:$16 sps:$4 sm:$0xff]  }
 0x81f   : > { %15682 = vmatpush1.bf16.msra.mxu1 %v22301_v5  ;;  %15658 = vmatprep.subr.bf16.mxu0 %v22306_v1  ;;  %v22387_v5 = vld [vmem:[%s22898_s13 + $0x40cc] ss:$16 sps:$4 sm:$0xff]  }
 0x820   : > { %15683 = vmatprep.subr.bf16.mxu1 %v22309_v27  ;;  %v26047_v27 = vld [vmem:[#allocation29_spill] sm:$0xff] }
 0x822   : > { %15659 = vmatpush2.bf16.msra.mxu0 %v22304_v55 }
 0x823   : > { %15684 = vmatpush1.bf16.msra.mxu1 %v22307_v35  ;;  %15660 = vmatprep.subr.bf16.mxu0 %v22312_v33  ;;  %v22382_v35 = vld [vmem:[%s22898_s13 + $0x3fc8] ss:$16 sps:$4 sm:$0xff]  }
 0x824   : > { %15685 = vmatprep.subr.bf16.mxu1 %v22315_v38  ;;  %v22385_v33 = vld [vmem:[%s22898_s13 + $0x40c8] ss:$16 sps:$4 sm:$0xff]  }
 0x826   : > { %15661 = vmatpush2.bf16.msra.mxu0 %v22310_v49  ;;  %v22390_v49 = vld [vmem:[%s22898_s13 + $0x3fac] ss:$16 sps:$4 sm:$0xff]  }
 0x827   : > { %15686 = vmatpush1.bf16.msra.mxu1 %v22313_v6  ;;  %15662 = vmatprep.subr.bf16.mxu0 %v22318_v30  ;;  %v22393_v6 = vld [vmem:[%s22898_s13 + $0x40ac] ss:$16 sps:$4 sm:$0xff]  }
 0x828   : > { %15687 = vmatprep.subr.bf16.mxu1 %v22321_v19 }
 0x82a   : > { %15663 = vmatpush2.bf16.msra.mxu0 %v22316_v26  ;;  %v22388_v26 = vld [vmem:[%s22898_s13 + $0x3fa8] ss:$16 sps:$4 sm:$0xff]  }
 0x82b   : > { %15688 = vmatpush1.bf16.msra.mxu1 %v22319_v40  ;;  %15664 = vmatprep.subr.bf16.mxu0 %v22324_v50  ;;  %v22391_v40 = vld [vmem:[%s22898_s13 + $0x40a8] ss:$16 sps:$4 sm:$0xff]  }
 0x82c   : > { %15689 = vmatprep.subr.bf16.mxu1 %v22327_v36  ;;  %v22396_v36 = vld [vmem:[%s22898_s13 + $0x3f8c] ss:$16 sps:$4 sm:$0xff]  }
 0x82e   : > { %15665 = vmatpush2.bf16.msra.mxu0 %v22322_v23  ;;  %v22399_v23 = vld [vmem:[%s22898_s13 + $0x408c] ss:$16 sps:$4 sm:$0xff]  }
 0x82f   : > { %15690 = vmatpush1.bf16.msra.mxu1 %v22325_v21  ;;  %15716 = vmatprep.subr.bf16.mxu0 %v22333_v15  ;;  %v22394_v21 = vld [vmem:[%s22898_s13 + $0x3f88] ss:$16 sps:$4 sm:$0xff]   ;;  %v22405_v15 = vld [vmem:[%s22898_s13 + $0x406c] ss:$16 sps:$4 sm:$0xff]  }
 0x830   : > { %15691 = vmatprep.subr.bf16.mxu1 %v22330_v51  ;;  %v22402_v51 = vld [vmem:[%s22898_s13 + $0x3f6c] ss:$16 sps:$4 sm:$0xff]  }
 0x831   : > { %v15422_v24 = vpop.f32.mrf.mxu0  ;;  %15667 = vmatmul.mubr.bf16.vlgmr.msra.gmra.mxu0 %v24390_v46 }
 0x832   : > { %v25716_v0 = vadd.f32 %v15422_v24, %v25679_v17  ;;  %15717 = vmatpush1.bf16.msra.mxu0 %v22331_v47  ;;  %15748 = vmatprep.mubr.bf16.mxu0 %v24402_v61  ;;  %v22349_v61 = vld [vmem:[%s22898_s13 + $0x3e88] ss:$16 sps:$4 sm:$0xff]  }
 0x833   : > { %15692 = vmatpush2.bf16.msra.mxu1 %v22328_v14  ;;  %v15424_v20 = vpop.f32.mrf.mxu0  ;;  %15718 = vmatprep.subr.bf16.mxu0 %v22339_v45  ;;  %v22364_v17 = vld [vmem:[%s22898_s13 + $0x3d28] ss:$16 sps:$4 sm:$0xff]   ;;  %v22411_v45 = vld [vmem:[%s22898_s13 + $0x404c] ss:$16 sps:$4 sm:$0xff]  }
 0x834   : > { %15693 = vmatprep.subr.bf16.mxu1 %v22336_v4  ;;  %v25723_v46 = vadd.f32 %v15424_v20, %v25683_v25  ;;  %v22375_v25 = vld [vmem:[%s22898_s13 + $0x3e0c] ss:$16 sps:$4 sm:$0xff]   ;;  %v22400_v14 = vld [vmem:[%s22898_s13 + $0x3f68] ss:$16 sps:$4 sm:$0xff]  }
 0x835   : > { %v15426_v43 = vpop.f32.mrf.mxu0  ;;  %v22403_v47 = vld [vmem:[%s22898_s13 + $0x4068] ss:$16 sps:$4 sm:$0xff]   ;;  %v22408_v4 = vld [vmem:[%s22898_s13 + $0x3f4c] ss:$16 sps:$4 sm:$0xff]  }
 0x836   : > { %15719 = vmatpush1.bf16.msra.mxu0 %v22337_v54  ;;  %v22406_v24 = vld [vmem:[%s22898_s13 + $0x3f48] ss:$16 sps:$4 sm:$0xff]   ;;  %v22417_v54 = vld [vmem:[%s22898_s13 + $0x402c] ss:$16 sps:$4 sm:$0xff]  }
 0x837   : > { %15694 = vmatpush2.bf16.msra.mxu1 %v22334_v32  ;;  %v15427_v7 = vpop.f32.mrf.mxu0  ;;  %15720 = vmatprep.subr.bf16.mxu0 %v22345_v52  ;;  %v22414_v32 = vld [vmem:[%s22898_s13 + $0x3f2c] ss:$16 sps:$4 sm:$0xff]   ;;  %v22412_v20 = vld [vmem:[%s22898_s13 + $0x3f28] ss:$16 sps:$4 sm:$0xff]  }
 0x838   : > { %15695 = vmatprep.subr.bf16.mxu1 %v22342_v22  ;;  %v22415_v22 = vld [vmem:[%s22898_s13 + $0x4028] ss:$16 sps:$4 sm:$0xff]   ;;  %v22420_v52 = vld [vmem:[%s22898_s13 + $0x3f0c] ss:$16 sps:$4 sm:$0xff]   ;;  %v15799_v7 = vmax.f32 %v24759_v39, 0.0 }
 0x839   : > { %v22418_v43 = vld [vmem:[%s22898_s13 + $0x3f08] ss:$16 sps:$4 sm:$0xff]  }
 0x83a   : > { %15721 = vmatpush1.bf16.msra.mxu0 %v22343_v53  ;;  %v22426_v53 = vld [vmem:[%s25632_s11 + $0xe4] ss:$16 sps:$4 sm:$0xff]  }
 0x83b   : > { %15696 = vmatpush2.bf16.msra.mxu1 %v22340_v29  ;;  %15722 = vmatprep.subr.bf16.mxu0 %v22351_v63  ;;  %v22421_v29 = vld [vmem:[%s22898_s13 + $0x4008] ss:$16 sps:$4 sm:$0xff]   ;;  %v22429_v63 = vld [vmem:[%s25632_s11 + $0xc4] ss:$16 sps:$4 sm:$0xff]  }
 0x83c   : > { %15697 = vmatprep.subr.bf16.mxu1 %v22348_v3  ;;  %v22424_v3 = vld [vmem:[%s25632_s11 + $0xe0] ss:$16 sps:$4 sm:$0xff]  }
 0x83e   : > { %15723 = vmatpush1.bf16.msra.mxu0 %v22349_v61 }
 0x83f   : > { %15698 = vmatpush2.bf16.msra.mxu1 %v22346_v18  ;;  %15724 = vmatprep.subr.bf16.mxu0 %v22357_v9  ;;  %v25792_v18 = vpack.c.bf16 %v15799_v7, %v15799_v7  ;;  %v22427_v9 = vld [vmem:[%s25632_s11 + $0xc0] ss:$16 sps:$4 sm:$0xff]  }
 0x840   : > { %15699 = vmatprep.subr.bf16.mxu1 %v22354_v13  ;;  %v22617_v13 = vld [vmem:[%s25971_s0 + $0x100] ss:$0 sps:$4 sm:$0xff]   ;;  %v22463_v7 = vld [vmem:[%s25632_s11 + $0x140] ss:$16 sps:$4 sm:$0xff]  }
 0x842   : > { %15725 = vmatpush1.bf16.msra.mxu0 %v22355_v48 }
 0x843   : > { %15700 = vmatpush2.bf16.msra.mxu1 %v22352_v44  ;;  %15726 = vmatprep.subr.bf16.mxu0 %v22363_v34  ;;  %v22430_v34 = vld [vmem:[%s25632_s11 + $0xa0] ss:$16 sps:$4 sm:$0xff]  }
 0x844   : > { %15701 = vmatprep.subr.bf16.mxu1 %v22360_v41 }
 0x846   : > { %15727 = vmatpush1.bf16.msra.mxu0 %v22361_v2  ;;  %v22435_v2 = vld [vmem:[%s25632_s11 + $0x84] ss:$16 sps:$4 sm:$0xff]  }
 0x847   : > { %15702 = vmatpush2.bf16.msra.mxu1 %v22358_v57  ;;  %15728 = vmatprep.subr.bf16.mxu0 %v22369_v12  ;;  %v22522_v12 = vld [vmem:[%s25632_s11 + $0x2e4] ss:$16 sps:$4 sm:$0xff]  }
 0x848   : > { %15703 = vmatprep.subr.bf16.mxu1 %v22366_v56  ;;  %v22520_v56 = vld [vmem:[%s25632_s11 + $0x2e0] ss:$16 sps:$4 sm:$0xff]  }
 0x84a   : > { %15729 = vmatpush1.bf16.msra.mxu0 %v22367_v31  ;;  %v22433_v31 = vld [vmem:[%s25632_s11 + $0x80] ss:$16 sps:$4 sm:$0xff]  }
 0x84b   : > { %15704 = vmatpush2.bf16.msra.mxu1 %v22364_v17  ;;  %15730 = vmatprep.subr.bf16.mxu0 %v22375_v25  ;;  %v22525_v17 = vld [vmem:[%s25632_s11 + $0x2c4] ss:$16 sps:$4 sm:$0xff]  }
 0x84c   : > { %15705 = vmatprep.subr.bf16.mxu1 %v22372_v28  ;;  %v22523_v28 = vld [vmem:[%s25632_s11 + $0x2c0] ss:$16 sps:$4 sm:$0xff]   ;;  %v22438_v25 = vld [vmem:[%s25632_s11 + $0x64] ss:$16 sps:$4 sm:$0xff]  }
 0x84e   : > { %15731 = vmatpush1.bf16.msra.mxu0 %v22373_v60  ;;  %v22436_v60 = vld [vmem:[%s25632_s11 + $0x60] ss:$16 sps:$4 sm:$0xff]  }
 0x84f   : > { %15706 = vmatpush2.bf16.msra.mxu1 %v22370_v37  ;;  %15732 = vmatprep.subr.bf16.mxu0 %v22378_v11  ;;  %v22528_v37 = vld [vmem:[%s25632_s11 + $0x2a4] ss:$16 sps:$4 sm:$0xff]   ;;  %v22526_v11 = vld [vmem:[%s25632_s11 + $0x2a0] ss:$16 sps:$4 sm:$0xff]  }
 0x850   : > { %15757 = vmatprep.subr.bf16.mxu1 %v22381_v8  ;;  %v22441_v8 = vld [vmem:[%s25632_s11 + $0x44] ss:$16 sps:$4 sm:$0xff]  }
 0x852   : > { %v15463_v1 = vpop.f32.mrf.mxu1  ;;  %15708 = vmatmul.mubr.bf16.vlgmr.msra.gmra.mxu1 %v26047_v27  ;;  %15733 = vmatpush2.bf16.msra.mxu0 %v22376_v62  ;;  %v22531_v62 = vld [vmem:[%s25632_s11 + $0x284] ss:$16 sps:$4 sm:$0xff]   ;;  %v22442_v27 = vld [vmem:[%s25632_s11 + $0x20] ss:$16 sps:$4 sm:$0xff]  }
 0x853   : > { %v25756_v55 = vadd.f32 %v15463_v1, %v25716_v0  ;;  %15758 = vmatpush1.bf16.msra.mxu1 %v22379_v10  ;;  %15734 = vmatprep.subr.bf16.mxu0 %v22384_v59  ;;  %v22409_v0 = vld [vmem:[%s22898_s13 + $0x4048] ss:$16 sps:$4 sm:$0xff]   ;;  %v22534_v1 = vld [vmem:[%s25632_s11 + $0x264] ss:$16 sps:$4 sm:$0xff]  }
 0x854   : > { %v15465_v38 = vpop.f32.mrf.mxu1  ;;  %15759 = vmatprep.subr.bf16.mxu1 %v22387_v5  ;;  %15789 = vmatprep.mubr.bf16.mxu1 %v22763_v42  ;;  %v22397_v42 = vld [vmem:[%s22898_s13 + $0x4088] ss:$16 sps:$4 sm:$0xff]   ;;  %v22444_v5 = vld [vmem:[%s25632_s11 + $0x24] ss:$16 sps:$4 sm:$0xff]  }
 0x855   : > { %v25763_v30 = vadd.f32 %v15465_v38, %v25723_v46  ;;  %v22423_v46 = vld [vmem:[%s22898_s13 + $0x400c] ss:$16 sps:$4 sm:$0xff]   ;;  %v22439_v10 = vld [vmem:[%s25632_s11 + $0x40] ss:$16 sps:$4 sm:$0xff]  }
 0x856   : > { %v15467_v19 = vpop.f32.mrf.mxu1  ;;  %15735 = vmatpush2.bf16.msra.mxu0 %v22382_v35  ;;  %v22529_v59 = vld [vmem:[%s25632_s11 + $0x280] ss:$16 sps:$4 sm:$0xff]   ;;  %v22447_v35 = vld [vmem:[%s25632_s11 + $0x4] ss:$16 sps:$4 sm:$0xff]  }
 0x857   : > { %15760 = vmatpush1.bf16.msra.mxu1 %v22385_v33  ;;  %15736 = vmatprep.subr.bf16.mxu0 %v22390_v49  ;;  %v22537_v33 = vld [vmem:[%s25632_s11 + $0x244] ss:$16 sps:$4 sm:$0xff]   ;;  %v22445_v38 = vld [vmem:[%s25632_s11] ss:$16 sps:$4 sm:$0xff]  }
 0x858   : > { %v15468_v50 = vpop.f32.mrf.mxu1  ;;  %15761 = vmatprep.subr.bf16.mxu1 %v22393_v6  ;;  %v22535_v49 = vld [vmem:[%s25632_s11 + $0x240] ss:$16 sps:$4 sm:$0xff]   ;;  %v22450_v6 = vld [vmem:[%s25632_s11 + $0x1e4] ss:$16 sps:$4 sm:$0xff]  }
 0x859   : > { %v22453_v19 = vld [vmem:[%s25632_s11 + $0x1c4] ss:$16 sps:$4 sm:$0xff]   ;;  %v22451_v50 = vld [vmem:[%s25632_s11 + $0x1c0] ss:$16 sps:$4 sm:$0xff]  }
 0x85a   : > { %15737 = vmatpush2.bf16.msra.mxu0 %v22388_v26 }
 0x85b   : > { %15762 = vmatpush1.bf16.msra.mxu1 %v22391_v40  ;;  %15738 = vmatprep.subr.bf16.mxu0 %v22396_v36  ;;  %v22540_v36 = vld [vmem:[%s25632_s11 + $0x224] ss:$16 sps:$4 sm:$0xff]  }
 0x85c   : > { %15763 = vmatprep.subr.bf16.mxu1 %v22399_v23 }
 0x85e   : > { %15739 = vmatpush2.bf16.msra.mxu0 %v22394_v21  ;;  %v22456_v21 = vld [vmem:[%s25632_s11 + $0x1a4] ss:$16 sps:$4 sm:$0xff]  }
 0x85f   : > { %15764 = vmatpush1.bf16.msra.mxu1 %v22397_v42  ;;  %15740 = vmatprep.subr.bf16.mxu0 %v22402_v51  ;;  %v22538_v42 = vld [vmem:[%s25632_s11 + $0x220] ss:$16 sps:$4 sm:$0xff]  }
 0x860   : > { %15765 = vmatprep.subr.bf16.mxu1 %v22405_v15 }
 0x862   : > { %15741 = vmatpush2.bf16.msra.mxu0 %v22400_v14  ;;  %v22454_v14 = vld [vmem:[%s25632_s11 + $0x1a0] ss:$16 sps:$4 sm:$0xff]  }
 0x863   : > { %15766 = vmatpush1.bf16.msra.mxu1 %v22403_v47  ;;  %15742 = vmatprep.subr.bf16.mxu0 %v22408_v4  ;;  %v22543_v47 = vld [vmem:[%s25632_s11 + $0x204] ss:$16 sps:$4 sm:$0xff]  }
 0x864   : > { %15767 = vmatprep.subr.bf16.mxu1 %v22411_v45  ;;  %v22459_v45 = vld [vmem:[%s25632_s11 + $0x184] ss:$16 sps:$4 sm:$0xff]  }
 0x866   : > { %15743 = vmatpush2.bf16.msra.mxu0 %v22406_v24  ;;  %v22541_v24 = vld [vmem:[%s25632_s11 + $0x200] ss:$16 sps:$4 sm:$0xff]  }
 0x867   : > { %15768 = vmatpush1.bf16.msra.mxu1 %v22409_v0  ;;  %15744 = vmatprep.subr.bf16.mxu0 %v22414_v32  ;;  %v22546_v0 = vld [vmem:[%s25632_s11 + $0x3e4] ss:$16 sps:$4 sm:$0xff]   ;;  %v22544_v32 = vld [vmem:[%s25632_s11 + $0x3e0] ss:$16 sps:$4 sm:$0xff]  }
 0x868   : > { %15769 = vmatprep.subr.bf16.mxu1 %v22417_v54  ;;  %v22457_v54 = vld [vmem:[%s25632_s11 + $0x180] ss:$16 sps:$4 sm:$0xff]  }
 0x86a   : > { %15745 = vmatpush2.bf16.msra.mxu0 %v22412_v20  ;;  %v22549_v20 = vld [vmem:[%s25632_s11 + $0x3c4] ss:$16 sps:$4 sm:$0xff]  }
 0x86b   : > { %15770 = vmatpush1.bf16.msra.mxu1 %v22415_v22  ;;  %15746 = vmatprep.subr.bf16.mxu0 %v22420_v52  ;;  %v22462_v22 = vld [vmem:[%s25632_s11 + $0x164] ss:$16 sps:$4 sm:$0xff]   ;;  %v22547_v52 = vld [vmem:[%s25632_s11 + $0x3c0] ss:$16 sps:$4 sm:$0xff]  }
 0x86c   : > { %15771 = vmatprep.subr.bf16.mxu1 %v22423_v46  ;;  %v22460_v46 = vld [vmem:[%s25632_s11 + $0x160] ss:$16 sps:$4 sm:$0xff]  }
 0x86e   : > { %15747 = vmatpush2.bf16.msra.mxu0 %v22418_v43  ;;  %v22552_v43 = vld [vmem:[%s25632_s11 + $0x3a4] ss:$16 sps:$4 sm:$0xff]  }
 0x86f   : > { %15772 = vmatpush1.bf16.msra.mxu1 %v22421_v29  ;;  %16578 = vmatprep.subr.bf16.mxu0 %v22426_v53  ;;  %v22465_v29 = vld [vmem:[%s25632_s11 + $0x144] ss:$16 sps:$4 sm:$0xff]   ;;  %v22550_v53 = vld [vmem:[%s25632_s11 + $0x3a0] ss:$16 sps:$4 sm:$0xff]  }
 0x870   : > { %16619 = vmatprep.subr.bf16.mxu1 %v22522_v12  ;;  %v22477_v12 = vld [vmem:[%s25632_s11 + $0xcc] ss:$16 sps:$4 sm:$0xff]  }
 0x871   : > { %v15504_v61 = vpop.f32.mrf.mxu0  ;;  %15749 = vmatmul.mubr.bf16.vlgmr.msra.gmra.mxu0 %v24480_v58  ;;  %v22432_v58 = vld [vmem:[%s25632_s11 + $0xa4] ss:$16 sps:$4 sm:$0xff]  }
 0x872   : > { %15790 = vmatmul.mubr.bf16.vlgmr.msra.gmra.mxu1 %v22617_v13  ;;  %v25799_v39 = vadd.f32 %v15504_v61, %v25756_v55  ;;  %16579 = vmatpush1.bf16.msra.mxu0 %v22424_v3  ;;  %v22532_v55 = vld [vmem:[%s25632_s11 + $0x260] ss:$16 sps:$4 sm:$0xff]   ;;  %v22555_v3 = vld [vmem:[%s25632_s11 + $0x384] ss:$16 sps:$4 sm:$0xff]  }
 0x873   : > { %16610 = vmatprep.mubr.bf16.mxu0 %v25792_v18  ;;  %v15506_v44 = vpop.f32.mrf.mxu0  ;;  %16580 = vmatprep.subr.bf16.mxu0 %v22429_v63  ;;  %v22468_v63 = vld [vmem:[%s25632_s11 + $0x124] ss:$16 sps:$4 sm:$0xff]   ;;  %v22553_v61 = vld [vmem:[%s25632_s11 + $0x380] ss:$16 sps:$4 sm:$0xff]  }
 0x874   : > { %v25805_v48 = vadd.f32 %v15506_v44, %v25763_v30  ;;  %16620 = vmatpush1.bf16.msra.mxu1 %v22520_v56  ;;  %v22448_v30 = vld [vmem:[%s25632_s11 + $0x1e0] ss:$16 sps:$4 sm:$0xff]  }
 0x875   : > { %v15508_v41 = vpop.f32.mrf.mxu0  ;;  %16621 = vmatprep.subr.bf16.mxu1 %v22525_v17  ;;  %v22466_v13 = vld [vmem:[%s25632_s11 + $0x120] ss:$16 sps:$4 sm:$0xff]  }
 0x876   : > { %16581 = vmatpush1.bf16.msra.mxu0 %v22427_v9  ;;  %v22471_v9 = vld [vmem:[%s25632_s11 + $0x104] ss:$16 sps:$4 sm:$0xff]   ;;  %v22556_v44 = vld [vmem:[%s25632_s11 + $0x360] ss:$16 sps:$4 sm:$0xff]   ;;  %v15798_v41 = vmax.f32 %v24752_v16, 0.0 }
 0x877   : > { %v15509_v57 = vpop.f32.mrf.mxu0  ;;  %16582 = vmatprep.subr.bf16.mxu0 %v22432_v58  ;;  %v22469_v58 = vld [vmem:[%s25632_s11 + $0x100] ss:$16 sps:$4 sm:$0xff]  }
 0x878   : > { %16622 = vmatpush1.bf16.msra.mxu1 %v22523_v28  ;;  %v22559_v57 = vld [vmem:[%s25632_s11 + $0x340] ss:$16 sps:$4 sm:$0xff]   ;;  %v25871_v56 = vpack.c.bf16 %v15798_v41, %v15798_v41  ;;  %v22564_v28 = vld [vmem:[%s25632_s11 + $0x324] ss:$16 sps:$4 sm:$0xff]  }
 0x879   : > { %16623 = vmatprep.subr.bf16.mxu1 %v22528_v37  ;;  %v22480_v37 = vld [vmem:[%s25632_s11 + $0xac] ss:$16 sps:$4 sm:$0xff]  }
 0x87a   : > { %16583 = vmatpush1.bf16.msra.mxu0 %v22430_v34  ;;  %v22474_v34 = vld [vmem:[%s25632_s11 + $0xec] ss:$16 sps:$4 sm:$0xff]  }
 0x87b   : > { %16584 = vmatprep.subr.bf16.mxu0 %v22435_v2  ;;  %v22472_v2 = vld [vmem:[%s25632_s11 + $0xe8] ss:$16 sps:$4 sm:$0xff]  }
 0x87c   : > { %16624 = vmatpush1.bf16.msra.mxu1 %v22526_v11 }
 0x87d   : > { %16625 = vmatprep.subr.bf16.mxu1 %v22531_v62  ;;  %v22478_v62 = vld [vmem:[%s25632_s11 + $0xa8] ss:$16 sps:$4 sm:$0xff]  }
 0x87e   : > { %16585 = vmatpush1.bf16.msra.mxu0 %v22433_v31  ;;  %v22475_v31 = vld [vmem:[%s25632_s11 + $0xc8] ss:$16 sps:$4 sm:$0xff]  }
 0x87f   : > { %16586 = vmatprep.subr.bf16.mxu0 %v22438_v25 }
 0x880   : > { %16626 = vmatpush1.bf16.msra.mxu1 %v22529_v59  ;;  %v22483_v59 = vld [vmem:[%s25632_s11 + $0x8c] ss:$16 sps:$4 sm:$0xff]  }
 0x881   : > { %16627 = vmatprep.subr.bf16.mxu1 %v22534_v1  ;;  %v22481_v1 = vld [vmem:[%s25632_s11 + $0x88] ss:$16 sps:$4 sm:$0xff]  }
 0x882   : > { %16587 = vmatpush1.bf16.msra.mxu0 %v22436_v60  ;;  %v22562_v60 = vld [vmem:[%s25632_s11 + $0x320] ss:$16 sps:$4 sm:$0xff]  }
 0x883   : > { %16588 = vmatprep.subr.bf16.mxu0 %v22441_v8 }
 0x884   : > { %16628 = vmatpush1.bf16.msra.mxu1 %v22532_v55  ;;  %v22486_v55 = vld [vmem:[%s25632_s11 + $0x6c] ss:$16 sps:$4 sm:$0xff]  }
 0x885   : > { %16629 = vmatprep.subr.bf16.mxu1 %v22537_v33  ;;  %v22489_v33 = vld [vmem:[%s25632_s11 + $0x4c] ss:$16 sps:$4 sm:$0xff]  }
 0x886   : > { %16589 = vmatpush1.bf16.msra.mxu0 %v22439_v10 }
 0x887   : > { %16590 = vmatprep.subr.bf16.mxu0 %v22444_v5  ;;  %v22565_v5 = vld [vmem:[%s25632_s11 + $0x300] ss:$16 sps:$4 sm:$0xff]  }
 0x888   : > { %16630 = vmatpush1.bf16.msra.mxu1 %v22535_v49  ;;  %v22492_v49 = vld [vmem:[%s25632_s11 + $0x2c] ss:$16 sps:$4 sm:$0xff]  }
 0x889   : > { %16631 = vmatprep.subr.bf16.mxu1 %v22540_v36 }
 0x88a   : > { %16591 = vmatpush1.bf16.msra.mxu0 %v22442_v27  ;;  %v22570_v27 = vld [vmem:[%s25632_s11 + $0x2ec] ss:$16 sps:$4 sm:$0xff]  }
 0x88b   : > { %16592 = vmatprep.subr.bf16.mxu0 %v22447_v35  ;;  %v22484_v35 = vld [vmem:[%s25632_s11 + $0x68] ss:$16 sps:$4 sm:$0xff]  }
 0x88c   : > { %16632 = vmatpush1.bf16.msra.mxu1 %v22538_v42 }
 0x88d   : > { %16633 = vmatprep.subr.bf16.mxu1 %v22543_v47  ;;  %v22502_v47 = vld [vmem:[%s25632_s11 + $0x1a8] ss:$16 sps:$4 sm:$0xff]  }
 0x88e   : > { %16593 = vmatpush1.bf16.msra.mxu0 %v22445_v38  ;;  %v22487_v38 = vld [vmem:[%s25632_s11 + $0x48] ss:$16 sps:$4 sm:$0xff]  }
 0x88f   : > { %16594 = vmatprep.subr.bf16.mxu0 %v22450_v6  ;;  %v22490_v6 = vld [vmem:[%s25632_s11 + $0x28] ss:$16 sps:$4 sm:$0xff]  }
 0x890   : > { %16634 = vmatpush1.bf16.msra.mxu1 %v22541_v24  ;;  %v22505_v24 = vld [vmem:[%s25632_s11 + $0x188] ss:$16 sps:$4 sm:$0xff]  }
 0x891   : > { %16635 = vmatprep.subr.bf16.mxu1 %v22546_v0  ;;  %v22510_v0 = vld [vmem:[%s25632_s11 + $0x16c] ss:$16 sps:$4 sm:$0xff]  }
 0x892   : > { %v15545_v26 = vpop.f32.mrf.mxu1  ;;  %16595 = vmatpush2.bf16.msra.mxu0 %v22448_v30  ;;  %v22495_v30 = vld [vmem:[%s25632_s11 + $0xc] ss:$16 sps:$4 sm:$0xff]  }
 0x893   : > { %v25834_v40 = vadd.f32 %v15545_v26, %v25799_v39  ;;  %16596 = vmatprep.subr.bf16.mxu0 %v22453_v19  ;;  %v22558_v39 = vld [vmem:[%s25632_s11 + $0x364] ss:$16 sps:$4 sm:$0xff]   ;;  %v22493_v19 = vld [vmem:[%s25632_s11 + $0x8] ss:$16 sps:$4 sm:$0xff]   ;;  %v22498_v26 = vld [vmem:[%s25632_s11 + $0x1ec] ss:$16 sps:$4 sm:$0xff]  }
 0x894   : > { %v15547_v23 = vpop.f32.mrf.mxu1  ;;  %16636 = vmatpush2.bf16.msra.mxu1 %v22544_v32  ;;  %v22508_v32 = vld [vmem:[%s25632_s11 + $0x168] ss:$16 sps:$4 sm:$0xff]  }
 0x895   : > { %v25841_v51 = vadd.f32 %v15547_v23, %v25805_v48  ;;  %16637 = vmatprep.subr.bf16.mxu1 %v22549_v20  ;;  %v22561_v48 = vld [vmem:[%s25632_s11 + $0x344] ss:$16 sps:$4 sm:$0xff]   ;;  %v22511_v20 = vld [vmem:[%s25632_s11 + $0x148] ss:$16 sps:$4 sm:$0xff]  }
 0x896   : > { %v15549_v15 = vpop.f32.mrf.mxu1  ;;  %16597 = vmatpush2.bf16.msra.mxu0 %v22451_v50  ;;  %v22501_v50 = vld [vmem:[%s25632_s11 + $0x1cc] ss:$16 sps:$4 sm:$0xff]  }
 0x897   : > { %16598 = vmatprep.subr.bf16.mxu0 %v22456_v21  ;;  %v22499_v21 = vld [vmem:[%s25632_s11 + $0x1c8] ss:$16 sps:$4 sm:$0xff]  }
 0x898   : > { %v15550_v4 = vpop.f32.mrf.mxu1  ;;  %16638 = vmatpush2.bf16.msra.mxu1 %v22547_v52  ;;  %v22514_v52 = vld [vmem:[%s25632_s11 + $0x128] ss:$16 sps:$4 sm:$0xff]  }
 0x899   : > { %16639 = vmatprep.subr.bf16.mxu1 %v22552_v43  ;;  %v22517_v43 = vld [vmem:[%s25632_s11 + $0x108] ss:$16 sps:$4 sm:$0xff]  }
 0x89a   : > { %16599 = vmatpush2.bf16.msra.mxu0 %v22454_v14 }
 0x89b   : > { %16600 = vmatprep.subr.bf16.mxu0 %v22459_v45  ;;  %v22507_v45 = vld [vmem:[%s25632_s11 + $0x18c] ss:$16 sps:$4 sm:$0xff]  }
 0x89c   : > { %16640 = vmatpush2.bf16.msra.mxu1 %v22550_v53 }
 0x89d   : > { %16641 = vmatprep.subr.bf16.mxu1 %v22555_v3 }
 0x89e   : > { %16601 = vmatpush2.bf16.msra.mxu0 %v22457_v54  ;;  %v22513_v54 = vld [vmem:[%s25632_s11 + $0x14c] ss:$16 sps:$4 sm:$0xff]  }
 0x89f   : > { %16602 = vmatprep.subr.bf16.mxu0 %v22462_v22  ;;  %v22516_v22 = vld [vmem:[%s25632_s11 + $0x12c] ss:$16 sps:$4 sm:$0xff]  }
 0x8a0   : > { %16642 = vmatpush2.bf16.msra.mxu1 %v22553_v61 }
 0x8a1   : > { %16643 = vmatprep.subr.bf16.mxu1 %v22558_v39 }
 0x8a2   : > { %16603 = vmatpush2.bf16.msra.mxu0 %v22460_v46  ;;  %v22519_v46 = vld [vmem:[%s25632_s11 + $0x10c] ss:$16 sps:$4 sm:$0xff]  }
 0x8a3   : > { %16604 = vmatprep.subr.bf16.mxu0 %v22465_v29 }
 0x8a4   : > { %16644 = vmatpush2.bf16.msra.mxu1 %v22556_v44 }
 0x8a5   : > { %16645 = vmatprep.subr.bf16.mxu1 %v22561_v48 }
 0x8a6   : > { %16605 = vmatpush2.bf16.msra.mxu0 %v22463_v7 }
 0x8a7   : > { %16606 = vmatprep.subr.bf16.mxu0 %v22468_v63 }
 0x8a8   : > { %16646 = vmatpush2.bf16.msra.mxu1 %v22559_v57 }
 0x8a9   : > { %16647 = vmatprep.subr.bf16.mxu1 %v22564_v28 }
 0x8aa   : > { %16607 = vmatpush2.bf16.msra.mxu0 %v22466_v13 }
 0x8ab   : > { %16608 = vmatprep.subr.bf16.mxu0 %v22471_v9 }
 0x8ac   : > { %16648 = vmatpush2.bf16.msra.mxu1 %v22562_v60 }
 0x8ae   : > { %16609 = vmatpush2.bf16.msra.mxu0 %v22469_v58 }
 0x8af   : > { %16660 = vmatprep.subr.bf16.mxu0 %v22474_v34 }
 0x8b1   : > { %v15586_v17 = vpop.f32.mrf.mxu0  ;;  %16611 = vmatmul.mubr.bf16.vlgmr.msra.gmra.mxu0 %v25871_v56 }
 0x8b2   : > { %v15587_v16 = vadd.f32 %v15586_v17, %v25834_v40  ;;  %16661 = vmatpush1.bf16.msra.mxu0 %v22472_v2  ;;  %16692 = vmatprep.mubr.bf16.mxu0 %v25792_v18  ;;  %v22567_v18 = vld [vmem:[%s25632_s11 + $0x304] ss:$16 sps:$4 sm:$0xff]   ;;  %v22496_v40 = vld [vmem:[%s25632_s11 + $0x1e8] ss:$16 sps:$4 sm:$0xff]  }
 0x8b3   : > { %v15588_v25 = vpop.f32.mrf.mxu0  ;;  %16662 = vmatprep.subr.bf16.mxu0 %v22477_v12  ;;  %16649 = vmatprep.subr.bf16.mxu1 %v22567_v18 }
 0x8b4   : > { %v15589_v11 = vadd.f32 %v15588_v25, %v25841_v51  ;;  %16650 = vmatpush2.bf16.msra.mxu1 %v22565_v5  ;;  %v22504_v51 = vld [vmem:[%s25632_s11 + $0x1ac] ss:$16 sps:$4 sm:$0xff]  }
 0x8b5   : > { %v15590_v8 = vpop.f32.mrf.mxu0  ;;  %16701 = vmatprep.subr.bf16.mxu1 %v22570_v27  ;;  %v22576_v5 = vld [vmem:[%s25632_s11 + $0x2ac] ss:$16 sps:$4 sm:$0xff]  }
 0x8b6   : > { %16663 = vmatpush1.bf16.msra.mxu0 %v22475_v31  ;;  %v22579_v27 = vld [vmem:[%s25632_s11 + $0x28c] ss:$16 sps:$4 sm:$0xff]  }
 0x8b7   : > { %v15591_v10 = vpop.f32.mrf.mxu0  ;;  %16664 = vmatprep.subr.bf16.mxu0 %v22480_v37 }
 0x8b8   : > { %v22573_v10 = vld [vmem:[%s25632_s11 + $0x2cc] ss:$16 sps:$4 sm:$0xff]  }
 0x8ba   : > { %16665 = vmatpush1.bf16.msra.mxu0 %v22478_v62  ;;  %v22568_v62 = vld [vmem:[%s25632_s11 + $0x2e8] ss:$16 sps:$4 sm:$0xff]  }
 0x8bb   : > { %16666 = vmatprep.subr.bf16.mxu0 %v22483_v59  ;;  %v22571_v59 = vld [vmem:[%s25632_s11 + $0x2c8] ss:$16 sps:$4 sm:$0xff]  }
 0x8be   : > { %16667 = vmatpush1.bf16.msra.mxu0 %v22481_v1  ;;  %v22574_v1 = vld [vmem:[%s25632_s11 + $0x2a8] ss:$16 sps:$4 sm:$0xff]  }
 0x8bf   : > { %16668 = vmatprep.subr.bf16.mxu0 %v22486_v55  ;;  %v22577_v55 = vld [vmem:[%s25632_s11 + $0x288] ss:$16 sps:$4 sm:$0xff]  }
 0x8c2   : > { %16669 = vmatpush1.bf16.msra.mxu0 %v22484_v35  ;;  %v22582_v35 = vld [vmem:[%s25632_s11 + $0x26c] ss:$16 sps:$4 sm:$0xff]  }
 0x8c3   : > { %16670 = vmatprep.subr.bf16.mxu0 %v22489_v33  ;;  %v22580_v33 = vld [vmem:[%s25632_s11 + $0x268] ss:$16 sps:$4 sm:$0xff]  }
 0x8c6   : > { %16671 = vmatpush1.bf16.msra.mxu0 %v22487_v38  ;;  %v22585_v38 = vld [vmem:[%s25632_s11 + $0x24c] ss:$16 sps:$4 sm:$0xff]  }
 0x8c7   : > { %16672 = vmatprep.subr.bf16.mxu0 %v22492_v49  ;;  %v22583_v49 = vld [vmem:[%s25632_s11 + $0x248] ss:$16 sps:$4 sm:$0xff]  }
 0x8ca   : > { %16673 = vmatpush1.bf16.msra.mxu0 %v22490_v6  ;;  %v22588_v6 = vld [vmem:[%s25632_s11 + $0x22c] ss:$16 sps:$4 sm:$0xff]  }
 0x8cb   : > { %16674 = vmatprep.subr.bf16.mxu0 %v22495_v30  ;;  %v22586_v30 = vld [vmem:[%s25632_s11 + $0x228] ss:$16 sps:$4 sm:$0xff]  }
 0x8ce   : > { %16675 = vmatpush1.bf16.msra.mxu0 %v22493_v19  ;;  %v22591_v19 = vld [vmem:[%s25632_s11 + $0x20c] ss:$16 sps:$4 sm:$0xff]  }
 0x8cf   : > { %16676 = vmatprep.subr.bf16.mxu0 %v22498_v26  ;;  %v22589_v26 = vld [vmem:[%s25632_s11 + $0x208] ss:$16 sps:$4 sm:$0xff]  }
 0x8d2   : > { %v15627_v36 = vpop.f32.mrf.mxu1  ;;  %16677 = vmatpush2.bf16.msra.mxu0 %v22496_v40  ;;  %v22594_v40 = vld [vmem:[%s25632_s11 + $0x3ec] ss:$16 sps:$4 sm:$0xff]  }
 0x8d3   : > { %v15628_v23 = vadd.f32 %v15627_v36, %v15587_v16  ;;  %16678 = vmatprep.subr.bf16.mxu0 %v22501_v50  ;;  %v22592_v50 = vld [vmem:[%s25632_s11 + $0x3e8] ss:$16 sps:$4 sm:$0xff]   ;;  %v22597_v36 = vld [vmem:[%s25632_s11 + $0x3cc] ss:$16 sps:$4 sm:$0xff]  }
 0x8d4   : > { %v15629_v42 = vpop.f32.mrf.mxu1 }
 0x8d5   : > { %v15630_v15 = vadd.f32 %v15629_v42, %v15589_v11  ;;  %v22598_v42 = vld [vmem:[%s25632_s11 + $0x3a8] ss:$16 sps:$4 sm:$0xff]  }
 0x8d6   : > { %v15631_v14 = vpop.f32.mrf.mxu1  ;;  %16679 = vmatpush2.bf16.msra.mxu0 %v22499_v21  ;;  %v22600_v21 = vld [vmem:[%s25632_s11 + $0x3ac] ss:$16 sps:$4 sm:$0xff]  }
 0x8d7   : > { %16680 = vmatprep.subr.bf16.mxu0 %v22504_v51  ;;  %v22603_v51 = vld [vmem:[%s25632_s11 + $0x38c] ss:$16 sps:$4 sm:$0xff]  }
 0x8d8   : > { %v15632_v4 = vpop.f32.mrf.mxu1  ;;  %v22606_v14 = vld [vmem:[%s25632_s11 + $0x36c] ss:$16 sps:$4 sm:$0xff]  }
 0x8d9   : > { %v22609_v4 = vld [vmem:[%s25632_s11 + $0x34c] ss:$16 sps:$4 sm:$0xff]  }
 0x8da   : > { %16681 = vmatpush2.bf16.msra.mxu0 %v22502_v47  ;;  %v22604_v47 = vld [vmem:[%s25632_s11 + $0x368] ss:$16 sps:$4 sm:$0xff]  }
 0x8db   : > { %16682 = vmatprep.subr.bf16.mxu0 %v22507_v45  ;;  %v22607_v45 = vld [vmem:[%s25632_s11 + $0x348] ss:$16 sps:$4 sm:$0xff]  }
 0x8de   : > { %16683 = vmatpush2.bf16.msra.mxu0 %v22505_v24  ;;  %v22612_v24 = vld [vmem:[%s25632_s11 + $0x32c] ss:$16 sps:$4 sm:$0xff]  }
 0x8df   : > { %16684 = vmatprep.subr.bf16.mxu0 %v22510_v0 }
 0x8e2   : > { %16685 = vmatpush2.bf16.msra.mxu0 %v22508_v32  ;;  %v22610_v32 = vld [vmem:[%s25632_s11 + $0x328] ss:$16 sps:$4 sm:$0xff]  }
 0x8e3   : > { %16686 = vmatprep.subr.bf16.mxu0 %v22513_v54 }
 0x8e6   : > { %16687 = vmatpush2.bf16.msra.mxu0 %v22511_v20  ;;  %v22615_v20 = vld [vmem:[%s25632_s11 + $0x30c] ss:$16 sps:$4 sm:$0xff]  }
 0x8e7   : > { %16688 = vmatprep.subr.bf16.mxu0 %v22516_v22 }
 0x8ea   : > { %16689 = vmatpush2.bf16.msra.mxu0 %v22514_v52  ;;  %v22613_v52 = vld [vmem:[%s25632_s11 + $0x308] ss:$16 sps:$4 sm:$0xff]  }
 0x8eb   : > { %16690 = vmatprep.subr.bf16.mxu0 %v22519_v46 }
 0x8ee   : > { %16691 = vmatpush2.bf16.msra.mxu0 %v22517_v43 }
 0x8f1   : > { %v15668_v29 = vpop.f32.mrf.mxu0  ;;  %16693 = vmatmul.mubr.bf16.vlgmr.msra.gmra.mxu0 %v25871_v56 }
 0x8f2   : > { %v15669_v9 = vadd.f32 %v15668_v29, %v15628_v23  ;;  %v22595_v23 = vld [vmem:[%s25632_s11 + $0x3c8] ss:$16 sps:$4 sm:$0xff]  }
 0x8f3   : > { %v15670_v53 = vpop.f32.mrf.mxu0 }
 0x8f4   : > { %v15671_v44 = vadd.f32 %v15670_v53, %v15630_v15  ;;  %v22601_v15 = vld [vmem:[%s25632_s11 + $0x388] ss:$16 sps:$4 sm:$0xff]  }
 0x8f5   : > { %v15672_v7 = vpop.f32.mrf.mxu0 }
 0x8f7   : > { %v15673_v3 = vpop.f32.mrf.mxu0 }
 0x912   : > { %v15709_v63 = vpop.f32.mrf.mxu1 }
 0x913   : > { %v15710_v58 = vadd.f32 %v15709_v63, %v15669_v9 }
 0x914   : > { %v15711_v61 = vpop.f32.mrf.mxu1 }
 0x915   : > { %v15712_v34 = vadd.f32 %v15711_v61, %v15671_v44 }
 0x916   : > { %v15713_v13 = vpop.f32.mrf.mxu1 }
 0x918   : > { %v15714_v39 = vpop.f32.mrf.mxu1 }
 0x931   : > { %v15750_v48 = vpop.f32.mrf.mxu0 }
 0x932   : > { %v15791_v41 = vpop.f32.mrf.mxu1  ;;  %v15751_v57 = vadd.f32 %v15750_v48, %v15710_v58 }
 0x933   : > { %v15752_v2 = vpop.f32.mrf.mxu0 }
 0x934   : > { %v15793_v12 = vpop.f32.mrf.mxu1  ;;  %v15792_v17 = vadd.f32 %v15791_v41, %v15751_v57  ;;  %v15753_v56 = vadd.f32 %v15752_v2, %v15712_v34 }
 0x935   : > { %v15754_v16 = vpop.f32.mrf.mxu0 }
 0x936   : > { %v15795_v31 = vpop.f32.mrf.mxu1  ;;  %v15794_v28 = vadd.f32 %v15793_v12, %v15753_v56  ;;  %v15800_v25 = vmax.f32 %v15792_v17, 0.0 }
 0x937   : > { %v15755_v37 = vpop.f32.mrf.mxu0 }
 0x938   : > { %v15796_v60 = vpop.f32.mrf.mxu1  ;;  %v15801_v11 = vmax.f32 %v15794_v28, 0.0  ;;  %v25914_v18 = vpack.c.bf16 %v15800_v25, %v15800_v25 }
 0x93a   : > { %v15809_v8 = vpack.c.bf16 %v15801_v11, %v15801_v11 }
 0x93c   : > { %16651 = vmatprep.mubr.bf16.mxu1 %v15809_v8 }
 0x93d   : > { %16652 = vmatmul.mubr.bf16.vlgmr.msra.gmra.mxu1 %v25914_v18 }
 0x93e   : > { %16702 = vmatpush1.bf16.msra.mxu1 %v22568_v62  ;;  %16733 = vmatprep.mubr.bf16.mxu1 %v15809_v8 }
 0x93f   : > { %16703 = vmatprep.subr.bf16.mxu1 %v22573_v10 }
 0x942   : > { %16704 = vmatpush1.bf16.msra.mxu1 %v22571_v59 }
 0x943   : > { %16705 = vmatprep.subr.bf16.mxu1 %v22576_v5 }
 0x946   : > { %16706 = vmatpush1.bf16.msra.mxu1 %v22574_v1 }
 0x947   : > { %16707 = vmatprep.subr.bf16.mxu1 %v22579_v27 }
 0x94a   : > { %16708 = vmatpush1.bf16.msra.mxu1 %v22577_v55 }
 0x94b   : > { %16709 = vmatprep.subr.bf16.mxu1 %v22582_v35 }
 0x94e   : > { %16710 = vmatpush1.bf16.msra.mxu1 %v22580_v33 }
 0x94f   : > { %16711 = vmatprep.subr.bf16.mxu1 %v22585_v38 }
 0x952   : > { %16712 = vmatpush1.bf16.msra.mxu1 %v22583_v49 }
 0x953   : > { %16713 = vmatprep.subr.bf16.mxu1 %v22588_v6 }
 0x956   : > { %16714 = vmatpush1.bf16.msra.mxu1 %v22586_v30 }
 0x957   : > { %16715 = vmatprep.subr.bf16.mxu1 %v22591_v19 }
 0x95a   : > { %16716 = vmatpush1.bf16.msra.mxu1 %v22589_v26 }
 0x95b   : > { %16717 = vmatprep.subr.bf16.mxu1 %v22594_v40 }
 0x95e   : > { %16718 = vmatpush2.bf16.msra.mxu1 %v22592_v50 }
 0x95f   : > { %16719 = vmatprep.subr.bf16.mxu1 %v22597_v36 }
 0x962   : > { %16720 = vmatpush2.bf16.msra.mxu1 %v22595_v23 }
 0x963   : > { %16721 = vmatprep.subr.bf16.mxu1 %v22600_v21 }
 0x966   : > { %16722 = vmatpush2.bf16.msra.mxu1 %v22598_v42 }
 0x967   : > { %16723 = vmatprep.subr.bf16.mxu1 %v22603_v51 }
 0x96a   : > { %16724 = vmatpush2.bf16.msra.mxu1 %v22601_v15 }
 0x96b   : > { %16725 = vmatprep.subr.bf16.mxu1 %v22606_v14 }
 0x96e   : > { %16726 = vmatpush2.bf16.msra.mxu1 %v22604_v47 }
 0x96f   : > { %16727 = vmatprep.subr.bf16.mxu1 %v22609_v4 }
 0x971   : > { %v16612_v0 = vpop.f32.mrf.mxu0 }
 0x972   : > { %16728 = vmatpush2.bf16.msra.mxu1 %v22607_v45 }
 0x973   : > { %v16614_v54 = vpop.f32.mrf.mxu0  ;;  %16729 = vmatprep.subr.bf16.mxu1 %v22612_v24 }
 0x975   : > { %v16616_v22 = vpop.f32.mrf.mxu0 }
 0x976   : > { %16730 = vmatpush2.bf16.msra.mxu1 %v22610_v32 }
 0x977   : > { %v16617_v46 = vpop.f32.mrf.mxu0  ;;  %16731 = vmatprep.subr.bf16.mxu1 %v22615_v20 }
 0x97a   : > { %16732 = vmatpush2.bf16.msra.mxu1 %v22613_v52 }
 0x97d   : > { %16734 = vmatmul.mubr.bf16.vlgmr.msra.gmra.mxu1 %v25914_v18 }
 0x9b1   : > { %v16694_v43 = vpop.f32.mrf.mxu0 }
 0x9b3   : > { %v16696_v29 = vpop.f32.mrf.mxu0 }
 0x9b5   : > { %v16698_v53 = vpop.f32.mrf.mxu0 }
 0x9b7   : > { %v16699_v7 = vpop.f32.mrf.mxu0 }
 0x9fd   : > { %v16653_v3 = vpop.f32.mrf.mxu1 }
 0x9fe   : > { %v16654_v63 = vadd.f32 %v16653_v3, %v16612_v0 }
 0x9ff   : > { %v16655_v61 = vpop.f32.mrf.mxu1 }
 0xa00   : > { %v16656_v13 = vadd.f32 %v16655_v61, %v16614_v54  ;;  %16746 = vst [vmem:[%s319_s28] sm:$0xff] %v16654_v63 }
 0xa01   : > { %v16657_v39 = vpop.f32.mrf.mxu1 }
 0xa02   : > { %16747 = vst [vmem:[%s319_s28 + $0x8] sm:$0xff] %v16656_v13 }
 0xa03   : > { %v16658_v9 = vpop.f32.mrf.mxu1 }
 0xa3d   : > { %v16735_v44 = vpop.f32.mrf.mxu1 }
 0xa3e   : > { %v16736_v58 = vadd.f32 %v16735_v44, %v16694_v43 }
 0xa3f   : > { %v16737_v48 = vpop.f32.mrf.mxu1 }
 0xa40   : > { %v16738_v41 = vadd.f32 %v16737_v48, %v16696_v29  ;;  %16748 = vst [vmem:[%s319_s28 + $0x10] sm:$0xff] %v16736_v58 }
 0xa41   : > { %v16739_v34 = vpop.f32.mrf.mxu1 }
 0xa42   : > { %16749 = vst [vmem:[%s319_s28 + $0x18] sm:$0xff] %v16738_v41 }
 0xa43   : > { %v16740_v57 = vpop.f32.mrf.mxu1 }
 0xa44 PF: > { %s20_s20 = sadd.s32 1, %s22756_s20   ;;  %s26048_s15 = smov %s22740_s16 }
 0xa45   : > { %p17_p9 = scmp.ge.s32.totalorder %s20_s20, 4   ;;  %s26049_s16 = smov %s22744_s17 }
 0xa46   : > { %s26050_s17 = smov %s22836_s26  ;;  %s26051_s18 = smov %s22752_s19 }
 0xa47   : > { %s26052_s19 = smov %s26054_s22  ;;  %19 = sbr.rel (!%p17_p9) target bundleno = 9 (0x9), region = 104 }
 0xa4c   :  { %16771 = vsyncpa [#allocation3], 1 }
 0xa4d   :  { %16773 = vsyncpa [#allocation3 + $0x1], 1 }
 0xa4e   :  { %16774 = vsyncpa [#allocation5], 1 }
 0xa4f   :  { %16776 = vsyncpa [#allocation5 + $0x1], 1 }

</bundles_post_ra>
